<compile_context>
chip_gen: v7x
topology: tpu7x:2x2x1
jax: 0.10.0
libtpu: 0.0.40
codegen_flags: <defaults>
</compile_context>

<pallas_src>
import functools
import numpy as np
import jax
import jax.numpy as jnp
from jax.experimental import pallas as pl
from jax.experimental.pallas import tpu as pltpu


# ----------------------------------------------------------------------------
# Trace-time (numpy) constant builders -- all hoisted OUT of the jitted forward
# ----------------------------------------------------------------------------
def _pool_shift_operator(grid_h, grid_w):
    """Transposed (3x3-shift + 2x2 avg-pool) operators, one per conv tap.

    ops[t, y*W + x, Y*(W//2) + X] = 1/4 iff input pixel (y, x) contributes to
    pooled output (Y, X) for tap t = kh*3 + kw of a padding-1 3x3 conv
    followed by AvgPool2d(2, 2).  Zero padding is encoded by missing entries.
    """
    oh, ow = grid_h // 2, grid_w // 2
    ops = np.zeros((9, grid_h * grid_w, oh * ow), np.float32)
    for t in range(9):
        dy, dx = t // 3 - 1, t % 3 - 1
        for yy in range(oh):
            for xx in range(ow):
                p = yy * ow + xx
                for i in range(2):
                    for j in range(2):
                        y = 2 * yy + i + dy
                        x = 2 * xx + j + dx
                        if 0 <= y < grid_h and 0 <= x < grid_w:
                            ops[t, y * grid_w + x, p] += 0.25
    return ops


def _blockdiag_tap_weights(w, nb):
    """(Cout, Cin, 3, 3) conv weight -> per-tap batch-block-diagonal
    (9, nb*Cout, nb*Cin) matrices so one matmul handles all branches."""
    w = np.asarray(w, np.float32)
    co, ci = w.shape[:2]
    out = np.zeros((9, nb * co, nb * ci), np.float32)
    for t in range(9):
        blk = w[:, :, t // 3, t % 3]
        for b in range(nb):
            out[t, b * co:(b + 1) * co, b * ci:(b + 1) * ci] = blk
    return out


def _build_adjacency(std_edge, nb, n, per_branch):
    """Dense per-branch A_hat[b, dst, src] with self loops (GCNConv message mask)."""
    src, dst = std_edge[0], std_edge[1]
    a = np.zeros((nb, n, n), np.float32)
    if per_branch:
        for b in range(nb):
            a[b, dst, src] = 1.0
    else:
        a[0, dst, src] = 1.0          # gcn4 uses std_edge WITHOUT branch offsets
    return np.maximum(a, np.eye(n, dtype=np.float32)[None])


def prepare_model(params, std_edge_np, *, nb, num_nodes, node_f, h, w):
    """Pre-layout every static operand exactly once (outside jit)."""
    f32 = np.float32
    c1 = np.asarray(params['conv1_w']).shape[0]

    def t2(p):                         # torch Linear weight (out, in) -> (in, out)
        return np.asarray(p, f32).T

    prep = dict(
        g1=_pool_shift_operator(h, w),                                    # (9, 256, 64)
        w1=_blockdiag_tap_weights(params['conv1_w'], nb),                 # (9, nb*128, nb*Cin)
        c1b=np.tile(np.asarray(params['conv1_b'], f32), nb).reshape(nb * c1, 1),
        g2=_pool_shift_operator(h // 2, w // 2),                          # (9, 64, 16)
        w2=_blockdiag_tap_weights(params['conv2_w'], nb),                 # (9, nb*N, nb*128)
        c2b=np.tile(np.asarray(params['conv2_b'], f32), nb).reshape(nb * num_nodes, 1),
        fc1w=t2(params['fc1_w']),
        fc1b=np.asarray(params['fc1_b'], f32).reshape(1, node_f),
        a1=_build_adjacency(std_edge_np, nb, num_nodes, True),
        a4=_build_adjacency(std_edge_np, nb, num_nodes, False),
        gw=np.stack([t2(params['gcn%d_w' % i]) for i in range(1, 5)]),    # (4, F, F)
        gb=np.stack([np.asarray(params['gcn%d_b' % i], f32) for i in range(1, 5)]),
        adjw=t2(params['adj_fc_w']),
        adjb=np.asarray(params['adj_fc_b'], f32).reshape(1, num_nodes),
        row=t2(params['readout_w']),
        rob=np.asarray(params['readout_b'], f32).reshape(1, 2),
    )
    return {k: jnp.asarray(v) for k, v in prep.items()}


# ----------------------------------------------------------------------------
# The single fused kernel
# ----------------------------------------------------------------------------
def _fused_kernel(xr_ref, g1_ref, w1_ref, c1b_ref, g2_ref, w2_ref, c2b_ref,
                  fc1w_ref, fc1b_ref, a1_ref, a4_ref, gw_ref, gb_ref,
                  adjw_ref, adjb_ref, row_ref, rob_ref,
                  out_ref, loss_ref, *, nb, n, f):
    m_nodes = nb * n
    tiny = 1e-24

    # ---------------- NodeFeatureNet ----------------
    # conv(3x3, pad=1) + AvgPool2d(2) pairs as 9 accumulated gather-matmuls;
    # all activations stay in VMEM/vregs (no HBM round trips, no XLA im2col).
    xr = xr_ref[...]                                            # (nb*Cin, H*W)
    p1 = None
    for t in range(9):
        mm = jnp.dot(xr, g1_ref[t], preferred_element_type=jnp.float32)      # (nb*Cin, 64)
        vv = jnp.dot(w1_ref[t], mm, preferred_element_type=jnp.float32)      # (nb*128, 64)
        p1 = vv if p1 is None else p1 + vv
    p1 = p1 + c1b_ref[...]                                      # conv1 bias survives avg-pool

    h = None
    for t in range(9):
        mm = jnp.dot(p1, g2_ref[t], preferred_element_type=jnp.float32)      # (nb*128, 16)
        vv = jnp.dot(w2_ref[t], mm, preferred_element_type=jnp.float32)      # (nb*N, 16)
        h = vv if h is None else h + vv
    h = h + c2b_ref[...]                                        # (nb*N, IN_DIM) node features

    # fc1 + relu
    x = jnp.dot(h, fc1w_ref[...], preferred_element_type=jnp.float32)
    x = jnp.maximum(x + fc1b_ref[...], 0.0)                     # (nb*N, F)

    # ---------------- GCNModel ----------------
    ri = jax.lax.broadcasted_iota(jnp.int32, (n, n), 0)
    ci = jax.lax.broadcasted_iota(jnp.int32, (n, n), 1)
    eye = jnp.where(ri == ci, 1.0, 0.0).astype(jnp.float32)[None]   # (1, N, N)

    def gcn(a_b, x2d, w, brow):
        # a_b[b, dst, src] with self loops.  PyG GCNConv (gcn_norm):
        #   out[dst] = deg(dst)^-1/2 * sum_src A[dst,src] * deg(src)^-1/2 * (XW)[src] + b
        deg = jnp.sum(a_b, axis=-1, keepdims=True)              # (nb, N, 1), >= 1
        dinv = jax.lax.rsqrt(deg)
        t3 = jnp.dot(x2d, w, preferred_element_type=jnp.float32).reshape(nb, n, f)
        t3 = t3 * dinv                                          # scale sources
        agg = jnp.einsum('bnm,bmf->bnf', a_b, t3,
                         preferred_element_type=jnp.float32)    # block-diagonal aggregation
        return (agg * dinv + brow).reshape(m_nodes, f)

    def adjacency(x2d):
        # AdjacencyNet + get_edge_index, with the dynamic edge list expressed
        # as a dense per-branch 0/1 connectivity mask (same GCNConv semantics).
        adj = jnp.dot(x2d, adjw_ref[...], preferred_element_type=jnp.float32)
        adj = jnp.maximum(adj + adjb_ref[...], 0.0).reshape(nb, n, n)    # adj[b, src, dst]
        fro2 = jnp.sum(jnp.sum(adj * adj, axis=2, keepdims=True),
                       axis=1, keepdims=True)                   # (nb, 1, 1)
        adj = adj * jax.lax.rsqrt(jnp.maximum(fro2, tiny))      # Frobenius normalize
        xb = x2d.reshape(nb, n, f)
        nrm2 = jnp.sum(xb * xb, axis=2, keepdims=True)
        xn = xb * jax.lax.rsqrt(jnp.maximum(nrm2, tiny))        # per-node L2 normalize
        sim = jnp.einsum('bnf,bmf->bnm', xn, xn,
                         preferred_element_type=jnp.float32)
        diff = adj - sim
        loss = jnp.sum(diff * diff) * (1.0 / nb)                # sum over (N,N), mean over branches
        thr = jnp.max(adj) * 0.5                                # global max (as in get_edge_index)
        mask = jnp.where((adj >= thr) & (adj > 0.0), 1.0, 0.0)
        a_hat = jnp.maximum(jnp.swapaxes(mask, 1, 2), eye)      # [b, dst, src] + self loops
        return a_hat, loss

    gw = gw_ref[...]                                            # (4, F, F)
    gb = gb_ref[...]                                            # (4, F)

    x1 = jnp.maximum(gcn(a1_ref[...], x, gw[0], gb[0:1]), 0.0)
    a2, loss1 = adjacency(x1)
    x2 = jnp.maximum(gcn(a2, x1, gw[1], gb[1:2]), 0.0)
    a3, loss2 = adjacency(x2)
    x3 = jnp.maximum(gcn(a3, x2, gw[2], gb[2:3]), 0.0)
    x4 = gcn(a4_ref[...], x3, gw[3], gb[3:4])                   # no relu on gcn4

    # readout: Conv1d(F, 2, kernel=1) == per-node linear
    out = jnp.dot(x4, row_ref[...], preferred_element_type=jnp.float32) + rob_ref[...]
    out_ref[...] = out.reshape(nb, n, 2)
    loss_ref[0, 0] = loss1 + loss2


def fused_forward(xr, prep, *, nb, n, f):
    def full(shape):
        return pl.BlockSpec(shape, lambda i, r=len(shape): (0,) * r)

    args = (xr, prep['g1'], prep['w1'], prep['c1b'], prep['g2'], prep['w2'],
            prep['c2b'], prep['fc1w'], prep['fc1b'], prep['a1'], prep['a4'],
            prep['gw'], prep['gb'], prep['adjw'], prep['adjb'],
            prep['row'], prep['rob'])
    out, loss = pl.pallas_call(
        functools.partial(_fused_kernel, nb=nb, n=n, f=f),
        out_shape=(jax.ShapeDtypeStruct((nb, n, 2), jnp.float32),
                   jax.ShapeDtypeStruct((1, 1), jnp.float32)),
        grid=(1,),
        in_specs=[full(a.shape) for a in args],
        out_specs=(full((nb, n, 2)),
                   pl.BlockSpec((1, 1), lambda i: (0, 0),
                                memory_space=pltpu.MemorySpace.SMEM)),
        compiler_params=pltpu.CompilerParams(
            dimension_semantics=("arbitrary",)),
    )(*args)
    return out, loss


def my_model_forward(x, prep, *, nb, n, f):
    b, cin, hh, ww = x.shape
    # NCHW -> (B*Cin, H*W): a free reshape of contiguous memory; the only
    # non-pallas op left inside jit.
    xr = x.astype(jnp.float32).reshape(b * cin, hh * ww)
    out, loss = fused_forward(xr, prep, nb=nb, n=n, f=f)
    return out, loss[0, 0]


# ----------------------------------------------------------------------------
if __name__ == "__main__":
    B = 2                   # num_branches (batch)
    IN_CH = 3
    H = W = 16
    NUM_NODES = 8           # cfg.MODEL.NUM_NODES (= conv2 out_channel)
    NODE_F = 16             # cfg.MODEL.NODE_FEATURE_DIM
    IN_DIM = (H // 4) * (W // 4)    # cfg.MODEL.IN_DIM = 16

    # static edge template (2, E) over NUM_NODES nodes: ring + chords
    std_src = np.array([0, 1, 2, 3, 4, 5, 6, 7, 0, 2, 4, 6], dtype=np.int32)
    std_dst = np.array([1, 2, 3, 4, 5, 6, 7, 0, 4, 6, 0, 2], dtype=np.int32)
    std_edge_np = np.stack([std_src, std_dst])

    key = jax.random.PRNGKey(0)
    keys = jax.random.split(key, 20)

    def nrm(k, shape, scale=0.1):
        return (scale * jax.random.normal(k, shape)).astype(jnp.float32)

    params = dict(
        conv1_w=nrm(keys[0], (128, IN_CH, 3, 3)), conv1_b=nrm(keys[1], (128,)),
        conv2_w=nrm(keys[2], (NUM_NODES, 128, 3, 3)), conv2_b=nrm(keys[3], (NUM_NODES,)),
        fc1_w=nrm(keys[4], (NODE_F, IN_DIM)), fc1_b=nrm(keys[5], (NODE_F,)),
        gcn1_w=nrm(keys[6], (NODE_F, NODE_F)), gcn1_b=nrm(keys[7], (NODE_F,)),
        gcn2_w=nrm(keys[8], (NODE_F, NODE_F)), gcn2_b=nrm(keys[9], (NODE_F,)),
        gcn3_w=nrm(keys[10], (NODE_F, NODE_F)), gcn3_b=nrm(keys[11], (NODE_F,)),
        gcn4_w=nrm(keys[12], (NODE_F, NODE_F)), gcn4_b=nrm(keys[13], (NODE_F,)),
        adj_fc_w=nrm(keys[14], (NUM_NODES, NODE_F)), adj_fc_b=nrm(keys[15], (NUM_NODES,)),
        readout_w=nrm(keys[16], (2, NODE_F)), readout_b=nrm(keys[17], (2,)),
    )

    # All static layout work (shift+pool gather operators, block-diag conv
    # weights, Linear transposes, dense adjacency constants) done ONCE, outside jit.
    prep = prepare_model(params, std_edge_np, nb=B, num_nodes=NUM_NODES,
                         node_f=NODE_F, h=H, w=W)

    x = jax.random.normal(keys[18], (B, IN_CH, H, W), dtype=jnp.float32)

    fwd = jax.jit(functools.partial(my_model_forward, nb=B, n=NUM_NODES, f=NODE_F))
    out, loss = fwd(x, prep)
    jax.block_until_ready((out, loss))
    assert out.shape == (B, NUM_NODES, 2)
    assert loss.shape == ()
    assert bool(np.isfinite(np.asarray(loss)))
    assert bool(np.all(np.isfinite(np.asarray(out))))
    print("KERNEL_OK")
</pallas_src>

<mosaic_0001>
module attributes {stable_mosaic.version = 11 : i64} {
  func.func @_fused_kernel(%arg0: i32, %arg1: memref<6x256xf32, #tpu.memory_space<vmem>>, %arg2: memref<9x256x64xf32, #tpu.memory_space<vmem>>, %arg3: memref<9x256x6xf32, #tpu.memory_space<vmem>>, %arg4: memref<256x1xf32, #tpu.memory_space<vmem>>, %arg5: memref<9x64x16xf32, #tpu.memory_space<vmem>>, %arg6: memref<9x16x256xf32, #tpu.memory_space<vmem>>, %arg7: memref<16x1xf32, #tpu.memory_space<vmem>>, %arg8: memref<16x16xf32, #tpu.memory_space<vmem>>, %arg9: memref<1x16xf32, #tpu.memory_space<vmem>>, %arg10: memref<2x8x8xf32, #tpu.memory_space<vmem>>, %arg11: memref<2x8x8xf32, #tpu.memory_space<vmem>>, %arg12: memref<4x16x16xf32, #tpu.memory_space<vmem>>, %arg13: memref<4x16xf32, #tpu.memory_space<vmem>>, %arg14: memref<16x8xf32, #tpu.memory_space<vmem>>, %arg15: memref<1x8xf32, #tpu.memory_space<vmem>>, %arg16: memref<16x2xf32, #tpu.memory_space<vmem>>, %arg17: memref<1x2xf32, #tpu.memory_space<vmem>>, %arg18: memref<2x8x2xf32, #tpu.memory_space<vmem>>, %arg19: memref<1x1xf32, #tpu.memory_space<smem>>) attributes {dimension_semantics = [#tpu.dimension_semantics<arbitrary>], iteration_bounds = array<i64: 1>, scalar_prefetch = 0 : i64, scratch_operands = 0 : i64, tpu.core_type = #tpu.core_type<tc>, window_params = [{pipeline_mode = #tpu.pipeline_mode<synchronous>, transform_indices = @transform_0, window_bounds = array<i64: 6, 256>}, {pipeline_mode = #tpu.pipeline_mode<synchronous>, transform_indices = @transform_1, window_bounds = array<i64: 9, 256, 64>}, {pipeline_mode = #tpu.pipeline_mode<synchronous>, transform_indices = @transform_2, window_bounds = array<i64: 9, 256, 6>}, {pipeline_mode = #tpu.pipeline_mode<synchronous>, transform_indices = @transform_3, window_bounds = array<i64: 256, 1>}, {pipeline_mode = #tpu.pipeline_mode<synchronous>, transform_indices = @transform_4, window_bounds = array<i64: 9, 64, 16>}, {pipeline_mode = #tpu.pipeline_mode<synchronous>, transform_indices = @transform_5, window_bounds = array<i64: 9, 16, 256>}, {pipeline_mode = #tpu.pipeline_mode<synchronous>, transform_indices = @transform_6, window_bounds = array<i64: 16, 1>}, {pipeline_mode = #tpu.pipeline_mode<synchronous>, transform_indices = @transform_7, window_bounds = array<i64: 16, 16>}, {pipeline_mode = #tpu.pipeline_mode<synchronous>, transform_indices = @transform_8, window_bounds = array<i64: 1, 16>}, {pipeline_mode = #tpu.pipeline_mode<synchronous>, transform_indices = @transform_9, window_bounds = array<i64: 2, 8, 8>}, {pipeline_mode = #tpu.pipeline_mode<synchronous>, transform_indices = @transform_10, window_bounds = array<i64: 2, 8, 8>}, {pipeline_mode = #tpu.pipeline_mode<synchronous>, transform_indices = @transform_11, window_bounds = array<i64: 4, 16, 16>}, {pipeline_mode = #tpu.pipeline_mode<synchronous>, transform_indices = @transform_12, window_bounds = array<i64: 4, 16>}, {pipeline_mode = #tpu.pipeline_mode<synchronous>, transform_indices = @transform_13, window_bounds = array<i64: 16, 8>}, {pipeline_mode = #tpu.pipeline_mode<synchronous>, transform_indices = @transform_14, window_bounds = array<i64: 1, 8>}, {pipeline_mode = #tpu.pipeline_mode<synchronous>, transform_indices = @transform_15, window_bounds = array<i64: 16, 2>}, {pipeline_mode = #tpu.pipeline_mode<synchronous>, transform_indices = @transform_16, window_bounds = array<i64: 1, 2>}, {pipeline_mode = #tpu.pipeline_mode<synchronous>, transform_indices = @transform_17, window_bounds = array<i64: 2, 8, 2>}, {transform_indices = @transform_18, window_bounds = array<i64: 1, 1>}]} {
    %c0 = arith.constant 0 : index
    %c0_0 = arith.constant 0 : index
    %0 = vector.load %arg1[%c0, %c0_0] : memref<6x256xf32, #tpu.memory_space<vmem>>, vector<6x256xf32>
    %c0_1 = arith.constant 0 : index
    %c0_2 = arith.constant 0 : index
    %c0_3 = arith.constant 0 : index
    %1 = vector.load %arg2[%c0_1, %c0_2, %c0_3] : memref<9x256x64xf32, #tpu.memory_space<vmem>>, vector<1x256x64xf32>
    %2 = vector.shape_cast %1 : vector<1x256x64xf32> to vector<256x64xf32>
    %cst = arith.constant dense<0.000000e+00> : vector<6x64xf32>
    %3 = tpu.matmul %0, %2, %cst {dimension_numbers = #tpu.dot_dimension_numbers<[1], [0], [0], [1], [0, 0, 1, 1], [], []>} : vector<6x256xf32>, vector<256x64xf32>, vector<6x64xf32> -> vector<6x64xf32>
    %c0_4 = arith.constant 0 : index
    %c0_5 = arith.constant 0 : index
    %c0_6 = arith.constant 0 : index
    %4 = vector.load %arg3[%c0_4, %c0_5, %c0_6] : memref<9x256x6xf32, #tpu.memory_space<vmem>>, vector<1x256x6xf32>
    %5 = vector.shape_cast %4 : vector<1x256x6xf32> to vector<256x6xf32>
    %cst_7 = arith.constant dense<0.000000e+00> : vector<256x64xf32>
    %6 = tpu.matmul %5, %3, %cst_7 {dimension_numbers = #tpu.dot_dimension_numbers<[1], [0], [0], [1], [0, 0, 1, 1], [], []>} : vector<256x6xf32>, vector<6x64xf32>, vector<256x64xf32> -> vector<256x64xf32>
    %c1 = arith.constant 1 : index
    %c0_8 = arith.constant 0 : index
    %c0_9 = arith.constant 0 : index
    %7 = vector.load %arg2[%c1, %c0_8, %c0_9] : memref<9x256x64xf32, #tpu.memory_space<vmem>>, vector<1x256x64xf32>
    %8 = vector.shape_cast %7 : vector<1x256x64xf32> to vector<256x64xf32>
    %cst_10 = arith.constant dense<0.000000e+00> : vector<6x64xf32>
    %9 = tpu.matmul %0, %8, %cst_10 {dimension_numbers = #tpu.dot_dimension_numbers<[1], [0], [0], [1], [0, 0, 1, 1], [], []>} : vector<6x256xf32>, vector<256x64xf32>, vector<6x64xf32> -> vector<6x64xf32>
    %c1_11 = arith.constant 1 : index
    %c0_12 = arith.constant 0 : index
    %c0_13 = arith.constant 0 : index
    %10 = vector.load %arg3[%c1_11, %c0_12, %c0_13] : memref<9x256x6xf32, #tpu.memory_space<vmem>>, vector<1x256x6xf32>
    %11 = vector.shape_cast %10 : vector<1x256x6xf32> to vector<256x6xf32>
    %cst_14 = arith.constant dense<0.000000e+00> : vector<256x64xf32>
    %12 = tpu.matmul %11, %9, %cst_14 {dimension_numbers = #tpu.dot_dimension_numbers<[1], [0], [0], [1], [0, 0, 1, 1], [], []>} : vector<256x6xf32>, vector<6x64xf32>, vector<256x64xf32> -> vector<256x64xf32>
    %13 = arith.addf %6, %12 : vector<256x64xf32>
    %c2 = arith.constant 2 : index
    %c0_15 = arith.constant 0 : index
    %c0_16 = arith.constant 0 : index
    %14 = vector.load %arg2[%c2, %c0_15, %c0_16] : memref<9x256x64xf32, #tpu.memory_space<vmem>>, vector<1x256x64xf32>
    %15 = vector.shape_cast %14 : vector<1x256x64xf32> to vector<256x64xf32>
    %cst_17 = arith.constant dense<0.000000e+00> : vector<6x64xf32>
    %16 = tpu.matmul %0, %15, %cst_17 {dimension_numbers = #tpu.dot_dimension_numbers<[1], [0], [0], [1], [0, 0, 1, 1], [], []>} : vector<6x256xf32>, vector<256x64xf32>, vector<6x64xf32> -> vector<6x64xf32>
    %c2_18 = arith.constant 2 : index
    %c0_19 = arith.constant 0 : index
    %c0_20 = arith.constant 0 : index
    %17 = vector.load %arg3[%c2_18, %c0_19, %c0_20] : memref<9x256x6xf32, #tpu.memory_space<vmem>>, vector<1x256x6xf32>
    %18 = vector.shape_cast %17 : vector<1x256x6xf32> to vector<256x6xf32>
    %cst_21 = arith.constant dense<0.000000e+00> : vector<256x64xf32>
    %19 = tpu.matmul %18, %16, %cst_21 {dimension_numbers = #tpu.dot_dimension_numbers<[1], [0], [0], [1], [0, 0, 1, 1], [], []>} : vector<256x6xf32>, vector<6x64xf32>, vector<256x64xf32> -> vector<256x64xf32>
    %20 = arith.addf %13, %19 : vector<256x64xf32>
    %c3 = arith.constant 3 : index
    %c0_22 = arith.constant 0 : index
    %c0_23 = arith.constant 0 : index
    %21 = vector.load %arg2[%c3, %c0_22, %c0_23] : memref<9x256x64xf32, #tpu.memory_space<vmem>>, vector<1x256x64xf32>
    %22 = vector.shape_cast %21 : vector<1x256x64xf32> to vector<256x64xf32>
    %cst_24 = arith.constant dense<0.000000e+00> : vector<6x64xf32>
    %23 = tpu.matmul %0, %22, %cst_24 {dimension_numbers = #tpu.dot_dimension_numbers<[1], [0], [0], [1], [0, 0, 1, 1], [], []>} : vector<6x256xf32>, vector<256x64xf32>, vector<6x64xf32> -> vector<6x64xf32>
    %c3_25 = arith.constant 3 : index
    %c0_26 = arith.constant 0 : index
    %c0_27 = arith.constant 0 : index
    %24 = vector.load %arg3[%c3_25, %c0_26, %c0_27] : memref<9x256x6xf32, #tpu.memory_space<vmem>>, vector<1x256x6xf32>
    %25 = vector.shape_cast %24 : vector<1x256x6xf32> to vector<256x6xf32>
    %cst_28 = arith.constant dense<0.000000e+00> : vector<256x64xf32>
    %26 = tpu.matmul %25, %23, %cst_28 {dimension_numbers = #tpu.dot_dimension_numbers<[1], [0], [0], [1], [0, 0, 1, 1], [], []>} : vector<256x6xf32>, vector<6x64xf32>, vector<256x64xf32> -> vector<256x64xf32>
    %27 = arith.addf %20, %26 : vector<256x64xf32>
    %c4 = arith.constant 4 : index
    %c0_29 = arith.constant 0 : index
    %c0_30 = arith.constant 0 : index
    %28 = vector.load %arg2[%c4, %c0_29, %c0_30] : memref<9x256x64xf32, #tpu.memory_space<vmem>>, vector<1x256x64xf32>
    %29 = vector.shape_cast %28 : vector<1x256x64xf32> to vector<256x64xf32>
    %cst_31 = arith.constant dense<0.000000e+00> : vector<6x64xf32>
    %30 = tpu.matmul %0, %29, %cst_31 {dimension_numbers = #tpu.dot_dimension_numbers<[1], [0], [0], [1], [0, 0, 1, 1], [], []>} : vector<6x256xf32>, vector<256x64xf32>, vector<6x64xf32> -> vector<6x64xf32>
    %c4_32 = arith.constant 4 : index
    %c0_33 = arith.constant 0 : index
    %c0_34 = arith.constant 0 : index
    %31 = vector.load %arg3[%c4_32, %c0_33, %c0_34] : memref<9x256x6xf32, #tpu.memory_space<vmem>>, vector<1x256x6xf32>
    %32 = vector.shape_cast %31 : vector<1x256x6xf32> to vector<256x6xf32>
    %cst_35 = arith.constant dense<0.000000e+00> : vector<256x64xf32>
    %33 = tpu.matmul %32, %30, %cst_35 {dimension_numbers = #tpu.dot_dimension_numbers<[1], [0], [0], [1], [0, 0, 1, 1], [], []>} : vector<256x6xf32>, vector<6x64xf32>, vector<256x64xf32> -> vector<256x64xf32>
    %34 = arith.addf %27, %33 : vector<256x64xf32>
    %c5 = arith.constant 5 : index
    %c0_36 = arith.constant 0 : index
    %c0_37 = arith.constant 0 : index
    %35 = vector.load %arg2[%c5, %c0_36, %c0_37] : memref<9x256x64xf32, #tpu.memory_space<vmem>>, vector<1x256x64xf32>
    %36 = vector.shape_cast %35 : vector<1x256x64xf32> to vector<256x64xf32>
    %cst_38 = arith.constant dense<0.000000e+00> : vector<6x64xf32>
    %37 = tpu.matmul %0, %36, %cst_38 {dimension_numbers = #tpu.dot_dimension_numbers<[1], [0], [0], [1], [0, 0, 1, 1], [], []>} : vector<6x256xf32>, vector<256x64xf32>, vector<6x64xf32> -> vector<6x64xf32>
    %c5_39 = arith.constant 5 : index
    %c0_40 = arith.constant 0 : index
    %c0_41 = arith.constant 0 : index
    %38 = vector.load %arg3[%c5_39, %c0_40, %c0_41] : memref<9x256x6xf32, #tpu.memory_space<vmem>>, vector<1x256x6xf32>
    %39 = vector.shape_cast %38 : vector<1x256x6xf32> to vector<256x6xf32>
    %cst_42 = arith.constant dense<0.000000e+00> : vector<256x64xf32>
    %40 = tpu.matmul %39, %37, %cst_42 {dimension_numbers = #tpu.dot_dimension_numbers<[1], [0], [0], [1], [0, 0, 1, 1], [], []>} : vector<256x6xf32>, vector<6x64xf32>, vector<256x64xf32> -> vector<256x64xf32>
    %41 = arith.addf %34, %40 : vector<256x64xf32>
    %c6 = arith.constant 6 : index
    %c0_43 = arith.constant 0 : index
    %c0_44 = arith.constant 0 : index
    %42 = vector.load %arg2[%c6, %c0_43, %c0_44] : memref<9x256x64xf32, #tpu.memory_space<vmem>>, vector<1x256x64xf32>
    %43 = vector.shape_cast %42 : vector<1x256x64xf32> to vector<256x64xf32>
    %cst_45 = arith.constant dense<0.000000e+00> : vector<6x64xf32>
    %44 = tpu.matmul %0, %43, %cst_45 {dimension_numbers = #tpu.dot_dimension_numbers<[1], [0], [0], [1], [0, 0, 1, 1], [], []>} : vector<6x256xf32>, vector<256x64xf32>, vector<6x64xf32> -> vector<6x64xf32>
    %c6_46 = arith.constant 6 : index
    %c0_47 = arith.constant 0 : index
    %c0_48 = arith.constant 0 : index
    %45 = vector.load %arg3[%c6_46, %c0_47, %c0_48] : memref<9x256x6xf32, #tpu.memory_space<vmem>>, vector<1x256x6xf32>
    %46 = vector.shape_cast %45 : vector<1x256x6xf32> to vector<256x6xf32>
    %cst_49 = arith.constant dense<0.000000e+00> : vector<256x64xf32>
    %47 = tpu.matmul %46, %44, %cst_49 {dimension_numbers = #tpu.dot_dimension_numbers<[1], [0], [0], [1], [0, 0, 1, 1], [], []>} : vector<256x6xf32>, vector<6x64xf32>, vector<256x64xf32> -> vector<256x64xf32>
    %48 = arith.addf %41, %47 : vector<256x64xf32>
    %c7 = arith.constant 7 : index
    %c0_50 = arith.constant 0 : index
    %c0_51 = arith.constant 0 : index
    %49 = vector.load %arg2[%c7, %c0_50, %c0_51] : memref<9x256x64xf32, #tpu.memory_space<vmem>>, vector<1x256x64xf32>
    %50 = vector.shape_cast %49 : vector<1x256x64xf32> to vector<256x64xf32>
    %cst_52 = arith.constant dense<0.000000e+00> : vector<6x64xf32>
    %51 = tpu.matmul %0, %50, %cst_52 {dimension_numbers = #tpu.dot_dimension_numbers<[1], [0], [0], [1], [0, 0, 1, 1], [], []>} : vector<6x256xf32>, vector<256x64xf32>, vector<6x64xf32> -> vector<6x64xf32>
    %c7_53 = arith.constant 7 : index
    %c0_54 = arith.constant 0 : index
    %c0_55 = arith.constant 0 : index
    %52 = vector.load %arg3[%c7_53, %c0_54, %c0_55] : memref<9x256x6xf32, #tpu.memory_space<vmem>>, vector<1x256x6xf32>
    %53 = vector.shape_cast %52 : vector<1x256x6xf32> to vector<256x6xf32>
    %cst_56 = arith.constant dense<0.000000e+00> : vector<256x64xf32>
    %54 = tpu.matmul %53, %51, %cst_56 {dimension_numbers = #tpu.dot_dimension_numbers<[1], [0], [0], [1], [0, 0, 1, 1], [], []>} : vector<256x6xf32>, vector<6x64xf32>, vector<256x64xf32> -> vector<256x64xf32>
    %55 = arith.addf %48, %54 : vector<256x64xf32>
    %c8 = arith.constant 8 : index
    %c0_57 = arith.constant 0 : index
    %c0_58 = arith.constant 0 : index
    %56 = vector.load %arg2[%c8, %c0_57, %c0_58] : memref<9x256x64xf32, #tpu.memory_space<vmem>>, vector<1x256x64xf32>
    %57 = vector.shape_cast %56 : vector<1x256x64xf32> to vector<256x64xf32>
    %cst_59 = arith.constant dense<0.000000e+00> : vector<6x64xf32>
    %58 = tpu.matmul %0, %57, %cst_59 {dimension_numbers = #tpu.dot_dimension_numbers<[1], [0], [0], [1], [0, 0, 1, 1], [], []>} : vector<6x256xf32>, vector<256x64xf32>, vector<6x64xf32> -> vector<6x64xf32>
    %c8_60 = arith.constant 8 : index
    %c0_61 = arith.constant 0 : index
    %c0_62 = arith.constant 0 : index
    %59 = vector.load %arg3[%c8_60, %c0_61, %c0_62] : memref<9x256x6xf32, #tpu.memory_space<vmem>>, vector<1x256x6xf32>
    %60 = vector.shape_cast %59 : vector<1x256x6xf32> to vector<256x6xf32>
    %cst_63 = arith.constant dense<0.000000e+00> : vector<256x64xf32>
    %61 = tpu.matmul %60, %58, %cst_63 {dimension_numbers = #tpu.dot_dimension_numbers<[1], [0], [0], [1], [0, 0, 1, 1], [], []>} : vector<256x6xf32>, vector<6x64xf32>, vector<256x64xf32> -> vector<256x64xf32>
    %62 = arith.addf %55, %61 : vector<256x64xf32>
    %c0_64 = arith.constant 0 : index
    %c0_65 = arith.constant 0 : index
    %63 = vector.load %arg4[%c0_64, %c0_65] : memref<256x1xf32, #tpu.memory_space<vmem>>, vector<256x1xf32>
    %64 = vector.broadcast %63 : vector<256x1xf32> to vector<256x64xf32>
    %65 = arith.addf %62, %64 : vector<256x64xf32>
    %c0_66 = arith.constant 0 : index
    %c0_67 = arith.constant 0 : index
    %c0_68 = arith.constant 0 : index
    %66 = vector.load %arg5[%c0_66, %c0_67, %c0_68] : memref<9x64x16xf32, #tpu.memory_space<vmem>>, vector<1x64x16xf32>
    %67 = vector.shape_cast %66 : vector<1x64x16xf32> to vector<64x16xf32>
    %cst_69 = arith.constant dense<0.000000e+00> : vector<256x16xf32>
    %68 = tpu.matmul %65, %67, %cst_69 {dimension_numbers = #tpu.dot_dimension_numbers<[1], [0], [0], [1], [0, 0, 1, 1], [], []>} : vector<256x64xf32>, vector<64x16xf32>, vector<256x16xf32> -> vector<256x16xf32>
    %c0_70 = arith.constant 0 : index
    %c0_71 = arith.constant 0 : index
    %c0_72 = arith.constant 0 : index
    %69 = vector.load %arg6[%c0_70, %c0_71, %c0_72] : memref<9x16x256xf32, #tpu.memory_space<vmem>>, vector<1x16x256xf32>
    %70 = vector.shape_cast %69 : vector<1x16x256xf32> to vector<16x256xf32>
    %cst_73 = arith.constant dense<0.000000e+00> : vector<16x16xf32>
    %71 = tpu.matmul %70, %68, %cst_73 {dimension_numbers = #tpu.dot_dimension_numbers<[1], [0], [0], [1], [0, 0, 1, 1], [], []>} : vector<16x256xf32>, vector<256x16xf32>, vector<16x16xf32> -> vector<16x16xf32>
    %c1_74 = arith.constant 1 : index
    %c0_75 = arith.constant 0 : index
    %c0_76 = arith.constant 0 : index
    %72 = vector.load %arg5[%c1_74, %c0_75, %c0_76] : memref<9x64x16xf32, #tpu.memory_space<vmem>>, vector<1x64x16xf32>
    %73 = vector.shape_cast %72 : vector<1x64x16xf32> to vector<64x16xf32>
    %cst_77 = arith.constant dense<0.000000e+00> : vector<256x16xf32>
    %74 = tpu.matmul %65, %73, %cst_77 {dimension_numbers = #tpu.dot_dimension_numbers<[1], [0], [0], [1], [0, 0, 1, 1], [], []>} : vector<256x64xf32>, vector<64x16xf32>, vector<256x16xf32> -> vector<256x16xf32>
    %c1_78 = arith.constant 1 : index
    %c0_79 = arith.constant 0 : index
    %c0_80 = arith.constant 0 : index
    %75 = vector.load %arg6[%c1_78, %c0_79, %c0_80] : memref<9x16x256xf32, #tpu.memory_space<vmem>>, vector<1x16x256xf32>
    %76 = vector.shape_cast %75 : vector<1x16x256xf32> to vector<16x256xf32>
    %cst_81 = arith.constant dense<0.000000e+00> : vector<16x16xf32>
    %77 = tpu.matmul %76, %74, %cst_81 {dimension_numbers = #tpu.dot_dimension_numbers<[1], [0], [0], [1], [0, 0, 1, 1], [], []>} : vector<16x256xf32>, vector<256x16xf32>, vector<16x16xf32> -> vector<16x16xf32>
    %78 = arith.addf %71, %77 : vector<16x16xf32>
    %c2_82 = arith.constant 2 : index
    %c0_83 = arith.constant 0 : index
    %c0_84 = arith.constant 0 : index
    %79 = vector.load %arg5[%c2_82, %c0_83, %c0_84] : memref<9x64x16xf32, #tpu.memory_space<vmem>>, vector<1x64x16xf32>
    %80 = vector.shape_cast %79 : vector<1x64x16xf32> to vector<64x16xf32>
    %cst_85 = arith.constant dense<0.000000e+00> : vector<256x16xf32>
    %81 = tpu.matmul %65, %80, %cst_85 {dimension_numbers = #tpu.dot_dimension_numbers<[1], [0], [0], [1], [0, 0, 1, 1], [], []>} : vector<256x64xf32>, vector<64x16xf32>, vector<256x16xf32> -> vector<256x16xf32>
    %c2_86 = arith.constant 2 : index
    %c0_87 = arith.constant 0 : index
    %c0_88 = arith.constant 0 : index
    %82 = vector.load %arg6[%c2_86, %c0_87, %c0_88] : memref<9x16x256xf32, #tpu.memory_space<vmem>>, vector<1x16x256xf32>
    %83 = vector.shape_cast %82 : vector<1x16x256xf32> to vector<16x256xf32>
    %cst_89 = arith.constant dense<0.000000e+00> : vector<16x16xf32>
    %84 = tpu.matmul %83, %81, %cst_89 {dimension_numbers = #tpu.dot_dimension_numbers<[1], [0], [0], [1], [0, 0, 1, 1], [], []>} : vector<16x256xf32>, vector<256x16xf32>, vector<16x16xf32> -> vector<16x16xf32>
    %85 = arith.addf %78, %84 : vector<16x16xf32>
    %c3_90 = arith.constant 3 : index
    %c0_91 = arith.constant 0 : index
    %c0_92 = arith.constant 0 : index
    %86 = vector.load %arg5[%c3_90, %c0_91, %c0_92] : memref<9x64x16xf32, #tpu.memory_space<vmem>>, vector<1x64x16xf32>
    %87 = vector.shape_cast %86 : vector<1x64x16xf32> to vector<64x16xf32>
    %cst_93 = arith.constant dense<0.000000e+00> : vector<256x16xf32>
    %88 = tpu.matmul %65, %87, %cst_93 {dimension_numbers = #tpu.dot_dimension_numbers<[1], [0], [0], [1], [0, 0, 1, 1], [], []>} : vector<256x64xf32>, vector<64x16xf32>, vector<256x16xf32> -> vector<256x16xf32>
    %c3_94 = arith.constant 3 : index
    %c0_95 = arith.constant 0 : index
    %c0_96 = arith.constant 0 : index
    %89 = vector.load %arg6[%c3_94, %c0_95, %c0_96] : memref<9x16x256xf32, #tpu.memory_space<vmem>>, vector<1x16x256xf32>
    %90 = vector.shape_cast %89 : vector<1x16x256xf32> to vector<16x256xf32>
    %cst_97 = arith.constant dense<0.000000e+00> : vector<16x16xf32>
    %91 = tpu.matmul %90, %88, %cst_97 {dimension_numbers = #tpu.dot_dimension_numbers<[1], [0], [0], [1], [0, 0, 1, 1], [], []>} : vector<16x256xf32>, vector<256x16xf32>, vector<16x16xf32> -> vector<16x16xf32>
    %92 = arith.addf %85, %91 : vector<16x16xf32>
    %c4_98 = arith.constant 4 : index
    %c0_99 = arith.constant 0 : index
    %c0_100 = arith.constant 0 : index
    %93 = vector.load %arg5[%c4_98, %c0_99, %c0_100] : memref<9x64x16xf32, #tpu.memory_space<vmem>>, vector<1x64x16xf32>
    %94 = vector.shape_cast %93 : vector<1x64x16xf32> to vector<64x16xf32>
    %cst_101 = arith.constant dense<0.000000e+00> : vector<256x16xf32>
    %95 = tpu.matmul %65, %94, %cst_101 {dimension_numbers = #tpu.dot_dimension_numbers<[1], [0], [0], [1], [0, 0, 1, 1], [], []>} : vector<256x64xf32>, vector<64x16xf32>, vector<256x16xf32> -> vector<256x16xf32>
    %c4_102 = arith.constant 4 : index
    %c0_103 = arith.constant 0 : index
    %c0_104 = arith.constant 0 : index
    %96 = vector.load %arg6[%c4_102, %c0_103, %c0_104] : memref<9x16x256xf32, #tpu.memory_space<vmem>>, vector<1x16x256xf32>
    %97 = vector.shape_cast %96 : vector<1x16x256xf32> to vector<16x256xf32>
    %cst_105 = arith.constant dense<0.000000e+00> : vector<16x16xf32>
    %98 = tpu.matmul %97, %95, %cst_105 {dimension_numbers = #tpu.dot_dimension_numbers<[1], [0], [0], [1], [0, 0, 1, 1], [], []>} : vector<16x256xf32>, vector<256x16xf32>, vector<16x16xf32> -> vector<16x16xf32>
    %99 = arith.addf %92, %98 : vector<16x16xf32>
    %c5_106 = arith.constant 5 : index
    %c0_107 = arith.constant 0 : index
    %c0_108 = arith.constant 0 : index
    %100 = vector.load %arg5[%c5_106, %c0_107, %c0_108] : memref<9x64x16xf32, #tpu.memory_space<vmem>>, vector<1x64x16xf32>
    %101 = vector.shape_cast %100 : vector<1x64x16xf32> to vector<64x16xf32>
    %cst_109 = arith.constant dense<0.000000e+00> : vector<256x16xf32>
    %102 = tpu.matmul %65, %101, %cst_109 {dimension_numbers = #tpu.dot_dimension_numbers<[1], [0], [0], [1], [0, 0, 1, 1], [], []>} : vector<256x64xf32>, vector<64x16xf32>, vector<256x16xf32> -> vector<256x16xf32>
    %c5_110 = arith.constant 5 : index
    %c0_111 = arith.constant 0 : index
    %c0_112 = arith.constant 0 : index
    %103 = vector.load %arg6[%c5_110, %c0_111, %c0_112] : memref<9x16x256xf32, #tpu.memory_space<vmem>>, vector<1x16x256xf32>
    %104 = vector.shape_cast %103 : vector<1x16x256xf32> to vector<16x256xf32>
    %cst_113 = arith.constant dense<0.000000e+00> : vector<16x16xf32>
    %105 = tpu.matmul %104, %102, %cst_113 {dimension_numbers = #tpu.dot_dimension_numbers<[1], [0], [0], [1], [0, 0, 1, 1], [], []>} : vector<16x256xf32>, vector<256x16xf32>, vector<16x16xf32> -> vector<16x16xf32>
    %106 = arith.addf %99, %105 : vector<16x16xf32>
    %c6_114 = arith.constant 6 : index
    %c0_115 = arith.constant 0 : index
    %c0_116 = arith.constant 0 : index
    %107 = vector.load %arg5[%c6_114, %c0_115, %c0_116] : memref<9x64x16xf32, #tpu.memory_space<vmem>>, vector<1x64x16xf32>
    %108 = vector.shape_cast %107 : vector<1x64x16xf32> to vector<64x16xf32>
    %cst_117 = arith.constant dense<0.000000e+00> : vector<256x16xf32>
    %109 = tpu.matmul %65, %108, %cst_117 {dimension_numbers = #tpu.dot_dimension_numbers<[1], [0], [0], [1], [0, 0, 1, 1], [], []>} : vector<256x64xf32>, vector<64x16xf32>, vector<256x16xf32> -> vector<256x16xf32>
    %c6_118 = arith.constant 6 : index
    %c0_119 = arith.constant 0 : index
    %c0_120 = arith.constant 0 : index
    %110 = vector.load %arg6[%c6_118, %c0_119, %c0_120] : memref<9x16x256xf32, #tpu.memory_space<vmem>>, vector<1x16x256xf32>
    %111 = vector.shape_cast %110 : vector<1x16x256xf32> to vector<16x256xf32>
    %cst_121 = arith.constant dense<0.000000e+00> : vector<16x16xf32>
    %112 = tpu.matmul %111, %109, %cst_121 {dimension_numbers = #tpu.dot_dimension_numbers<[1], [0], [0], [1], [0, 0, 1, 1], [], []>} : vector<16x256xf32>, vector<256x16xf32>, vector<16x16xf32> -> vector<16x16xf32>
    %113 = arith.addf %106, %112 : vector<16x16xf32>
    %c7_122 = arith.constant 7 : index
    %c0_123 = arith.constant 0 : index
    %c0_124 = arith.constant 0 : index
    %114 = vector.load %arg5[%c7_122, %c0_123, %c0_124] : memref<9x64x16xf32, #tpu.memory_space<vmem>>, vector<1x64x16xf32>
    %115 = vector.shape_cast %114 : vector<1x64x16xf32> to vector<64x16xf32>
    %cst_125 = arith.constant dense<0.000000e+00> : vector<256x16xf32>
    %116 = tpu.matmul %65, %115, %cst_125 {dimension_numbers = #tpu.dot_dimension_numbers<[1], [0], [0], [1], [0, 0, 1, 1], [], []>} : vector<256x64xf32>, vector<64x16xf32>, vector<256x16xf32> -> vector<256x16xf32>
    %c7_126 = arith.constant 7 : index
    %c0_127 = arith.constant 0 : index
    %c0_128 = arith.constant 0 : index
    %117 = vector.load %arg6[%c7_126, %c0_127, %c0_128] : memref<9x16x256xf32, #tpu.memory_space<vmem>>, vector<1x16x256xf32>
    %118 = vector.shape_cast %117 : vector<1x16x256xf32> to vector<16x256xf32>
    %cst_129 = arith.constant dense<0.000000e+00> : vector<16x16xf32>
    %119 = tpu.matmul %118, %116, %cst_129 {dimension_numbers = #tpu.dot_dimension_numbers<[1], [0], [0], [1], [0, 0, 1, 1], [], []>} : vector<16x256xf32>, vector<256x16xf32>, vector<16x16xf32> -> vector<16x16xf32>
    %120 = arith.addf %113, %119 : vector<16x16xf32>
    %c8_130 = arith.constant 8 : index
    %c0_131 = arith.constant 0 : index
    %c0_132 = arith.constant 0 : index
    %121 = vector.load %arg5[%c8_130, %c0_131, %c0_132] : memref<9x64x16xf32, #tpu.memory_space<vmem>>, vector<1x64x16xf32>
    %122 = vector.shape_cast %121 : vector<1x64x16xf32> to vector<64x16xf32>
    %cst_133 = arith.constant dense<0.000000e+00> : vector<256x16xf32>
    %123 = tpu.matmul %65, %122, %cst_133 {dimension_numbers = #tpu.dot_dimension_numbers<[1], [0], [0], [1], [0, 0, 1, 1], [], []>} : vector<256x64xf32>, vector<64x16xf32>, vector<256x16xf32> -> vector<256x16xf32>
    %c8_134 = arith.constant 8 : index
    %c0_135 = arith.constant 0 : index
    %c0_136 = arith.constant 0 : index
    %124 = vector.load %arg6[%c8_134, %c0_135, %c0_136] : memref<9x16x256xf32, #tpu.memory_space<vmem>>, vector<1x16x256xf32>
    %125 = vector.shape_cast %124 : vector<1x16x256xf32> to vector<16x256xf32>
    %cst_137 = arith.constant dense<0.000000e+00> : vector<16x16xf32>
    %126 = tpu.matmul %125, %123, %cst_137 {dimension_numbers = #tpu.dot_dimension_numbers<[1], [0], [0], [1], [0, 0, 1, 1], [], []>} : vector<16x256xf32>, vector<256x16xf32>, vector<16x16xf32> -> vector<16x16xf32>
    %127 = arith.addf %120, %126 : vector<16x16xf32>
    %c0_138 = arith.constant 0 : index
    %c0_139 = arith.constant 0 : index
    %128 = vector.load %arg7[%c0_138, %c0_139] : memref<16x1xf32, #tpu.memory_space<vmem>>, vector<16x1xf32>
    %129 = vector.broadcast %128 : vector<16x1xf32> to vector<16x16xf32>
    %130 = arith.addf %127, %129 : vector<16x16xf32>
    %c0_140 = arith.constant 0 : index
    %c0_141 = arith.constant 0 : index
    %131 = vector.load %arg8[%c0_140, %c0_141] : memref<16x16xf32, #tpu.memory_space<vmem>>, vector<16x16xf32>
    %cst_142 = arith.constant dense<0.000000e+00> : vector<16x16xf32>
    %132 = tpu.matmul %130, %131, %cst_142 {dimension_numbers = #tpu.dot_dimension_numbers<[1], [0], [0], [1], [0, 0, 1, 1], [], []>} : vector<16x16xf32>, vector<16x16xf32>, vector<16x16xf32> -> vector<16x16xf32>
    %c0_143 = arith.constant 0 : index
    %c0_144 = arith.constant 0 : index
    %133 = vector.load %arg9[%c0_143, %c0_144] : memref<1x16xf32, #tpu.memory_space<vmem>>, vector<1x16xf32>
    %134 = vector.broadcast %133 : vector<1x16xf32> to vector<16x16xf32>
    %135 = arith.addf %132, %134 : vector<16x16xf32>
    %cst_145 = arith.constant 0.000000e+00 : f32
    %136 = vector.broadcast %cst_145 : f32 to vector<16x16xf32>
    %137 = arith.maximumf %135, %136 : vector<16x16xf32>
    %138 = tpu.iota {dimensions = array<i32: 0>} : vector<8x8xi32>
    %139 = tpu.iota {dimensions = array<i32: 1>} : vector<8x8xi32>
    %140 = arith.cmpi eq, %138, %139 : vector<8x8xi32>
    %cst_146 = arith.constant 1.000000e+00 : f32
    %cst_147 = arith.constant 0.000000e+00 : f32
    %141 = vector.broadcast %cst_146 : f32 to vector<8x8xf32>
    %142 = vector.broadcast %cst_147 : f32 to vector<8x8xf32>
    %143 = arith.select %140, %141, %142 : vector<8x8xi1>, vector<8x8xf32>
    %144 = vector.shape_cast %143 : vector<8x8xf32> to vector<1x8x8xf32>
    %c0_148 = arith.constant 0 : index
    %c0_149 = arith.constant 0 : index
    %c0_150 = arith.constant 0 : index
    %145 = vector.load %arg12[%c0_148, %c0_149, %c0_150] : memref<4x16x16xf32, #tpu.memory_space<vmem>>, vector<4x16x16xf32>
    %c0_151 = arith.constant 0 : index
    %c0_152 = arith.constant 0 : index
    %146 = vector.load %arg13[%c0_151, %c0_152] : memref<4x16xf32, #tpu.memory_space<vmem>>, vector<4x16xf32>
    %c0_153 = arith.constant 0 : index
    %c0_154 = arith.constant 0 : index
    %c0_155 = arith.constant 0 : index
    %147 = vector.load %arg10[%c0_153, %c0_154, %c0_155] : memref<2x8x8xf32, #tpu.memory_space<vmem>>, vector<2x8x8xf32>
    %148 = vector.extract_strided_slice %145 {offsets = [0, 0, 0], sizes = [1, 16, 16], strides = [1, 1, 1]} : vector<4x16x16xf32> to vector<1x16x16xf32>
    %149 = vector.shape_cast %148 : vector<1x16x16xf32> to vector<16x16xf32>
    %150 = vector.extract_strided_slice %146 {offsets = [0, 0], sizes = [1, 16], strides = [1, 1]} : vector<4x16xf32> to vector<1x16xf32>
    %cst_156 = arith.constant dense<0.000000e+00> : vector<2x8xf32>
    %151 = vector.multi_reduction <add>, %147, %cst_156 [2] : vector<2x8x8xf32> to vector<2x8xf32>
    %152 = vector.shape_cast %151 : vector<2x8xf32> to vector<2x8x1xf32>
    %153 = math.rsqrt %152 : vector<2x8x1xf32>
    %cst_157 = arith.constant dense<0.000000e+00> : vector<16x16xf32>
    %154 = tpu.matmul %137, %149, %cst_157 {dimension_numbers = #tpu.dot_dimension_numbers<[1], [0], [0], [1], [0, 0, 1, 1], [], []>} : vector<16x16xf32>, vector<16x16xf32>, vector<16x16xf32> -> vector<16x16xf32>
    %155 = vector.shape_cast %154 : vector<16x16xf32> to vector<2x8x16xf32>
    %156 = vector.broadcast %153 : vector<2x8x1xf32> to vector<2x8x16xf32>
    %157 = arith.mulf %155, %156 : vector<2x8x16xf32>
    "tpu.trace_start"() <{level = 10 : i32, message = "bnm,bmf->bnf"}> : () -> ()
    %cst_158 = arith.constant dense<0.000000e+00> : vector<2x8x16xf32>
    %158 = tpu.matmul %147, %157, %cst_158 {dimension_numbers = #tpu.dot_dimension_numbers<[2], [1], [1], [2], [0, 0, 0, 1, 1, 2], [0], [0]>} : vector<2x8x8xf32>, vector<2x8x16xf32>, vector<2x8x16xf32> -> vector<2x8x16xf32>
    "tpu.trace_stop"() : () -> ()
    %159 = vector.broadcast %153 : vector<2x8x1xf32> to vector<2x8x16xf32>
    %160 = arith.mulf %158, %159 : vector<2x8x16xf32>
    %161 = vector.shape_cast %150 : vector<1x16xf32> to vector<1x1x16xf32>
    %162 = vector.broadcast %161 : vector<1x1x16xf32> to vector<2x8x16xf32>
    %163 = arith.addf %160, %162 : vector<2x8x16xf32>
    %164 = vector.shape_cast %163 : vector<2x8x16xf32> to vector<16x16xf32>
    %cst_159 = arith.constant 0.000000e+00 : f32
    %165 = vector.broadcast %cst_159 : f32 to vector<16x16xf32>
    %166 = arith.maximumf %164, %165 : vector<16x16xf32>
    %c0_160 = arith.constant 0 : index
    %c0_161 = arith.constant 0 : index
    %167 = vector.load %arg14[%c0_160, %c0_161] : memref<16x8xf32, #tpu.memory_space<vmem>>, vector<16x8xf32>
    %cst_162 = arith.constant dense<0.000000e+00> : vector<16x8xf32>
    %168 = tpu.matmul %166, %167, %cst_162 {dimension_numbers = #tpu.dot_dimension_numbers<[1], [0], [0], [1], [0, 0, 1, 1], [], []>} : vector<16x16xf32>, vector<16x8xf32>, vector<16x8xf32> -> vector<16x8xf32>
    %c0_163 = arith.constant 0 : index
    %c0_164 = arith.constant 0 : index
    %169 = vector.load %arg15[%c0_163, %c0_164] : memref<1x8xf32, #tpu.memory_space<vmem>>, vector<1x8xf32>
    %170 = vector.broadcast %169 : vector<1x8xf32> to vector<16x8xf32>
    %171 = arith.addf %168, %170 : vector<16x8xf32>
    %cst_165 = arith.constant 0.000000e+00 : f32
    %172 = vector.broadcast %cst_165 : f32 to vector<16x8xf32>
    %173 = arith.maximumf %171, %172 : vector<16x8xf32>
    %174 = vector.shape_cast %173 : vector<16x8xf32> to vector<2x8x8xf32>
    %175 = arith.mulf %174, %174 : vector<2x8x8xf32>
    %cst_166 = arith.constant dense<0.000000e+00> : vector<2x8xf32>
    %176 = vector.multi_reduction <add>, %175, %cst_166 [2] : vector<2x8x8xf32> to vector<2x8xf32>
    %177 = vector.shape_cast %176 : vector<2x8xf32> to vector<2x8x1xf32>
    %cst_167 = arith.constant dense<0.000000e+00> : vector<2x1xf32>
    %178 = vector.multi_reduction <add>, %177, %cst_167 [1] : vector<2x8x1xf32> to vector<2x1xf32>
    %179 = vector.shape_cast %178 : vector<2x1xf32> to vector<2x1x1xf32>
    %cst_168 = arith.constant 1.000000e-24 : f32
    %180 = vector.broadcast %cst_168 : f32 to vector<2x1x1xf32>
    %181 = arith.maximumf %179, %180 : vector<2x1x1xf32>
    %182 = math.rsqrt %181 : vector<2x1x1xf32>
    %183 = vector.broadcast %182 : vector<2x1x1xf32> to vector<2x8x8xf32>
    %184 = arith.mulf %174, %183 : vector<2x8x8xf32>
    %185 = vector.shape_cast %166 : vector<16x16xf32> to vector<2x8x16xf32>
    %186 = arith.mulf %185, %185 : vector<2x8x16xf32>
    %cst_169 = arith.constant dense<0.000000e+00> : vector<2x8xf32>
    %187 = vector.multi_reduction <add>, %186, %cst_169 [2] : vector<2x8x16xf32> to vector<2x8xf32>
    %188 = vector.shape_cast %187 : vector<2x8xf32> to vector<2x8x1xf32>
    %cst_170 = arith.constant 1.000000e-24 : f32
    %189 = vector.broadcast %cst_170 : f32 to vector<2x8x1xf32>
    %190 = arith.maximumf %188, %189 : vector<2x8x1xf32>
    %191 = math.rsqrt %190 : vector<2x8x1xf32>
    %192 = vector.broadcast %191 : vector<2x8x1xf32> to vector<2x8x16xf32>
    %193 = arith.mulf %185, %192 : vector<2x8x16xf32>
    "tpu.trace_start"() <{level = 10 : i32, message = "bnf,bmf->bnm"}> : () -> ()
    %cst_171 = arith.constant dense<0.000000e+00> : vector<2x8x8xf32>
    %194 = tpu.matmul %193, %193, %cst_171 {dimension_numbers = #tpu.dot_dimension_numbers<[2], [2], [1], [1], [0, 0, 0, 1, 1, 1], [0], [0]>} : vector<2x8x16xf32>, vector<2x8x16xf32>, vector<2x8x8xf32> -> vector<2x8x8xf32>
    "tpu.trace_stop"() : () -> ()
    %195 = arith.subf %184, %194 : vector<2x8x8xf32>
    %196 = arith.mulf %195, %195 : vector<2x8x8xf32>
    %197 = vector.shape_cast %196 : vector<2x8x8xf32> to vector<1x2x8x8xf32>
    %cst_172 = arith.constant dense<0.000000e+00> : vector<1xf32>
    %198 = vector.multi_reduction <add>, %197, %cst_172 [1, 2, 3] : vector<1x2x8x8xf32> to vector<1xf32>
    %199 = vector.shape_cast %198 : vector<1xf32> to vector<1x1x1x1xf32>
    %200 = vector.extract %199[0, 0, 0, 0] : f32 from vector<1x1x1x1xf32>
    %cst_173 = arith.constant 5.000000e-01 : f32
    %201 = arith.mulf %200, %cst_173 : f32
    %202 = vector.shape_cast %184 : vector<2x8x8xf32> to vector<1x2x8x8xf32>
    %cst_174 = arith.constant dense<0xFF800000> : vector<1xf32>
    %203 = vector.multi_reduction <maximumf>, %202, %cst_174 [1, 2, 3] : vector<1x2x8x8xf32> to vector<1xf32>
    %204 = vector.shape_cast %203 : vector<1xf32> to vector<1x1x1x1xf32>
    %205 = vector.extract %204[0, 0, 0, 0] : f32 from vector<1x1x1x1xf32>
    %cst_175 = arith.constant 5.000000e-01 : f32
    %206 = arith.mulf %205, %cst_175 : f32
    %207 = vector.broadcast %206 : f32 to vector<2x8x8xf32>
    %208 = arith.cmpf oge, %184, %207 : vector<2x8x8xf32>
    %cst_176 = arith.constant 0.000000e+00 : f32
    %209 = vector.broadcast %cst_176 : f32 to vector<2x8x8xf32>
    %210 = arith.cmpf ogt, %184, %209 : vector<2x8x8xf32>
    %211 = arith.andi %208, %210 : vector<2x8x8xi1>
    %cst_177 = arith.constant 1.000000e+00 : f32
    %cst_178 = arith.constant 0.000000e+00 : f32
    %212 = vector.broadcast %cst_177 : f32 to vector<2x8x8xf32>
    %213 = vector.broadcast %cst_178 : f32 to vector<2x8x8xf32>
    %214 = arith.select %211, %212, %213 : vector<2x8x8xi1>, vector<2x8x8xf32>
    %215 = tpu.transpose %214, [0, 2, 1] : vector<2x8x8xf32> -> vector<2x8x8xf32>
    %216 = vector.broadcast %144 : vector<1x8x8xf32> to vector<2x8x8xf32>
    %217 = arith.maximumf %215, %216 : vector<2x8x8xf32>
    %218 = vector.extract_strided_slice %145 {offsets = [1, 0, 0], sizes = [1, 16, 16], strides = [1, 1, 1]} : vector<4x16x16xf32> to vector<1x16x16xf32>
    %219 = vector.shape_cast %218 : vector<1x16x16xf32> to vector<16x16xf32>
    %220 = vector.extract_strided_slice %146 {offsets = [1, 0], sizes = [1, 16], strides = [1, 1]} : vector<4x16xf32> to vector<1x16xf32>
    %cst_179 = arith.constant dense<0.000000e+00> : vector<2x8xf32>
    %221 = vector.multi_reduction <add>, %217, %cst_179 [2] : vector<2x8x8xf32> to vector<2x8xf32>
    %222 = vector.shape_cast %221 : vector<2x8xf32> to vector<2x8x1xf32>
    %223 = math.rsqrt %222 : vector<2x8x1xf32>
    %cst_180 = arith.constant dense<0.000000e+00> : vector<16x16xf32>
    %224 = tpu.matmul %166, %219, %cst_180 {dimension_numbers = #tpu.dot_dimension_numbers<[1], [0], [0], [1], [0, 0, 1, 1], [], []>} : vector<16x16xf32>, vector<16x16xf32>, vector<16x16xf32> -> vector<16x16xf32>
    %225 = vector.shape_cast %224 : vector<16x16xf32> to vector<2x8x16xf32>
    %226 = vector.broadcast %223 : vector<2x8x1xf32> to vector<2x8x16xf32>
    %227 = arith.mulf %225, %226 : vector<2x8x16xf32>
    "tpu.trace_start"() <{level = 10 : i32, message = "bnm,bmf->bnf"}> : () -> ()
    %cst_181 = arith.constant dense<0.000000e+00> : vector<2x8x16xf32>
    %228 = tpu.matmul %217, %227, %cst_181 {dimension_numbers = #tpu.dot_dimension_numbers<[2], [1], [1], [2], [0, 0, 0, 1, 1, 2], [0], [0]>} : vector<2x8x8xf32>, vector<2x8x16xf32>, vector<2x8x16xf32> -> vector<2x8x16xf32>
    "tpu.trace_stop"() : () -> ()
    %229 = vector.broadcast %223 : vector<2x8x1xf32> to vector<2x8x16xf32>
    %230 = arith.mulf %228, %229 : vector<2x8x16xf32>
    %231 = vector.shape_cast %220 : vector<1x16xf32> to vector<1x1x16xf32>
    %232 = vector.broadcast %231 : vector<1x1x16xf32> to vector<2x8x16xf32>
    %233 = arith.addf %230, %232 : vector<2x8x16xf32>
    %234 = vector.shape_cast %233 : vector<2x8x16xf32> to vector<16x16xf32>
    %cst_182 = arith.constant 0.000000e+00 : f32
    %235 = vector.broadcast %cst_182 : f32 to vector<16x16xf32>
    %236 = arith.maximumf %234, %235 : vector<16x16xf32>
    %c0_183 = arith.constant 0 : index
    %c0_184 = arith.constant 0 : index
    %237 = vector.load %arg14[%c0_183, %c0_184] : memref<16x8xf32, #tpu.memory_space<vmem>>, vector<16x8xf32>
    %cst_185 = arith.constant dense<0.000000e+00> : vector<16x8xf32>
    %238 = tpu.matmul %236, %237, %cst_185 {dimension_numbers = #tpu.dot_dimension_numbers<[1], [0], [0], [1], [0, 0, 1, 1], [], []>} : vector<16x16xf32>, vector<16x8xf32>, vector<16x8xf32> -> vector<16x8xf32>
    %c0_186 = arith.constant 0 : index
    %c0_187 = arith.constant 0 : index
    %239 = vector.load %arg15[%c0_186, %c0_187] : memref<1x8xf32, #tpu.memory_space<vmem>>, vector<1x8xf32>
    %240 = vector.broadcast %239 : vector<1x8xf32> to vector<16x8xf32>
    %241 = arith.addf %238, %240 : vector<16x8xf32>
    %cst_188 = arith.constant 0.000000e+00 : f32
    %242 = vector.broadcast %cst_188 : f32 to vector<16x8xf32>
    %243 = arith.maximumf %241, %242 : vector<16x8xf32>
    %244 = vector.shape_cast %243 : vector<16x8xf32> to vector<2x8x8xf32>
    %245 = arith.mulf %244, %244 : vector<2x8x8xf32>
    %cst_189 = arith.constant dense<0.000000e+00> : vector<2x8xf32>
    %246 = vector.multi_reduction <add>, %245, %cst_189 [2] : vector<2x8x8xf32> to vector<2x8xf32>
    %247 = vector.shape_cast %246 : vector<2x8xf32> to vector<2x8x1xf32>
    %cst_190 = arith.constant dense<0.000000e+00> : vector<2x1xf32>
    %248 = vector.multi_reduction <add>, %247, %cst_190 [1] : vector<2x8x1xf32> to vector<2x1xf32>
    %249 = vector.shape_cast %248 : vector<2x1xf32> to vector<2x1x1xf32>
    %cst_191 = arith.constant 1.000000e-24 : f32
    %250 = vector.broadcast %cst_191 : f32 to vector<2x1x1xf32>
    %251 = arith.maximumf %249, %250 : vector<2x1x1xf32>
    %252 = math.rsqrt %251 : vector<2x1x1xf32>
    %253 = vector.broadcast %252 : vector<2x1x1xf32> to vector<2x8x8xf32>
    %254 = arith.mulf %244, %253 : vector<2x8x8xf32>
    %255 = vector.shape_cast %236 : vector<16x16xf32> to vector<2x8x16xf32>
    %256 = arith.mulf %255, %255 : vector<2x8x16xf32>
    %cst_192 = arith.constant dense<0.000000e+00> : vector<2x8xf32>
    %257 = vector.multi_reduction <add>, %256, %cst_192 [2] : vector<2x8x16xf32> to vector<2x8xf32>
    %258 = vector.shape_cast %257 : vector<2x8xf32> to vector<2x8x1xf32>
    %cst_193 = arith.constant 1.000000e-24 : f32
    %259 = vector.broadcast %cst_193 : f32 to vector<2x8x1xf32>
    %260 = arith.maximumf %258, %259 : vector<2x8x1xf32>
    %261 = math.rsqrt %260 : vector<2x8x1xf32>
    %262 = vector.broadcast %261 : vector<2x8x1xf32> to vector<2x8x16xf32>
    %263 = arith.mulf %255, %262 : vector<2x8x16xf32>
    "tpu.trace_start"() <{level = 10 : i32, message = "bnf,bmf->bnm"}> : () -> ()
    %cst_194 = arith.constant dense<0.000000e+00> : vector<2x8x8xf32>
    %264 = tpu.matmul %263, %263, %cst_194 {dimension_numbers = #tpu.dot_dimension_numbers<[2], [2], [1], [1], [0, 0, 0, 1, 1, 1], [0], [0]>} : vector<2x8x16xf32>, vector<2x8x16xf32>, vector<2x8x8xf32> -> vector<2x8x8xf32>
    "tpu.trace_stop"() : () -> ()
    %265 = arith.subf %254, %264 : vector<2x8x8xf32>
    %266 = arith.mulf %265, %265 : vector<2x8x8xf32>
    %267 = vector.shape_cast %266 : vector<2x8x8xf32> to vector<1x2x8x8xf32>
    %cst_195 = arith.constant dense<0.000000e+00> : vector<1xf32>
    %268 = vector.multi_reduction <add>, %267, %cst_195 [1, 2, 3] : vector<1x2x8x8xf32> to vector<1xf32>
    %269 = vector.shape_cast %268 : vector<1xf32> to vector<1x1x1x1xf32>
    %270 = vector.extract %269[0, 0, 0, 0] : f32 from vector<1x1x1x1xf32>
    %cst_196 = arith.constant 5.000000e-01 : f32
    %271 = arith.mulf %270, %cst_196 : f32
    %272 = vector.shape_cast %254 : vector<2x8x8xf32> to vector<1x2x8x8xf32>
    %cst_197 = arith.constant dense<0xFF800000> : vector<1xf32>
    %273 = vector.multi_reduction <maximumf>, %272, %cst_197 [1, 2, 3] : vector<1x2x8x8xf32> to vector<1xf32>
    %274 = vector.shape_cast %273 : vector<1xf32> to vector<1x1x1x1xf32>
    %275 = vector.extract %274[0, 0, 0, 0] : f32 from vector<1x1x1x1xf32>
    %cst_198 = arith.constant 5.000000e-01 : f32
    %276 = arith.mulf %275, %cst_198 : f32
    %277 = vector.broadcast %276 : f32 to vector<2x8x8xf32>
    %278 = arith.cmpf oge, %254, %277 : vector<2x8x8xf32>
    %cst_199 = arith.constant 0.000000e+00 : f32
    %279 = vector.broadcast %cst_199 : f32 to vector<2x8x8xf32>
    %280 = arith.cmpf ogt, %254, %279 : vector<2x8x8xf32>
    %281 = arith.andi %278, %280 : vector<2x8x8xi1>
    %cst_200 = arith.constant 1.000000e+00 : f32
    %cst_201 = arith.constant 0.000000e+00 : f32
    %282 = vector.broadcast %cst_200 : f32 to vector<2x8x8xf32>
    %283 = vector.broadcast %cst_201 : f32 to vector<2x8x8xf32>
    %284 = arith.select %281, %282, %283 : vector<2x8x8xi1>, vector<2x8x8xf32>
    %285 = tpu.transpose %284, [0, 2, 1] : vector<2x8x8xf32> -> vector<2x8x8xf32>
    %286 = vector.broadcast %144 : vector<1x8x8xf32> to vector<2x8x8xf32>
    %287 = arith.maximumf %285, %286 : vector<2x8x8xf32>
    %288 = vector.extract_strided_slice %145 {offsets = [2, 0, 0], sizes = [1, 16, 16], strides = [1, 1, 1]} : vector<4x16x16xf32> to vector<1x16x16xf32>
    %289 = vector.shape_cast %288 : vector<1x16x16xf32> to vector<16x16xf32>
    %290 = vector.extract_strided_slice %146 {offsets = [2, 0], sizes = [1, 16], strides = [1, 1]} : vector<4x16xf32> to vector<1x16xf32>
    %cst_202 = arith.constant dense<0.000000e+00> : vector<2x8xf32>
    %291 = vector.multi_reduction <add>, %287, %cst_202 [2] : vector<2x8x8xf32> to vector<2x8xf32>
    %292 = vector.shape_cast %291 : vector<2x8xf32> to vector<2x8x1xf32>
    %293 = math.rsqrt %292 : vector<2x8x1xf32>
    %cst_203 = arith.constant dense<0.000000e+00> : vector<16x16xf32>
    %294 = tpu.matmul %236, %289, %cst_203 {dimension_numbers = #tpu.dot_dimension_numbers<[1], [0], [0], [1], [0, 0, 1, 1], [], []>} : vector<16x16xf32>, vector<16x16xf32>, vector<16x16xf32> -> vector<16x16xf32>
    %295 = vector.shape_cast %294 : vector<16x16xf32> to vector<2x8x16xf32>
    %296 = vector.broadcast %293 : vector<2x8x1xf32> to vector<2x8x16xf32>
    %297 = arith.mulf %295, %296 : vector<2x8x16xf32>
    "tpu.trace_start"() <{level = 10 : i32, message = "bnm,bmf->bnf"}> : () -> ()
    %cst_204 = arith.constant dense<0.000000e+00> : vector<2x8x16xf32>
    %298 = tpu.matmul %287, %297, %cst_204 {dimension_numbers = #tpu.dot_dimension_numbers<[2], [1], [1], [2], [0, 0, 0, 1, 1, 2], [0], [0]>} : vector<2x8x8xf32>, vector<2x8x16xf32>, vector<2x8x16xf32> -> vector<2x8x16xf32>
    "tpu.trace_stop"() : () -> ()
    %299 = vector.broadcast %293 : vector<2x8x1xf32> to vector<2x8x16xf32>
    %300 = arith.mulf %298, %299 : vector<2x8x16xf32>
    %301 = vector.shape_cast %290 : vector<1x16xf32> to vector<1x1x16xf32>
    %302 = vector.broadcast %301 : vector<1x1x16xf32> to vector<2x8x16xf32>
    %303 = arith.addf %300, %302 : vector<2x8x16xf32>
    %304 = vector.shape_cast %303 : vector<2x8x16xf32> to vector<16x16xf32>
    %cst_205 = arith.constant 0.000000e+00 : f32
    %305 = vector.broadcast %cst_205 : f32 to vector<16x16xf32>
    %306 = arith.maximumf %304, %305 : vector<16x16xf32>
    %c0_206 = arith.constant 0 : index
    %c0_207 = arith.constant 0 : index
    %c0_208 = arith.constant 0 : index
    %307 = vector.load %arg11[%c0_206, %c0_207, %c0_208] : memref<2x8x8xf32, #tpu.memory_space<vmem>>, vector<2x8x8xf32>
    %308 = vector.extract_strided_slice %145 {offsets = [3, 0, 0], sizes = [1, 16, 16], strides = [1, 1, 1]} : vector<4x16x16xf32> to vector<1x16x16xf32>
    %309 = vector.shape_cast %308 : vector<1x16x16xf32> to vector<16x16xf32>
    %310 = vector.extract_strided_slice %146 {offsets = [3, 0], sizes = [1, 16], strides = [1, 1]} : vector<4x16xf32> to vector<1x16xf32>
    %cst_209 = arith.constant dense<0.000000e+00> : vector<2x8xf32>
    %311 = vector.multi_reduction <add>, %307, %cst_209 [2] : vector<2x8x8xf32> to vector<2x8xf32>
    %312 = vector.shape_cast %311 : vector<2x8xf32> to vector<2x8x1xf32>
    %313 = math.rsqrt %312 : vector<2x8x1xf32>
    %cst_210 = arith.constant dense<0.000000e+00> : vector<16x16xf32>
    %314 = tpu.matmul %306, %309, %cst_210 {dimension_numbers = #tpu.dot_dimension_numbers<[1], [0], [0], [1], [0, 0, 1, 1], [], []>} : vector<16x16xf32>, vector<16x16xf32>, vector<16x16xf32> -> vector<16x16xf32>
    %315 = vector.shape_cast %314 : vector<16x16xf32> to vector<2x8x16xf32>
    %316 = vector.broadcast %313 : vector<2x8x1xf32> to vector<2x8x16xf32>
    %317 = arith.mulf %315, %316 : vector<2x8x16xf32>
    "tpu.trace_start"() <{level = 10 : i32, message = "bnm,bmf->bnf"}> : () -> ()
    %cst_211 = arith.constant dense<0.000000e+00> : vector<2x8x16xf32>
    %318 = tpu.matmul %307, %317, %cst_211 {dimension_numbers = #tpu.dot_dimension_numbers<[2], [1], [1], [2], [0, 0, 0, 1, 1, 2], [0], [0]>} : vector<2x8x8xf32>, vector<2x8x16xf32>, vector<2x8x16xf32> -> vector<2x8x16xf32>
    "tpu.trace_stop"() : () -> ()
    %319 = vector.broadcast %313 : vector<2x8x1xf32> to vector<2x8x16xf32>
    %320 = arith.mulf %318, %319 : vector<2x8x16xf32>
    %321 = vector.shape_cast %310 : vector<1x16xf32> to vector<1x1x16xf32>
    %322 = vector.broadcast %321 : vector<1x1x16xf32> to vector<2x8x16xf32>
    %323 = arith.addf %320, %322 : vector<2x8x16xf32>
    %324 = vector.shape_cast %323 : vector<2x8x16xf32> to vector<16x16xf32>
    %c0_212 = arith.constant 0 : index
    %c0_213 = arith.constant 0 : index
    %325 = vector.load %arg16[%c0_212, %c0_213] : memref<16x2xf32, #tpu.memory_space<vmem>>, vector<16x2xf32>
    %cst_214 = arith.constant dense<0.000000e+00> : vector<16x2xf32>
    %326 = tpu.matmul %324, %325, %cst_214 {dimension_numbers = #tpu.dot_dimension_numbers<[1], [0], [0], [1], [0, 0, 1, 1], [], []>} : vector<16x16xf32>, vector<16x2xf32>, vector<16x2xf32> -> vector<16x2xf32>
    %c0_215 = arith.constant 0 : index
    %c0_216 = arith.constant 0 : index
    %327 = vector.load %arg17[%c0_215, %c0_216] : memref<1x2xf32, #tpu.memory_space<vmem>>, vector<1x2xf32>
    %328 = vector.broadcast %327 : vector<1x2xf32> to vector<16x2xf32>
    %329 = arith.addf %326, %328 : vector<16x2xf32>
    %330 = vector.shape_cast %329 : vector<16x2xf32> to vector<2x8x2xf32>
    %c0_217 = arith.constant 0 : index
    %c0_218 = arith.constant 0 : index
    %c0_219 = arith.constant 0 : index
    %331 = vector.load %arg18[%c0_217, %c0_218, %c0_219] : memref<2x8x2xf32, #tpu.memory_space<vmem>>, vector<2x8x2xf32>
    tpu.vector_store %arg18[%c0_217, %c0_218, %c0_219], %330 {strides = array<i32>} : memref<2x8x2xf32, #tpu.memory_space<vmem>>, vector<2x8x2xf32>,
    %332 = arith.addf %201, %271 : f32
    %c0_220 = arith.constant 0 : index
    %c0_221 = arith.constant 0 : index
    %333 = memref.load %arg19[%c0_220, %c0_221] : memref<1x1xf32, #tpu.memory_space<smem>>
    memref.store %332, %arg19[%c0_220, %c0_221] : memref<1x1xf32, #tpu.memory_space<smem>>
    return
  }
  func.func @transform_0(%arg0: i32) -> (i32, i32) {
    %c0_i32 = arith.constant 0 : i32
    %c0_i32_0 = arith.constant 0 : i32
    %c0_i32_1 = arith.constant 0 : i32
    return %c0_i32, %c0_i32_0 : i32, i32
  }
  func.func @transform_1(%arg0: i32) -> (i32, i32, i32) {
    %c0_i32 = arith.constant 0 : i32
    %c0_i32_0 = arith.constant 0 : i32
    %c0_i32_1 = arith.constant 0 : i32
    %c0_i32_2 = arith.constant 0 : i32
    return %c0_i32, %c0_i32_0, %c0_i32_1 : i32, i32, i32
  }
  func.func @transform_2(%arg0: i32) -> (i32, i32, i32) {
    %c0_i32 = arith.constant 0 : i32
    %c0_i32_0 = arith.constant 0 : i32
    %c0_i32_1 = arith.constant 0 : i32
    %c0_i32_2 = arith.constant 0 : i32
    return %c0_i32, %c0_i32_0, %c0_i32_1 : i32, i32, i32
  }
  func.func @transform_3(%arg0: i32) -> (i32, i32) {
    %c0_i32 = arith.constant 0 : i32
    %c0_i32_0 = arith.constant 0 : i32
    %c0_i32_1 = arith.constant 0 : i32
    return %c0_i32, %c0_i32_0 : i32, i32
  }
  func.func @transform_4(%arg0: i32) -> (i32, i32, i32) {
    %c0_i32 = arith.constant 0 : i32
    %c0_i32_0 = arith.constant 0 : i32
    %c0_i32_1 = arith.constant 0 : i32
    %c0_i32_2 = arith.constant 0 : i32
    return %c0_i32, %c0_i32_0, %c0_i32_1 : i32, i32, i32
  }
  func.func @transform_5(%arg0: i32) -> (i32, i32, i32) {
    %c0_i32 = arith.constant 0 : i32
    %c0_i32_0 = arith.constant 0 : i32
    %c0_i32_1 = arith.constant 0 : i32
    %c0_i32_2 = arith.constant 0 : i32
    return %c0_i32, %c0_i32_0, %c0_i32_1 : i32, i32, i32
  }
  func.func @transform_6(%arg0: i32) -> (i32, i32) {
    %c0_i32 = arith.constant 0 : i32
    %c0_i32_0 = arith.constant 0 : i32
    %c0_i32_1 = arith.constant 0 : i32
    return %c0_i32, %c0_i32_0 : i32, i32
  }
  func.func @transform_7(%arg0: i32) -> (i32, i32) {
    %c0_i32 = arith.constant 0 : i32
    %c0_i32_0 = arith.constant 0 : i32
    %c0_i32_1 = arith.constant 0 : i32
    return %c0_i32, %c0_i32_0 : i32, i32
  }
  func.func @transform_8(%arg0: i32) -> (i32, i32) {
    %c0_i32 = arith.constant 0 : i32
    %c0_i32_0 = arith.constant 0 : i32
    %c0_i32_1 = arith.constant 0 : i32
    return %c0_i32, %c0_i32_0 : i32, i32
  }
  func.func @transform_9(%arg0: i32) -> (i32, i32, i32) {
    %c0_i32 = arith.constant 0 : i32
    %c0_i32_0 = arith.constant 0 : i32
    %c0_i32_1 = arith.constant 0 : i32
    %c0_i32_2 = arith.constant 0 : i32
    return %c0_i32, %c0_i32_0, %c0_i32_1 : i32, i32, i32
  }
  func.func @transform_10(%arg0: i32) -> (i32, i32, i32) {
    %c0_i32 = arith.constant 0 : i32
    %c0_i32_0 = arith.constant 0 : i32
    %c0_i32_1 = arith.constant 0 : i32
    %c0_i32_2 = arith.constant 0 : i32
    return %c0_i32, %c0_i32_0, %c0_i32_1 : i32, i32, i32
  }
  func.func @transform_11(%arg0: i32) -> (i32, i32, i32) {
    %c0_i32 = arith.constant 0 : i32
    %c0_i32_0 = arith.constant 0 : i32
    %c0_i32_1 = arith.constant 0 : i32
    %c0_i32_2 = arith.constant 0 : i32
    return %c0_i32, %c0_i32_0, %c0_i32_1 : i32, i32, i32
  }
  func.func @transform_12(%arg0: i32) -> (i32, i32) {
    %c0_i32 = arith.constant 0 : i32
    %c0_i32_0 = arith.constant 0 : i32
    %c0_i32_1 = arith.constant 0 : i32
    return %c0_i32, %c0_i32_0 : i32, i32
  }
  func.func @transform_13(%arg0: i32) -> (i32, i32) {
    %c0_i32 = arith.constant 0 : i32
    %c0_i32_0 = arith.constant 0 : i32
    %c0_i32_1 = arith.constant 0 : i32
    return %c0_i32, %c0_i32_0 : i32, i32
  }
  func.func @transform_14(%arg0: i32) -> (i32, i32) {
    %c0_i32 = arith.constant 0 : i32
    %c0_i32_0 = arith.constant 0 : i32
    %c0_i32_1 = arith.constant 0 : i32
    return %c0_i32, %c0_i32_0 : i32, i32
  }
  func.func @transform_15(%arg0: i32) -> (i32, i32) {
    %c0_i32 = arith.constant 0 : i32
    %c0_i32_0 = arith.constant 0 : i32
    %c0_i32_1 = arith.constant 0 : i32
    return %c0_i32, %c0_i32_0 : i32, i32
  }
  func.func @transform_16(%arg0: i32) -> (i32, i32) {
    %c0_i32 = arith.constant 0 : i32
    %c0_i32_0 = arith.constant 0 : i32
    %c0_i32_1 = arith.constant 0 : i32
    return %c0_i32, %c0_i32_0 : i32, i32
  }
  func.func @transform_17(%arg0: i32) -> (i32, i32, i32) {
    %c0_i32 = arith.constant 0 : i32
    %c0_i32_0 = arith.constant 0 : i32
    %c0_i32_1 = arith.constant 0 : i32
    %c0_i32_2 = arith.constant 0 : i32
    return %c0_i32, %c0_i32_0, %c0_i32_1 : i32, i32, i32
  }
  func.func @transform_18(%arg0: i32) -> (i32, i32) {
    %c0_i32 = arith.constant 0 : i32
    %c0_i32_0 = arith.constant 0 : i32
    %c0_i32_1 = arith.constant 0 : i32
    return %c0_i32, %c0_i32_0 : i32, i32
  }
}

</mosaic_0001>

<bundles_post_ra>
// kernel: my_model_forward.1
= control target key start
LH: loop header
LB: loop body
LE: loop exit
PB: predicated region body
PF: predicated region fallthrough
CT: control target
= control target key end

     0   :  { %s18053_s0 = inlined_call_operand.vmem [shape: f32[6,256], index: 0, kind: input, shape index: {}]   ;;  %s18054_s1 = inlined_call_operand.vmem [shape: f32[9,256,64], index: 1, kind: input, shape index: {}]   ;;  %s18055_s2 = inlined_call_operand.vmem [shape: f32[9,256,6], index: 2, kind: input, shape index: {}]   ;;  %s18056_s3 = inlined_call_operand.vmem [shape: f32[256,1], index: 3, kind: input, shape index: {}]   ;;  %s18057_s4 = inlined_call_operand.vmem [shape: f32[9,64,16], index: 4, kind: input, shape index: {}]   ;;  %s18058_s5 = inlined_call_operand.vmem [shape: f32[9,16,256], index: 5, kind: input, shape index: {}]   ;;  %s18059_s6 = inlined_call_operand.vmem [shape: f32[16,1], index: 6, kind: input, shape index: {}]   ;;  %s18060_s7 = inlined_call_operand.vmem [shape: f32[16,16], index: 7, kind: input, shape index: {}]   ;;  %s18061_s8 = inlined_call_operand.vmem [shape: f32[1,16], index: 8, kind: input, shape index: {}]   ;;  %s18062_s9 = inlined_call_operand.vmem [shape: f32[2,8,8], index: 9, kind: input, shape index: {}]   ;;  %s18063_s10 = inlined_call_operand.vmem [shape: f32[2,8,8], index: 10, kind: input, shape index: {}]   ;;  %s18064_s11 = inlined_call_operand.vmem [shape: f32[4,16,16], index: 11, kind: input, shape index: {}]   ;;  %s18065_s12 = inlined_call_operand.vmem [shape: f32[4,16], index: 12, kind: input, shape index: {}]   ;;  %s18066_s13 = inlined_call_operand.vmem [shape: f32[16,8], index: 13, kind: input, shape index: {}]   ;;  %s18067_s14 = inlined_call_operand.vmem [shape: f32[1,8], index: 14, kind: input, shape index: {}]   ;;  %s18068_s15 = inlined_call_operand.vmem [shape: f32[16,2], index: 15, kind: input, shape index: {}]   ;;  %s18069_s16 = inlined_call_operand.vmem [shape: f32[1,2], index: 16, kind: input, shape index: {}]   ;;  %s18070_s17 = inlined_call_operand.vmem [shape: f32[2,8,2], index: 17, kind: output, shape index: {0}]   ;;  %s18071_s18 = inlined_call_operand.hbm [shape: f32[1,1], index: 18, kind: output, shape index: {1}]  }
   0x1   :  { %18123 = sst [smem:[#allocation29_spill]] %s18053_s0 }
   0x2   :  { %18124 = sst [smem:[#allocation30_spill]] %s18054_s1 }
   0x3   :  { %18125 = sst [smem:[#allocation31_spill]] %s18055_s2 }
   0x4   :  { %s18126_s29 = sld [smem:[#allocation30_spill]]  ;;  %s18127_s23 = sld [smem:[#allocation29_spill]] }
   0xa   :  { %v9580_v0 = vld [vmem:[%s18126_s29 + $0x180] sm:$0xff]  ;;  %v9581_v1 = vld [vmem:[%s18126_s29 + $0x188] sm:$0xff]  ;;  %v9582_v5 = vld [vmem:[%s18126_s29 + $0x190] sm:$0xff] }
   0xb   :  { %v9564_v2 = vld [vmem:[%s18126_s29 + $0x100] sm:$0xff]  ;;  %v13337_v3 = vpack.c.bf16 %v9581_v1, %v9580_v0  ;;  %v9565_v4 = vld [vmem:[%s18126_s29 + $0x108] sm:$0xff]  ;;  %v9583_v6 = vld [vmem:[%s18126_s29 + $0x198] sm:$0xff] }
   0xc   :  { %v13339_v7 = vpack.c.bf16 %v9565_v4, %v9564_v2  ;;  %v13341_v8 = vpack.c.bf16 %v9583_v6, %v9582_v5  ;;  %v9566_v9 = vld [vmem:[%s18126_s29 + $0x110] sm:$0xff]  ;;  %v9567_v10 = vld [vmem:[%s18126_s29 + $0x118] sm:$0xff]  ;;  %v9584_v11 = vld [vmem:[%s18126_s29 + $0x1a0] sm:$0xff] }
   0xd   :  { %13338 = vmatprep.subr.bf16.mxu1 %v13337_v3  ;;  %v9585_v12 = vld [vmem:[%s18126_s29 + $0x1a8] sm:$0xff]  ;;  %v13343_v13 = vpack.c.bf16 %v9567_v10, %v9566_v9  ;;  %v9568_v15 = vld [vmem:[%s18126_s29 + $0x120] sm:$0xff]  ;;  %v9586_v17 = vld [vmem:[%s18126_s29 + $0x1b0] sm:$0xff] }
   0xe   :  { %13340 = vmatpush3.bf16.msra.mxu1 %v13339_v7  ;;  %v13345_v14 = vpack.c.bf16 %v9585_v12, %v9584_v11  ;;  %v9569_v16 = vld [vmem:[%s18126_s29 + $0x128] sm:$0xff]  ;;  %v9587_v18 = vld [vmem:[%s18126_s29 + $0x1b8] sm:$0xff]  ;;  %v9570_v21 = vld [vmem:[%s18126_s29 + $0x130] sm:$0xff] }
   0xf   :  { %13342 = vmatprep.subr.bf16.mxu1 %v13341_v8  ;;  %v13347_v19 = vpack.c.bf16 %v9569_v16, %v9568_v15  ;;  %v13349_v20 = vpack.c.bf16 %v9587_v18, %v9586_v17  ;;  %v9571_v22 = vld [vmem:[%s18126_s29 + $0x138] sm:$0xff]  ;;  %v9588_v23 = vld [vmem:[%s18126_s29 + $0x1c0] sm:$0xff]  ;;  %v9589_v24 = vld [vmem:[%s18126_s29 + $0x1c8] sm:$0xff] }
  0x10   :  { %v14536_v25 = vld [vmem:[%s18127_s23 + $0x8] sm:$0x3f]  ;;  %v9572_v26 = vld [vmem:[%s18126_s29 + $0x140] sm:$0xff]  ;;  %v13351_v30 = vpack.c.bf16 %v9571_v22, %v9570_v21  ;;  %v9590_v31 = vld [vmem:[%s18126_s29 + $0x1d0] sm:$0xff]  ;;  %v13353_v36 = vpack.c.bf16 %v9589_v24, %v9588_v23 }
  0x11   :  { %v9573_v27 = vld [vmem:[%s18126_s29 + $0x148] sm:$0xff]  ;;  %292 = vmatprep.mubr.f32.mxu1 %v14536_v25  ;;  %v77_v28 = vld [vmem:[%s18126_s29 + $0x80] sm:$0xff]  ;;  %157 = vmatprep.mubr.f32.mxu0 %v14536_v25  ;;  %v79_v35 = vld [vmem:[%s18126_s29 + $0x90] sm:$0xff] }
  0x12   :  { %13344 = vmatpush3.bf16.msra.mxu1 %v13343_v13  ;;  %v78_v29 = vld [vmem:[%s18126_s29 + $0x88] sm:$0xff]  ;;  %v61_v33 = vld [vmem:[%s18126_s29] sm:$0xff]  ;;  %v80_v38 = vld [vmem:[%s18126_s29 + $0x98] sm:$0xff]  ;;  %v13355_v46 = vpack.c.bf16 %v9573_v27, %v9572_v26 }
  0x13   :  { %13346 = vmatprep.subr.bf16.mxu1 %v13345_v14  ;;  %v13305_v32 = vpack.c.bf16 %v78_v29, %v77_v28  ;;  %v62_v34 = vld [vmem:[%s18126_s29 + $0x8] sm:$0xff]  ;;  %v63_v39 = vld [vmem:[%s18126_s29 + $0x10] sm:$0xff]  ;;  %v64_v40 = vld [vmem:[%s18126_s29 + $0x18] sm:$0xff]  ;;  %v13309_v42 = vpack.c.bf16 %v80_v38, %v79_v35 }
  0x14   :  { %v13307_v37 = vpack.c.bf16 %v62_v34, %v61_v33  ;;  %v9591_v41 = vld [vmem:[%s18126_s29 + $0x1d8] sm:$0xff]  ;;  %v81_v43 = vld [vmem:[%s18126_s29 + $0xa0] sm:$0xff]  ;;  %v82_v44 = vld [vmem:[%s18126_s29 + $0xa8] sm:$0xff]  ;;  %v13311_v45 = vpack.c.bf16 %v64_v40, %v63_v39 }
  0x15   :  { %13306 = vmatprep.subr.bf16.mxu0 %v13305_v32  ;;  %v9574_v47 = vld [vmem:[%s18126_s29 + $0x150] sm:$0xff]  ;;  %v13313_v48 = vpack.c.bf16 %v82_v44, %v81_v43  ;;  %v65_v49 = vld [vmem:[%s18126_s29 + $0x20] sm:$0xff]  ;;  %v66_v50 = vld [vmem:[%s18126_s29 + $0x28] sm:$0xff]  ;;  %v13357_v51 = vpack.c.bf16 %v9591_v41, %v9590_v31 }
  0x16   :  { %13348 = vmatpush3.bf16.msra.mxu1 %v13347_v19  ;;  %13308 = vmatpush3.bf16.msra.mxu0 %v13307_v37  ;;  %v9575_v52 = vld [vmem:[%s18126_s29 + $0x158] sm:$0xff]  ;;  %v83_v53 = vld [vmem:[%s18126_s29 + $0xb0] sm:$0xff]  ;;  %v9592_v55 = vld [vmem:[%s18126_s29 + $0x1e0] sm:$0xff]  ;;  %v13315_v57 = vpack.c.bf16 %v66_v50, %v65_v49 }
  0x17   :  { %13350 = vmatprep.subr.bf16.mxu1 %v13349_v20  ;;  %13310 = vmatprep.subr.bf16.mxu0 %v13309_v42  ;;  %v84_v54 = vld [vmem:[%s18126_s29 + $0xb8] sm:$0xff]  ;;  %v9593_v56 = vld [vmem:[%s18126_s29 + $0x1e8] sm:$0xff]  ;;  %v13359_v58 = vpack.c.bf16 %v9575_v52, %v9574_v47  ;;  %v9576_v59 = vld [vmem:[%s18126_s29 + $0x160] sm:$0xff] }
  0x18   :  { %v13317_v60 = vpack.c.bf16 %v84_v54, %v83_v53  ;;  %v67_v61 = vld [vmem:[%s18126_s29 + $0x30] sm:$0xff]  ;;  %v68_v62 = vld [vmem:[%s18126_s29 + $0x38] sm:$0xff]  ;;  %v13361_v63 = vpack.c.bf16 %v9593_v56, %v9592_v55  ;;  %v9577_v0 = vld [vmem:[%s18126_s29 + $0x168] sm:$0xff] }
  0x19   :  { %v85_v1 = vld [vmem:[%s18126_s29 + $0xc0] sm:$0xff]  ;;  %v86_v2 = vld [vmem:[%s18126_s29 + $0xc8] sm:$0xff]  ;;  %v9594_v3 = vld [vmem:[%s18126_s29 + $0x1f0] sm:$0xff]  ;;  %v13319_v5 = vpack.c.bf16 %v68_v62, %v67_v61  ;;  %v13363_v6 = vpack.c.bf16 %v9577_v0, %v9576_v59 }
  0x1a   :  { %13352 = vmatpush3.bf16.msra.mxu1 %v13351_v30  ;;  %13312 = vmatpush3.bf16.msra.mxu0 %v13311_v45  ;;  %v9595_v4 = vld [vmem:[%s18126_s29 + $0x1f8] sm:$0xff]  ;;  %v9578_v7 = vld [vmem:[%s18126_s29 + $0x170] sm:$0xff]  ;;  %v13321_v8 = vpack.c.bf16 %v86_v2, %v85_v1  ;;  %v69_v9 = vld [vmem:[%s18126_s29 + $0x40] sm:$0xff] }
  0x1b   :  { %13354 = vmatprep.subr.bf16.mxu1 %v13353_v36  ;;  %13314 = vmatprep.subr.bf16.mxu0 %v13313_v48  ;;  %v70_v10 = vld [vmem:[%s18126_s29 + $0x48] sm:$0xff]  ;;  %v13365_v11 = vpack.c.bf16 %v9595_v4, %v9594_v3  ;;  %v9579_v12 = vld [vmem:[%s18126_s29 + $0x178] sm:$0xff]  ;;  %v87_v13 = vld [vmem:[%s18126_s29 + $0xd0] sm:$0xff] }
  0x1c   :  { %v88_v14 = vld [vmem:[%s18126_s29 + $0xd8] sm:$0xff]  ;;  %v9710_v15 = vld [vmem:[%s18126_s29 + $0x280] sm:$0xff]  ;;  %v9711_v16 = vld [vmem:[%s18126_s29 + $0x288] sm:$0xff]  ;;  %v13323_v17 = vpack.c.bf16 %v70_v10, %v69_v9  ;;  %v13367_v18 = vpack.c.bf16 %v9579_v12, %v9578_v7 }
  0x1d   :  { %v13325_v19 = vpack.c.bf16 %v88_v14, %v87_v13  ;;  %v71_v20 = vld [vmem:[%s18126_s29 + $0x50] sm:$0xff]  ;;  %v72_v21 = vld [vmem:[%s18126_s29 + $0x58] sm:$0xff]  ;;  %v89_v22 = vld [vmem:[%s18126_s29 + $0xe0] sm:$0xff]  ;;  %v13369_v24 = vpack.c.bf16 %v9711_v16, %v9710_v15 }
  0x1e   :  { %13356 = vmatpush3.bf16.msra.mxu1 %v13355_v46  ;;  %13316 = vmatpush3.bf16.msra.mxu0 %v13315_v57  ;;  %v90_v23 = vld [vmem:[%s18126_s29 + $0xe8] sm:$0xff]  ;;  %v9694_v26 = vld [vmem:[%s18126_s29 + $0x200] sm:$0xff]  ;;  %v9712_v28 = vld [vmem:[%s18126_s29 + $0x290] sm:$0xff]  ;;  %v13327_v31 = vpack.c.bf16 %v72_v21, %v71_v20 }
  0x1f   :  { %13358 = vmatprep.subr.bf16.mxu1 %v13357_v51  ;;  %13318 = vmatprep.subr.bf16.mxu0 %v13317_v60  ;;  %v9695_v27 = vld [vmem:[%s18126_s29 + $0x208] sm:$0xff]  ;;  %v9713_v29 = vld [vmem:[%s18126_s29 + $0x298] sm:$0xff]  ;;  %v14681_v30 = vld [vmem:[%s18127_s23] sm:$0x3f]  ;;  %v13329_v32 = vpack.c.bf16 %v90_v23, %v89_v22 }
  0x20   :  { %v73_v33 = vld [vmem:[%s18126_s29 + $0x60] sm:$0xff]  ;;  %v74_v34 = vld [vmem:[%s18126_s29 + $0x68] sm:$0xff]  ;;  %v91_v35 = vld [vmem:[%s18126_s29 + $0xf0] sm:$0xff]  ;;  %v13371_v36 = vpack.c.bf16 %v9695_v27, %v9694_v26  ;;  %v13373_v38 = vpack.c.bf16 %v9713_v29, %v9712_v28 }
  0x21   :  { %v92_v37 = vld [vmem:[%s18126_s29 + $0xf8] sm:$0xff]  ;;  %v9696_v39 = vld [vmem:[%s18126_s29 + $0x210] sm:$0xff]  ;;  %v9714_v41 = vld [vmem:[%s18126_s29 + $0x2a0] sm:$0xff]  ;;  %v13331_v43 = vpack.c.bf16 %v74_v34, %v73_v33 }
  0x22   :  { %13360 = vmatpush3.bf16.msra.mxu1 %v13359_v58  ;;  %13320 = vmatpush3.bf16.msra.mxu0 %v13319_v5  ;;  %v9697_v40 = vld [vmem:[%s18126_s29 + $0x218] sm:$0xff]  ;;  %v9715_v42 = vld [vmem:[%s18126_s29 + $0x2a8] sm:$0xff]  ;;  %v13333_v44 = vpack.c.bf16 %v92_v37, %v91_v35  ;;  %v75_v45 = vld [vmem:[%s18126_s29 + $0x70] sm:$0xff] }
  0x23   :  { %13362 = vmatprep.subr.bf16.mxu1 %v13361_v63  ;;  %13322 = vmatprep.subr.bf16.mxu0 %v13321_v8  ;;  %v76_v46 = vld [vmem:[%s18126_s29 + $0x78] sm:$0xff]  ;;  %v13375_v47 = vpack.c.bf16 %v9697_v40, %v9696_v39  ;;  %v13377_v48 = vpack.c.bf16 %v9715_v42, %v9714_v41  ;;  %v9698_v49 = vld [vmem:[%s18126_s29 + $0x220] sm:$0xff]  ;;  %v9699_v50 = vld [vmem:[%s18126_s29 + $0x228] sm:$0xff] }
  0x24   :  { %v9716_v51 = vld [vmem:[%s18126_s29 + $0x2b0] sm:$0xff]  ;;  %v9717_v52 = vld [vmem:[%s18126_s29 + $0x2b8] sm:$0xff]  ;;  %v13335_v53 = vpack.c.bf16 %v76_v46, %v75_v45  ;;  %v13379_v54 = vpack.c.bf16 %v9699_v50, %v9698_v49  ;;  %v9718_v58 = vld [vmem:[%s18126_s29 + $0x2c0] sm:$0xff] }
  0x25   :  { %v13381_v55 = vpack.c.bf16 %v9717_v52, %v9716_v51  ;;  %v9700_v56 = vld [vmem:[%s18126_s29 + $0x230] sm:$0xff]  ;;  %v9701_v57 = vld [vmem:[%s18126_s29 + $0x238] sm:$0xff]  ;;  %v9719_v59 = vld [vmem:[%s18126_s29 + $0x2c8] sm:$0xff] }
  0x26   :  { %13364 = vmatpush3.bf16.msra.mxu1 %v13363_v6  ;;  %13324 = vmatpush3.bf16.msra.mxu0 %v13323_v17 }
  0x27   :  { %13366 = vmatprep.subr.bf16.mxu1 %v13365_v11  ;;  %13326 = vmatprep.subr.bf16.mxu0 %v13325_v19 }
  0x2a   :  { %13368 = vmatpush3.bf16.msra.mxu1 %v13367_v18  ;;  %13328 = vmatpush3.bf16.msra.mxu0 %v13327_v31 }
  0x2b   :  { %13370 = vmatprep.subr.bf16.mxu1 %v13369_v24  ;;  %13330 = vmatprep.subr.bf16.mxu0 %v13329_v32 }
  0x2d   :  { %293 = vmatmul.mubr.f32.vlgmr.msra.gmra.mrb[0].mxu1 %v14681_v30 }
  0x2e   :  { %13372 = vmatpush3.bf16.msra.mxu1 %v13371_v36  ;;  %1078 = vmatprep.mubr.f32.mxu1 %v14536_v25 }
  0x2f   :  { %13374 = vmatprep.subr.bf16.mxu1 %v13373_v38  ;;  %13332 = vmatpush3.bf16.msra.mxu0 %v13331_v43 }
  0x30   :  { %13334 = vmatprep.subr.bf16.mxu0 %v13333_v44 }
  0x32   :  { %13376 = vmatpush3.bf16.msra.mxu1 %v13375_v47 }
  0x33   :  { %13378 = vmatprep.subr.bf16.mxu1 %v13377_v48  ;;  %13336 = vmatpush3.bf16.msra.mxu0 %v13335_v53 }
  0x34   :  { %24 = vsyncpa [#allocation3], 0  ;;  %v13383_v60 = vpack.c.bf16 %v9701_v57, %v9700_v56  ;;  %v13385_v61 = vpack.c.bf16 %v9719_v59, %v9718_v58  ;;  %v9702_v62 = vld [vmem:[%s18126_s29 + $0x240] sm:$0xff]  ;;  %v9703_v63 = vld [vmem:[%s18126_s29 + $0x248] sm:$0xff]  ;;  %s18128_s27 = sld [smem:[#allocation31_spill]]  ;;  %vm331_vm0 = vcmask 48128  }
  0x35   :  { %v9720_v0 = vld [vmem:[%s18126_s29 + $0x2d0] sm:$0xff]  ;;  %v9721_v1 = vld [vmem:[%s18126_s29 + $0x2d8] sm:$0xff]  ;;  %v13387_v2 = vpack.c.bf16 %v9703_v63, %v9702_v62  ;;  %v9722_v6 = vld [vmem:[%s18126_s29 + $0x2e0] sm:$0xff]  ;;  %vm428_vm1 = vcmask 1045504   ;;  %vm4657_vm2 = vcmask 523264   ;;  %vm7607_vm3 = vcmask 130048  }
  0x36   :  { %13380 = vmatpush3.bf16.msra.mxu1 %v13379_v54  ;;  %158 = vmatmul.mubr.f32.vlgmr.msra.gmra.mrb[0].mxu0 %v14681_v30  ;;  %v13389_v3 = vpack.c.bf16 %v9721_v1, %v9720_v0  ;;  %v9704_v4 = vld [vmem:[%s18126_s29 + $0x250] sm:$0xff]  ;;  %v9705_v5 = vld [vmem:[%s18126_s29 + $0x258] sm:$0xff]  ;;  %v9723_v7 = vld [vmem:[%s18126_s29 + $0x2e8] sm:$0xff]  ;;  %vm7708_vm4 = vcmask 64512   ;;  %vm14382_vm5 = vmmov 0  }
  0x37   :  { %13382 = vmatprep.subr.bf16.mxu1 %v13381_v55  ;;  %v13391_v8 = vpack.c.bf16 %v9705_v5, %v9704_v4  ;;  %v13393_v9 = vpack.c.bf16 %v9723_v7, %v9722_v6  ;;  %v9706_v10 = vld [vmem:[%s18126_s29 + $0x260] sm:$0xff]  ;;  %v9707_v11 = vld [vmem:[%s18126_s29 + $0x268] sm:$0xff]  ;;  %v9724_v12 = vld [vmem:[%s18126_s29 + $0x2f0] sm:$0xff] }
  0x38   :  { %v9725_v13 = vld [vmem:[%s18126_s29 + $0x2f8] sm:$0xff]  ;;  %v13395_v14 = vpack.c.bf16 %v9707_v11, %v9706_v10  ;;  %v9708_v16 = vld [vmem:[%s18126_s29 + $0x270] sm:$0xff]  ;;  %v9807_v18 = vld [vmem:[%s18126_s29 + $0x380] sm:$0xff] }
  0x39   :  { %v13397_v15 = vpack.c.bf16 %v9725_v13, %v9724_v12  ;;  %v9709_v17 = vld [vmem:[%s18126_s29 + $0x278] sm:$0xff]  ;;  %v9808_v19 = vld [vmem:[%s18126_s29 + $0x388] sm:$0xff]  ;;  %v9791_v22 = vld [vmem:[%s18126_s29 + $0x300] sm:$0xff] }
  0x3a   :  { %13384 = vmatpush3.bf16.msra.mxu1 %v13383_v60  ;;  %v13399_v20 = vpack.c.bf16 %v9709_v17, %v9708_v16  ;;  %v13401_v21 = vpack.c.bf16 %v9808_v19, %v9807_v18  ;;  %v9792_v23 = vld [vmem:[%s18126_s29 + $0x308] sm:$0xff]  ;;  %v9809_v24 = vld [vmem:[%s18126_s29 + $0x390] sm:$0xff]  ;;  %v9810_v26 = vld [vmem:[%s18126_s29 + $0x398] sm:$0xff] }
  0x3b   :  { %13386 = vmatprep.subr.bf16.mxu1 %v13385_v61  ;;  %v13403_v27 = vpack.c.bf16 %v9792_v23, %v9791_v22  ;;  %v13405_v28 = vpack.c.bf16 %v9810_v26, %v9809_v24  ;;  %v9793_v29 = vld [vmem:[%s18126_s29 + $0x310] sm:$0xff]  ;;  %v9794_v31 = vld [vmem:[%s18126_s29 + $0x318] sm:$0xff]  ;;  %v9811_v32 = vld [vmem:[%s18126_s29 + $0x3a0] sm:$0xff] }
  0x3c   :  { %v9812_v33 = vld [vmem:[%s18126_s29 + $0x3a8] sm:$0xff]  ;;  %v13407_v34 = vpack.c.bf16 %v9794_v31, %v9793_v29  ;;  %v9795_v36 = vld [vmem:[%s18126_s29 + $0x320] sm:$0xff]  ;;  %v9813_v38 = vld [vmem:[%s18126_s29 + $0x3b0] sm:$0xff] }
  0x3d   :  { %v13409_v35 = vpack.c.bf16 %v9812_v33, %v9811_v32  ;;  %v9796_v37 = vld [vmem:[%s18126_s29 + $0x328] sm:$0xff]  ;;  %v9814_v39 = vld [vmem:[%s18126_s29 + $0x3b8] sm:$0xff]  ;;  %v9797_v42 = vld [vmem:[%s18126_s29 + $0x330] sm:$0xff] }
  0x3e   :  { %13388 = vmatpush3.bf16.msra.mxu1 %v13387_v2  ;;  %v13411_v40 = vpack.c.bf16 %v9796_v37, %v9795_v36  ;;  %v13413_v41 = vpack.c.bf16 %v9814_v39, %v9813_v38  ;;  %v9798_v43 = vld [vmem:[%s18126_s29 + $0x338] sm:$0xff]  ;;  %v9815_v44 = vld [vmem:[%s18126_s29 + $0x3c0] sm:$0xff]  ;;  %v9816_v45 = vld [vmem:[%s18126_s29 + $0x3c8] sm:$0xff] }
  0x3f   :  { %13390 = vmatprep.subr.bf16.mxu1 %v13389_v3  ;;  %v13415_v46 = vpack.c.bf16 %v9798_v43, %v9797_v42  ;;  %v13417_v47 = vpack.c.bf16 %v9816_v45, %v9815_v44  ;;  %v9799_v48 = vld [vmem:[%s18126_s29 + $0x340] sm:$0xff]  ;;  %v9800_v49 = vld [vmem:[%s18126_s29 + $0x348] sm:$0xff]  ;;  %v9817_v50 = vld [vmem:[%s18126_s29 + $0x3d0] sm:$0xff] }
  0x40   :  { %v9818_v51 = vld [vmem:[%s18126_s29 + $0x3d8] sm:$0xff]  ;;  %v13419_v52 = vpack.c.bf16 %v9800_v49, %v9799_v48  ;;  %v9801_v54 = vld [vmem:[%s18126_s29 + $0x350] sm:$0xff]  ;;  %v9819_v56 = vld [vmem:[%s18126_s29 + $0x3e0] sm:$0xff] }
  0x41   :  { %v13421_v53 = vpack.c.bf16 %v9818_v51, %v9817_v50  ;;  %v9802_v55 = vld [vmem:[%s18126_s29 + $0x358] sm:$0xff]  ;;  %v9820_v57 = vld [vmem:[%s18126_s29 + $0x3e8] sm:$0xff]  ;;  %v9803_v60 = vld [vmem:[%s18126_s29 + $0x360] sm:$0xff] }
  0x42   :  { %13392 = vmatpush3.bf16.msra.mxu1 %v13391_v8  ;;  %v13423_v58 = vpack.c.bf16 %v9802_v55, %v9801_v54  ;;  %v13425_v59 = vpack.c.bf16 %v9820_v57, %v9819_v56  ;;  %v9804_v61 = vld [vmem:[%s18126_s29 + $0x368] sm:$0xff]  ;;  %v9821_v62 = vld [vmem:[%s18126_s29 + $0x3f0] sm:$0xff]  ;;  %v9822_v63 = vld [vmem:[%s18126_s29 + $0x3f8] sm:$0xff] }
  0x43   :  { %13394 = vmatprep.subr.bf16.mxu1 %v13393_v9  ;;  %v13427_v0 = vpack.c.bf16 %v9804_v61, %v9803_v60  ;;  %v13429_v1 = vpack.c.bf16 %v9822_v63, %v9821_v62  ;;  %v9805_v2 = vld [vmem:[%s18126_s29 + $0x370] sm:$0xff]  ;;  %v9806_v3 = vld [vmem:[%s18126_s29 + $0x378] sm:$0xff]  ;;  %v9596_v5 = vld [vmem:[%s18128_s27 + $0x100] sm:$0xff] }
  0x44   :  { %v13431_v4 = vpack.c.bf16 %v9806_v3, %v9805_v2  ;;  %12165 = vmatprep.mubr.msk.f32.mxu0 %vm331_vm0, %v9596_v5  ;;  %v9904_v6 = vld [vmem:[%s18126_s29 + $0x480] sm:$0xff]  ;;  %v9905_v7 = vld [vmem:[%s18126_s29 + $0x488] sm:$0xff]  ;;  %v9906_v12 = vld [vmem:[%s18126_s29 + $0x490] sm:$0xff] }
  0x45   :  { %v13433_v8 = vpack.c.bf16 %v9905_v7, %v9904_v6  ;;  %v9888_v9 = vld [vmem:[%s18126_s29 + $0x400] sm:$0xff]  ;;  %v9889_v10 = vld [vmem:[%s18126_s29 + $0x408] sm:$0xff]  ;;  %v9907_v13 = vld [vmem:[%s18126_s29 + $0x498] sm:$0xff] }
  0x46   :  { %13396 = vmatpush3.bf16.msra.mxu1 %v13395_v14  ;;  %v13435_v11 = vpack.c.bf16 %v9889_v10, %v9888_v9  ;;  %v13437_v14 = vpack.c.bf16 %v9907_v13, %v9906_v12  ;;  %v9891_v16 = vld [vmem:[%s18126_s29 + $0x418] sm:$0xff]  ;;  %v9908_v18 = vld [vmem:[%s18126_s29 + $0x4a0] sm:$0xff]  ;;  %v9909_v19 = vld [vmem:[%s18126_s29 + $0x4a8] sm:$0xff] }
  0x47   :  { %13398 = vmatprep.subr.bf16.mxu1 %v13397_v15  ;;  %v9890_v15 = vld [vmem:[%s18126_s29 + $0x410] sm:$0xff]  ;;  %v9893_v22 = vld [vmem:[%s18126_s29 + $0x428] sm:$0xff]  ;;  %v9911_v26 = vld [vmem:[%s18126_s29 + $0x4b8] sm:$0xff] }
  0x48   :  { %v13439_v17 = vpack.c.bf16 %v9891_v16, %v9890_v15  ;;  %v9910_v24 = vld [vmem:[%s18126_s29 + $0x4b0] sm:$0xff]  ;;  %v9895_v29 = vld [vmem:[%s18126_s29 + $0x438] sm:$0xff]  ;;  %v9912_v32 = vld [vmem:[%s18126_s29 + $0x4c0] sm:$0xff] }
  0x49   :  { %v9913_v33 = vld [vmem:[%s18126_s29 + $0x4c8] sm:$0xff]  ;;  %v9914_v38 = vld [vmem:[%s18126_s29 + $0x4d0] sm:$0xff]  ;;  %v9915_v39 = vld [vmem:[%s18126_s29 + $0x4d8] sm:$0xff] }
  0x4a   :  { %13400 = vmatpush3.bf16.msra.mxu1 %v13399_v20  ;;  %v13441_v20 = vpack.c.bf16 %v9909_v19, %v9908_v18  ;;  %v9897_v36 = vld [vmem:[%s18126_s29 + $0x448] sm:$0xff]  ;;  %v9899_v42 = vld [vmem:[%s18126_s29 + $0x458] sm:$0xff]  ;;  %v9916_v44 = vld [vmem:[%s18126_s29 + $0x4e0] sm:$0xff] }
  0x4b   :  { %13402 = vmatprep.subr.bf16.mxu1 %v13401_v21  ;;  %v9892_v21 = vld [vmem:[%s18126_s29 + $0x420] sm:$0xff]  ;;  %v9917_v45 = vld [vmem:[%s18126_s29 + $0x4e8] sm:$0xff]  ;;  %v9918_v50 = vld [vmem:[%s18126_s29 + $0x4f0] sm:$0xff] }
  0x4c   :  { %v13443_v23 = vpack.c.bf16 %v9893_v22, %v9892_v21  ;;  %v9901_v48 = vld [vmem:[%s18126_s29 + $0x468] sm:$0xff]  ;;  %v9919_v51 = vld [vmem:[%s18126_s29 + $0x4f8] sm:$0xff]  ;;  %v10001_v56 = vld [vmem:[%s18126_s29 + $0x580] sm:$0xff] }
  0x4d   :  { %1079 = vmatmul.mubr.f32.vlgmr.msra.gmra.mrb[2].mxu1 %v14681_v30  ;;  %v9903_v54 = vld [vmem:[%s18126_s29 + $0x478] sm:$0xff]  ;;  %v10002_v57 = vld [vmem:[%s18126_s29 + $0x588] sm:$0xff]  ;;  %v10003_v62 = vld [vmem:[%s18126_s29 + $0x590] sm:$0xff] }
  0x4e   :  { %13404 = vmatpush3.bf16.msra.mxu1 %v13403_v27  ;;  %1570 = vmatprep.mubr.f32.mxu1 %v14536_v25  ;;  %v13445_v27 = vpack.c.bf16 %v9911_v26, %v9910_v24  ;;  %v9986_v60 = vld [vmem:[%s18126_s29 + $0x508] sm:$0xff]  ;;  %v10004_v63 = vld [vmem:[%s18126_s29 + $0x598] sm:$0xff]  ;;  %v9989_v7 = vld [vmem:[%s18126_s29 + $0x520] sm:$0xff] }
  0x4f   :  { %13406 = vmatprep.subr.bf16.mxu1 %v13405_v28  ;;  %v9894_v28 = vld [vmem:[%s18126_s29 + $0x430] sm:$0xff]  ;;  %v9988_v2 = vld [vmem:[%s18126_s29 + $0x518] sm:$0xff]  ;;  %v10006_v5 = vld [vmem:[%s18126_s29 + $0x5a8] sm:$0xff] }
  0x50   :  { %v13447_v31 = vpack.c.bf16 %v9895_v29, %v9894_v28  ;;  %v10007_v10 = vld [vmem:[%s18126_s29 + $0x5b0] sm:$0xff]  ;;  %v10009_v16 = vld [vmem:[%s18126_s29 + $0x5c0] sm:$0xff] }
  0x51   :  { %v9991_v13 = vld [vmem:[%s18126_s29 + $0x530] sm:$0xff]  ;;  %v9993_v19 = vld [vmem:[%s18126_s29 + $0x540] sm:$0xff] }
  0x52   :  { %13408 = vmatpush3.bf16.msra.mxu1 %v13407_v34  ;;  %v13449_v34 = vpack.c.bf16 %v9913_v33, %v9912_v32  ;;  %v10011_v22 = vld [vmem:[%s18126_s29 + $0x5d0] sm:$0xff]  ;;  %v10013_v29 = vld [vmem:[%s18126_s29 + $0x5e0] sm:$0xff] }
  0x53   :  { %13410 = vmatprep.subr.bf16.mxu1 %v13409_v35  ;;  %v9896_v35 = vld [vmem:[%s18126_s29 + $0x440] sm:$0xff]  ;;  %v9995_v26 = vld [vmem:[%s18126_s29 + $0x550] sm:$0xff] }
  0x54   :  { %v13451_v37 = vpack.c.bf16 %v9897_v36, %v9896_v35  ;;  %v9997_v33 = vld [vmem:[%s18126_s29 + $0x560] sm:$0xff]  ;;  %v10015_v36 = vld [vmem:[%s18126_s29 + $0x5f0] sm:$0xff] }
  0x56   :  { %13412 = vmatpush3.bf16.msra.mxu1 %v13411_v40  ;;  %v13453_v40 = vpack.c.bf16 %v9915_v39, %v9914_v38  ;;  %v9999_v39 = vld [vmem:[%s18126_s29 + $0x570] sm:$0xff] }
  0x57   :  { %13414 = vmatprep.subr.bf16.mxu1 %v13413_v41  ;;  %v9898_v41 = vld [vmem:[%s18126_s29 + $0x450] sm:$0xff] }
  0x58   :  { %v13455_v43 = vpack.c.bf16 %v9899_v42, %v9898_v41 }
  0x5a   :  { %13416 = vmatpush3.bf16.msra.mxu1 %v13415_v46  ;;  %v13457_v46 = vpack.c.bf16 %v9917_v45, %v9916_v44  ;;  %v9597_v45 = vld [vmem:[%s18128_s27 + $0x108] sm:$0xff] }
  0x5b   :  { %13418 = vmatprep.subr.bf16.mxu1 %v13417_v47  ;;  %v9900_v47 = vld [vmem:[%s18126_s29 + $0x460] sm:$0xff] }
  0x5c   :  { %v13459_v49 = vpack.c.bf16 %v9901_v48, %v9900_v47  ;;  %v10098_v47 = vld [vmem:[%s18126_s29 + $0x680] sm:$0xff]  ;;  %v10099_v48 = vld [vmem:[%s18126_s29 + $0x688] sm:$0xff] }
  0x5e   :  { %13420 = vmatpush3.bf16.msra.mxu1 %v13419_v52  ;;  %v13461_v52 = vpack.c.bf16 %v9919_v51, %v9918_v50  ;;  %v13497_v50 = vpack.c.bf16 %v10099_v48, %v10098_v47  ;;  %v10082_v51 = vld [vmem:[%s18126_s29 + $0x600] sm:$0xff]  ;;  %v10112_v47 = vld [vmem:[%s18126_s29 + $0x6f0] sm:$0xff]  ;;  %v10113_v48 = vld [vmem:[%s18126_s29 + $0x6f8] sm:$0xff] }
  0x5f   :  { %13422 = vmatprep.subr.bf16.mxu1 %v13421_v53  ;;  %v9902_v53 = vld [vmem:[%s18126_s29 + $0x470] sm:$0xff] }
  0x60   :  { %v13463_v55 = vpack.c.bf16 %v9903_v54, %v9902_v53  ;;  %v9600_v53 = vld [vmem:[%s18128_s27 + $0x120] sm:$0xff] }
  0x62   :  { %13424 = vmatpush3.bf16.msra.mxu1 %v13423_v58  ;;  %v13465_v58 = vpack.c.bf16 %v10002_v57, %v10001_v56  ;;  %v10101_v56 = vld [vmem:[%s18126_s29 + $0x698] sm:$0xff]  ;;  %v9601_v57 = vld [vmem:[%s18128_s27 + $0x128] sm:$0xff] }
  0x63   :  { %13426 = vmatprep.subr.bf16.mxu1 %v13425_v59  ;;  %v9985_v59 = vld [vmem:[%s18126_s29 + $0x500] sm:$0xff] }
  0x64   :  { %v13467_v61 = vpack.c.bf16 %v9986_v60, %v9985_v59  ;;  %v10084_v60 = vld [vmem:[%s18126_s29 + $0x610] sm:$0xff] }
  0x66   :  { %13428 = vmatpush3.bf16.msra.mxu1 %v13427_v0  ;;  %v13469_v0 = vpack.c.bf16 %v10004_v63, %v10003_v62  ;;  %v9602_v62 = vld [vmem:[%s18128_s27 + $0x130] sm:$0xff] }
  0x67   :  { %13430 = vmatprep.subr.bf16.mxu1 %v13429_v1  ;;  %v9987_v1 = vld [vmem:[%s18126_s29 + $0x510] sm:$0xff] }
  0x68   :  { %v13471_v3 = vpack.c.bf16 %v9988_v2, %v9987_v1  ;;  %v10102_v2 = vld [vmem:[%s18126_s29 + $0x6a0] sm:$0xff] }
  0x6a   :  { %13432 = vmatpush3.bf16.msra.mxu1 %v13431_v4  ;;  %v10005_v4 = vld [vmem:[%s18126_s29 + $0x5a0] sm:$0xff] }
  0x6b   :  { %13434 = vmatprep.subr.bf16.mxu1 %v13433_v8  ;;  %v13473_v6 = vpack.c.bf16 %v10006_v5, %v10005_v4  ;;  %v9990_v8 = vld [vmem:[%s18126_s29 + $0x528] sm:$0xff]  ;;  %v9603_v4 = vld [vmem:[%s18128_s27 + $0x138] sm:$0xff] }
  0x6c   :  { %v13475_v9 = vpack.c.bf16 %v9990_v8, %v9989_v7  ;;  %v10087_v7 = vld [vmem:[%s18126_s29 + $0x628] sm:$0xff]  ;;  %v9604_v8 = vld [vmem:[%s18128_s27 + $0x140] sm:$0xff] }
  0x6d   :  { %1571 = vmatmul.mubr.f32.vlgmr.msra.gmra.mrb[4].mxu1 %v14681_v30 }
  0x6e   :  { %2062 = vmatprep.mubr.f32.mxu1 %v14536_v25  ;;  %13436 = vmatpush3.bf16.msra.mxu1 %v13435_v11  ;;  %v10008_v11 = vld [vmem:[%s18126_s29 + $0x5b8] sm:$0xff] }
  0x6f   :  { %13438 = vmatprep.subr.bf16.mxu1 %v13437_v14  ;;  %v13477_v12 = vpack.c.bf16 %v10008_v11, %v10007_v10  ;;  %v9992_v14 = vld [vmem:[%s18126_s29 + $0x538] sm:$0xff]  ;;  %v10104_v10 = vld [vmem:[%s18126_s29 + $0x6b0] sm:$0xff] }
  0x70   :  { %v13479_v15 = vpack.c.bf16 %v9992_v14, %v9991_v13  ;;  %v10105_v11 = vld [vmem:[%s18126_s29 + $0x6b8] sm:$0xff]  ;;  %v10088_v14 = vld [vmem:[%s18126_s29 + $0x630] sm:$0xff] }
  0x71   :  { %v13509_v13 = vpack.c.bf16 %v10105_v11, %v10104_v10  ;;  %v166_v10 = vld [vmem:[%s18128_s27 + $0x18] sm:$0xff] }
  0x72   :  { %13440 = vmatpush3.bf16.msra.mxu1 %v13439_v17  ;;  %v10010_v17 = vld [vmem:[%s18126_s29 + $0x5c8] sm:$0xff] }
  0x73   :  { %13442 = vmatprep.subr.bf16.mxu1 %v13441_v20  ;;  %v13481_v18 = vpack.c.bf16 %v10010_v17, %v10009_v16  ;;  %v9994_v20 = vld [vmem:[%s18126_s29 + $0x548] sm:$0xff]  ;;  %v9606_v16 = vld [vmem:[%s18128_s27 + $0x150] sm:$0xff] }
  0x74   :  { %v13483_v21 = vpack.c.bf16 %v9994_v20, %v9993_v19  ;;  %v10107_v19 = vld [vmem:[%s18126_s29 + $0x6c8] sm:$0xff]  ;;  %v9607_v20 = vld [vmem:[%s18128_s27 + $0x158] sm:$0xff] }
  0x76   :  { %13444 = vmatpush3.bf16.msra.mxu1 %v13443_v23  ;;  %v10012_v23 = vld [vmem:[%s18126_s29 + $0x5d8] sm:$0xff] }
  0x77   :  { %13446 = vmatprep.subr.bf16.mxu1 %v13445_v27  ;;  %v13485_v24 = vpack.c.bf16 %v10012_v23, %v10011_v22  ;;  %v9996_v27 = vld [vmem:[%s18126_s29 + $0x558] sm:$0xff]  ;;  %v10090_v22 = vld [vmem:[%s18126_s29 + $0x640] sm:$0xff]  ;;  %v10091_v23 = vld [vmem:[%s18126_s29 + $0x648] sm:$0xff] }
  0x78   :  { %v13487_v28 = vpack.c.bf16 %v9996_v27, %v9995_v26  ;;  %v13515_v26 = vpack.c.bf16 %v10091_v23, %v10090_v22  ;;  %v10108_v27 = vld [vmem:[%s18126_s29 + $0x6d0] sm:$0xff] }
  0x79   :  { %v169_v22 = vld [vmem:[%s18128_s27 + $0x30] sm:$0xff] }
  0x7a   :  { %13448 = vmatpush3.bf16.msra.mxu1 %v13447_v31  ;;  %v10014_v31 = vld [vmem:[%s18126_s29 + $0x5e8] sm:$0xff] }
  0x7b   :  { %13450 = vmatprep.subr.bf16.mxu1 %v13449_v34  ;;  %v13489_v32 = vpack.c.bf16 %v10014_v31, %v10013_v29  ;;  %v9998_v34 = vld [vmem:[%s18126_s29 + $0x568] sm:$0xff] }
  0x7c   :  { %v13491_v35 = vpack.c.bf16 %v9998_v34, %v9997_v33  ;;  %v9609_v29 = vld [vmem:[%s18128_s27 + $0x168] sm:$0xff]  ;;  %v10093_v33 = vld [vmem:[%s18126_s29 + $0x658] sm:$0xff]  ;;  %v9610_v34 = vld [vmem:[%s18128_s27 + $0x170] sm:$0xff] }
  0x7e   :  { %13452 = vmatpush3.bf16.msra.mxu1 %v13451_v37  ;;  %v10016_v37 = vld [vmem:[%s18126_s29 + $0x5f8] sm:$0xff] }
  0x7f   :  { %13454 = vmatprep.subr.bf16.mxu1 %v13453_v40  ;;  %v13493_v38 = vpack.c.bf16 %v10016_v37, %v10015_v36  ;;  %v10000_v40 = vld [vmem:[%s18126_s29 + $0x578] sm:$0xff]  ;;  %v10110_v36 = vld [vmem:[%s18126_s29 + $0x6e0] sm:$0xff]  ;;  %v10111_v37 = vld [vmem:[%s18126_s29 + $0x6e8] sm:$0xff] }
  0x80   :  { %v13495_v41 = vpack.c.bf16 %v10000_v40, %v9999_v39  ;;  %v13521_v39 = vpack.c.bf16 %v10111_v37, %v10110_v36  ;;  %v10094_v40 = vld [vmem:[%s18126_s29 + $0x660] sm:$0xff]  ;;  %v172_v36 = vld [vmem:[%s18128_s27 + $0x48] sm:$0xff] }
  0x82   :  { %13456 = vmatpush3.bf16.msra.mxu1 %v13455_v43 }
  0x83   :  { %13458 = vmatprep.subr.bf16.mxu1 %v13457_v46  ;;  %v9598_v46 = vld [vmem:[%s18128_s27 + $0x110] sm:$0xff] }
  0x86   :  { %13460 = vmatpush3.bf16.msra.mxu1 %v13459_v49  ;;  %v9599_v49 = vld [vmem:[%s18128_s27 + $0x118] sm:$0xff] }
  0x87   :  { %13462 = vmatprep.subr.bf16.mxu1 %v13461_v52  ;;  %v10083_v52 = vld [vmem:[%s18126_s29 + $0x608] sm:$0xff] }
  0x88   :  { %v13499_v54 = vpack.c.bf16 %v10083_v52, %v10082_v51  ;;  %v10096_v51 = vld [vmem:[%s18126_s29 + $0x670] sm:$0xff]  ;;  %v10097_v52 = vld [vmem:[%s18126_s29 + $0x678] sm:$0xff] }
  0x8a   :  { %13464 = vmatpush3.bf16.msra.mxu1 %v13463_v55  ;;  %v10100_v55 = vld [vmem:[%s18126_s29 + $0x690] sm:$0xff] }
  0x8b   :  { %13466 = vmatprep.subr.bf16.mxu1 %v13465_v58  ;;  %v13501_v59 = vpack.c.bf16 %v10101_v56, %v10100_v55  ;;  %v9615_v55 = vld [vmem:[%s18128_s27 + $0x198] sm:$0xff]  ;;  %v9616_v56 = vld [vmem:[%s18128_s27 + $0x1a0] sm:$0xff] }
  0x8d   :  { %2063 = vmatmul.mubr.f32.vlgmr.msra.gmra.mrb[6].mxu1 %v14681_v30 }
  0x8e   :  { %2554 = vmatprep.mubr.f32.mxu1 %v14536_v25  ;;  %13468 = vmatpush3.bf16.msra.mxu1 %v13467_v61  ;;  %v10085_v61 = vld [vmem:[%s18126_s29 + $0x618] sm:$0xff] }
  0x8f   :  { %13470 = vmatprep.subr.bf16.mxu1 %v13469_v0  ;;  %v13503_v0 = vpack.c.bf16 %v10085_v61, %v10084_v60  ;;  %v9622_v60 = vld [vmem:[%s18128_s27 + $0x1d0] sm:$0xff]  ;;  %v9623_v61 = vld [vmem:[%s18128_s27 + $0x1d8] sm:$0xff] }
  0x92   :  { %13472 = vmatpush3.bf16.msra.mxu1 %v13471_v3  ;;  %v10103_v3 = vld [vmem:[%s18126_s29 + $0x6a8] sm:$0xff] }
  0x93   :  { %13474 = vmatprep.subr.bf16.mxu1 %v13473_v6  ;;  %v13505_v5 = vpack.c.bf16 %v10103_v3, %v10102_v2  ;;  %v10086_v6 = vld [vmem:[%s18126_s29 + $0x620] sm:$0xff] }
  0x94   :  { %v163_v2 = vld [vmem:[%s18128_s27] sm:$0xff] }
  0x96   :  { %13476 = vmatpush3.bf16.msra.mxu1 %v13475_v9  ;;  %v13507_v9 = vpack.c.bf16 %v10087_v7, %v10086_v6  ;;  %v164_v6 = vld [vmem:[%s18128_s27 + $0x8] sm:$0xff]  ;;  %v165_v7 = vld [vmem:[%s18128_s27 + $0x10] sm:$0xff] }
  0x97   :  { %13478 = vmatprep.subr.bf16.mxu1 %v13477_v12  ;;  %v9605_v12 = vld [vmem:[%s18128_s27 + $0x148] sm:$0xff] }
  0x9a   :  { %13480 = vmatpush3.bf16.msra.mxu1 %v13479_v15  ;;  %v10089_v15 = vld [vmem:[%s18126_s29 + $0x638] sm:$0xff] }
  0x9b   :  { %13482 = vmatprep.subr.bf16.mxu1 %v13481_v18  ;;  %v13511_v17 = vpack.c.bf16 %v10089_v15, %v10088_v14  ;;  %v10106_v18 = vld [vmem:[%s18126_s29 + $0x6c0] sm:$0xff] }
  0x9c   :  { %v167_v14 = vld [vmem:[%s18128_s27 + $0x20] sm:$0xff] }
  0x9e   :  { %13484 = vmatpush3.bf16.msra.mxu1 %v13483_v21  ;;  %v13513_v21 = vpack.c.bf16 %v10107_v19, %v10106_v18  ;;  %v168_v18 = vld [vmem:[%s18128_s27 + $0x28] sm:$0xff] }
  0x9f   :  { %13486 = vmatprep.subr.bf16.mxu1 %v13485_v24  ;;  %v9608_v24 = vld [vmem:[%s18128_s27 + $0x160] sm:$0xff] }
  0xa2   :  { %13488 = vmatpush3.bf16.msra.mxu1 %v13487_v28  ;;  %v10109_v28 = vld [vmem:[%s18126_s29 + $0x6d8] sm:$0xff] }
  0xa3   :  { %13490 = vmatprep.subr.bf16.mxu1 %v13489_v32  ;;  %v13517_v31 = vpack.c.bf16 %v10109_v28, %v10108_v27  ;;  %v10092_v32 = vld [vmem:[%s18126_s29 + $0x650] sm:$0xff]  ;;  %v170_v27 = vld [vmem:[%s18128_s27 + $0x38] sm:$0xff] }
  0xa6   :  { %13492 = vmatpush3.bf16.msra.mxu1 %v13491_v35  ;;  %v13519_v35 = vpack.c.bf16 %v10093_v33, %v10092_v32  ;;  %v171_v32 = vld [vmem:[%s18128_s27 + $0x40] sm:$0xff] }
  0xa7   :  { %13494 = vmatprep.subr.bf16.mxu1 %v13493_v38  ;;  %v9611_v38 = vld [vmem:[%s18128_s27 + $0x178] sm:$0xff] }
  0xaa   :  { %13496 = vmatpush3.bf16.msra.mxu1 %v13495_v41  ;;  %v10095_v41 = vld [vmem:[%s18126_s29 + $0x668] sm:$0xff] }
  0xab   :  { %13498 = vmatprep.subr.bf16.mxu1 %v13497_v50  ;;  %v13525_v50 = vpack.c.bf16 %v10113_v48, %v10112_v47  ;;  %v10188_v47 = vld [vmem:[%s18126_s29 + $0x748] sm:$0xff]  ;;  %v175_v48 = vld [vmem:[%s18128_s27 + $0x60] sm:$0xff] }
  0xad   :  { %2555 = vmatmul.mubr.f32.vlgmr.msra.gmra.mrb[8].mxu1 %v14681_v30 }
  0xae   :  { %3046 = vmatprep.mubr.f32.mxu1 %v14536_v25  ;;  %13500 = vmatpush3.bf16.msra.mxu1 %v13499_v54  ;;  %v13527_v54 = vpack.c.bf16 %v10097_v52, %v10096_v51  ;;  %v10206_v51 = vld [vmem:[%s18126_s29 + $0x7d8] sm:$0xff]  ;;  %v176_v52 = vld [vmem:[%s18128_s27 + $0x68] sm:$0xff] }
  0xaf   :  { %13502 = vmatprep.subr.bf16.mxu1 %v13501_v59  ;;  %v9621_v59 = vld [vmem:[%s18128_s27 + $0x1c8] sm:$0xff] }
  0xb2   :  { %13504 = vmatpush3.bf16.msra.mxu1 %v13503_v0  ;;  %v9626_v0 = vld [vmem:[%s18128_s27 + $0x1f0] sm:$0xff] }
  0xb3   :  { %13506 = vmatprep.subr.bf16.mxu1 %v13505_v5 }
  0xb6   :  { %13508 = vmatpush3.bf16.msra.mxu1 %v13507_v9  ;;  %v10196_v9 = vld [vmem:[%s18126_s29 + $0x788] sm:$0xff] }
  0xb7   :  { %13510 = vmatprep.subr.bf16.mxu1 %v13509_v13  ;;  %v10180_v13 = vld [vmem:[%s18126_s29 + $0x708] sm:$0xff] }
  0xba   :  { %13512 = vmatpush3.bf16.msra.mxu1 %v13511_v17  ;;  %v10198_v17 = vld [vmem:[%s18126_s29 + $0x798] sm:$0xff] }
  0xbb   :  { %13514 = vmatprep.subr.bf16.mxu1 %v13513_v21  ;;  %v10182_v21 = vld [vmem:[%s18126_s29 + $0x718] sm:$0xff] }
  0xbe   :  { %13516 = vmatpush3.bf16.msra.mxu1 %v13515_v26  ;;  %v10200_v26 = vld [vmem:[%s18126_s29 + $0x7a8] sm:$0xff] }
  0xbf   :  { %13518 = vmatprep.subr.bf16.mxu1 %v13517_v31  ;;  %v10184_v31 = vld [vmem:[%s18126_s29 + $0x728] sm:$0xff] }
  0xc2   :  { %13520 = vmatpush3.bf16.msra.mxu1 %v13519_v35  ;;  %v10202_v35 = vld [vmem:[%s18126_s29 + $0x7b8] sm:$0xff] }
  0xc3   :  { %13522 = vmatprep.subr.bf16.mxu1 %v13521_v39  ;;  %v10186_v39 = vld [vmem:[%s18126_s29 + $0x738] sm:$0xff] }
 0x100   :  { %v10860_v42 = vpop.f32.mrb[0].mxu1 }
 0x101   :  { %v10861_v43 = vpop.f32.mrb[1].mxu1 }
 0x102   :  { %v10862_v44 = vadd.f32 %v10861_v43, %v10860_v42  ;;  %v9612_v42 = vld [vmem:[%s18128_s27 + $0x180] sm:$0xff] }
 0x104   :  { %12163 = vmatprep.subr.msk.mxu0 %vm428_vm1, %v10862_v44 }
 0x105   :  { %12164 = vmatpush3.msk.msra.mxu0 %vm428_vm1, %v10862_v44  ;;  %v13523_v44 = vpack.c.bf16 %v10095_v41, %v10094_v40  ;;  %v173_v40 = vld [vmem:[%s18128_s27 + $0x50] sm:$0xff] }
 0x106   :  { %12166 = vmatmul.mubr.msk.f32.vlgmr.msra.gmra.mrb[2].mxu0 %vm331_vm0, %v9597_v45 }
 0x107   :  { %12168 = vmatprep.mubr.msk.f32.mxu0 %vm331_vm0, %v9598_v46  ;;  %13524 = vmatpush3.bf16.msra.mxu1 %v13523_v44  ;;  %v174_v44 = vld [vmem:[%s18128_s27 + $0x58] sm:$0xff] }
 0x108   :  { %13526 = vmatprep.subr.bf16.mxu1 %v13525_v50  ;;  %v10205_v50 = vld [vmem:[%s18126_s29 + $0x7d0] sm:$0xff] }
 0x109   :  { %v10825_v58 = vpop.f32.mrb[0].mxu0 }
 0x10a   :  { %12169 = vmatmul.mubr.msk.f32.gmra.mrb[4].mxu0 %vm331_vm0, %v9599_v49  ;;  %v10826_v63 = vpop.f32.mrb[1].mxu0  ;;  %v9613_v49 = vld [vmem:[%s18128_s27 + $0x188] sm:$0xff] }
 0x10b   :  { %12171 = vmatprep.mubr.msk.f32.mxu0 %vm331_vm0, %v9600_v53  ;;  %v10827_v1 = vadd.f32 %v10826_v63, %v10825_v58  ;;  %v9614_v53 = vld [vmem:[%s18128_s27 + $0x190] sm:$0xff]  ;;  %13528 = vmatpush3.bf16.msra.mxu1 %v13527_v54  ;;  %v9625_v63 = vld [vmem:[%s18128_s27 + $0x1e8] sm:$0xff] }
 0x10c   :  { %v9618_v58 = vld [vmem:[%s18128_s27 + $0x1b0] sm:$0xff] }
 0x10d   :  { %12213 = vmatprep.subr.msk.mxu0 %vm428_vm1, %v10827_v1  ;;  %v10189_v54 = vld [vmem:[%s18126_s29 + $0x750] sm:$0xff] }
 0x10e   :  { %12172 = vmatmul.mubr.msk.f32.gmra.mrb[6].mxu0 %vm331_vm0, %v9601_v57  ;;  %3047 = vmatmul.mubr.f32.vlgmr.msra.gmra.mrb[10].mxu1 %v14681_v30  ;;  %v9617_v57 = vld [vmem:[%s18128_s27 + $0x1a8] sm:$0xff]  ;;  %v9619_v30 = vld [vmem:[%s18128_s27 + $0x1b8] sm:$0xff] }
 0x10f   :  { %12174 = vmatprep.mubr.msk.f32.mxu0 %vm331_vm0, %v9602_v62  ;;  %12214 = vmatpush3.msk.msra.mxu0 %vm428_vm1, %v10827_v1  ;;  %v9624_v62 = vld [vmem:[%s18128_s27 + $0x1e0] sm:$0xff]  ;;  %v9627_v1 = vld [vmem:[%s18128_s27 + $0x1f8] sm:$0xff] }
 0x110   :  { %3538 = vmatprep.mubr.f32.mxu1 %v14536_v25  ;;  %v9620_v25 = vld [vmem:[%s18128_s27 + $0x1c0] sm:$0xff] }
 0x112   :  { %12175 = vmatmul.mubr.msk.f32.gmra.mrb[8].mxu0 %vm331_vm0, %v9603_v4 }
 0x113   :  { %12177 = vmatprep.mubr.msk.f32.mxu0 %vm331_vm0, %v9604_v8  ;;  %v10195_v8 = vld [vmem:[%s18126_s29 + $0x780] sm:$0xff] }
 0x114   :  { %v13529_v11 = vpack.c.bf16 %v10196_v9, %v10195_v8  ;;  %v182_v9 = vld [vmem:[%s18128_s27 + $0x98] sm:$0xff] }
 0x116   :  { %12178 = vmatmul.mubr.msk.f32.gmra.mrb[10].mxu0 %vm331_vm0, %v9605_v12  ;;  %v10179_v12 = vld [vmem:[%s18126_s29 + $0x700] sm:$0xff]  ;;  %13530 = vmatprep.subr.bf16.mxu1 %v13529_v11 }
 0x117   :  { %12180 = vmatprep.mubr.msk.f32.mxu0 %vm331_vm0, %v9606_v16  ;;  %v13531_v15 = vpack.c.bf16 %v10180_v13, %v10179_v12  ;;  %v10197_v16 = vld [vmem:[%s18126_s29 + $0x790] sm:$0xff]  ;;  %v15495_v11 = vld [vmem:[%s18127_s23] sm:$0x3f]  ;;  %v14367_v12 = vld [vmem:[%s18127_s23 + $0x8] sm:$0x3f] }
 0x118   :  { %v13533_v19 = vpack.c.bf16 %v10198_v17, %v10197_v16  ;;  %v184_v13 = vld [vmem:[%s18128_s27 + $0xa8] sm:$0xff]  ;;  %v187_v16 = vld [vmem:[%s18128_s27 + $0xc0] sm:$0xff] }
 0x119   :  { %13532 = vmatpush3.bf16.msra.mxu1 %v13531_v15  ;;  %v186_v15 = vld [vmem:[%s18128_s27 + $0xb8] sm:$0xff]  ;;  %v188_v17 = vld [vmem:[%s18128_s27 + $0xc8] sm:$0xff] }
 0x11a   :  { %12181 = vmatmul.mubr.msk.f32.gmra.mrb[12].mxu0 %vm331_vm0, %v9607_v20  ;;  %v10181_v20 = vld [vmem:[%s18126_s29 + $0x710] sm:$0xff]  ;;  %13534 = vmatprep.subr.bf16.mxu1 %v13533_v19  ;;  %v190_v19 = vld [vmem:[%s18128_s27 + $0xd8] sm:$0xff] }
 0x11b   :  { %12183 = vmatprep.mubr.msk.f32.mxu0 %vm331_vm0, %v9608_v24  ;;  %v13535_v23 = vpack.c.bf16 %v10182_v21, %v10181_v20  ;;  %v10199_v24 = vld [vmem:[%s18126_s29 + $0x7a0] sm:$0xff]  ;;  %v192_v21 = vld [vmem:[%s18128_s27 + $0xe8] sm:$0xff] }
 0x11c   :  { %v13537_v28 = vpack.c.bf16 %v10200_v26, %v10199_v24  ;;  %v191_v20 = vld [vmem:[%s18128_s27 + $0xe0] sm:$0xff] }
 0x11d   :  { %13536 = vmatpush3.bf16.msra.mxu1 %v13535_v23 }
 0x11e   :  { %12184 = vmatmul.mubr.msk.f32.gmra.mrb[14].mxu0 %vm331_vm0, %v9609_v29  ;;  %v10183_v29 = vld [vmem:[%s18126_s29 + $0x720] sm:$0xff]  ;;  %13538 = vmatprep.subr.bf16.mxu1 %v13537_v28 }
 0x11f   :  { %12186 = vmatprep.mubr.msk.f32.mxu0 %vm331_vm0, %v9610_v34  ;;  %v13539_v33 = vpack.c.bf16 %v10184_v31, %v10183_v29  ;;  %v10201_v34 = vld [vmem:[%s18126_s29 + $0x7b0] sm:$0xff]  ;;  %v9726_v28 = vld [vmem:[%s18128_s27 + $0x200] sm:$0xff]  ;;  %v9727_v29 = vld [vmem:[%s18128_s27 + $0x208] sm:$0xff] }
 0x120   :  { %v10961_v43 = vpop.f32.mrb[2].mxu1  ;;  %v13541_v37 = vpack.c.bf16 %v10202_v35, %v10201_v34  ;;  %v9728_v31 = vld [vmem:[%s18128_s27 + $0x210] sm:$0xff]  ;;  %v9729_v34 = vld [vmem:[%s18128_s27 + $0x218] sm:$0xff] }
 0x121   :  { %v10962_v45 = vpop.f32.mrb[3].mxu1  ;;  %13540 = vmatpush3.bf16.msra.mxu1 %v13539_v33  ;;  %v10293_v33 = vld [vmem:[%s18126_s29 + $0x888] sm:$0xff] }
 0x122   :  { %12187 = vmatmul.mubr.msk.f32.gmra.mrb[16].mxu0 %vm331_vm0, %v9611_v38  ;;  %v10963_v46 = vadd.f32 %v10962_v45, %v10961_v43  ;;  %v10185_v38 = vld [vmem:[%s18126_s29 + $0x730] sm:$0xff]  ;;  %13542 = vmatprep.subr.bf16.mxu1 %v13541_v37  ;;  %v10204_v43 = vld [vmem:[%s18126_s29 + $0x7c8] sm:$0xff] }
 0x123   :  { %12189 = vmatprep.mubr.msk.f32.mxu0 %vm331_vm0, %v9612_v42  ;;  %v13543_v41 = vpack.c.bf16 %v10186_v39, %v10185_v38  ;;  %v10203_v42 = vld [vmem:[%s18126_s29 + $0x7c0] sm:$0xff]  ;;  %v10277_v37 = vld [vmem:[%s18126_s29 + $0x808] sm:$0xff] }
 0x124   :  { %12263 = vmatprep.subr.msk.mxu0 %vm428_vm1, %v10963_v46  ;;  %v13545_v45 = vpack.c.bf16 %v10204_v43, %v10203_v42  ;;  %v9730_v38 = vld [vmem:[%s18128_s27 + $0x220] sm:$0xff]  ;;  %v10278_v43 = vld [vmem:[%s18126_s29 + $0x810] sm:$0xff] }
 0x125   :  { %13544 = vmatpush3.bf16.msra.mxu1 %v13543_v41  ;;  %v9731_v41 = vld [vmem:[%s18128_s27 + $0x228] sm:$0xff] }
 0x126   :  { %12190 = vmatmul.mubr.msk.f32.gmra.mrb[18].mxu0 %vm331_vm0, %v9613_v49  ;;  %13546 = vmatprep.subr.bf16.mxu1 %v13545_v45  ;;  %v9732_v45 = vld [vmem:[%s18128_s27 + $0x230] sm:$0xff] }
 0x127   :  { %12192 = vmatprep.mubr.msk.f32.mxu0 %vm331_vm0, %v9614_v53  ;;  %v13549_v53 = vpack.c.bf16 %v10206_v51, %v10205_v50  ;;  %v10280_v51 = vld [vmem:[%s18126_s29 + $0x820] sm:$0xff] }
 0x12a   :  { %12193 = vmatmul.mubr.msk.f32.gmra.mrb[20].mxu0 %vm331_vm0, %v9615_v55  ;;  %v10190_v55 = vld [vmem:[%s18126_s29 + $0x758] sm:$0xff] }
 0x12b   :  { %12195 = vmatprep.mubr.msk.f32.mxu0 %vm331_vm0, %v9616_v56  ;;  %v177_v56 = vld [vmem:[%s18128_s27 + $0x70] sm:$0xff] }
 0x12e   :  { %12196 = vmatmul.mubr.msk.f32.gmra.mrb[22].mxu0 %vm331_vm0, %v9617_v57  ;;  %v13551_v57 = vpack.c.bf16 %v10190_v55, %v10189_v54  ;;  %v10298_v55 = vld [vmem:[%s18126_s29 + $0x8b0] sm:$0xff] }
 0x12f   :  { %12198 = vmatprep.mubr.msk.f32.mxu0 %vm331_vm0, %v9618_v58  ;;  %v10207_v58 = vld [vmem:[%s18126_s29 + $0x7e0] sm:$0xff] }
 0x132   :  { %12199 = vmatmul.mubr.msk.f32.gmra.mrb[24].mxu0 %vm331_vm0, %v9619_v30  ;;  %v10208_v30 = vld [vmem:[%s18126_s29 + $0x7e8] sm:$0xff] }
 0x133   :  { %12201 = vmatprep.mubr.msk.f32.mxu0 %vm331_vm0, %v9620_v25  ;;  %v178_v25 = vld [vmem:[%s18128_s27 + $0x78] sm:$0xff] }
 0x136   :  { %12202 = vmatmul.mubr.msk.f32.gmra.mrb[26].mxu0 %vm331_vm0, %v9621_v59  ;;  %v13553_v59 = vpack.c.bf16 %v10208_v30, %v10207_v58  ;;  %v10282_v30 = vld [vmem:[%s18126_s29 + $0x830] sm:$0xff] }
 0x137   :  { %12204 = vmatprep.mubr.msk.f32.mxu0 %vm331_vm0, %v9622_v60  ;;  %v10191_v60 = vld [vmem:[%s18126_s29 + $0x760] sm:$0xff] }
 0x13a   :  { %12205 = vmatmul.mubr.msk.f32.gmra.mrb[28].mxu0 %vm331_vm0, %v9623_v61  ;;  %v10192_v61 = vld [vmem:[%s18126_s29 + $0x768] sm:$0xff] }
 0x13b   :  { %12207 = vmatprep.mubr.msk.f32.mxu0 %vm331_vm0, %v9624_v62  ;;  %v179_v62 = vld [vmem:[%s18128_s27 + $0x80] sm:$0xff] }
 0x13e   :  { %12208 = vmatmul.mubr.msk.f32.gmra.mrb[30].mxu0 %vm331_vm0, %v9625_v63  ;;  %v13555_v63 = vpack.c.bf16 %v10192_v61, %v10191_v60  ;;  %v10300_v61 = vld [vmem:[%s18126_s29 + $0x8c0] sm:$0xff] }
 0x13f   :  { %12210 = vmatprep.mubr.msk.f32.mxu0 %vm331_vm0, %v9626_v0  ;;  %v10209_v0 = vld [vmem:[%s18126_s29 + $0x7f0] sm:$0xff] }
 0x140   :  { %v11029_v3 = vpop.f32.mrb[4].mxu1 }
 0x141   :  { %v11030_v4 = vpop.f32.mrb[5].mxu1 }
 0x142   :  { %12211 = vmatmul.mubr.msk.f32.gmra.mrb[32].mxu0 %vm331_vm0, %v9627_v1  ;;  %v15312_v5 = vadd.f32 %v11030_v4, %v11029_v3  ;;  %v10210_v1 = vld [vmem:[%s18126_s29 + $0x7f8] sm:$0xff]  ;;  %v10193_v4 = vld [vmem:[%s18126_s29 + $0x770] sm:$0xff] }
 0x143   :  { %12215 = vmatprep.mubr.msk.f32.mxu0 %vm331_vm0, %v163_v2  ;;  %v180_v2 = vld [vmem:[%s18128_s27 + $0x88] sm:$0xff]  ;;  %v13557_v3 = vpack.c.bf16 %v10210_v1, %v10209_v0  ;;  %v10284_v1 = vld [vmem:[%s18126_s29 + $0x840] sm:$0xff] }
 0x146   :  { %12216 = vmatmul.mubr.msk.f32.vlgmr.msra.gmra.mrb[2].mxu0 %vm331_vm0, %v164_v6  ;;  %v10194_v6 = vld [vmem:[%s18126_s29 + $0x778] sm:$0xff] }
 0x147   :  { %12218 = vmatprep.mubr.msk.f32.mxu0 %vm331_vm0, %v165_v7  ;;  %12264 = vmatpush3.msk.msra.mxu0 %vm428_vm1, %v10963_v46  ;;  %v10187_v46 = vld [vmem:[%s18126_s29 + $0x740] sm:$0xff]  ;;  %v181_v7 = vld [vmem:[%s18128_s27 + $0x90] sm:$0xff]  ;;  %v13559_v8 = vpack.c.bf16 %v10194_v6, %v10193_v4 }
 0x148   :  { %12313 = vmatprep.subr.msk.mxu0 %vm428_vm1, %v15312_v5  ;;  %v13547_v49 = vpack.c.bf16 %v10188_v47, %v10187_v46  ;;  %v10296_v47 = vld [vmem:[%s18126_s29 + $0x8a0] sm:$0xff]  ;;  %v10302_v6 = vld [vmem:[%s18126_s29 + $0x8d0] sm:$0xff] }
 0x14a   :  { %12219 = vmatmul.mubr.msk.f32.gmra.mrb[4].mxu0 %vm331_vm0, %v166_v10  ;;  %13548 = vmatpush3.bf16.msra.mxu1 %v13547_v49  ;;  %v183_v10 = vld [vmem:[%s18128_s27 + $0xa0] sm:$0xff]  ;;  %v9733_v49 = vld [vmem:[%s18128_s27 + $0x238] sm:$0xff] }
 0x14b   :  { %12221 = vmatprep.mubr.msk.f32.mxu0 %vm331_vm0, %v167_v14  ;;  %13550 = vmatprep.subr.bf16.mxu1 %v13549_v53  ;;  %v185_v14 = vld [vmem:[%s18128_s27 + $0xb0] sm:$0xff]  ;;  %v9734_v53 = vld [vmem:[%s18128_s27 + $0x240] sm:$0xff] }
 0x14e   :  { %12222 = vmatmul.mubr.msk.f32.gmra.mrb[6].mxu0 %vm331_vm0, %v168_v18  ;;  %13552 = vmatpush3.bf16.msra.mxu1 %v13551_v57  ;;  %v189_v18 = vld [vmem:[%s18128_s27 + $0xd0] sm:$0xff]  ;;  %v9735_v57 = vld [vmem:[%s18128_s27 + $0x248] sm:$0xff] }
 0x14f   :  { %12224 = vmatprep.mubr.msk.f32.mxu0 %vm331_vm0, %v169_v22  ;;  %13554 = vmatprep.subr.bf16.mxu1 %v13553_v59  ;;  %v193_v22 = vld [vmem:[%s18128_s27 + $0xf0] sm:$0xff] }
 0x150   :  { %v9736_v59 = vld [vmem:[%s18128_s27 + $0x250] sm:$0xff] }
 0x152   :  { %12225 = vmatmul.mubr.msk.f32.gmra.mrb[8].mxu0 %vm331_vm0, %v170_v27  ;;  %13556 = vmatpush3.bf16.msra.mxu1 %v13555_v63  ;;  %v194_v27 = vld [vmem:[%s18128_s27 + $0xf8] sm:$0xff] }
 0x153   :  { %12227 = vmatprep.mubr.msk.f32.mxu0 %vm331_vm0, %v171_v32  ;;  %13558 = vmatprep.subr.bf16.mxu1 %v13557_v3  ;;  %v10292_v32 = vld [vmem:[%s18126_s29 + $0x880] sm:$0xff]  ;;  %v9737_v63 = vld [vmem:[%s18128_s27 + $0x258] sm:$0xff] }
 0x154   :  { %v13561_v35 = vpack.c.bf16 %v10293_v33, %v10292_v32  ;;  %v9738_v3 = vld [vmem:[%s18128_s27 + $0x260] sm:$0xff]  ;;  %v9744_v32 = vld [vmem:[%s18128_s27 + $0x290] sm:$0xff] }
 0x156   :  { %12228 = vmatmul.mubr.msk.f32.gmra.mrb[10].mxu0 %vm331_vm0, %v172_v36  ;;  %13560 = vmatpush3.bf16.msra.mxu1 %v13559_v8  ;;  %v10276_v36 = vld [vmem:[%s18126_s29 + $0x800] sm:$0xff]  ;;  %v9739_v8 = vld [vmem:[%s18128_s27 + $0x268] sm:$0xff] }
 0x157   :  { %12230 = vmatprep.mubr.msk.f32.mxu0 %vm331_vm0, %v173_v40  ;;  %v13563_v39 = vpack.c.bf16 %v10277_v37, %v10276_v36  ;;  %13562 = vmatprep.subr.bf16.mxu1 %v13561_v35  ;;  %v10295_v40 = vld [vmem:[%s18126_s29 + $0x898] sm:$0xff]  ;;  %v9746_v35 = vld [vmem:[%s18128_s27 + $0x2a0] sm:$0xff]  ;;  %v9747_v36 = vld [vmem:[%s18128_s27 + $0x2a8] sm:$0xff] }
 0x158   :  { %v9748_v37 = vld [vmem:[%s18128_s27 + $0x2b0] sm:$0xff] }
 0x159   :  { %3539 = vmatmul.mubr.f32.vlgmr.msra.gmra.mrb[12].mxu1 %v15495_v11 }
 0x15a   :  { %12231 = vmatmul.mubr.msk.f32.gmra.mrb[12].mxu0 %vm331_vm0, %v174_v44  ;;  %4030 = vmatprep.mubr.f32.mxu1 %v14367_v12  ;;  %v10279_v44 = vld [vmem:[%s18126_s29 + $0x818] sm:$0xff] }
 0x15b   :  { %12233 = vmatprep.mubr.msk.f32.mxu0 %vm331_vm0, %v175_v48  ;;  %13564 = vmatpush3.bf16.msra.mxu1 %v13563_v39  ;;  %v13567_v46 = vpack.c.bf16 %v10279_v44, %v10278_v43  ;;  %v10297_v48 = vld [vmem:[%s18126_s29 + $0x8a8] sm:$0xff]  ;;  %v10287_v12 = vld [vmem:[%s18126_s29 + $0x858] sm:$0xff]  ;;  %v9756_v43 = vld [vmem:[%s18128_s27 + $0x2f0] sm:$0xff] }
 0x15c   :  { %v13569_v50 = vpack.c.bf16 %v10297_v48, %v10296_v47  ;;  %v9751_v39 = vld [vmem:[%s18128_s27 + $0x2c8] sm:$0xff]  ;;  %v9757_v47 = vld [vmem:[%s18128_s27 + $0x2f8] sm:$0xff]  ;;  %v9823_v48 = vld [vmem:[%s18128_s27 + $0x300] sm:$0xff] }
 0x15e   :  { %12234 = vmatmul.mubr.msk.f32.gmra.mrb[14].mxu0 %vm331_vm0, %v176_v52  ;;  %v10281_v52 = vld [vmem:[%s18126_s29 + $0x828] sm:$0xff] }
 0x15f   :  { %12236 = vmatprep.mubr.msk.f32.mxu0 %vm331_vm0, %v177_v56  ;;  %v13571_v54 = vpack.c.bf16 %v10281_v52, %v10280_v51  ;;  %v10299_v56 = vld [vmem:[%s18126_s29 + $0x8b8] sm:$0xff]  ;;  %v9827_v52 = vld [vmem:[%s18128_s27 + $0x320] sm:$0xff] }
 0x160   :  { %v11097_v23 = vpop.f32.mrb[6].mxu1  ;;  %v13573_v58 = vpack.c.bf16 %v10299_v56, %v10298_v55  ;;  %v9826_v51 = vld [vmem:[%s18128_s27 + $0x318] sm:$0xff]  ;;  %v9831_v55 = vld [vmem:[%s18128_s27 + $0x340] sm:$0xff]  ;;  %v9832_v56 = vld [vmem:[%s18128_s27 + $0x348] sm:$0xff] }
 0x161   :  { %v11098_v24 = vpop.f32.mrb[7].mxu1 }
 0x162   :  { %12237 = vmatmul.mubr.msk.f32.gmra.mrb[16].mxu0 %vm331_vm0, %v178_v25  ;;  %v15542_v26 = vadd.f32 %v11098_v24, %v11097_v23  ;;  %v10283_v25 = vld [vmem:[%s18126_s29 + $0x838] sm:$0xff]  ;;  %v10306_v23 = vld [vmem:[%s18126_s29 + $0x8f0] sm:$0xff] }
 0x163   :  { %12239 = vmatprep.mubr.msk.f32.mxu0 %vm331_vm0, %v179_v62  ;;  %v13575_v60 = vpack.c.bf16 %v10283_v25, %v10282_v30  ;;  %v10301_v62 = vld [vmem:[%s18126_s29 + $0x8c8] sm:$0xff]  ;;  %v10307_v24 = vld [vmem:[%s18126_s29 + $0x8f8] sm:$0xff]  ;;  %v9835_v30 = vld [vmem:[%s18128_s27 + $0x360] sm:$0xff] }
 0x164   :  { %v13577_v0 = vpack.c.bf16 %v10301_v62, %v10300_v61  ;;  %v9836_v25 = vld [vmem:[%s18128_s27 + $0x368] sm:$0xff]  ;;  %v9839_v61 = vld [vmem:[%s18128_s27 + $0x380] sm:$0xff] }
 0x165   :  { %v9840_v62 = vld [vmem:[%s18128_s27 + $0x388] sm:$0xff] }
 0x166   :  { %12240 = vmatmul.mubr.msk.f32.gmra.mrb[18].mxu0 %vm331_vm0, %v180_v2  ;;  %v10285_v2 = vld [vmem:[%s18126_s29 + $0x848] sm:$0xff] }
 0x167   :  { %12242 = vmatprep.mubr.msk.f32.mxu0 %vm331_vm0, %v181_v7  ;;  %v13579_v4 = vpack.c.bf16 %v10285_v2, %v10284_v1  ;;  %v10303_v7 = vld [vmem:[%s18126_s29 + $0x8d8] sm:$0xff]  ;;  %v9843_v1 = vld [vmem:[%s18128_s27 + $0x3a0] sm:$0xff]  ;;  %v9844_v2 = vld [vmem:[%s18128_s27 + $0x3a8] sm:$0xff] }
 0x16a   :  { %12243 = vmatmul.mubr.msk.f32.gmra.mrb[20].mxu0 %vm331_vm0, %v182_v9  ;;  %v13581_v9 = vpack.c.bf16 %v10303_v7, %v10302_v6  ;;  %v9847_v6 = vld [vmem:[%s18128_s27 + $0x3c0] sm:$0xff]  ;;  %v9848_v7 = vld [vmem:[%s18128_s27 + $0x3c8] sm:$0xff] }
 0x16b   :  { %12245 = vmatprep.mubr.msk.f32.mxu0 %vm331_vm0, %v183_v10  ;;  %v10286_v10 = vld [vmem:[%s18126_s29 + $0x850] sm:$0xff] }
 0x16e   :  { %12246 = vmatmul.mubr.msk.f32.gmra.mrb[22].mxu0 %vm331_vm0, %v184_v13  ;;  %v9740_v13 = vld [vmem:[%s18128_s27 + $0x270] sm:$0xff] }
 0x16f   :  { %12248 = vmatprep.mubr.msk.f32.mxu0 %vm331_vm0, %v185_v14  ;;  %v13583_v14 = vpack.c.bf16 %v10287_v12, %v10286_v10  ;;  %v9851_v10 = vld [vmem:[%s18128_s27 + $0x3e0] sm:$0xff]  ;;  %v9852_v12 = vld [vmem:[%s18128_s27 + $0x3e8] sm:$0xff] }
 0x172   :  { %12249 = vmatmul.mubr.msk.f32.gmra.mrb[24].mxu0 %vm331_vm0, %v186_v15  ;;  %v10304_v15 = vld [vmem:[%s18126_s29 + $0x8e0] sm:$0xff] }
 0x173   :  { %12251 = vmatprep.mubr.msk.f32.mxu0 %vm331_vm0, %v187_v16  ;;  %v10305_v16 = vld [vmem:[%s18126_s29 + $0x8e8] sm:$0xff] }
 0x176   :  { %12252 = vmatmul.mubr.msk.f32.gmra.mrb[26].mxu0 %vm331_vm0, %v188_v17  ;;  %v9741_v17 = vld [vmem:[%s18128_s27 + $0x278] sm:$0xff] }
 0x177   :  { %12254 = vmatprep.mubr.msk.f32.mxu0 %vm331_vm0, %v189_v18  ;;  %v13585_v18 = vpack.c.bf16 %v10305_v16, %v10304_v15 }
 0x17a   :  { %12255 = vmatmul.mubr.msk.f32.gmra.mrb[28].mxu0 %vm331_vm0, %v190_v19  ;;  %v10288_v19 = vld [vmem:[%s18126_s29 + $0x860] sm:$0xff] }
 0x17b   :  { %12257 = vmatprep.mubr.msk.f32.mxu0 %vm331_vm0, %v191_v20  ;;  %v10289_v20 = vld [vmem:[%s18126_s29 + $0x868] sm:$0xff] }
 0x17e   :  { %12258 = vmatmul.mubr.msk.f32.gmra.mrb[30].mxu0 %vm331_vm0, %v192_v21  ;;  %v9742_v21 = vld [vmem:[%s18128_s27 + $0x280] sm:$0xff] }
 0x17f   :  { %12260 = vmatprep.mubr.msk.f32.mxu0 %vm331_vm0, %v193_v22  ;;  %v13587_v22 = vpack.c.bf16 %v10289_v20, %v10288_v19  ;;  %v9921_v19 = vld [vmem:[%s18128_s27 + $0x408] sm:$0xff]  ;;  %v9922_v20 = vld [vmem:[%s18128_s27 + $0x410] sm:$0xff] }
 0x180   :  { %v11165_v44 = vpop.f32.mrb[8].mxu1 }
 0x182   :  { %12261 = vmatmul.mubr.msk.f32.gmra.mrb[32].mxu0 %vm331_vm0, %v194_v27  ;;  %v9743_v27 = vld [vmem:[%s18128_s27 + $0x288] sm:$0xff] }
 0x183   :  { %12265 = vmatprep.mubr.msk.f32.mxu0 %vm331_vm0, %v9726_v28  ;;  %v13589_v28 = vpack.c.bf16 %v10307_v24, %v10306_v23  ;;  %v9925_v23 = vld [vmem:[%s18128_s27 + $0x428] sm:$0xff]  ;;  %v9926_v24 = vld [vmem:[%s18128_s27 + $0x430] sm:$0xff] }
 0x186   :  { %12266 = vmatmul.mubr.msk.f32.vlgmr.msra.gmra.mrb[2].mxu0 %vm331_vm0, %v9727_v29  ;;  %v10290_v29 = vld [vmem:[%s18126_s29 + $0x870] sm:$0xff] }
 0x187   :  { %12268 = vmatprep.mubr.msk.f32.mxu0 %vm331_vm0, %v9728_v31  ;;  %12314 = vmatpush3.msk.msra.mxu0 %vm428_vm1, %v15312_v5  ;;  %v10294_v5 = vld [vmem:[%s18126_s29 + $0x890] sm:$0xff]  ;;  %v10291_v31 = vld [vmem:[%s18126_s29 + $0x878] sm:$0xff] }
 0x188   :  { %12363 = vmatprep.subr.msk.mxu0 %vm428_vm1, %v15542_v26  ;;  %v13565_v42 = vpack.c.bf16 %v10295_v40, %v10294_v5  ;;  %v13591_v33 = vpack.c.bf16 %v10291_v31, %v10290_v29  ;;  %v9752_v5 = vld [vmem:[%s18128_s27 + $0x2d0] sm:$0xff]  ;;  %v9753_v40 = vld [vmem:[%s18128_s27 + $0x2d8] sm:$0xff]  ;;  %v9929_v29 = vld [vmem:[%s18128_s27 + $0x448] sm:$0xff] }
 0x189   :  { %v9930_v31 = vld [vmem:[%s18128_s27 + $0x450] sm:$0xff] }
 0x18a   :  { %12269 = vmatmul.mubr.msk.f32.gmra.mrb[4].mxu0 %vm331_vm0, %v9729_v34  ;;  %13566 = vmatprep.subr.bf16.mxu1 %v13565_v42  ;;  %v9745_v34 = vld [vmem:[%s18128_s27 + $0x298] sm:$0xff]  ;;  %v9755_v42 = vld [vmem:[%s18128_s27 + $0x2e8] sm:$0xff] }
 0x18b   :  { %12271 = vmatprep.mubr.msk.f32.mxu0 %vm331_vm0, %v9730_v38  ;;  %13568 = vmatpush3.bf16.msra.mxu1 %v13567_v46  ;;  %v9750_v38 = vld [vmem:[%s18128_s27 + $0x2c0] sm:$0xff] }
 0x18c   :  { %13570 = vmatprep.subr.bf16.mxu1 %v13569_v50  ;;  %v9825_v50 = vld [vmem:[%s18128_s27 + $0x310] sm:$0xff] }
 0x18e   :  { %12272 = vmatmul.mubr.msk.f32.gmra.mrb[6].mxu0 %vm331_vm0, %v9731_v41  ;;  %v9754_v41 = vld [vmem:[%s18128_s27 + $0x2e0] sm:$0xff] }
 0x18f   :  { %12274 = vmatprep.mubr.msk.f32.mxu0 %vm331_vm0, %v9732_v45  ;;  %13572 = vmatpush3.bf16.msra.mxu1 %v13571_v54  ;;  %v11166_v45 = vpop.f32.mrb[9].mxu1  ;;  %v9829_v54 = vld [vmem:[%s18128_s27 + $0x330] sm:$0xff] }
 0x190   :  { %13574 = vmatprep.subr.bf16.mxu1 %v13573_v58  ;;  %v15773_v46 = vadd.f32 %v11166_v45, %v11165_v44  ;;  %v9834_v58 = vld [vmem:[%s18128_s27 + $0x358] sm:$0xff]  ;;  %v9945_v44 = vld [vmem:[%s18128_s27 + $0x4c8] sm:$0xff]  ;;  %v9946_v45 = vld [vmem:[%s18128_s27 + $0x4d0] sm:$0xff] }
 0x192   :  { %12275 = vmatmul.mubr.msk.f32.gmra.mrb[8].mxu0 %vm331_vm0, %v9733_v49  ;;  %v9824_v49 = vld [vmem:[%s18128_s27 + $0x308] sm:$0xff] }
 0x193   :  { %12277 = vmatprep.mubr.msk.f32.mxu0 %vm331_vm0, %v9734_v53  ;;  %13576 = vmatpush3.bf16.msra.mxu1 %v13575_v60  ;;  %v9828_v53 = vld [vmem:[%s18128_s27 + $0x328] sm:$0xff]  ;;  %v9838_v60 = vld [vmem:[%s18128_s27 + $0x378] sm:$0xff] }
 0x194   :  { %13578 = vmatprep.subr.bf16.mxu1 %v13577_v0  ;;  %v9842_v0 = vld [vmem:[%s18128_s27 + $0x398] sm:$0xff] }
 0x196   :  { %12278 = vmatmul.mubr.msk.f32.gmra.mrb[10].mxu0 %vm331_vm0, %v9735_v57  ;;  %v9833_v57 = vld [vmem:[%s18128_s27 + $0x350] sm:$0xff] }
 0x197   :  { %12280 = vmatprep.mubr.msk.f32.mxu0 %vm331_vm0, %v9736_v59  ;;  %13580 = vmatpush3.bf16.msra.mxu1 %v13579_v4  ;;  %v9837_v59 = vld [vmem:[%s18128_s27 + $0x370] sm:$0xff]  ;;  %v9846_v4 = vld [vmem:[%s18128_s27 + $0x3b8] sm:$0xff] }
 0x198   :  { %13582 = vmatprep.subr.bf16.mxu1 %v13581_v9  ;;  %v9850_v9 = vld [vmem:[%s18128_s27 + $0x3d8] sm:$0xff] }
 0x19a   :  { %12281 = vmatmul.mubr.msk.f32.gmra.mrb[12].mxu0 %vm331_vm0, %v9737_v63  ;;  %v9841_v63 = vld [vmem:[%s18128_s27 + $0x390] sm:$0xff] }
 0x19b   :  { %12283 = vmatprep.mubr.msk.f32.mxu0 %vm331_vm0, %v9738_v3  ;;  %13584 = vmatpush3.bf16.msra.mxu1 %v13583_v14  ;;  %v9845_v3 = vld [vmem:[%s18128_s27 + $0x3b0] sm:$0xff] }
 0x19c   :  { %13586 = vmatprep.subr.bf16.mxu1 %v13585_v18  ;;  %v9920_v18 = vld [vmem:[%s18128_s27 + $0x400] sm:$0xff] }
 0x19e   :  { %12284 = vmatmul.mubr.msk.f32.gmra.mrb[14].mxu0 %vm331_vm0, %v9739_v8  ;;  %v9849_v8 = vld [vmem:[%s18128_s27 + $0x3d0] sm:$0xff] }
 0x19f   :  { %12286 = vmatprep.mubr.msk.f32.mxu0 %vm331_vm0, %v9740_v13  ;;  %13588 = vmatpush3.bf16.msra.mxu1 %v13587_v22  ;;  %v9853_v13 = vld [vmem:[%s18128_s27 + $0x3f0] sm:$0xff]  ;;  %v9924_v22 = vld [vmem:[%s18128_s27 + $0x420] sm:$0xff] }
 0x1a0   :  { %13590 = vmatprep.subr.bf16.mxu1 %v13589_v28  ;;  %v9928_v28 = vld [vmem:[%s18128_s27 + $0x440] sm:$0xff] }
 0x1a2   :  { %12287 = vmatmul.mubr.msk.f32.gmra.mrb[16].mxu0 %vm331_vm0, %v9741_v17  ;;  %v9854_v17 = vld [vmem:[%s18128_s27 + $0x3f8] sm:$0xff] }
 0x1a3   :  { %12289 = vmatprep.mubr.msk.f32.mxu0 %vm331_vm0, %v9742_v21  ;;  %13592 = vmatpush3.bf16.msra.mxu1 %v13591_v33  ;;  %v9923_v21 = vld [vmem:[%s18128_s27 + $0x418] sm:$0xff]  ;;  %v9932_v33 = vld [vmem:[%s18128_s27 + $0x460] sm:$0xff] }
 0x1a6   :  { %12290 = vmatmul.mubr.msk.f32.gmra.mrb[18].mxu0 %vm331_vm0, %v9743_v27  ;;  %4031 = vmatmul.mubr.f32.vlgmr.msra.gmra.mrb[14].mxu1 %v15495_v11  ;;  %v9749_v11 = vld [vmem:[%s18128_s27 + $0x2b8] sm:$0xff] }
 0x1a7   :  { %12292 = vmatprep.mubr.msk.f32.mxu0 %vm331_vm0, %v9744_v32  ;;  %v9927_v27 = vld [vmem:[%s18128_s27 + $0x438] sm:$0xff] }
 0x1a8   :  { %v9931_v32 = vld [vmem:[%s18128_s27 + $0x458] sm:$0xff] }
 0x1aa   :  { %12293 = vmatmul.mubr.msk.f32.gmra.mrb[20].mxu0 %vm331_vm0, %v9745_v34  ;;  %v9933_v34 = vld [vmem:[%s18128_s27 + $0x468] sm:$0xff] }
 0x1ab   :  { %12295 = vmatprep.mubr.msk.f32.mxu0 %vm331_vm0, %v9746_v35  ;;  %v9934_v35 = vld [vmem:[%s18128_s27 + $0x470] sm:$0xff] }
 0x1ae   :  { %12296 = vmatmul.mubr.msk.f32.gmra.mrb[22].mxu0 %vm331_vm0, %v9747_v36  ;;  %v9935_v36 = vld [vmem:[%s18128_s27 + $0x478] sm:$0xff] }
 0x1af   :  { %12298 = vmatprep.mubr.msk.f32.mxu0 %vm331_vm0, %v9748_v37  ;;  %v9936_v37 = vld [vmem:[%s18128_s27 + $0x480] sm:$0xff] }
 0x1b2   :  { %12299 = vmatmul.mubr.msk.f32.gmra.mrb[24].mxu0 %vm331_vm0, %v9749_v11  ;;  %v9937_v11 = vld [vmem:[%s18128_s27 + $0x488] sm:$0xff] }
 0x1b3   :  { %12301 = vmatprep.mubr.msk.f32.mxu0 %vm331_vm0, %v9750_v38  ;;  %v9938_v38 = vld [vmem:[%s18128_s27 + $0x490] sm:$0xff] }
 0x1b6   :  { %12302 = vmatmul.mubr.msk.f32.gmra.mrb[26].mxu0 %vm331_vm0, %v9751_v39  ;;  %v9939_v39 = vld [vmem:[%s18128_s27 + $0x498] sm:$0xff] }
 0x1b7   :  { %12304 = vmatprep.mubr.msk.f32.mxu0 %vm331_vm0, %v9752_v5  ;;  %v9940_v5 = vld [vmem:[%s18128_s27 + $0x4a0] sm:$0xff] }
 0x1ba   :  { %12305 = vmatmul.mubr.msk.f32.gmra.mrb[28].mxu0 %vm331_vm0, %v9753_v40  ;;  %v9941_v40 = vld [vmem:[%s18128_s27 + $0x4a8] sm:$0xff] }
 0x1bb   :  { %12307 = vmatprep.mubr.msk.f32.mxu0 %vm331_vm0, %v9754_v41  ;;  %v9942_v41 = vld [vmem:[%s18128_s27 + $0x4b0] sm:$0xff] }
 0x1be   :  { %12308 = vmatmul.mubr.msk.f32.gmra.mrb[30].mxu0 %vm331_vm0, %v9755_v42  ;;  %v9943_v42 = vld [vmem:[%s18128_s27 + $0x4b8] sm:$0xff] }
 0x1bf   :  { %12310 = vmatprep.mubr.msk.f32.mxu0 %vm331_vm0, %v9756_v43  ;;  %v9944_v43 = vld [vmem:[%s18128_s27 + $0x4c0] sm:$0xff] }
 0x1c2   :  { %12311 = vmatmul.mubr.msk.f32.gmra.mrb[32].mxu0 %vm331_vm0, %v9757_v47  ;;  %v9948_v47 = vld [vmem:[%s18128_s27 + $0x4e0] sm:$0xff] }
 0x1c3   :  { %12315 = vmatprep.mubr.msk.f32.mxu0 %vm331_vm0, %v9823_v48  ;;  %v9949_v48 = vld [vmem:[%s18128_s27 + $0x4e8] sm:$0xff] }
 0x1c6   :  { %12316 = vmatmul.mubr.msk.f32.vlgmr.msra.gmra.mrb[2].mxu0 %vm331_vm0, %v9824_v49  ;;  %v9950_v49 = vld [vmem:[%s18128_s27 + $0x4f0] sm:$0xff] }
 0x1c7   :  { %12318 = vmatprep.mubr.msk.f32.mxu0 %vm331_vm0, %v9825_v50  ;;  %12364 = vmatpush3.msk.msra.mxu0 %vm428_vm1, %v15542_v26  ;;  %v9830_v26 = vld [vmem:[%s18128_s27 + $0x338] sm:$0xff] }
 0x1c8   :  { %12413 = vmatprep.subr.msk.mxu0 %vm428_vm1, %v15773_v46 }
 0x1ca   :  { %12319 = vmatmul.mubr.msk.f32.gmra.mrb[4].mxu0 %vm331_vm0, %v9826_v51 }
 0x1cb   :  { %12321 = vmatprep.mubr.msk.f32.mxu0 %vm331_vm0, %v9827_v52 }
 0x1ce   :  { %12322 = vmatmul.mubr.msk.f32.gmra.mrb[6].mxu0 %vm331_vm0, %v9828_v53  ;;  %v9951_v53 = vld [vmem:[%s18128_s27 + $0x4f8] sm:$0xff] }
 0x1cf   :  { %12324 = vmatprep.mubr.msk.f32.mxu0 %vm331_vm0, %v9829_v54  ;;  %v10017_v54 = vld [vmem:[%s18128_s27 + $0x500] sm:$0xff] }
 0x1d2   :  { %12325 = vmatmul.mubr.msk.f32.gmra.mrb[8].mxu0 %vm331_vm0, %v9830_v26  ;;  %v10018_v26 = vld [vmem:[%s18128_s27 + $0x508] sm:$0xff] }
 0x1d3   :  { %12327 = vmatprep.mubr.msk.f32.mxu0 %vm331_vm0, %v9831_v55  ;;  %v10019_v55 = vld [vmem:[%s18128_s27 + $0x510] sm:$0xff] }
 0x1d6   :  { %12328 = vmatmul.mubr.msk.f32.gmra.mrb[10].mxu0 %vm331_vm0, %v9832_v56  ;;  %v10020_v56 = vld [vmem:[%s18128_s27 + $0x518] sm:$0xff] }
 0x1d7   :  { %12330 = vmatprep.mubr.msk.f32.mxu0 %vm331_vm0, %v9833_v57  ;;  %v10021_v57 = vld [vmem:[%s18128_s27 + $0x520] sm:$0xff] }
 0x1da   :  { %12331 = vmatmul.mubr.msk.f32.gmra.mrb[12].mxu0 %vm331_vm0, %v9834_v58  ;;  %v10022_v58 = vld [vmem:[%s18128_s27 + $0x528] sm:$0xff] }
 0x1db   :  { %12333 = vmatprep.mubr.msk.f32.mxu0 %vm331_vm0, %v9835_v30  ;;  %v10023_v30 = vld [vmem:[%s18128_s27 + $0x530] sm:$0xff] }
 0x1de   :  { %12334 = vmatmul.mubr.msk.f32.gmra.mrb[14].mxu0 %vm331_vm0, %v9836_v25  ;;  %v10024_v25 = vld [vmem:[%s18128_s27 + $0x538] sm:$0xff] }
 0x1df   :  { %12336 = vmatprep.mubr.msk.f32.mxu0 %vm331_vm0, %v9837_v59  ;;  %v10025_v59 = vld [vmem:[%s18128_s27 + $0x540] sm:$0xff] }
 0x1e1   :  { %v11233_v14 = vpop.f32.mrb[10].mxu1 }
 0x1e2   :  { %12337 = vmatmul.mubr.msk.f32.gmra.mrb[16].mxu0 %vm331_vm0, %v9838_v60  ;;  %v11234_v15 = vpop.f32.mrb[11].mxu1  ;;  %v10026_v60 = vld [vmem:[%s18128_s27 + $0x548] sm:$0xff] }
 0x1e3   :  { %12339 = vmatprep.mubr.msk.f32.mxu0 %vm331_vm0, %v9839_v61  ;;  %v15907_v16 = vadd.f32 %v11234_v15, %v11233_v14  ;;  %v10027_v61 = vld [vmem:[%s18128_s27 + $0x550] sm:$0xff]  ;;  %v10042_v14 = vld [vmem:[%s18128_s27 + $0x5c8] sm:$0xff] }
 0x1e4   :  { %v10043_v15 = vld [vmem:[%s18128_s27 + $0x5d0] sm:$0xff] }
 0x1e6   :  { %12340 = vmatmul.mubr.msk.f32.gmra.mrb[18].mxu0 %vm331_vm0, %v9840_v62  ;;  %v10028_v62 = vld [vmem:[%s18128_s27 + $0x558] sm:$0xff] }
 0x1e7   :  { %12342 = vmatprep.mubr.msk.f32.mxu0 %vm331_vm0, %v9841_v63  ;;  %v10029_v63 = vld [vmem:[%s18128_s27 + $0x560] sm:$0xff] }
 0x1ea   :  { %12343 = vmatmul.mubr.msk.f32.gmra.mrb[20].mxu0 %vm331_vm0, %v9842_v0  ;;  %v10030_v0 = vld [vmem:[%s18128_s27 + $0x568] sm:$0xff] }
 0x1eb   :  { %12345 = vmatprep.mubr.msk.f32.mxu0 %vm331_vm0, %v9843_v1  ;;  %v10031_v1 = vld [vmem:[%s18128_s27 + $0x570] sm:$0xff] }
 0x1ee   :  { %12346 = vmatmul.mubr.msk.f32.gmra.mrb[22].mxu0 %vm331_vm0, %v9844_v2  ;;  %v10032_v2 = vld [vmem:[%s18128_s27 + $0x578] sm:$0xff] }
 0x1ef   :  { %12348 = vmatprep.mubr.msk.f32.mxu0 %vm331_vm0, %v9845_v3  ;;  %v10033_v3 = vld [vmem:[%s18128_s27 + $0x580] sm:$0xff] }
 0x1f2   :  { %12349 = vmatmul.mubr.msk.f32.gmra.mrb[24].mxu0 %vm331_vm0, %v9846_v4  ;;  %v10034_v4 = vld [vmem:[%s18128_s27 + $0x588] sm:$0xff] }
 0x1f3   :  { %12351 = vmatprep.mubr.msk.f32.mxu0 %vm331_vm0, %v9847_v6  ;;  %v10035_v6 = vld [vmem:[%s18128_s27 + $0x590] sm:$0xff] }
 0x1f6   :  { %12352 = vmatmul.mubr.msk.f32.gmra.mrb[26].mxu0 %vm331_vm0, %v9848_v7  ;;  %v10036_v7 = vld [vmem:[%s18128_s27 + $0x598] sm:$0xff] }
 0x1f7   :  { %12354 = vmatprep.mubr.msk.f32.mxu0 %vm331_vm0, %v9849_v8  ;;  %v10037_v8 = vld [vmem:[%s18128_s27 + $0x5a0] sm:$0xff] }
 0x1fa   :  { %12355 = vmatmul.mubr.msk.f32.gmra.mrb[28].mxu0 %vm331_vm0, %v9850_v9  ;;  %v10038_v9 = vld [vmem:[%s18128_s27 + $0x5a8] sm:$0xff] }
 0x1fb   :  { %12357 = vmatprep.mubr.msk.f32.mxu0 %vm331_vm0, %v9851_v10  ;;  %v10039_v10 = vld [vmem:[%s18128_s27 + $0x5b0] sm:$0xff] }
 0x1fe   :  { %12358 = vmatmul.mubr.msk.f32.gmra.mrb[30].mxu0 %vm331_vm0, %v9852_v12  ;;  %v10040_v12 = vld [vmem:[%s18128_s27 + $0x5b8] sm:$0xff] }
 0x1ff   :  { %12360 = vmatprep.mubr.msk.f32.mxu0 %vm331_vm0, %v9853_v13  ;;  %v10041_v13 = vld [vmem:[%s18128_s27 + $0x5c0] sm:$0xff] }
 0x202   :  { %12361 = vmatmul.mubr.msk.f32.gmra.mrb[32].mxu0 %vm331_vm0, %v9854_v17  ;;  %v10045_v17 = vld [vmem:[%s18128_s27 + $0x5e0] sm:$0xff] }
 0x203   :  { %12365 = vmatprep.mubr.msk.f32.mxu0 %vm331_vm0, %v9920_v18  ;;  %v10046_v18 = vld [vmem:[%s18128_s27 + $0x5e8] sm:$0xff] }
 0x206   :  { %12366 = vmatmul.mubr.msk.f32.vlgmr.msra.gmra.mrb[2].mxu0 %vm331_vm0, %v9921_v19  ;;  %v10047_v19 = vld [vmem:[%s18128_s27 + $0x5f0] sm:$0xff] }
 0x207   :  { %12368 = vmatprep.mubr.msk.f32.mxu0 %vm331_vm0, %v9922_v20  ;;  %12414 = vmatpush3.msk.msra.mxu0 %vm428_vm1, %v15773_v46  ;;  %v9947_v46 = vld [vmem:[%s18128_s27 + $0x4d8] sm:$0xff] }
 0x208   :  { %12463 = vmatprep.subr.msk.mxu0 %vm428_vm1, %v15907_v16 }
 0x20a   :  { %12369 = vmatmul.mubr.msk.f32.gmra.mrb[4].mxu0 %vm331_vm0, %v9923_v21 }
 0x20b   :  { %12371 = vmatprep.mubr.msk.f32.mxu0 %vm331_vm0, %v9924_v22 }
 0x20e   :  { %12372 = vmatmul.mubr.msk.f32.gmra.mrb[6].mxu0 %vm331_vm0, %v9925_v23  ;;  %v10048_v23 = vld [vmem:[%s18128_s27 + $0x5f8] sm:$0xff] }
 0x20f   :  { %12374 = vmatprep.mubr.msk.f32.mxu0 %vm331_vm0, %v9926_v24  ;;  %v10114_v24 = vld [vmem:[%s18128_s27 + $0x600] sm:$0xff] }
 0x212   :  { %12375 = vmatmul.mubr.msk.f32.gmra.mrb[8].mxu0 %vm331_vm0, %v9927_v27  ;;  %v10115_v27 = vld [vmem:[%s18128_s27 + $0x608] sm:$0xff] }
 0x213   :  { %12377 = vmatprep.mubr.msk.f32.mxu0 %vm331_vm0, %v9928_v28  ;;  %v10116_v28 = vld [vmem:[%s18128_s27 + $0x610] sm:$0xff] }
 0x216   :  { %12378 = vmatmul.mubr.msk.f32.gmra.mrb[10].mxu0 %vm331_vm0, %v9929_v29  ;;  %v10117_v29 = vld [vmem:[%s18128_s27 + $0x618] sm:$0xff] }
 0x217   :  { %12380 = vmatprep.mubr.msk.f32.mxu0 %vm331_vm0, %v9930_v31  ;;  %v10118_v31 = vld [vmem:[%s18128_s27 + $0x620] sm:$0xff] }
 0x21a   :  { %12381 = vmatmul.mubr.msk.f32.gmra.mrb[12].mxu0 %vm331_vm0, %v9931_v32  ;;  %v10119_v32 = vld [vmem:[%s18128_s27 + $0x628] sm:$0xff] }
 0x21b   :  { %12383 = vmatprep.mubr.msk.f32.mxu0 %vm331_vm0, %v9932_v33  ;;  %v10120_v33 = vld [vmem:[%s18128_s27 + $0x630] sm:$0xff] }
 0x21e   :  { %12384 = vmatmul.mubr.msk.f32.gmra.mrb[14].mxu0 %vm331_vm0, %v9933_v34  ;;  %v10121_v34 = vld [vmem:[%s18128_s27 + $0x638] sm:$0xff] }
 0x21f   :  { %12386 = vmatprep.mubr.msk.f32.mxu0 %vm331_vm0, %v9934_v35  ;;  %v10122_v35 = vld [vmem:[%s18128_s27 + $0x640] sm:$0xff] }
 0x222   :  { %12387 = vmatmul.mubr.msk.f32.gmra.mrb[16].mxu0 %vm331_vm0, %v9935_v36  ;;  %v10123_v36 = vld [vmem:[%s18128_s27 + $0x648] sm:$0xff] }
 0x223   :  { %12389 = vmatprep.mubr.msk.f32.mxu0 %vm331_vm0, %v9936_v37  ;;  %v10124_v37 = vld [vmem:[%s18128_s27 + $0x650] sm:$0xff] }
 0x226   :  { %12390 = vmatmul.mubr.msk.f32.gmra.mrb[18].mxu0 %vm331_vm0, %v9937_v11  ;;  %v4425_v11 = vld [vmem:[%s18056_s3] sm:$0xff] }
 0x227   :  { %12392 = vmatprep.mubr.msk.f32.mxu0 %vm331_vm0, %v9938_v38  ;;  %v10125_v38 = vld [vmem:[%s18128_s27 + $0x658] sm:$0xff] }
 0x22a   :  { %12393 = vmatmul.mubr.msk.f32.gmra.mrb[20].mxu0 %vm331_vm0, %v9939_v39  ;;  %v14380_v39 = vmov 0  }
 0x22b   :  { %12395 = vmatprep.mubr.msk.f32.mxu0 %vm331_vm0, %v9940_v5  ;;  %14325 = vset.pattern.permute.xlu0 %v14380_v39  ;;  %v10126_v5 = vld [vmem:[%s18128_s27 + $0x660] sm:$0xff] }
 0x22c   :  { %v11301_v50 = vpop.f32.mrb[12].mxu1  ;;  %4459 = vperm.xlu0 %14325, %v4425_v11   ;;  %14326 = vset.pattern.permute.xlu1 %v14380_v39  ;;  %v10219_v11 = vld [vmem:[%s18128_s27 + $0x740] sm:$0xff]  ;;  %v4454_v39 = vld [vmem:[%s18056_s3 + $0xe8] sm:$0xff] }
 0x22d   :  { %v11302_v51 = vpop.f32.mrb[13].mxu1 }
 0x22e   :  { %12396 = vmatmul.mubr.msk.f32.gmra.mrb[22].mxu0 %vm331_vm0, %v9941_v40  ;;  %v16041_v52 = vadd.f32 %v11302_v51, %v11301_v50  ;;  %v4427_v40 = vld [vmem:[%s18056_s3 + $0x10] sm:$0xff]  ;;  %v10131_v50 = vld [vmem:[%s18128_s27 + $0x688] sm:$0xff] }
 0x22f   :  { %12398 = vmatprep.mubr.msk.f32.mxu0 %vm331_vm0, %v9942_v41  ;;  %v4426_v41 = vld [vmem:[%s18056_s3 + $0x8] sm:$0xff]  ;;  %4469 = vperm.xlu1 %14326, %v4427_v40   ;;  %v10132_v51 = vld [vmem:[%s18128_s27 + $0x690] sm:$0xff] }
 0x230   :  { %4464 = vperm.xlu0 %14325, %v4426_v41   ;;  %v10220_v40 = vld [vmem:[%s18128_s27 + $0x748] sm:$0xff]  ;;  %v4653_v41 = vld [vmem:[%s18057_s4 + $0x20] sm:$0xff] }
 0x232   :  { %12399 = vmatmul.mubr.msk.f32.gmra.mrb[24].mxu0 %vm331_vm0, %v9943_v42  ;;  %v10127_v42 = vld [vmem:[%s18128_s27 + $0x668] sm:$0xff] }
 0x233   :  { %12401 = vmatprep.mubr.msk.f32.mxu0 %vm331_vm0, %v9944_v43  ;;  %v10128_v43 = vld [vmem:[%s18128_s27 + $0x670] sm:$0xff] }
 0x236   :  { %12402 = vmatmul.mubr.msk.f32.gmra.mrb[26].mxu0 %vm331_vm0, %v9945_v44  ;;  %v4428_v44 = vld [vmem:[%s18056_s3 + $0x18] sm:$0xff] }
 0x237   :  { %12404 = vmatprep.mubr.msk.f32.mxu0 %vm331_vm0, %v9946_v45  ;;  %v4429_v45 = vld [vmem:[%s18056_s3 + $0x20] sm:$0xff]  ;;  %4474 = vperm.xlu1 %14326, %v4428_v44  }
 0x238   :  { %4479 = vperm.xlu0 %14325, %v4429_v45   ;;  %v4456_v45 = vld [vmem:[%s18056_s3 + $0xf8] sm:$0xff] }
 0x23a   :  { %12405 = vmatmul.mubr.msk.f32.gmra.mrb[28].mxu0 %vm331_vm0, %v9947_v46  ;;  %v10129_v46 = vld [vmem:[%s18128_s27 + $0x678] sm:$0xff] }
 0x23b   :  { %12407 = vmatprep.mubr.msk.f32.mxu0 %vm331_vm0, %v9948_v47  ;;  %v10130_v47 = vld [vmem:[%s18128_s27 + $0x680] sm:$0xff] }
 0x23e   :  { %12408 = vmatmul.mubr.msk.f32.gmra.mrb[30].mxu0 %vm331_vm0, %v9949_v48  ;;  %v4430_v48 = vld [vmem:[%s18056_s3 + $0x28] sm:$0xff] }
 0x23f   :  { %12410 = vmatprep.mubr.msk.f32.mxu0 %vm331_vm0, %v9950_v49  ;;  %v4431_v49 = vld [vmem:[%s18056_s3 + $0x30] sm:$0xff]  ;;  %4484 = vperm.xlu1 %14326, %v4430_v48   ;;  %v10223_v48 = vld [vmem:[%s18128_s27 + $0x760] sm:$0xff] }
 0x240   :  { %4489 = vperm.xlu0 %14325, %v4431_v49   ;;  %v7585_v49 = vld [vmem:[%s18059_s6 + $0x8] sm:$0xff] }
 0x242   :  { %12411 = vmatmul.mubr.msk.f32.gmra.mrb[32].mxu0 %vm331_vm0, %v9951_v53  ;;  %v4433_v53 = vld [vmem:[%s18056_s3 + $0x40] sm:$0xff] }
 0x243   :  { %12415 = vmatprep.mubr.msk.f32.mxu0 %vm331_vm0, %v10017_v54  ;;  %v10133_v54 = vld [vmem:[%s18128_s27 + $0x698] sm:$0xff] }
 0x244   :  { %4499 = vperm.xlu0 %14325, %v4433_v53   ;;  %v10227_v53 = vld [vmem:[%s18128_s27 + $0x780] sm:$0xff] }
 0x246   :  { %12416 = vmatmul.mubr.msk.f32.vlgmr.msra.gmra.mrb[2].mxu0 %vm331_vm0, %v10018_v26  ;;  %v10134_v26 = vld [vmem:[%s18128_s27 + $0x6a0] sm:$0xff] }
 0x247   :  { %12418 = vmatprep.mubr.msk.f32.mxu0 %vm331_vm0, %v10019_v55  ;;  %12464 = vmatpush3.msk.msra.mxu0 %vm428_vm1, %v15907_v16  ;;  %v10044_v16 = vld [vmem:[%s18128_s27 + $0x5d8] sm:$0xff]  ;;  %v4434_v55 = vld [vmem:[%s18056_s3 + $0x48] sm:$0xff] }
 0x248   :  { %12513 = vmatprep.subr.msk.mxu0 %vm428_vm1, %v16041_v52 }
 0x24a   :  { %12419 = vmatmul.mubr.msk.f32.gmra.mrb[4].mxu0 %vm331_vm0, %v10020_v56  ;;  %v4435_v56 = vld [vmem:[%s18056_s3 + $0x50] sm:$0xff] }
 0x24b   :  { %12421 = vmatprep.mubr.msk.f32.mxu0 %vm331_vm0, %v10021_v57  ;;  %v10135_v57 = vld [vmem:[%s18128_s27 + $0x6a8] sm:$0xff]  ;;  %4509 = vperm.xlu0 %14325, %v4435_v56   ;;  %v10231_v56 = vld [vmem:[%s18128_s27 + $0x7a0] sm:$0xff] }
 0x24e   :  { %12422 = vmatmul.mubr.msk.f32.gmra.mrb[6].mxu0 %vm331_vm0, %v10022_v58  ;;  %v10136_v58 = vld [vmem:[%s18128_s27 + $0x6b0] sm:$0xff] }
 0x24f   :  { %12424 = vmatprep.mubr.msk.f32.mxu0 %vm331_vm0, %v10023_v30  ;;  %v4436_v30 = vld [vmem:[%s18056_s3 + $0x58] sm:$0xff] }
 0x252   :  { %12425 = vmatmul.mubr.msk.f32.gmra.mrb[8].mxu0 %vm331_vm0, %v10024_v25  ;;  %v4437_v25 = vld [vmem:[%s18056_s3 + $0x60] sm:$0xff] }
 0x253   :  { %12427 = vmatprep.mubr.msk.f32.mxu0 %vm331_vm0, %v10025_v59  ;;  %v10137_v59 = vld [vmem:[%s18128_s27 + $0x6b8] sm:$0xff]  ;;  %4519 = vperm.xlu0 %14325, %v4437_v25   ;;  %v10235_v25 = vld [vmem:[%s18128_s27 + $0x7c0] sm:$0xff] }
 0x256   :  { %12428 = vmatmul.mubr.msk.f32.gmra.mrb[10].mxu0 %vm331_vm0, %v10026_v60  ;;  %v10138_v60 = vld [vmem:[%s18128_s27 + $0x6c0] sm:$0xff] }
 0x257   :  { %12430 = vmatprep.mubr.msk.f32.mxu0 %vm331_vm0, %v10027_v61  ;;  %v4438_v61 = vld [vmem:[%s18056_s3 + $0x68] sm:$0xff] }
 0x25a   :  { %12431 = vmatmul.mubr.msk.f32.gmra.mrb[12].mxu0 %vm331_vm0, %v10028_v62  ;;  %v4439_v62 = vld [vmem:[%s18056_s3 + $0x70] sm:$0xff] }
 0x25b   :  { %12433 = vmatprep.mubr.msk.f32.mxu0 %vm331_vm0, %v10029_v63  ;;  %v10139_v63 = vld [vmem:[%s18128_s27 + $0x6c8] sm:$0xff]  ;;  %4529 = vperm.xlu0 %14325, %v4439_v62   ;;  %v10239_v62 = vld [vmem:[%s18128_s27 + $0x7e0] sm:$0xff] }
 0x25e   :  { %12434 = vmatmul.mubr.msk.f32.gmra.mrb[14].mxu0 %vm331_vm0, %v10030_v0  ;;  %v10140_v0 = vld [vmem:[%s18128_s27 + $0x6d0] sm:$0xff] }
 0x25f   :  { %12436 = vmatprep.mubr.msk.f32.mxu0 %vm331_vm0, %v10031_v1  ;;  %v4440_v1 = vld [vmem:[%s18056_s3 + $0x78] sm:$0xff] }
 0x262   :  { %12437 = vmatmul.mubr.msk.f32.gmra.mrb[16].mxu0 %vm331_vm0, %v10032_v2  ;;  %v4441_v2 = vld [vmem:[%s18056_s3 + $0x80] sm:$0xff] }
 0x263   :  { %12439 = vmatprep.mubr.msk.f32.mxu0 %vm331_vm0, %v10033_v3  ;;  %v10141_v3 = vld [vmem:[%s18128_s27 + $0x6d8] sm:$0xff]  ;;  %4539 = vperm.xlu0 %14325, %v4441_v2   ;;  %v10308_v2 = vld [vmem:[%s18128_s27 + $0x800] sm:$0xff] }
 0x266   :  { %12440 = vmatmul.mubr.msk.f32.gmra.mrb[18].mxu0 %vm331_vm0, %v10034_v4  ;;  %v10142_v4 = vld [vmem:[%s18128_s27 + $0x6e0] sm:$0xff] }
 0x267   :  { %12442 = vmatprep.mubr.msk.f32.mxu0 %vm331_vm0, %v10035_v6  ;;  %v4442_v6 = vld [vmem:[%s18056_s3 + $0x88] sm:$0xff] }
 0x26a   :  { %12443 = vmatmul.mubr.msk.f32.gmra.mrb[20].mxu0 %vm331_vm0, %v10036_v7  ;;  %v4443_v7 = vld [vmem:[%s18056_s3 + $0x90] sm:$0xff] }
 0x26b   :  { %12445 = vmatprep.mubr.msk.f32.mxu0 %vm331_vm0, %v10037_v8  ;;  %v10143_v8 = vld [vmem:[%s18128_s27 + $0x6e8] sm:$0xff]  ;;  %4549 = vperm.xlu0 %14325, %v4443_v7   ;;  %v10312_v7 = vld [vmem:[%s18128_s27 + $0x820] sm:$0xff] }
 0x26e   :  { %12446 = vmatmul.mubr.msk.f32.gmra.mrb[22].mxu0 %vm331_vm0, %v10038_v9  ;;  %v10144_v9 = vld [vmem:[%s18128_s27 + $0x6f0] sm:$0xff] }
 0x26f   :  { %12448 = vmatprep.mubr.msk.f32.mxu0 %vm331_vm0, %v10039_v10  ;;  %v4444_v10 = vld [vmem:[%s18056_s3 + $0x98] sm:$0xff] }
 0x272   :  { %12449 = vmatmul.mubr.msk.f32.gmra.mrb[24].mxu0 %vm331_vm0, %v10040_v12  ;;  %v4445_v12 = vld [vmem:[%s18056_s3 + $0xa0] sm:$0xff] }
 0x273   :  { %12451 = vmatprep.mubr.msk.f32.mxu0 %vm331_vm0, %v10041_v13  ;;  %v10145_v13 = vld [vmem:[%s18128_s27 + $0x6f8] sm:$0xff]  ;;  %4559 = vperm.xlu0 %14325, %v4445_v12   ;;  %v10316_v12 = vld [vmem:[%s18128_s27 + $0x840] sm:$0xff] }
 0x276   :  { %12452 = vmatmul.mubr.msk.f32.gmra.mrb[26].mxu0 %vm331_vm0, %v10042_v14  ;;  %v10211_v14 = vld [vmem:[%s18128_s27 + $0x700] sm:$0xff] }
 0x277   :  { %12454 = vmatprep.mubr.msk.f32.mxu0 %vm331_vm0, %v10043_v15  ;;  %v4446_v15 = vld [vmem:[%s18056_s3 + $0xa8] sm:$0xff] }
 0x279   :  { %v11369_v20 = vpop.f32.mrb[14].mxu1 }
 0x27a   :  { %12455 = vmatmul.mubr.msk.f32.gmra.mrb[28].mxu0 %vm331_vm0, %v10044_v16  ;;  %v11370_v21 = vpop.f32.mrb[15].mxu1  ;;  %v4447_v16 = vld [vmem:[%s18056_s3 + $0xb0] sm:$0xff] }
 0x27b   :  { %12457 = vmatprep.mubr.msk.f32.mxu0 %vm331_vm0, %v10045_v17  ;;  %v16175_v22 = vadd.f32 %v11370_v21, %v11369_v20  ;;  %v10212_v17 = vld [vmem:[%s18128_s27 + $0x708] sm:$0xff]  ;;  %4569 = vperm.xlu0 %14325, %v4447_v16   ;;  %v4449_v20 = vld [vmem:[%s18056_s3 + $0xc0] sm:$0xff]  ;;  %v10214_v21 = vld [vmem:[%s18128_s27 + $0x718] sm:$0xff] }
 0x27c   :  { %v10320_v16 = vld [vmem:[%s18128_s27 + $0x860] sm:$0xff] }
 0x27e   :  { %12458 = vmatmul.mubr.msk.f32.gmra.mrb[30].mxu0 %vm331_vm0, %v10046_v18  ;;  %v10213_v18 = vld [vmem:[%s18128_s27 + $0x710] sm:$0xff] }
 0x27f   :  { %12460 = vmatprep.mubr.msk.f32.mxu0 %vm331_vm0, %v10047_v19  ;;  %v4448_v19 = vld [vmem:[%s18056_s3 + $0xb8] sm:$0xff]  ;;  %4579 = vperm.xlu0 %14325, %v4449_v20   ;;  %v10324_v20 = vld [vmem:[%s18128_s27 + $0x880] sm:$0xff] }
 0x282   :  { %12461 = vmatmul.mubr.msk.f32.gmra.mrb[32].mxu0 %vm331_vm0, %v10048_v23  ;;  %v10215_v23 = vld [vmem:[%s18128_s27 + $0x720] sm:$0xff] }
 0x283   :  { %12465 = vmatprep.mubr.msk.f32.mxu0 %vm331_vm0, %v10114_v24  ;;  %v4450_v24 = vld [vmem:[%s18056_s3 + $0xc8] sm:$0xff] }
 0x286   :  { %12466 = vmatmul.mubr.msk.f32.vlgmr.msra.gmra.mrb[2].mxu0 %vm331_vm0, %v10115_v27  ;;  %v4451_v27 = vld [vmem:[%s18056_s3 + $0xd0] sm:$0xff] }
 0x287   :  { %12468 = vmatprep.mubr.msk.f32.mxu0 %vm331_vm0, %v10116_v28  ;;  %12514 = vmatpush3.msk.msra.mxu0 %vm428_vm1, %v16041_v52  ;;  %v4432_v52 = vld [vmem:[%s18056_s3 + $0x38] sm:$0xff]  ;;  %v4649_v28 = vld [vmem:[%s18057_s4] sm:$0xff] }
 0x288   :  { %12563 = vmatprep.subr.msk.mxu0 %vm428_vm1, %v16175_v22  ;;  %4494 = vperm.xlu1 %14326, %v4432_v52   ;;  %v10226_v52 = vld [vmem:[%s18128_s27 + $0x778] sm:$0xff] }
 0x289   :  { %4589 = vperm.xlu0 %14325, %v4451_v27   ;;  %v10328_v27 = vld [vmem:[%s18128_s27 + $0x8a0] sm:$0xff] }
 0x28a   :  { %12469 = vmatmul.mubr.msk.f32.gmra.mrb[4].mxu0 %vm331_vm0, %v10117_v29  ;;  %v4650_v29 = vld [vmem:[%s18057_s4 + $0x8] sm:$0xff] }
 0x28b   :  { %12471 = vmatprep.mubr.msk.f32.mxu0 %vm331_vm0, %v10118_v31  ;;  %v10217_v31 = vld [vmem:[%s18128_s27 + $0x730] sm:$0xff] }
 0x28c   :  { %4504 = vperm.xlu1 %14326, %v4434_v55   ;;  %v10230_v55 = vld [vmem:[%s18128_s27 + $0x798] sm:$0xff] }
 0x28e   :  { %12472 = vmatmul.mubr.msk.f32.gmra.mrb[6].mxu0 %vm331_vm0, %v10119_v32  ;;  %v13593_v32 = vpack.c.bf16 %v4650_v29, %v4649_v28  ;;  %v10330_v28 = vld [vmem:[%s18128_s27 + $0x8b0] sm:$0xff]  ;;  %v10331_v29 = vld [vmem:[%s18128_s27 + $0x8b8] sm:$0xff] }
 0x28f   :  { %12474 = vmatprep.mubr.msk.f32.mxu0 %vm331_vm0, %v10120_v33  ;;  %v4452_v33 = vld [vmem:[%s18056_s3 + $0xd8] sm:$0xff] }
 0x290   :  { %4514 = vperm.xlu1 %14326, %v4436_v30   ;;  %13594 = vmatprep.subr.bf16.mxu1 %v13593_v32  ;;  %v10234_v30 = vld [vmem:[%s18128_s27 + $0x7b8] sm:$0xff] }
 0x291   :  { %13596 = vmatpush3.bf16.msra.mxu1 %v13593_v32  ;;  %v10333_v32 = vld [vmem:[%s18128_s27 + $0x8c8] sm:$0xff] }
 0x292   :  { %12475 = vmatmul.mubr.msk.f32.gmra.mrb[8].mxu0 %vm331_vm0, %v10121_v34  ;;  %v4453_v34 = vld [vmem:[%s18056_s3 + $0xe0] sm:$0xff] }
 0x293   :  { %12477 = vmatprep.mubr.msk.f32.mxu0 %vm331_vm0, %v10122_v35  ;;  %v10218_v35 = vld [vmem:[%s18128_s27 + $0x738] sm:$0xff]  ;;  %4599 = vperm.xlu0 %14325, %v4453_v34  }
 0x294   :  { %4524 = vperm.xlu1 %14326, %v4438_v61   ;;  %v10238_v61 = vld [vmem:[%s18128_s27 + $0x7d8] sm:$0xff] }
 0x295   :  { %v10335_v34 = vld [vmem:[%s18128_s27 + $0x8d8] sm:$0xff] }
 0x296   :  { %12478 = vmatmul.mubr.msk.f32.gmra.mrb[10].mxu0 %vm331_vm0, %v10123_v36  ;;  %v4651_v36 = vld [vmem:[%s18057_s4 + $0x10] sm:$0xff] }
 0x297   :  { %12480 = vmatprep.mubr.msk.f32.mxu0 %vm331_vm0, %v10124_v37  ;;  %v4652_v37 = vld [vmem:[%s18057_s4 + $0x18] sm:$0xff] }
 0x298   :  { %4534 = vperm.xlu1 %14326, %v4440_v1   ;;  %v10242_v1 = vld [vmem:[%s18128_s27 + $0x7f8] sm:$0xff] }
 0x29a   :  { %12481 = vmatmul.mubr.msk.f32.gmra.mrb[12].mxu0 %vm331_vm0, %v10125_v38  ;;  %v13597_v38 = vpack.c.bf16 %v4652_v37, %v4651_v36  ;;  %v10337_v36 = vld [vmem:[%s18128_s27 + $0x8e8] sm:$0xff]  ;;  %v10338_v37 = vld [vmem:[%s18128_s27 + $0x8f0] sm:$0xff] }
 0x29b   :  { %12483 = vmatprep.mubr.msk.f32.mxu0 %vm331_vm0, %v10126_v5  ;;  %v4455_v5 = vld [vmem:[%s18056_s3 + $0xf0] sm:$0xff] }
 0x29c   :  { %4544 = vperm.xlu1 %14326, %v4442_v6   ;;  %13598 = vmatprep.subr.bf16.mxu1 %v13597_v38  ;;  %v10311_v6 = vld [vmem:[%s18128_s27 + $0x818] sm:$0xff] }
 0x29d   :  { %13600 = vmatpush3.bf16.msra.mxu1 %v13597_v38  ;;  %4609 = vperm.xlu0 %14325, %v4455_v5   ;;  %v4655_v38 = vld [vmem:[%s18057_s4 + $0x30] sm:$0xff] }
 0x29e   :  { %12484 = vmatmul.mubr.msk.f32.gmra.mrb[14].mxu0 %vm331_vm0, %v10127_v42  ;;  %v4654_v42 = vld [vmem:[%s18057_s4 + $0x28] sm:$0xff] }
 0x29f   :  { %12486 = vmatprep.mubr.msk.f32.mxu0 %vm331_vm0, %v10128_v43  ;;  %v10221_v43 = vld [vmem:[%s18128_s27 + $0x750] sm:$0xff]  ;;  %v13601_v44 = vpack.c.bf16 %v4654_v42, %v4653_v41  ;;  %v10406_v41 = vld [vmem:[%s18057_s4 + $0x48] sm:$0xff] }
 0x2a0   :  { %4554 = vperm.xlu1 %14326, %v4444_v10   ;;  %v10315_v10 = vld [vmem:[%s18128_s27 + $0x838] sm:$0xff] }
 0x2a1   :  { %13602 = vmatprep.subr.bf16.mxu1 %v13601_v44 }
 0x2a2   :  { %12487 = vmatmul.mubr.msk.f32.gmra.mrb[16].mxu0 %vm331_vm0, %v10129_v46  ;;  %v7584_v46 = vld [vmem:[%s18059_s6] sm:$0xff]  ;;  %13604 = vmatpush3.bf16.msra.mxu1 %v13601_v44  ;;  %s14368_s6 = scalar_lea.hbm %s18071_s18, 16 }
 0x2a3   :  { %12489 = vmatprep.mubr.msk.f32.mxu0 %vm331_vm0, %v10130_v47  ;;  %v10222_v47 = vld [vmem:[%s18128_s27 + $0x758] sm:$0xff]  ;;  %7588 = vperm.xlu0 %14325, %v7584_v46   ;;  %p14369_p0 = scmp.ne.s32.totalorder %s18071_s18, %s14368_s6  ;;  %p14372_p1 = scmp.lt.u32.totalorder %s14368_s6, %s18071_s18 }
 0x2a4   :  { %4564 = vperm.xlu1 %14326, %v4446_v15   ;;  %v10319_v15 = vld [vmem:[%s18128_s27 + $0x858] sm:$0xff] }
 0x2a5   :  { %p14374_p2 = pnand %p14372_p1, %p14369_p0 }
 0x2a6   :  { %12490 = vmatmul.mubr.msk.f32.gmra.mrb[18].mxu0 %vm331_vm0, %v10131_v50  ;;  %v10224_v50 = vld [vmem:[%s18128_s27 + $0x768] sm:$0xff] }
 0x2a7   :  { %12492 = vmatprep.mubr.msk.f32.mxu0 %vm331_vm0, %v10132_v51  ;;  %v10225_v51 = vld [vmem:[%s18128_s27 + $0x770] sm:$0xff] }
 0x2a8   :  { %4574 = vperm.xlu1 %14326, %v4448_v19   ;;  %v10323_v19 = vld [vmem:[%s18128_s27 + $0x878] sm:$0xff] }
 0x2aa   :  { %12493 = vmatmul.mubr.msk.f32.gmra.mrb[20].mxu0 %vm331_vm0, %v10133_v54  ;;  %v10228_v54 = vld [vmem:[%s18128_s27 + $0x788] sm:$0xff] }
 0x2ab   :  { %12495 = vmatprep.mubr.msk.f32.mxu0 %vm331_vm0, %v10134_v26  ;;  %v10229_v26 = vld [vmem:[%s18128_s27 + $0x790] sm:$0xff] }
 0x2ac   :  { %4584 = vperm.xlu1 %14326, %v4450_v24   ;;  %v10327_v24 = vld [vmem:[%s18128_s27 + $0x898] sm:$0xff] }
 0x2ae   :  { %12496 = vmatmul.mubr.msk.f32.gmra.mrb[22].mxu0 %vm331_vm0, %v10135_v57  ;;  %v10232_v57 = vld [vmem:[%s18128_s27 + $0x7a8] sm:$0xff]  ;;  %v4470_v44 = vpop.permute.xlu1 %4469 }
 0x2af   :  { %12498 = vmatprep.mubr.msk.f32.mxu0 %vm331_vm0, %v10136_v58  ;;  %v10233_v58 = vld [vmem:[%s18128_s27 + $0x7b0] sm:$0xff] }
 0x2b0   :  { %4594 = vperm.xlu1 %14326, %v4452_v33   ;;  %v10334_v33 = vld [vmem:[%s18128_s27 + $0x8d0] sm:$0xff] }
 0x2b2   :  { %12499 = vmatmul.mubr.msk.f32.gmra.mrb[24].mxu0 %vm331_vm0, %v10137_v59  ;;  %v10236_v59 = vld [vmem:[%s18128_s27 + $0x7c8] sm:$0xff] }
 0x2b3   :  { %12501 = vmatprep.mubr.msk.f32.mxu0 %vm331_vm0, %v10138_v60  ;;  %v10237_v60 = vld [vmem:[%s18128_s27 + $0x7d0] sm:$0xff] }
 0x2b4   :  { %4604 = vperm.xlu1 %14326, %v4454_v39   ;;  %v4656_v39 = vld [vmem:[%s18057_s4 + $0x38] sm:$0xff] }
 0x2b5   :  { %v13605_v5 = vpack.c.bf16 %v4656_v39, %v4655_v38 }
 0x2b6   :  { %12502 = vmatmul.mubr.msk.f32.gmra.mrb[26].mxu0 %vm331_vm0, %v10139_v63  ;;  %v10240_v63 = vld [vmem:[%s18128_s27 + $0x7e8] sm:$0xff]  ;;  %v4475_v46 = vpop.permute.xlu1 %4474 }
 0x2b7   :  { %12504 = vmatprep.mubr.msk.f32.mxu0 %vm331_vm0, %v10140_v0  ;;  %v10241_v0 = vld [vmem:[%s18128_s27 + $0x7f0] sm:$0xff]  ;;  %13606 = vmatprep.subr.bf16.mxu1 %v13605_v5 }
 0x2b8   :  { %4614 = vperm.xlu1 %14326, %v4456_v45   ;;  %13608 = vmatpush3.bf16.msra.mxu1 %v13605_v5 }
 0x2ba   :  { %12505 = vmatmul.mubr.msk.f32.gmra.mrb[28].mxu0 %vm331_vm0, %v10141_v3  ;;  %v10309_v3 = vld [vmem:[%s18128_s27 + $0x808] sm:$0xff] }
 0x2bb   :  { %12507 = vmatprep.mubr.msk.f32.mxu0 %vm331_vm0, %v10142_v4  ;;  %v10310_v4 = vld [vmem:[%s18128_s27 + $0x810] sm:$0xff] }
 0x2bc   :  { %7593 = vperm.xlu1 %14326, %v7585_v49  }
 0x2be   :  { %12508 = vmatmul.mubr.msk.f32.gmra.mrb[30].mxu0 %vm331_vm0, %v10143_v8  ;;  %v10313_v8 = vld [vmem:[%s18128_s27 + $0x828] sm:$0xff] }
 0x2bf   :  { %12510 = vmatprep.mubr.msk.f32.mxu0 %vm331_vm0, %v10144_v9  ;;  %v10314_v9 = vld [vmem:[%s18128_s27 + $0x830] sm:$0xff] }
 0x2c2   :  { %12511 = vmatmul.mubr.msk.f32.gmra.mrb[32].mxu0 %vm331_vm0, %v10145_v13  ;;  %v10317_v13 = vld [vmem:[%s18128_s27 + $0x848] sm:$0xff] }
 0x2c3   :  { %12515 = vmatprep.mubr.msk.f32.mxu0 %vm331_vm0, %v10211_v14  ;;  %v10318_v14 = vld [vmem:[%s18128_s27 + $0x850] sm:$0xff] }
 0x2c6   :  { %12516 = vmatmul.mubr.msk.f32.vlgmr.msra.gmra.mrb[2].mxu0 %vm331_vm0, %v10212_v17  ;;  %v10321_v17 = vld [vmem:[%s18128_s27 + $0x868] sm:$0xff] }
 0x2c7   :  { %12518 = vmatprep.mubr.msk.f32.mxu0 %vm331_vm0, %v10213_v18  ;;  %12564 = vmatpush3.msk.msra.mxu0 %vm428_vm1, %v16175_v22  ;;  %v10216_v22 = vld [vmem:[%s18128_s27 + $0x728] sm:$0xff]  ;;  %v10322_v18 = vld [vmem:[%s18128_s27 + $0x870] sm:$0xff] }
 0x2ca   :  { %12519 = vmatmul.mubr.msk.f32.gmra.mrb[4].mxu0 %vm331_vm0, %v10214_v21  ;;  %v10325_v21 = vld [vmem:[%s18128_s27 + $0x888] sm:$0xff] }
 0x2cb   :  { %12521 = vmatprep.mubr.msk.f32.mxu0 %vm331_vm0, %v10215_v23  ;;  %v10326_v23 = vld [vmem:[%s18128_s27 + $0x890] sm:$0xff] }
 0x2ce   :  { %12522 = vmatmul.mubr.msk.f32.gmra.mrb[6].mxu0 %vm331_vm0, %v10216_v22  ;;  %v10329_v22 = vld [vmem:[%s18128_s27 + $0x8a8] sm:$0xff] }
 0x2cf   :  { %12524 = vmatprep.mubr.msk.f32.mxu0 %vm331_vm0, %v10217_v31  ;;  %v10332_v31 = vld [vmem:[%s18128_s27 + $0x8c0] sm:$0xff] }
 0x2d2   :  { %12525 = vmatmul.mubr.msk.f32.gmra.mrb[8].mxu0 %vm331_vm0, %v10218_v35  ;;  %v10336_v35 = vld [vmem:[%s18128_s27 + $0x8e0] sm:$0xff] }
 0x2d3   :  { %12527 = vmatprep.mubr.msk.f32.mxu0 %vm331_vm0, %v10219_v11  ;;  %v10339_v11 = vld [vmem:[%s18128_s27 + $0x8f8] sm:$0xff] }
 0x2d6   :  { %12528 = vmatmul.mubr.msk.f32.gmra.mrb[10].mxu0 %vm331_vm0, %v10220_v40  ;;  %v10405_v40 = vld [vmem:[%s18057_s4 + $0x40] sm:$0xff] }
 0x2d7   :  { %12530 = vmatprep.mubr.msk.f32.mxu0 %vm331_vm0, %v10221_v43  ;;  %v13609_v42 = vpack.c.bf16 %v10406_v41, %v10405_v40  ;;  %v4460_v43 = vpop.permute.xlu0 %4459 }
 0x2d9   :  { %13610 = vmatprep.subr.bf16.mxu1 %v13609_v42 }
 0x2da   :  { %12531 = vmatmul.mubr.msk.f32.gmra.mrb[12].mxu0 %vm331_vm0, %v10222_v47 }
 0x2db   :  { %12533 = vmatprep.mubr.msk.f32.mxu0 %vm331_vm0, %v10223_v48  ;;  %v4465_v45 = vpop.permute.xlu0 %4464  ;;  %v4485_v48 = vpop.permute.xlu1 %4484 }
 0x2de   :  { %12534 = vmatmul.mubr.msk.f32.gmra.mrb[14].mxu0 %vm331_vm0, %v10224_v50 }
 0x2df   :  { %12536 = vmatprep.mubr.msk.f32.mxu0 %vm331_vm0, %v10225_v51  ;;  %v4480_v47 = vpop.permute.xlu0 %4479 }
 0x2e2   :  { %12537 = vmatmul.mubr.msk.f32.gmra.mrb[16].mxu0 %vm331_vm0, %v10226_v52 }
 0x2e3   :  { %12539 = vmatprep.mubr.msk.f32.mxu0 %vm331_vm0, %v10227_v53  ;;  %v4490_v49 = vpop.permute.xlu0 %4489 }
 0x2e6   :  { %12540 = vmatmul.mubr.msk.f32.gmra.mrb[18].mxu0 %vm331_vm0, %v10228_v54  ;;  %v10407_v54 = vld [vmem:[%s18057_s4 + $0x50] sm:$0xff] }
 0x2e7   :  { %12542 = vmatprep.mubr.msk.f32.mxu0 %vm331_vm0, %v10229_v26  ;;  %v4500_v51 = vpop.permute.xlu0 %4499  ;;  %v10408_v26 = vld [vmem:[%s18057_s4 + $0x58] sm:$0xff] }
 0x2ea   :  { %12543 = vmatmul.mubr.msk.f32.gmra.mrb[20].mxu0 %vm331_vm0, %v10230_v55 }
 0x2eb   :  { %12545 = vmatprep.mubr.msk.f32.mxu0 %vm331_vm0, %v10231_v56  ;;  %v4510_v55 = vpop.permute.xlu0 %4509 }
 0x2ee   :  { %12546 = vmatmul.mubr.msk.f32.gmra.mrb[22].mxu0 %vm331_vm0, %v10232_v57 }
 0x2ef   :  { %12548 = vmatprep.mubr.msk.f32.mxu0 %vm331_vm0, %v10233_v58 }
 0x2f2   :  { %12549 = vmatmul.mubr.msk.f32.gmra.mrb[24].mxu0 %vm331_vm0, %v10234_v30 }
 0x2f3   :  { %12551 = vmatprep.mubr.msk.f32.mxu0 %vm331_vm0, %v10235_v25  ;;  %v13613_v25 = vpack.c.bf16 %v10408_v26, %v10407_v54 }
 0x2f6   :  { %12552 = vmatmul.mubr.msk.f32.gmra.mrb[26].mxu0 %vm331_vm0, %v10236_v59 }
 0x2f7   :  { %12554 = vmatprep.mubr.msk.f32.mxu0 %vm331_vm0, %v10237_v60  ;;  %v10409_v60 = vld [vmem:[%s18057_s4 + $0x60] sm:$0xff] }
 0x2fa   :  { %12555 = vmatmul.mubr.msk.f32.gmra.mrb[28].mxu0 %vm331_vm0, %v10238_v61  ;;  %v10410_v61 = vld [vmem:[%s18057_s4 + $0x68] sm:$0xff] }
 0x2fb   :  { %12557 = vmatprep.mubr.msk.f32.mxu0 %vm331_vm0, %v10239_v62 }
 0x2fe   :  { %12558 = vmatmul.mubr.msk.f32.gmra.mrb[30].mxu0 %vm331_vm0, %v10240_v63 }
 0x2ff   :  { %12560 = vmatprep.mubr.msk.f32.mxu0 %vm331_vm0, %v10241_v0  ;;  %v4520_v0 = vpop.permute.xlu0 %4519 }
 0x302   :  { %12561 = vmatmul.mubr.msk.f32.gmra.mrb[32].mxu0 %vm331_vm0, %v10242_v1 }
 0x303   :  { %12565 = vmatprep.mubr.msk.f32.mxu0 %vm331_vm0, %v10308_v2  ;;  %v13617_v2 = vpack.c.bf16 %v10410_v61, %v10409_v60 }
 0x306   :  { %12566 = vmatmul.mubr.msk.f32.vlgmr.msra.gmra.mrb[2].mxu0 %vm331_vm0, %v10309_v3 }
 0x307   :  { %12568 = vmatprep.mubr.msk.f32.mxu0 %vm331_vm0, %v10310_v4  ;;  %v4495_v50 = vpop.permute.xlu1 %4494 }
 0x30a   :  { %12569 = vmatmul.mubr.msk.f32.gmra.mrb[4].mxu0 %vm331_vm0, %v10311_v6  ;;  %v10411_v6 = vld [vmem:[%s18057_s4 + $0x70] sm:$0xff] }
 0x30b   :  { %12571 = vmatprep.mubr.msk.f32.mxu0 %vm331_vm0, %v10312_v7  ;;  %v4505_v52 = vpop.permute.xlu1 %4504  ;;  %v10412_v7 = vld [vmem:[%s18057_s4 + $0x78] sm:$0xff] }
 0x30e   :  { %12572 = vmatmul.mubr.msk.f32.gmra.mrb[6].mxu0 %vm331_vm0, %v10313_v8 }
 0x30f   :  { %12574 = vmatprep.mubr.msk.f32.mxu0 %vm331_vm0, %v10314_v9  ;;  %v4515_v57 = vpop.permute.xlu1 %4514 }
 0x312   :  { %12575 = vmatmul.mubr.msk.f32.gmra.mrb[8].mxu0 %vm331_vm0, %v10315_v10 }
 0x313   :  { %12577 = vmatprep.mubr.msk.f32.mxu0 %vm331_vm0, %v10316_v12  ;;  %v4525_v3 = vpop.permute.xlu1 %4524  ;;  %v13621_v12 = vpack.c.bf16 %v10412_v7, %v10411_v6 }
 0x316   :  { %12578 = vmatmul.mubr.msk.f32.gmra.mrb[10].mxu0 %vm331_vm0, %v10317_v13 }
 0x317   :  { %12580 = vmatprep.mubr.msk.f32.mxu0 %vm331_vm0, %v10318_v14  ;;  %v4530_v14 = vpop.permute.xlu0 %4529 }
 0x31a   :  { %12581 = vmatmul.mubr.msk.f32.gmra.mrb[12].mxu0 %vm331_vm0, %v10319_v15 }
 0x31b   :  { %12583 = vmatprep.mubr.msk.f32.mxu0 %vm331_vm0, %v10320_v16  ;;  %v4535_v16 = vpop.permute.xlu1 %4534 }
 0x31e   :  { %12584 = vmatmul.mubr.msk.f32.gmra.mrb[14].mxu0 %vm331_vm0, %v10321_v17 }
 0x31f   :  { %12586 = vmatprep.mubr.msk.f32.mxu0 %vm331_vm0, %v10322_v18 }
 0x322   :  { %12587 = vmatmul.mubr.msk.f32.gmra.mrb[16].mxu0 %vm331_vm0, %v10323_v19 }
 0x323   :  { %12589 = vmatprep.mubr.msk.f32.mxu0 %vm331_vm0, %v10324_v20 }
 0x326   :  { %12590 = vmatmul.mubr.msk.f32.gmra.mrb[18].mxu0 %vm331_vm0, %v10325_v21 }
 0x327   :  { %12592 = vmatprep.mubr.msk.f32.mxu0 %vm331_vm0, %v10326_v23  ;;  %v4540_v23 = vpop.permute.xlu0 %4539 }
 0x32a   :  { %12593 = vmatmul.mubr.msk.f32.gmra.mrb[20].mxu0 %vm331_vm0, %v10327_v24 }
 0x32b   :  { %12595 = vmatprep.mubr.msk.f32.mxu0 %vm331_vm0, %v10328_v27  ;;  %v4545_v27 = vpop.permute.xlu1 %4544 }
 0x32e   :  { %12596 = vmatmul.mubr.msk.f32.gmra.mrb[22].mxu0 %vm331_vm0, %v10329_v22 }
 0x32f   :  { %12598 = vmatprep.mubr.msk.f32.mxu0 %vm331_vm0, %v10330_v28 }
 0x332   :  { %12599 = vmatmul.mubr.msk.f32.gmra.mrb[24].mxu0 %vm331_vm0, %v10331_v29 }
 0x333   :  { %12601 = vmatprep.mubr.msk.f32.mxu0 %vm331_vm0, %v10332_v31 }
 0x336   :  { %12602 = vmatmul.mubr.msk.f32.gmra.mrb[26].mxu0 %vm331_vm0, %v10333_v32 }
 0x337   :  { %12604 = vmatprep.mubr.msk.f32.mxu0 %vm331_vm0, %v10334_v33  ;;  %v4550_v33 = vpop.permute.xlu0 %4549 }
 0x33a   :  { %12605 = vmatmul.mubr.msk.f32.gmra.mrb[28].mxu0 %vm331_vm0, %v10335_v34 }
 0x33b   :  { %12607 = vmatprep.mubr.msk.f32.mxu0 %vm331_vm0, %v10336_v35  ;;  %v4555_v35 = vpop.permute.xlu1 %4554  ;;  %v4560_v5 = vpop.permute.xlu0 %4559 }
 0x33e   :  { %12608 = vmatmul.mubr.msk.f32.gmra.mrb[30].mxu0 %vm331_vm0, %v10337_v36 }
 0x33f   :  { %12610 = vmatprep.mubr.msk.f32.mxu0 %vm331_vm0, %v10338_v37  ;;  %v4565_v41 = vpop.permute.xlu1 %4564 }
 0x342   :  { %12611 = vmatmul.mubr.msk.f32.gmra.mrb[32].mxu0 %vm331_vm0, %v10339_v11 }
 0x3d9   :  { %v12567_v53 = vpop.f32.mrb[2].mxu0 }
 0x3da   :  { %v4234_v56 = vpop.f32.mrb[3].mxu0  ;;  %v16712_v30 = vadd.f32 %v12567_v53, %v4465_v45 }
 0x3db   :  { %v16710_v58 = vadd.f32 %v4460_v43, %v4234_v56 }
 0x3dd   :  { %v12570_v59 = vpop.f32.mrb[4].mxu0  ;;  %12629 = vmatprep.mubr.msk.f32.mxu1 %vm4657_vm2, %v16710_v58 }
 0x3de   :  { %v4244_v62 = vpop.f32.mrb[5].mxu0  ;;  %12630 = vmatmul.mubr.msk.f32.vlgmr.msra.gmra.mrb[16].mxu1 %vm4657_vm2, %v16712_v30  ;;  %v16726_v1 = vadd.f32 %v12570_v59, %v4475_v46 }
 0x3df   :  { %v16724_v63 = vadd.f32 %v4470_v44, %v4244_v62  ;;  %13612 = vmatpush3.bf16.msra.mxu1 %v13609_v42 }
 0x3e0   :  { %13614 = vmatprep.subr.bf16.mxu1 %v13613_v25 }
 0x3e1   :  { %v12573_v4 = vpop.f32.mrb[6].mxu0  ;;  %12632 = vmatprep.mubr.msk.f32.mxu1 %vm4657_vm2, %v16724_v63 }
 0x3e2   :  { %v4254_v8 = vpop.f32.mrb[7].mxu0  ;;  %12633 = vmatmul.mubr.msk.f32.gmra.mrb[18].mxu1 %vm4657_vm2, %v16726_v1  ;;  %v16740_v10 = vadd.f32 %v12573_v4, %v4485_v48 }
 0x3e3   :  { %v16738_v9 = vadd.f32 %v4480_v47, %v4254_v8  ;;  %13616 = vmatpush3.bf16.msra.mxu1 %v13613_v25  ;;  %v4570_v47 = vpop.permute.xlu0 %4569 }
 0x3e4   :  { %13618 = vmatprep.subr.bf16.mxu1 %v13617_v2 }
 0x3e5   :  { %v12576_v13 = vpop.f32.mrb[8].mxu0  ;;  %12635 = vmatprep.mubr.msk.f32.mxu1 %vm4657_vm2, %v16738_v9 }
 0x3e6   :  { %v4264_v15 = vpop.f32.mrb[9].mxu0  ;;  %12636 = vmatmul.mubr.msk.f32.gmra.mrb[20].mxu1 %vm4657_vm2, %v16740_v10  ;;  %v16748_v18 = vadd.f32 %v12576_v13, %v4495_v50 }
 0x3e7   :  { %v16746_v17 = vadd.f32 %v4490_v49, %v4264_v15  ;;  %13620 = vmatpush3.bf16.msra.mxu1 %v13617_v2  ;;  %v4575_v49 = vpop.permute.xlu1 %4574  ;;  %v4580_v26 = vpop.permute.xlu0 %4579 }
 0x3e8   :  { %13622 = vmatprep.subr.bf16.mxu1 %v13621_v12 }
 0x3e9   :  { %v12579_v19 = vpop.f32.mrb[10].mxu0  ;;  %12638 = vmatprep.mubr.msk.f32.mxu1 %vm4657_vm2, %v16746_v17 }
 0x3ea   :  { %v4274_v20 = vpop.f32.mrb[11].mxu0  ;;  %12639 = vmatmul.mubr.msk.f32.gmra.mrb[22].mxu1 %vm4657_vm2, %v16748_v18  ;;  %v16756_v24 = vadd.f32 %v12579_v19, %v4505_v52 }
 0x3eb   :  { %v16754_v21 = vadd.f32 %v4500_v51, %v4274_v20  ;;  %13624 = vmatpush3.bf16.msra.mxu1 %v13621_v12  ;;  %v4585_v56 = vpop.permute.xlu1 %4584  ;;  %v4590_v62 = vpop.permute.xlu0 %4589 }
 0x3ec   :  { %18130 = vst [vmem:[#allocation6_spill] sm:$0xff] %v16756_v24 }
 0x3ed   :  { %18129 = vst [vmem:[#allocation5_spill] sm:$0xff] %v16754_v21  ;;  %v12582_v22 = vpop.f32.mrb[12].mxu0  ;;  %12641 = vmatprep.mubr.msk.f32.mxu1 %vm4657_vm2, %v16754_v21 }
 0x3ee   :  { %v4284_v28 = vpop.f32.mrb[13].mxu0  ;;  %12642 = vmatmul.mubr.msk.f32.gmra.mrb[24].mxu1 %vm4657_vm2, %v16756_v24  ;;  %v16764_v31 = vadd.f32 %v12582_v22, %v4515_v57 }
 0x3ef   :  { %v16762_v29 = vadd.f32 %v4510_v55, %v4284_v28  ;;  %v4595_v2 = vpop.permute.xlu1 %4594  ;;  %v4600_v12 = vpop.permute.xlu0 %4599 }
 0x3f0   :  { %18132 = vst [vmem:[#allocation8_spill] sm:$0xff] %v16764_v31 }
 0x3f1   :  { %18131 = vst [vmem:[#allocation7_spill] sm:$0xff] %v16762_v29  ;;  %v12585_v32 = vpop.f32.mrb[14].mxu0  ;;  %12644 = vmatprep.mubr.msk.f32.mxu1 %vm4657_vm2, %v16762_v29 }
 0x3f2   :  { %v4294_v34 = vpop.f32.mrb[15].mxu0  ;;  %12645 = vmatmul.mubr.msk.f32.gmra.mrb[26].mxu1 %vm4657_vm2, %v16764_v31  ;;  %v16772_v37 = vadd.f32 %v12585_v32, %v4525_v3 }
 0x3f3   :  { %v16770_v36 = vadd.f32 %v4520_v0, %v4294_v34 }
 0x3f4   :  { %18134 = vst [vmem:[#allocation10_spill] sm:$0xff] %v16772_v37 }
 0x3f5   :  { %18133 = vst [vmem:[#allocation9_spill] sm:$0xff] %v16770_v36  ;;  %v12588_v11 = vpop.f32.mrb[16].mxu0  ;;  %12647 = vmatprep.mubr.msk.f32.mxu1 %vm4657_vm2, %v16770_v36 }
 0x3f6   :  { %v4304_v38 = vpop.f32.mrb[17].mxu0  ;;  %12648 = vmatmul.mubr.msk.f32.gmra.mrb[28].mxu1 %vm4657_vm2, %v16772_v37  ;;  %v16780_v40 = vadd.f32 %v12588_v11, %v4535_v16 }
 0x3f7   :  { %v16778_v39 = vadd.f32 %v4530_v14, %v4304_v38  ;;  %v4605_v14 = vpop.permute.xlu1 %4604  ;;  %v10446_v38 = vld [vmem:[%s18058_s5 + $0x28] sm:$0xff] }
 0x3f8   :  { %18136 = vst [vmem:[#allocation12_spill] sm:$0xff] %v16780_v40 }
 0x3f9   :  { %18135 = vst [vmem:[#allocation11_spill] sm:$0xff] %v16778_v39  ;;  %v12591_v42 = vpop.f32.mrb[18].mxu0  ;;  %12650 = vmatprep.mubr.msk.f32.mxu1 %vm4657_vm2, %v16778_v39 }
 0x3fa   :  { %v4314_v43 = vpop.f32.mrb[19].mxu0  ;;  %12651 = vmatmul.mubr.msk.f32.gmra.mrb[30].mxu1 %vm4657_vm2, %v16780_v40  ;;  %v16788_v45 = vadd.f32 %v12591_v42, %v4545_v27  ;;  %v4610_v27 = vpop.permute.xlu0 %4609 }
 0x3fb   :  { %v16786_v44 = vadd.f32 %v4540_v23, %v4314_v43  ;;  %v4615_v28 = vpop.permute.xlu1 %4614 }
 0x3fc   :  { %18138 = vst [vmem:[#allocation14_spill] sm:$0xff] %v16788_v45 }
 0x3fd   :  { %18137 = vst [vmem:[#allocation13_spill] sm:$0xff] %v16786_v44  ;;  %v12594_v46 = vpop.f32.mrb[20].mxu0  ;;  %12653 = vmatprep.mubr.msk.f32.mxu1 %vm4657_vm2, %v16786_v44 }
 0x3fe   :  { %v4324_v48 = vpop.f32.mrb[21].mxu0  ;;  %12654 = vmatmul.mubr.msk.f32.gmra.mrb[32].mxu1 %vm4657_vm2, %v16788_v45  ;;  %v16796_v51 = vadd.f32 %v12594_v46, %v4555_v35 }
 0x3ff   :  { %v16794_v50 = vadd.f32 %v4550_v33, %v4324_v48 }
 0x400   :  { %18140 = vst [vmem:[#allocation16_spill] sm:$0xff] %v16796_v51 }
 0x401   :  { %18139 = vst [vmem:[#allocation15_spill] sm:$0xff] %v16794_v50  ;;  %v12597_v52 = vpop.f32.mrb[22].mxu0  ;;  %12656 = vmatprep.mubr.msk.f32.mxu1 %vm4657_vm2, %v16794_v50 }
 0x402   :  { %v4334_v53 = vpop.f32.mrb[23].mxu0  ;;  %12657 = vmatmul.mubr.msk.f32.gmra.mrb[34].mxu1 %vm4657_vm2, %v16796_v51  ;;  %v16804_v55 = vadd.f32 %v12597_v52, %v4565_v41 }
 0x403   :  { %v16802_v54 = vadd.f32 %v4560_v5, %v4334_v53 }
 0x404   :  { %18142 = vst [vmem:[#allocation18_spill] sm:$0xff] %v16804_v55 }
 0x405   :  { %18141 = vst [vmem:[#allocation17_spill] sm:$0xff] %v16802_v54  ;;  %v12600_v57 = vpop.f32.mrb[24].mxu0  ;;  %12659 = vmatprep.mubr.msk.f32.mxu1 %vm4657_vm2, %v16802_v54 }
 0x406   :  { %v4344_v25 = vpop.f32.mrb[25].mxu0  ;;  %12660 = vmatmul.mubr.msk.f32.gmra.mrb[36].mxu1 %vm4657_vm2, %v16804_v55  ;;  %v16812_v60 = vadd.f32 %v12600_v57, %v4575_v49 }
 0x407   :  { %v16810_v59 = vadd.f32 %v4570_v47, %v4344_v25 }
 0x408   :  { %18144 = vst [vmem:[#allocation20_spill] sm:$0xff] %v16812_v60 }
 0x409   :  { %18143 = vst [vmem:[#allocation19_spill] sm:$0xff] %v16810_v59  ;;  %v12603_v61 = vpop.f32.mrb[26].mxu0  ;;  %12662 = vmatprep.mubr.msk.f32.mxu1 %vm4657_vm2, %v16810_v59 }
 0x40a   :  { %v4354_v0 = vpop.f32.mrb[27].mxu0  ;;  %12663 = vmatmul.mubr.msk.f32.gmra.mrb[38].mxu1 %vm4657_vm2, %v16812_v60  ;;  %v16820_v4 = vadd.f32 %v12603_v61, %v4585_v56 }
 0x40b   :  { %v16818_v3 = vadd.f32 %v4580_v26, %v4354_v0 }
 0x40c   :  { %18146 = vst [vmem:[#allocation22_spill] sm:$0xff] %v16820_v4 }
 0x40d   :  { %18145 = vst [vmem:[#allocation21_spill] sm:$0xff] %v16818_v3  ;;  %v12606_v6 = vpop.f32.mrb[28].mxu0  ;;  %12665 = vmatprep.mubr.msk.f32.mxu1 %vm4657_vm2, %v16818_v3 }
 0x40e   :  { %v4364_v7 = vpop.f32.mrb[29].mxu0  ;;  %12666 = vmatmul.mubr.msk.f32.gmra.mrb[40].mxu1 %vm4657_vm2, %v16820_v4  ;;  %v16828_v13 = vadd.f32 %v12606_v6, %v4595_v2 }
 0x40f   :  { %v16826_v8 = vadd.f32 %v4590_v62, %v4364_v7 }
 0x410   :  { %18148 = vst [vmem:[#allocation24_spill] sm:$0xff] %v16828_v13 }
 0x411   :  { %18147 = vst [vmem:[#allocation23_spill] sm:$0xff] %v16826_v8  ;;  %v12609_v15 = vpop.f32.mrb[30].mxu0  ;;  %12668 = vmatprep.mubr.msk.f32.mxu1 %vm4657_vm2, %v16826_v8 }
 0x412   :  { %v4374_v16 = vpop.f32.mrb[31].mxu0  ;;  %12669 = vmatmul.mubr.msk.f32.gmra.mrb[42].mxu1 %vm4657_vm2, %v16828_v13  ;;  %v16836_v20 = vadd.f32 %v12609_v15, %v4605_v14 }
 0x413   :  { %v16834_v19 = vadd.f32 %v4600_v12, %v4374_v16 }
 0x414   :  { %18150 = vst [vmem:[#allocation26_spill] sm:$0xff] %v16836_v20 }
 0x415   :  { %18149 = vst [vmem:[#allocation25_spill] sm:$0xff] %v16834_v19  ;;  %v12612_v23 = vpop.f32.mrb[32].mxu0  ;;  %12671 = vmatprep.mubr.msk.f32.mxu1 %vm4657_vm2, %v16834_v19 }
 0x416   :  { %v4384_v22 = vpop.f32.mrb[33].mxu0  ;;  %12672 = vmatmul.mubr.msk.f32.gmra.mrb[44].mxu1 %vm4657_vm2, %v16836_v20  ;;  %v16844_v33 = vadd.f32 %v12612_v23, %v4615_v28 }
 0x417   :  { %v16842_v32 = vadd.f32 %v4610_v27, %v4384_v22 }
 0x418   :  { %18152 = vst [vmem:[#allocation28_spill] sm:$0xff] %v16844_v33 }
 0x419   :  { %18151 = vst [vmem:[#allocation27_spill] sm:$0xff] %v16842_v32  ;;  %12674 = vmatprep.mubr.msk.f32.mxu1 %vm4657_vm2, %v16842_v32 }
 0x41a   :  { %12675 = vmatmul.mubr.msk.f32.gmra.mrb[46].mxu1 %vm4657_vm2, %v16844_v33 }
 0x41b   :  { %12693 = vmatprep.mubr.msk.f32.mxu1 %vm4657_vm2, %v16710_v58 }
 0x41e   :  { %12694 = vmatmul.mubr.msk.f32.vlgmr.msra.gmra.mrb[48].mxu1 %vm4657_vm2, %v16712_v30 }
 0x41f   :  { %12696 = vmatprep.mubr.msk.f32.mxu1 %vm4657_vm2, %v16724_v63 }
 0x422   :  { %12697 = vmatmul.mubr.msk.f32.gmra.mrb[50].mxu1 %vm4657_vm2, %v16726_v1 }
 0x423   :  { %12699 = vmatprep.mubr.msk.f32.mxu1 %vm4657_vm2, %v16738_v9 }
 0x426   :  { %12700 = vmatmul.mubr.msk.f32.gmra.mrb[52].mxu1 %vm4657_vm2, %v16740_v10 }
 0x427   :  { %12702 = vmatprep.mubr.msk.f32.mxu1 %vm4657_vm2, %v16746_v17 }
 0x42a   :  { %12703 = vmatmul.mubr.msk.f32.gmra.mrb[54].mxu1 %vm4657_vm2, %v16748_v18 }
 0x42b   :  { %12705 = vmatprep.mubr.msk.f32.mxu1 %vm4657_vm2, %v16754_v21 }
 0x42e   :  { %12706 = vmatmul.mubr.msk.f32.gmra.mrb[56].mxu1 %vm4657_vm2, %v16756_v24 }
 0x42f   :  { %12708 = vmatprep.mubr.msk.f32.mxu1 %vm4657_vm2, %v16762_v29 }
 0x432   :  { %12709 = vmatmul.mubr.msk.f32.gmra.mrb[58].mxu1 %vm4657_vm2, %v16764_v31 }
 0x433   :  { %12711 = vmatprep.mubr.msk.f32.mxu1 %vm4657_vm2, %v16770_v36 }
 0x436   :  { %12712 = vmatmul.mubr.msk.f32.gmra.mrb[60].mxu1 %vm4657_vm2, %v16772_v37 }
 0x437   :  { %12714 = vmatprep.mubr.msk.f32.mxu1 %vm4657_vm2, %v16778_v39 }
 0x43a   :  { %12715 = vmatmul.mubr.msk.f32.gmra.mrb[62].mxu1 %vm4657_vm2, %v16780_v40 }
 0x43b   :  { %12717 = vmatprep.mubr.msk.f32.mxu1 %vm4657_vm2, %v16786_v44 }
 0x43e   :  { %12718 = vmatmul.mubr.msk.f32.gmra.mrb[64].mxu1 %vm4657_vm2, %v16788_v45 }
 0x43f   :  { %12720 = vmatprep.mubr.msk.f32.mxu1 %vm4657_vm2, %v16794_v50 }
 0x442   :  { %12721 = vmatmul.mubr.msk.f32.gmra.mrb[66].mxu1 %vm4657_vm2, %v16796_v51 }
 0x443   :  { %12723 = vmatprep.mubr.msk.f32.mxu1 %vm4657_vm2, %v16802_v54 }
 0x446   :  { %12724 = vmatmul.mubr.msk.f32.gmra.mrb[68].mxu1 %vm4657_vm2, %v16804_v55 }
 0x447   :  { %12726 = vmatprep.mubr.msk.f32.mxu1 %vm4657_vm2, %v16810_v59 }
 0x44a   :  { %12727 = vmatmul.mubr.msk.f32.gmra.mrb[70].mxu1 %vm4657_vm2, %v16812_v60 }
 0x44b   :  { %12729 = vmatprep.mubr.msk.f32.mxu1 %vm4657_vm2, %v16818_v3 }
 0x44e   :  { %12730 = vmatmul.mubr.msk.f32.gmra.mrb[72].mxu1 %vm4657_vm2, %v16820_v4 }
 0x44f   :  { %12732 = vmatprep.mubr.msk.f32.mxu1 %vm4657_vm2, %v16826_v8 }
 0x452   :  { %12733 = vmatmul.mubr.msk.f32.gmra.mrb[74].mxu1 %vm4657_vm2, %v16828_v13 }
 0x453   :  { %12735 = vmatprep.mubr.msk.f32.mxu1 %vm4657_vm2, %v16834_v19 }
 0x456   :  { %12736 = vmatmul.mubr.msk.f32.gmra.mrb[76].mxu1 %vm4657_vm2, %v16836_v20 }
 0x457   :  { %12738 = vmatprep.mubr.msk.f32.mxu1 %vm4657_vm2, %v16842_v32 }
 0x45a   :  { %12739 = vmatmul.mubr.msk.f32.gmra.mrb[78].mxu1 %vm4657_vm2, %v16844_v33 }
 0x45b   :  { %5286 = vmatprep.mubr.f32.mxu1 %v10446_v38 }
 0x4b1   :  { %v16914_v34 = vpop.f32.mrb[16].mxu1 }
 0x4b2   :  { %v16916_v35 = vpop.f32.mrb[17].mxu1 }
 0x4b5   :  { %v16923_v5 = vpop.f32.mrb[18].mxu1 }
 0x4b6   :  { %v16925_v41 = vpop.f32.mrb[19].mxu1 }
 0x4b9   :  { %v16929_v43 = vpop.f32.mrb[20].mxu1 }
 0x4ba   :  { %v16931_v46 = vpop.f32.mrb[21].mxu1 }
 0x4bd   :  { %v16935_v48 = vpop.f32.mrb[22].mxu1 }
 0x4be   :  { %v16937_v49 = vpop.f32.mrb[23].mxu1 }
 0x4c1   :  { %v16941_v53 = vpop.f32.mrb[24].mxu1 }
 0x4c2   :  { %v16943_v26 = vpop.f32.mrb[25].mxu1 }
 0x4c5   :  { %v16947_v57 = vpop.f32.mrb[26].mxu1 }
 0x4c6   :  { %v16949_v25 = vpop.f32.mrb[27].mxu1 }
 0x4c9   :  { %v16953_v62 = vpop.f32.mrb[28].mxu1 }
 0x4ca   :  { %v16955_v0 = vpop.f32.mrb[29].mxu1 }
 0x4cd   :  { %v16959_v6 = vpop.f32.mrb[30].mxu1 }
 0x4ce   :  { %v16961_v7 = vpop.f32.mrb[31].mxu1 }
 0x4d1   :  { %v16965_v14 = vpop.f32.mrb[32].mxu1 }
 0x4d2   :  { %v16967_v15 = vpop.f32.mrb[33].mxu1 }
 0x4d5   :  { %v16971_v23 = vpop.f32.mrb[34].mxu1 }
 0x4d6   :  { %v16973_v27 = vpop.f32.mrb[35].mxu1 }
 0x4d9   :  { %v16977_v28 = vpop.f32.mrb[36].mxu1 }
 0x4da   :  { %v16979_v38 = vpop.f32.mrb[37].mxu1 }
 0x4dd   :  { %v16983_v2 = vpop.f32.mrb[38].mxu1 }
 0x4de   :  { %v16985_v61 = vpop.f32.mrb[39].mxu1 }
 0x4e1   :  { %v16989_v52 = vpop.f32.mrb[40].mxu1 }
 0x4e2   :  { %v16991_v47 = vpop.f32.mrb[41].mxu1 }
 0x4e5   :  { %v16995_v22 = vpop.f32.mrb[42].mxu1 }
 0x4e6   :  { %v16997_v11 = vpop.f32.mrb[43].mxu1 }
 0x4e9   :  { %v17001_v16 = vpop.f32.mrb[44].mxu1 }
 0x4ea   :  { %v17003_v33 = vpop.f32.mrb[45].mxu1 }
 0x4ed   :  { %v17007_v32 = vpop.f32.mrb[46].mxu1 }
 0x4ee   :  { %v17009_v20 = vpop.f32.mrb[47].mxu1 }
 0x4f1   :  { %v12695_v19 = vpop.f32.mrb[48].mxu1 }
 0x4f2   :  { %v5058_v13 = vpop.f32.mrb[49].mxu1 }
 0x4f3   :  { %v13627_v8 = vpack.c.bf16 %v12695_v19, %v5058_v13 }
 0x4f5   :  { %v12698_v4 = vpop.f32.mrb[50].mxu1 }
 0x4f6   :  { %v5068_v3 = vpop.f32.mrb[51].mxu1 }
 0x4f7   :  { %v13631_v12 = vpack.c.bf16 %v12698_v4, %v5068_v3 }
 0x4f9   :  { %v12701_v60 = vpop.f32.mrb[52].mxu1 }
 0x4fa   :  { %v5078_v59 = vpop.f32.mrb[53].mxu1 }
 0x4fb   :  { %v13635_v55 = vpack.c.bf16 %v12701_v60, %v5078_v59 }
 0x4fd   :  { %v12704_v54 = vpop.f32.mrb[54].mxu1 }
 0x4fe   :  { %v5088_v51 = vpop.f32.mrb[55].mxu1 }
 0x4ff   :  { %v13639_v50 = vpack.c.bf16 %v12704_v54, %v5088_v51 }
 0x501   :  { %v12707_v56 = vpop.f32.mrb[56].mxu1 }
 0x502   :  { %v5098_v45 = vpop.f32.mrb[57].mxu1 }
 0x503   :  { %v13643_v44 = vpack.c.bf16 %v12707_v56, %v5098_v45 }
 0x505   :  { %v12710_v40 = vpop.f32.mrb[58].mxu1 }
 0x506   :  { %v5108_v39 = vpop.f32.mrb[59].mxu1 }
 0x507   :  { %v13647_v37 = vpack.c.bf16 %v12710_v40, %v5108_v39 }
 0x509   :  { %v12713_v36 = vpop.f32.mrb[60].mxu1 }
 0x50a   :  { %v5118_v42 = vpop.f32.mrb[61].mxu1 }
 0x50b   :  { %v13651_v31 = vpack.c.bf16 %v12713_v36, %v5118_v42 }
 0x50d   :  { %v12716_v29 = vpop.f32.mrb[62].mxu1 }
 0x50e   :  { %v5128_v13 = vpop.f32.mrb[63].mxu1 }
 0x50f   :  { %v13655_v19 = vpack.c.bf16 %v12716_v29, %v5128_v13 }
 0x511   :  { %v12719_v24 = vpop.f32.mrb[64].mxu1 }
 0x512   :  { %v5138_v3 = vpop.f32.mrb[65].mxu1 }
 0x513   :  { %v13625_v4 = vpack.c.bf16 %v12719_v24, %v5138_v3 }
 0x515   :  { %v12722_v21 = vpop.f32.mrb[66].mxu1  ;;  %13626 = vmatprep.subr.bf16.mxu1 %v13625_v4 }
 0x516   :  { %v5148_v59 = vpop.f32.mrb[67].mxu1  ;;  %13628 = vmatpush3.bf16.msra.mxu1 %v13627_v8 }
 0x517   :  { %v13629_v51 = vpack.c.bf16 %v12722_v21, %v5148_v59 }
 0x519   :  { %v12725_v54 = vpop.f32.mrb[68].mxu1  ;;  %13630 = vmatprep.subr.bf16.mxu1 %v13629_v51  ;;  %v18154_v51 = vpack.c.bf16 %v16914_v34, %v16916_v35  ;;  %v18157_v34 = vpack.c.bf16 %v16977_v28, %v16979_v38  ;;  %v18158_v35 = vpack.c.bf16 %v16929_v43, %v16931_v46  ;;  %v18163_v43 = vpack.c.bf16 %v16995_v22, %v16997_v11  ;;  %v18169_v22 = vld [vmem:[#allocation5_spill] sm:$0xff]  ;;  %v18170_v28 = vld [vmem:[#allocation6_spill] sm:$0xff]  ;;  %v18171_v38 = vld [vmem:[#allocation7_spill] sm:$0xff] }
 0x51a   :  { %v5158_v45 = vpop.f32.mrb[69].mxu1  ;;  %13632 = vmatpush3.bf16.msra.mxu1 %v13631_v12  ;;  %v18164_v46 = vpack.c.bf16 %v16947_v57, %v16949_v25  ;;  %v18166_v11 = vpack.c.bf16 %v16953_v62, %v16955_v0  ;;  %v18168_v57 = vpack.c.bf16 %v16959_v6, %v16961_v7  ;;  %v4979_v25 = vld [vmem:[%s18058_s5] sm:$0xff]  ;;  %v10454_v62 = vld [vmem:[%s18057_s4 + $0xa8] sm:$0xff]  ;;  %v4981_v0 = vld [vmem:[%s18058_s5 + $0x10] sm:$0xff] }
 0x51b   :  { %v13633_v60 = vpack.c.bf16 %v12725_v54, %v5158_v45  ;;  %v10455_v6 = vld [vmem:[%s18057_s4 + $0xb0] sm:$0xff]  ;;  %v10456_v7 = vld [vmem:[%s18057_s4 + $0xb8] sm:$0xff]  ;;  %v18172_v54 = vld [vmem:[#allocation8_spill] sm:$0xff] }
 0x51c   :  { %v18173_v45 = vld [vmem:[#allocation9_spill] sm:$0xff] }
 0x51d   :  { %v12728_v39 = vpop.f32.mrb[70].mxu1  ;;  %13634 = vmatprep.subr.bf16.mxu1 %v13633_v60  ;;  %v18174_v60 = vld [vmem:[#allocation10_spill] sm:$0xff] }
 0x51e   :  { %v5168_v40 = vpop.f32.mrb[71].mxu1  ;;  %13636 = vmatpush3.bf16.msra.mxu1 %v13635_v55 }
 0x51f   :  { %v13637_v36 = vpack.c.bf16 %v12728_v39, %v5168_v40  ;;  %v18175_v39 = vld [vmem:[#allocation11_spill] sm:$0xff]  ;;  %v18176_v40 = vld [vmem:[#allocation12_spill] sm:$0xff] }
 0x521   :  { %v12731_v42 = vpop.f32.mrb[72].mxu1  ;;  %13638 = vmatprep.subr.bf16.mxu1 %v13637_v36  ;;  %v18177_v36 = vld [vmem:[#allocation13_spill] sm:$0xff] }
 0x522   :  { %v5178_v29 = vpop.f32.mrb[73].mxu1  ;;  %13640 = vmatpush3.bf16.msra.mxu1 %v13639_v50  ;;  %v10445_v50 = vld [vmem:[%s18058_s5 + $0x20] sm:$0xff] }
 0x523   :  { %v13641_v24 = vpack.c.bf16 %v12731_v42, %v5178_v29  ;;  %v18178_v42 = vld [vmem:[#allocation14_spill] sm:$0xff]  ;;  %v18179_v29 = vld [vmem:[#allocation15_spill] sm:$0xff] }
 0x525   :  { %v12734_v56 = vpop.f32.mrb[74].mxu1  ;;  %13642 = vmatprep.subr.bf16.mxu1 %v13641_v24  ;;  %v18180_v24 = vld [vmem:[#allocation16_spill] sm:$0xff] }
 0x526   :  { %v5188_v13 = vpop.f32.mrb[75].mxu1  ;;  %13644 = vmatpush3.bf16.msra.mxu1 %v13643_v44  ;;  %v18153_v44 = vpack.c.bf16 %v16965_v14, %v16967_v15  ;;  %v4980_v14 = vld [vmem:[%s18058_s5 + $0x8] sm:$0xff]  ;;  %v18156_v15 = vpack.c.bf16 %v16923_v5, %v16925_v41  ;;  %v18161_v5 = vpack.c.bf16 %v16989_v52, %v16991_v47  ;;  %v18162_v41 = vpack.c.bf16 %v16941_v53, %v16943_v26  ;;  %v10449_v47 = vld [vmem:[%s18057_s4 + $0x80] sm:$0xff]  ;;  %v10452_v26 = vld [vmem:[%s18057_s4 + $0x98] sm:$0xff] }
 0x527   :  { %v13645_v21 = vpack.c.bf16 %v12734_v56, %v5188_v13  ;;  %v18167_v52 = vpack.c.bf16 %v17007_v32, %v17009_v20  ;;  %v4982_v20 = vld [vmem:[%s18058_s5 + $0x18] sm:$0xff]  ;;  %v18181_v56 = vld [vmem:[#allocation17_spill] sm:$0xff] }
 0x528   :  { %v18182_v13 = vld [vmem:[#allocation18_spill] sm:$0xff] }
 0x529   :  { %v12737_v8 = vpop.f32.mrb[76].mxu1  ;;  %13646 = vmatprep.subr.bf16.mxu1 %v13645_v21  ;;  %v18183_v21 = vld [vmem:[#allocation19_spill] sm:$0xff] }
 0x52a   :  { %v5198_v3 = vpop.f32.mrb[77].mxu1  ;;  %13648 = vmatpush3.bf16.msra.mxu1 %v13647_v37  ;;  %v10448_v37 = vld [vmem:[%s18058_s5 + $0x38] sm:$0xff] }
 0x52b   :  { %v13649_v12 = vpack.c.bf16 %v12737_v8, %v5198_v3  ;;  %v18184_v8 = vld [vmem:[#allocation20_spill] sm:$0xff]  ;;  %v18185_v3 = vld [vmem:[#allocation21_spill] sm:$0xff] }
 0x52d   :  { %v12740_v4 = vpop.f32.mrb[78].mxu1  ;;  %13650 = vmatprep.subr.bf16.mxu1 %v13649_v12  ;;  %v18186_v12 = vld [vmem:[#allocation22_spill] sm:$0xff] }
 0x52e   :  { %v5208_v59 = vpop.f32.mrb[79].mxu1  ;;  %13652 = vmatpush3.bf16.msra.mxu1 %v13651_v31  ;;  %v10447_v31 = vld [vmem:[%s18058_s5 + $0x30] sm:$0xff] }
 0x52f   :  { %v13653_v55 = vpack.c.bf16 %v12740_v4, %v5208_v59  ;;  %v18187_v4 = vld [vmem:[#allocation23_spill] sm:$0xff]  ;;  %v18188_v59 = vld [vmem:[#allocation24_spill] sm:$0xff] }
 0x531   :  { %13654 = vmatprep.subr.bf16.mxu1 %v13653_v55  ;;  %v18189_v55 = vld [vmem:[#allocation25_spill] sm:$0xff] }
 0x532   :  { %13656 = vmatpush3.bf16.msra.mxu1 %v13655_v19  ;;  %v18155_v19 = vpack.c.bf16 %v16971_v23, %v16973_v27  ;;  %v18159_v23 = vpack.c.bf16 %v16983_v2, %v16985_v61  ;;  %v18160_v27 = vpack.c.bf16 %v16935_v48, %v16937_v49  ;;  %v18165_v48 = vpack.c.bf16 %v17001_v16, %v17003_v33  ;;  %v10450_v49 = vld [vmem:[%s18057_s4 + $0x88] sm:$0xff]  ;;  %v10451_v33 = vld [vmem:[%s18057_s4 + $0x90] sm:$0xff]  ;;  %v10453_v61 = vld [vmem:[%s18057_s4 + $0xa0] sm:$0xff] }
 0x533   :  { %13658 = vmatprep.subr.bf16.mxu1 %v18153_v44  ;;  %v13689_v53 = vpack.c.bf16 %v10450_v49, %v10449_v47  ;;  %v13693_v32 = vpack.c.bf16 %v10452_v26, %v10451_v33  ;;  %v13697_v2 = vpack.c.bf16 %v10454_v62, %v10453_v61  ;;  %v13701_v16 = vpack.c.bf16 %v10456_v7, %v10455_v6  ;;  %v18191_v44 = vld [vmem:[#allocation27_spill] sm:$0xff] }
 0x535   :  { %5287 = vmatmul.mubr.f32.vlgmr.msra.gmra.mrb[80].mxu1 %v10445_v50  ;;  %v18190_v50 = vld [vmem:[#allocation26_spill] sm:$0xff] }
 0x536   :  { %13660 = vmatpush3.bf16.msra.mxu1 %v18154_v51  ;;  %5291 = vmatprep.mubr.f32.mxu1 %v10448_v37  ;;  %v18192_v37 = vld [vmem:[#allocation28_spill] sm:$0xff] }
 0x537   :  { %13662 = vmatprep.subr.bf16.mxu1 %v18155_v19  ;;  %v10490_v51 = vld [vmem:[%s18058_s5 + $0x48] sm:$0xff] }
 0x539   :  { %5292 = vmatmul.mubr.f32.gmra.mrb[82].mxu1 %v10447_v31 }
 0x53a   :  { %13664 = vmatpush3.bf16.msra.mxu1 %v18156_v15  ;;  %5361 = vmatprep.mubr.f32.mxu1 %v4980_v14 }
 0x53b   :  { %13666 = vmatprep.subr.bf16.mxu1 %v18157_v34 }
 0x53e   :  { %13668 = vmatpush3.bf16.msra.mxu1 %v18158_v35 }
 0x53f   :  { %13670 = vmatprep.subr.bf16.mxu1 %v18159_v23 }
 0x542   :  { %13672 = vmatpush3.bf16.msra.mxu1 %v18160_v27 }
 0x543   :  { %13674 = vmatprep.subr.bf16.mxu1 %v18161_v5 }
 0x546   :  { %13676 = vmatpush3.bf16.msra.mxu1 %v18162_v41 }
 0x547   :  { %13678 = vmatprep.subr.bf16.mxu1 %v18163_v43 }
 0x54a   :  { %13680 = vmatpush3.bf16.msra.mxu1 %v18164_v46 }
 0x54b   :  { %13682 = vmatprep.subr.bf16.mxu1 %v18165_v48 }
 0x54e   :  { %13684 = vmatpush3.bf16.msra.mxu1 %v18166_v11 }
 0x54f   :  { %13686 = vmatprep.subr.bf16.mxu1 %v18167_v52 }
 0x552   :  { %13688 = vmatpush3.bf16.msra.mxu1 %v18168_v57 }
 0x553   :  { %13690 = vmatprep.subr.bf16.mxu1 %v13689_v53 }
 0x555   :  { %5362 = vmatmul.mubr.f32.vlgmr.msra.gmra.mrb[84].mxu1 %v4979_v25 }
 0x556   :  { %13692 = vmatpush3.bf16.msra.mxu1 %v13689_v53  ;;  %5366 = vmatprep.mubr.f32.mxu1 %v4982_v20 }
 0x557   :  { %13694 = vmatprep.subr.bf16.mxu1 %v13693_v32 }
 0x559   :  { %5367 = vmatmul.mubr.f32.gmra.mrb[86].mxu1 %v4981_v0 }
 0x55a   :  { %13696 = vmatpush3.bf16.msra.mxu1 %v13693_v32  ;;  %12757 = vmatprep.mubr.msk.f32.mxu1 %vm4657_vm2, %v16710_v58 }
 0x55b   :  { %13698 = vmatprep.subr.bf16.mxu1 %v13697_v2 }
 0x55e   :  { %13700 = vmatpush3.bf16.msra.mxu1 %v13697_v2 }
 0x55f   :  { %13702 = vmatprep.subr.bf16.mxu1 %v13701_v16 }
 0x562   :  { %13704 = vmatpush3.bf16.msra.mxu1 %v13701_v16 }
 0x565   :  { %12758 = vmatmul.mubr.msk.f32.vlgmr.msra.gmra.mrb[88].mxu1 %vm4657_vm2, %v16712_v30 }
 0x566   :  { %12760 = vmatprep.mubr.msk.f32.mxu1 %vm4657_vm2, %v16724_v63 }
 0x569   :  { %12761 = vmatmul.mubr.msk.f32.gmra.mrb[90].mxu1 %vm4657_vm2, %v16726_v1 }
 0x56a   :  { %12763 = vmatprep.mubr.msk.f32.mxu1 %vm4657_vm2, %v16738_v9 }
 0x56d   :  { %12764 = vmatmul.mubr.msk.f32.gmra.mrb[92].mxu1 %vm4657_vm2, %v16740_v10 }
 0x56e   :  { %12766 = vmatprep.mubr.msk.f32.mxu1 %vm4657_vm2, %v16746_v17 }
 0x571   :  { %12767 = vmatmul.mubr.msk.f32.gmra.mrb[94].mxu1 %vm4657_vm2, %v16748_v18 }
 0x572   :  { %12769 = vmatprep.mubr.msk.f32.mxu1 %vm4657_vm2, %v18169_v22 }
 0x575   :  { %12770 = vmatmul.mubr.msk.f32.gmra.mrb[96].mxu1 %vm4657_vm2, %v18170_v28 }
 0x576   :  { %12772 = vmatprep.mubr.msk.f32.mxu1 %vm4657_vm2, %v18171_v38 }
 0x579   :  { %12773 = vmatmul.mubr.msk.f32.gmra.mrb[98].mxu1 %vm4657_vm2, %v18172_v54 }
 0x57a   :  { %12775 = vmatprep.mubr.msk.f32.mxu1 %vm4657_vm2, %v18173_v45 }
 0x57d   :  { %12776 = vmatmul.mubr.msk.f32.gmra.mrb[100].mxu1 %vm4657_vm2, %v18174_v60 }
 0x57e   :  { %12778 = vmatprep.mubr.msk.f32.mxu1 %vm4657_vm2, %v18175_v39 }
 0x581   :  { %12779 = vmatmul.mubr.msk.f32.gmra.mrb[102].mxu1 %vm4657_vm2, %v18176_v40 }
 0x582   :  { %12781 = vmatprep.mubr.msk.f32.mxu1 %vm4657_vm2, %v18177_v36 }
 0x585   :  { %12782 = vmatmul.mubr.msk.f32.gmra.mrb[104].mxu1 %vm4657_vm2, %v18178_v42 }
 0x586   :  { %12784 = vmatprep.mubr.msk.f32.mxu1 %vm4657_vm2, %v18179_v29 }
 0x589   :  { %12785 = vmatmul.mubr.msk.f32.gmra.mrb[106].mxu1 %vm4657_vm2, %v18180_v24 }
 0x58a   :  { %12787 = vmatprep.mubr.msk.f32.mxu1 %vm4657_vm2, %v18181_v56 }
 0x58d   :  { %12788 = vmatmul.mubr.msk.f32.gmra.mrb[108].mxu1 %vm4657_vm2, %v18182_v13 }
 0x58e   :  { %12790 = vmatprep.mubr.msk.f32.mxu1 %vm4657_vm2, %v18183_v21 }
 0x591   :  { %12791 = vmatmul.mubr.msk.f32.gmra.mrb[110].mxu1 %vm4657_vm2, %v18184_v8 }
 0x592   :  { %12793 = vmatprep.mubr.msk.f32.mxu1 %vm4657_vm2, %v18185_v3 }
 0x595   :  { %12794 = vmatmul.mubr.msk.f32.gmra.mrb[112].mxu1 %vm4657_vm2, %v18186_v12 }
 0x596   :  { %12796 = vmatprep.mubr.msk.f32.mxu1 %vm4657_vm2, %v18187_v4 }
 0x599   :  { %12797 = vmatmul.mubr.msk.f32.gmra.mrb[114].mxu1 %vm4657_vm2, %v18188_v59 }
 0x59a   :  { %12799 = vmatprep.mubr.msk.f32.mxu1 %vm4657_vm2, %v18189_v55 }
 0x59d   :  { %12800 = vmatmul.mubr.msk.f32.gmra.mrb[116].mxu1 %vm4657_vm2, %v18190_v50 }
 0x59e   :  { %12802 = vmatprep.mubr.msk.f32.mxu1 %vm4657_vm2, %v18191_v44 }
 0x5a1   :  { %12803 = vmatmul.mubr.msk.f32.gmra.mrb[118].mxu1 %vm4657_vm2, %v18192_v37 }
 0x5a2   :  { %5675 = vmatprep.mubr.f32.mxu1 %v10490_v51 }
 0x608   :  { %v11517_v31 = vpop.f32.mrb[80].mxu1 }
 0x609   :  { %v11518_v19 = vpop.f32.mrb[81].mxu1 }
 0x60a   :  { %v11519_v14 = vadd.f32 %v11518_v19, %v11517_v31 }
 0x60c   :  { %v11520_v15 = vpop.f32.mrb[82].mxu1 }
 0x60d   :  { %v11521_v34 = vpop.f32.mrb[83].mxu1 }
 0x60e   :  { %v11522_v35 = vadd.f32 %v11521_v34, %v11520_v15 }
 0x628   :  { %v11555_v23 = vpop.f32.mrb[84].mxu1 }
 0x629   :  { %v11556_v27 = vpop.f32.mrb[85].mxu1 }
 0x62a   :  { %v11557_v5 = vadd.f32 %v11556_v27, %v11555_v23 }
 0x62c   :  { %v17173_v41 = vadd.f32 %v11557_v5, %v11519_v14  ;;  %v11558_v43 = vpop.f32.mrb[86].mxu1 }
 0x62d   :  { %v11559_v46 = vpop.f32.mrb[87].mxu1 }
 0x62e   :  { %v11560_v48 = vadd.f32 %v11559_v46, %v11558_v43 }
 0x630   :  { %v17175_v47 = vadd.f32 %v11560_v48, %v11522_v35 }
 0x638   :  { %v12759_v49 = vpop.f32.mrb[88].mxu1 }
 0x639   :  { %v5447_v11 = vpop.f32.mrb[89].mxu1 }
 0x63a   :  { %v13707_v52 = vpack.c.bf16 %v12759_v49, %v5447_v11 }
 0x63c   :  { %v12762_v53 = vpop.f32.mrb[90].mxu1 }
 0x63d   :  { %v5457_v33 = vpop.f32.mrb[91].mxu1 }
 0x63e   :  { %v13711_v26 = vpack.c.bf16 %v12762_v53, %v5457_v33 }
 0x640   :  { %v12765_v57 = vpop.f32.mrb[92].mxu1 }
 0x641   :  { %v5467_v25 = vpop.f32.mrb[93].mxu1 }
 0x642   :  { %v13715_v20 = vpack.c.bf16 %v12765_v57, %v5467_v25 }
 0x644   :  { %v12768_v32 = vpop.f32.mrb[94].mxu1 }
 0x645   :  { %v5477_v61 = vpop.f32.mrb[95].mxu1 }
 0x646   :  { %v13719_v62 = vpack.c.bf16 %v12768_v32, %v5477_v61 }
 0x648   :  { %v12771_v0 = vpop.f32.mrb[96].mxu1 }
 0x649   :  { %v5487_v2 = vpop.f32.mrb[97].mxu1 }
 0x64a   :  { %v13723_v6 = vpack.c.bf16 %v12771_v0, %v5487_v2 }
 0x64c   :  { %v12774_v7 = vpop.f32.mrb[98].mxu1 }
 0x64d   :  { %v5497_v16 = vpop.f32.mrb[99].mxu1 }
 0x64e   :  { %v13727_v51 = vpack.c.bf16 %v12774_v7, %v5497_v16 }
 0x650   :  { %v12777_v31 = vpop.f32.mrb[100].mxu1 }
 0x651   :  { %v5507_v19 = vpop.f32.mrb[101].mxu1 }
 0x652   :  { %v13731_v14 = vpack.c.bf16 %v12777_v31, %v5507_v19  ;;  %v10494_v19 = vld [vmem:[%s18057_s4 + $0xc8] sm:$0xff] }
 0x654   :  { %v12780_v15 = vpop.f32.mrb[102].mxu1 }
 0x655   :  { %v5517_v34 = vpop.f32.mrb[103].mxu1 }
 0x656   :  { %v13735_v35 = vpack.c.bf16 %v12780_v15, %v5517_v34 }
 0x658   :  { %v12783_v23 = vpop.f32.mrb[104].mxu1 }
 0x659   :  { %v5527_v27 = vpop.f32.mrb[105].mxu1 }
 0x65a   :  { %v13705_v5 = vpack.c.bf16 %v12783_v23, %v5527_v27  ;;  %v10495_v23 = vld [vmem:[%s18057_s4 + $0xd0] sm:$0xff]  ;;  %v10489_v27 = vld [vmem:[%s18058_s5 + $0x40] sm:$0xff] }
 0x65c   :  { %v12786_v43 = vpop.f32.mrb[106].mxu1  ;;  %13706 = vmatprep.subr.bf16.mxu1 %v13705_v5 }
 0x65d   :  { %v5537_v46 = vpop.f32.mrb[107].mxu1  ;;  %13708 = vmatpush3.bf16.msra.mxu1 %v13707_v52 }
 0x65e   :  { %v13709_v48 = vpack.c.bf16 %v12786_v43, %v5537_v46  ;;  %v10497_v43 = vld [vmem:[%s18057_s4 + $0xe0] sm:$0xff]  ;;  %v10498_v46 = vld [vmem:[%s18057_s4 + $0xe8] sm:$0xff] }
 0x660   :  { %v12789_v49 = vpop.f32.mrb[108].mxu1  ;;  %13710 = vmatprep.subr.bf16.mxu1 %v13709_v48  ;;  %v13745_v48 = vpack.c.bf16 %v10498_v46, %v10497_v43 }
 0x661   :  { %v5547_v11 = vpop.f32.mrb[109].mxu1  ;;  %13712 = vmatpush3.bf16.msra.mxu1 %v13711_v26 }
 0x662   :  { %v13713_v53 = vpack.c.bf16 %v12789_v49, %v5547_v11  ;;  %v10499_v49 = vld [vmem:[%s18057_s4 + $0xf0] sm:$0xff]  ;;  %v10500_v11 = vld [vmem:[%s18057_s4 + $0xf8] sm:$0xff] }
 0x664   :  { %v12792_v33 = vpop.f32.mrb[110].mxu1  ;;  %13714 = vmatprep.subr.bf16.mxu1 %v13713_v53  ;;  %v13749_v53 = vpack.c.bf16 %v10500_v11, %v10499_v49 }
 0x665   :  { %v5557_v57 = vpop.f32.mrb[111].mxu1  ;;  %13716 = vmatpush3.bf16.msra.mxu1 %v13715_v20  ;;  %v10493_v20 = vld [vmem:[%s18057_s4 + $0xc0] sm:$0xff] }
 0x666   :  { %v13717_v25 = vpack.c.bf16 %v12792_v33, %v5557_v57  ;;  %v10534_v33 = vld [vmem:[%s18058_s5 + $0x68] sm:$0xff] }
 0x668   :  { %v12795_v32 = vpop.f32.mrb[112].mxu1  ;;  %13718 = vmatprep.subr.bf16.mxu1 %v13717_v25 }
 0x669   :  { %v5567_v61 = vpop.f32.mrb[113].mxu1  ;;  %13720 = vmatpush3.bf16.msra.mxu1 %v13719_v62 }
 0x66a   :  { %v13721_v0 = vpack.c.bf16 %v12795_v32, %v5567_v61 }
 0x66c   :  { %v12798_v2 = vpop.f32.mrb[114].mxu1  ;;  %13722 = vmatprep.subr.bf16.mxu1 %v13721_v0 }
 0x66d   :  { %v5577_v7 = vpop.f32.mrb[115].mxu1  ;;  %13724 = vmatpush3.bf16.msra.mxu1 %v13723_v6  ;;  %v13737_v6 = vpack.c.bf16 %v10494_v19, %v10493_v20 }
 0x66e   :  { %v13725_v52 = vpack.c.bf16 %v12798_v2, %v5577_v7 }
 0x670   :  { %v12801_v16 = vpop.f32.mrb[116].mxu1  ;;  %13726 = vmatprep.subr.bf16.mxu1 %v13725_v52 }
 0x671   :  { %v5587_v31 = vpop.f32.mrb[117].mxu1  ;;  %13728 = vmatpush3.bf16.msra.mxu1 %v13727_v51  ;;  %v10496_v51 = vld [vmem:[%s18057_s4 + $0xd8] sm:$0xff] }
 0x672   :  { %v13729_v26 = vpack.c.bf16 %v12801_v16, %v5587_v31  ;;  %v13741_v5 = vpack.c.bf16 %v10496_v51, %v10495_v23 }
 0x674   :  { %v12804_v62 = vpop.f32.mrb[118].mxu1  ;;  %13730 = vmatprep.subr.bf16.mxu1 %v13729_v26 }
 0x675   :  { %v5597_v15 = vpop.f32.mrb[119].mxu1  ;;  %13732 = vmatpush3.bf16.msra.mxu1 %v13731_v14  ;;  %v10492_v14 = vld [vmem:[%s18058_s5 + $0x58] sm:$0xff] }
 0x676   :  { %v13733_v34 = vpack.c.bf16 %v12804_v62, %v5597_v15 }
 0x678   :  { %13734 = vmatprep.subr.bf16.mxu1 %v13733_v34 }
 0x679   :  { %13736 = vmatpush3.bf16.msra.mxu1 %v13735_v35  ;;  %v10491_v35 = vld [vmem:[%s18058_s5 + $0x50] sm:$0xff] }
 0x67a   :  { %13738 = vmatprep.subr.bf16.mxu1 %v13737_v6 }
 0x67c   :  { %5676 = vmatmul.mubr.f32.vlgmr.msra.gmra.mrb[120].mxu1 %v10489_v27 }
 0x67d   :  { %13740 = vmatpush3.bf16.msra.mxu1 %v13737_v6  ;;  %5680 = vmatprep.mubr.f32.mxu1 %v10492_v14 }
 0x67e   :  { %13742 = vmatprep.subr.bf16.mxu1 %v13741_v5 }
 0x680   :  { %5681 = vmatmul.mubr.f32.gmra.mrb[122].mxu1 %v10491_v35 }
 0x681   :  { %13744 = vmatpush3.bf16.msra.mxu1 %v13741_v5  ;;  %12821 = vmatprep.mubr.msk.f32.mxu1 %vm4657_vm2, %v16710_v58 }
 0x682   :  { %13746 = vmatprep.subr.bf16.mxu1 %v13745_v48 }
 0x685   :  { %13748 = vmatpush3.bf16.msra.mxu1 %v13745_v48 }
 0x686   :  { %13750 = vmatprep.subr.bf16.mxu1 %v13749_v53 }
 0x689   :  { %13752 = vmatpush3.bf16.msra.mxu1 %v13749_v53 }
 0x68c   :  { %12822 = vmatmul.mubr.msk.f32.vlgmr.msra.gmra.mrb[124].mxu1 %vm4657_vm2, %v16712_v30 }
 0x68d   :  { %12824 = vmatprep.mubr.msk.f32.mxu1 %vm4657_vm2, %v16724_v63 }
 0x690   :  { %12825 = vmatmul.mubr.msk.f32.gmra.mrb[126].mxu1 %vm4657_vm2, %v16726_v1 }
 0x691   :  { %12827 = vmatprep.mubr.msk.f32.mxu1 %vm4657_vm2, %v16738_v9 }
 0x694   :  { %12828 = vmatmul.mubr.msk.f32.gmra.mrb[128].mxu1 %vm4657_vm2, %v16740_v10 }
 0x695   :  { %12830 = vmatprep.mubr.msk.f32.mxu1 %vm4657_vm2, %v16746_v17 }
 0x698   :  { %12831 = vmatmul.mubr.msk.f32.gmra.mrb[130].mxu1 %vm4657_vm2, %v16748_v18 }
 0x699   :  { %12833 = vmatprep.mubr.msk.f32.mxu1 %vm4657_vm2, %v18169_v22 }
 0x69c   :  { %12834 = vmatmul.mubr.msk.f32.gmra.mrb[132].mxu1 %vm4657_vm2, %v18170_v28 }
 0x69d   :  { %12836 = vmatprep.mubr.msk.f32.mxu1 %vm4657_vm2, %v18171_v38 }
 0x6a0   :  { %12837 = vmatmul.mubr.msk.f32.gmra.mrb[134].mxu1 %vm4657_vm2, %v18172_v54 }
 0x6a1   :  { %12839 = vmatprep.mubr.msk.f32.mxu1 %vm4657_vm2, %v18173_v45 }
 0x6a4   :  { %12840 = vmatmul.mubr.msk.f32.gmra.mrb[136].mxu1 %vm4657_vm2, %v18174_v60 }
 0x6a5   :  { %12842 = vmatprep.mubr.msk.f32.mxu1 %vm4657_vm2, %v18175_v39 }
 0x6a8   :  { %12843 = vmatmul.mubr.msk.f32.gmra.mrb[138].mxu1 %vm4657_vm2, %v18176_v40 }
 0x6a9   :  { %12845 = vmatprep.mubr.msk.f32.mxu1 %vm4657_vm2, %v18177_v36 }
 0x6ac   :  { %12846 = vmatmul.mubr.msk.f32.gmra.mrb[140].mxu1 %vm4657_vm2, %v18178_v42 }
 0x6ad   :  { %12848 = vmatprep.mubr.msk.f32.mxu1 %vm4657_vm2, %v18179_v29 }
 0x6b0   :  { %12849 = vmatmul.mubr.msk.f32.gmra.mrb[142].mxu1 %vm4657_vm2, %v18180_v24 }
 0x6b1   :  { %12851 = vmatprep.mubr.msk.f32.mxu1 %vm4657_vm2, %v18181_v56 }
 0x6b4   :  { %12852 = vmatmul.mubr.msk.f32.gmra.mrb[144].mxu1 %vm4657_vm2, %v18182_v13 }
 0x6b5   :  { %12854 = vmatprep.mubr.msk.f32.mxu1 %vm4657_vm2, %v18183_v21 }
 0x6b8   :  { %12855 = vmatmul.mubr.msk.f32.gmra.mrb[146].mxu1 %vm4657_vm2, %v18184_v8 }
 0x6b9   :  { %12857 = vmatprep.mubr.msk.f32.mxu1 %vm4657_vm2, %v18185_v3 }
 0x6bc   :  { %12858 = vmatmul.mubr.msk.f32.gmra.mrb[148].mxu1 %vm4657_vm2, %v18186_v12 }
 0x6bd   :  { %12860 = vmatprep.mubr.msk.f32.mxu1 %vm4657_vm2, %v18187_v4 }
 0x6c0   :  { %12861 = vmatmul.mubr.msk.f32.gmra.mrb[150].mxu1 %vm4657_vm2, %v18188_v59 }
 0x6c1   :  { %12863 = vmatprep.mubr.msk.f32.mxu1 %vm4657_vm2, %v18189_v55 }
 0x6c4   :  { %12864 = vmatmul.mubr.msk.f32.gmra.mrb[152].mxu1 %vm4657_vm2, %v18190_v50 }
 0x6c5   :  { %12866 = vmatprep.mubr.msk.f32.mxu1 %vm4657_vm2, %v18191_v44 }
 0x6c8   :  { %12867 = vmatmul.mubr.msk.f32.gmra.mrb[154].mxu1 %vm4657_vm2, %v18192_v37 }
 0x6c9   :  { %5991 = vmatprep.mubr.f32.mxu1 %v10534_v33 }
 0x74f   :  { %v11633_v57 = vpop.f32.mrb[120].mxu1 }
 0x750   :  { %v11634_v25 = vpop.f32.mrb[121].mxu1 }
 0x751   :  { %v11635_v32 = vadd.f32 %v11634_v25, %v11633_v57 }
 0x753   :  { %v17278_v61 = vadd.f32 %v11635_v32, %v17173_v41  ;;  %v11636_v0 = vpop.f32.mrb[122].mxu1 }
 0x754   :  { %v11637_v2 = vpop.f32.mrb[123].mxu1 }
 0x755   :  { %v11638_v7 = vadd.f32 %v11637_v2, %v11636_v0 }
 0x757   :  { %v17281_v52 = vadd.f32 %v11638_v7, %v17175_v47 }
 0x75f   :  { %v12823_v16 = vpop.f32.mrb[124].mxu1 }
 0x760   :  { %v5763_v31 = vpop.f32.mrb[125].mxu1 }
 0x761   :  { %v13755_v26 = vpack.c.bf16 %v12823_v16, %v5763_v31 }
 0x763   :  { %v12826_v20 = vpop.f32.mrb[126].mxu1 }
 0x764   :  { %v5773_v19 = vpop.f32.mrb[127].mxu1 }
 0x765   :  { %v13759_v62 = vpack.c.bf16 %v12826_v20, %v5773_v19 }
 0x767   :  { %v12829_v15 = vpop.f32.mrb[128].mxu1 }
 0x768   :  { %v5783_v34 = vpop.f32.mrb[129].mxu1 }
 0x769   :  { %v13763_v6 = vpack.c.bf16 %v12829_v15, %v5783_v34 }
 0x76b   :  { %v12832_v23 = vpop.f32.mrb[130].mxu1 }
 0x76c   :  { %v5793_v51 = vpop.f32.mrb[131].mxu1 }
 0x76d   :  { %v13767_v27 = vpack.c.bf16 %v12832_v23, %v5793_v51 }
 0x76f   :  { %v12835_v41 = vpop.f32.mrb[132].mxu1 }
 0x770   :  { %v5803_v14 = vpop.f32.mrb[133].mxu1 }
 0x771   :  { %v13771_v5 = vpack.c.bf16 %v12835_v41, %v5803_v14 }
 0x773   :  { %v12838_v43 = vpop.f32.mrb[134].mxu1 }
 0x774   :  { %v5813_v46 = vpop.f32.mrb[135].mxu1 }
 0x775   :  { %v13775_v35 = vpack.c.bf16 %v12838_v43, %v5813_v46 }
 0x777   :  { %v12841_v47 = vpop.f32.mrb[136].mxu1 }
 0x778   :  { %v5823_v48 = vpop.f32.mrb[137].mxu1 }
 0x779   :  { %v13779_v49 = vpack.c.bf16 %v12841_v47, %v5823_v48  ;;  %v10538_v48 = vld [vmem:[%s18057_s4 + $0x108] sm:$0xff] }
 0x77b   :  { %v12844_v11 = vpop.f32.mrb[138].mxu1 }
 0x77c   :  { %v5833_v53 = vpop.f32.mrb[139].mxu1 }
 0x77d   :  { %v13783_v33 = vpack.c.bf16 %v12844_v11, %v5833_v53 }
 0x77f   :  { %v12847_v57 = vpop.f32.mrb[140].mxu1 }
 0x780   :  { %v5843_v25 = vpop.f32.mrb[141].mxu1 }
 0x781   :  { %v13753_v32 = vpack.c.bf16 %v12847_v57, %v5843_v25  ;;  %v10539_v57 = vld [vmem:[%s18057_s4 + $0x110] sm:$0xff]  ;;  %v10533_v25 = vld [vmem:[%s18058_s5 + $0x60] sm:$0xff] }
 0x783   :  { %v12850_v0 = vpop.f32.mrb[142].mxu1  ;;  %13754 = vmatprep.subr.bf16.mxu1 %v13753_v32 }
 0x784   :  { %v5853_v2 = vpop.f32.mrb[143].mxu1  ;;  %13756 = vmatpush3.bf16.msra.mxu1 %v13755_v26 }
 0x785   :  { %v13757_v7 = vpack.c.bf16 %v12850_v0, %v5853_v2  ;;  %v10541_v0 = vld [vmem:[%s18057_s4 + $0x120] sm:$0xff]  ;;  %v10542_v2 = vld [vmem:[%s18057_s4 + $0x128] sm:$0xff] }
 0x787   :  { %v12853_v16 = vpop.f32.mrb[144].mxu1  ;;  %13758 = vmatprep.subr.bf16.mxu1 %v13757_v7  ;;  %v13793_v7 = vpack.c.bf16 %v10542_v2, %v10541_v0 }
 0x788   :  { %v5863_v31 = vpop.f32.mrb[145].mxu1  ;;  %13760 = vmatpush3.bf16.msra.mxu1 %v13759_v62 }
 0x789   :  { %v13761_v20 = vpack.c.bf16 %v12853_v16, %v5863_v31  ;;  %v10543_v16 = vld [vmem:[%s18057_s4 + $0x130] sm:$0xff]  ;;  %v10544_v31 = vld [vmem:[%s18057_s4 + $0x138] sm:$0xff] }
 0x78b   :  { %v12856_v19 = vpop.f32.mrb[146].mxu1  ;;  %13762 = vmatprep.subr.bf16.mxu1 %v13761_v20  ;;  %v13797_v20 = vpack.c.bf16 %v10544_v31, %v10543_v16 }
 0x78c   :  { %v5873_v15 = vpop.f32.mrb[147].mxu1  ;;  %13764 = vmatpush3.bf16.msra.mxu1 %v13763_v6  ;;  %v10537_v6 = vld [vmem:[%s18057_s4 + $0x100] sm:$0xff] }
 0x78d   :  { %v13765_v34 = vpack.c.bf16 %v12856_v19, %v5873_v15  ;;  %v10578_v19 = vld [vmem:[%s18058_s5 + $0x88] sm:$0xff] }
 0x78e   :  { %6307 = vmatprep.mubr.f32.mxu0 %v10578_v19 }
 0x78f   :  { %v12859_v23 = vpop.f32.mrb[148].mxu1  ;;  %13766 = vmatprep.subr.bf16.mxu1 %v13765_v34 }
 0x790   :  { %v5883_v51 = vpop.f32.mrb[149].mxu1  ;;  %13768 = vmatpush3.bf16.msra.mxu1 %v13767_v27 }
 0x791   :  { %v13769_v41 = vpack.c.bf16 %v12859_v23, %v5883_v51 }
 0x793   :  { %v12862_v14 = vpop.f32.mrb[150].mxu1  ;;  %13770 = vmatprep.subr.bf16.mxu1 %v13769_v41 }
 0x794   :  { %v5893_v43 = vpop.f32.mrb[151].mxu1  ;;  %13772 = vmatpush3.bf16.msra.mxu1 %v13771_v5  ;;  %v13785_v5 = vpack.c.bf16 %v10538_v48, %v10537_v6 }
 0x795   :  { %v13773_v26 = vpack.c.bf16 %v12862_v14, %v5893_v43 }
 0x797   :  { %v12865_v46 = vpop.f32.mrb[152].mxu1  ;;  %13774 = vmatprep.subr.bf16.mxu1 %v13773_v26 }
 0x798   :  { %v5903_v47 = vpop.f32.mrb[153].mxu1  ;;  %13776 = vmatpush3.bf16.msra.mxu1 %v13775_v35  ;;  %v10540_v35 = vld [vmem:[%s18057_s4 + $0x118] sm:$0xff] }
 0x799   :  { %v13777_v62 = vpack.c.bf16 %v12865_v46, %v5903_v47  ;;  %v13789_v32 = vpack.c.bf16 %v10540_v35, %v10539_v57 }
 0x79b   :  { %v12868_v27 = vpop.f32.mrb[154].mxu1  ;;  %13778 = vmatprep.subr.bf16.mxu1 %v13777_v62 }
 0x79c   :  { %v5913_v11 = vpop.f32.mrb[155].mxu1  ;;  %13780 = vmatpush3.bf16.msra.mxu1 %v13779_v49  ;;  %v10536_v49 = vld [vmem:[%s18058_s5 + $0x78] sm:$0xff] }
 0x79d   :  { %v13781_v53 = vpack.c.bf16 %v12868_v27, %v5913_v11 }
 0x79f   :  { %13782 = vmatprep.subr.bf16.mxu1 %v13781_v53 }
 0x7a0   :  { %13784 = vmatpush3.bf16.msra.mxu1 %v13783_v33  ;;  %v10535_v33 = vld [vmem:[%s18058_s5 + $0x70] sm:$0xff] }
 0x7a1   :  { %13786 = vmatprep.subr.bf16.mxu1 %v13785_v5 }
 0x7a3   :  { %5992 = vmatmul.mubr.f32.vlgmr.msra.gmra.mrb[156].mxu1 %v10533_v25 }
 0x7a4   :  { %13788 = vmatpush3.bf16.msra.mxu1 %v13785_v5  ;;  %5996 = vmatprep.mubr.f32.mxu1 %v10536_v49 }
 0x7a5   :  { %13790 = vmatprep.subr.bf16.mxu1 %v13789_v32 }
 0x7a7   :  { %5997 = vmatmul.mubr.f32.gmra.mrb[158].mxu1 %v10535_v33 }
 0x7a8   :  { %13792 = vmatpush3.bf16.msra.mxu1 %v13789_v32  ;;  %12885 = vmatprep.mubr.msk.f32.mxu1 %vm4657_vm2, %v16710_v58 }
 0x7a9   :  { %13794 = vmatprep.subr.bf16.mxu1 %v13793_v7 }
 0x7ac   :  { %13796 = vmatpush3.bf16.msra.mxu1 %v13793_v7 }
 0x7ad   :  { %13798 = vmatprep.subr.bf16.mxu1 %v13797_v20 }
 0x7b0   :  { %13800 = vmatpush3.bf16.msra.mxu1 %v13797_v20 }
 0x7b3   :  { %12886 = vmatmul.mubr.msk.f32.vlgmr.msra.gmra.mrb[160].mxu1 %vm4657_vm2, %v16712_v30 }
 0x7b4   :  { %12888 = vmatprep.mubr.msk.f32.mxu1 %vm4657_vm2, %v16724_v63 }
 0x7b7   :  { %12889 = vmatmul.mubr.msk.f32.gmra.mrb[162].mxu1 %vm4657_vm2, %v16726_v1 }
 0x7b8   :  { %12891 = vmatprep.mubr.msk.f32.mxu1 %vm4657_vm2, %v16738_v9 }
 0x7bb   :  { %12892 = vmatmul.mubr.msk.f32.gmra.mrb[164].mxu1 %vm4657_vm2, %v16740_v10 }
 0x7bc   :  { %12894 = vmatprep.mubr.msk.f32.mxu1 %vm4657_vm2, %v16746_v17 }
 0x7bf   :  { %12895 = vmatmul.mubr.msk.f32.gmra.mrb[166].mxu1 %vm4657_vm2, %v16748_v18 }
 0x7c0   :  { %12897 = vmatprep.mubr.msk.f32.mxu1 %vm4657_vm2, %v18169_v22 }
 0x7c3   :  { %12898 = vmatmul.mubr.msk.f32.gmra.mrb[168].mxu1 %vm4657_vm2, %v18170_v28 }
 0x7c4   :  { %12900 = vmatprep.mubr.msk.f32.mxu1 %vm4657_vm2, %v18171_v38 }
 0x7c7   :  { %12901 = vmatmul.mubr.msk.f32.gmra.mrb[170].mxu1 %vm4657_vm2, %v18172_v54 }
 0x7c8   :  { %12903 = vmatprep.mubr.msk.f32.mxu1 %vm4657_vm2, %v18173_v45 }
 0x7cb   :  { %12904 = vmatmul.mubr.msk.f32.gmra.mrb[172].mxu1 %vm4657_vm2, %v18174_v60 }
 0x7cc   :  { %12906 = vmatprep.mubr.msk.f32.mxu1 %vm4657_vm2, %v18175_v39 }
 0x7cf   :  { %12907 = vmatmul.mubr.msk.f32.gmra.mrb[174].mxu1 %vm4657_vm2, %v18176_v40 }
 0x7d0   :  { %12909 = vmatprep.mubr.msk.f32.mxu1 %vm4657_vm2, %v18177_v36 }
 0x7d3   :  { %12910 = vmatmul.mubr.msk.f32.gmra.mrb[176].mxu1 %vm4657_vm2, %v18178_v42 }
 0x7d4   :  { %12912 = vmatprep.mubr.msk.f32.mxu1 %vm4657_vm2, %v18179_v29 }
 0x7d7   :  { %12913 = vmatmul.mubr.msk.f32.gmra.mrb[178].mxu1 %vm4657_vm2, %v18180_v24 }
 0x7d8   :  { %12915 = vmatprep.mubr.msk.f32.mxu1 %vm4657_vm2, %v18181_v56 }
 0x7db   :  { %12916 = vmatmul.mubr.msk.f32.gmra.mrb[180].mxu1 %vm4657_vm2, %v18182_v13 }
 0x7dc   :  { %12918 = vmatprep.mubr.msk.f32.mxu1 %vm4657_vm2, %v18183_v21 }
 0x7df   :  { %12919 = vmatmul.mubr.msk.f32.gmra.mrb[182].mxu1 %vm4657_vm2, %v18184_v8 }
 0x7e0   :  { %12921 = vmatprep.mubr.msk.f32.mxu1 %vm4657_vm2, %v18185_v3 }
 0x7e3   :  { %12922 = vmatmul.mubr.msk.f32.gmra.mrb[184].mxu1 %vm4657_vm2, %v18186_v12 }
 0x7e4   :  { %12924 = vmatprep.mubr.msk.f32.mxu1 %vm4657_vm2, %v18187_v4 }
 0x7e7   :  { %12925 = vmatmul.mubr.msk.f32.gmra.mrb[186].mxu1 %vm4657_vm2, %v18188_v59 }
 0x7e8   :  { %12927 = vmatprep.mubr.msk.f32.mxu1 %vm4657_vm2, %v18189_v55 }
 0x7eb   :  { %12928 = vmatmul.mubr.msk.f32.gmra.mrb[188].mxu1 %vm4657_vm2, %v18190_v50 }
 0x7ec   :  { %12930 = vmatprep.mubr.msk.f32.mxu1 %vm4657_vm2, %v18191_v44 }
 0x7ef   :  { %12931 = vmatmul.mubr.msk.f32.gmra.mrb[190].mxu1 %vm4657_vm2, %v18192_v37 }
 0x876   :  { %v11711_v15 = vpop.f32.mrb[156].mxu1 }
 0x877   :  { %v11712_v34 = vpop.f32.mrb[157].mxu1 }
 0x878   :  { %v11713_v23 = vadd.f32 %v11712_v34, %v11711_v15 }
 0x87a   :  { %v17384_v51 = vadd.f32 %v11713_v23, %v17278_v61  ;;  %v11714_v41 = vpop.f32.mrb[158].mxu1 }
 0x87b   :  { %v11715_v14 = vpop.f32.mrb[159].mxu1 }
 0x87c   :  { %v11716_v43 = vadd.f32 %v11715_v14, %v11714_v41 }
 0x87e   :  { %v17387_v26 = vadd.f32 %v11716_v43, %v17281_v52 }
 0x886   :  { %v12887_v46 = vpop.f32.mrb[160].mxu1 }
 0x887   :  { %v6079_v47 = vpop.f32.mrb[161].mxu1 }
 0x888   :  { %v13803_v62 = vpack.c.bf16 %v12887_v46, %v6079_v47 }
 0x88a   :  { %v12890_v6 = vpop.f32.mrb[162].mxu1 }
 0x88b   :  { %v6089_v48 = vpop.f32.mrb[163].mxu1 }
 0x88c   :  { %v13807_v27 = vpack.c.bf16 %v12890_v6, %v6089_v48 }
 0x88e   :  { %v12893_v11 = vpop.f32.mrb[164].mxu1 }
 0x88f   :  { %v6099_v53 = vpop.f32.mrb[165].mxu1 }
 0x890   :  { %v13811_v5 = vpack.c.bf16 %v12893_v11, %v6099_v53 }
 0x892   :  { %v12896_v57 = vpop.f32.mrb[166].mxu1 }
 0x893   :  { %v6109_v35 = vpop.f32.mrb[167].mxu1 }
 0x894   :  { %v13815_v25 = vpack.c.bf16 %v12896_v57, %v6109_v35 }
 0x896   :  { %v12899_v61 = vpop.f32.mrb[168].mxu1 }
 0x897   :  { %v6119_v49 = vpop.f32.mrb[169].mxu1 }
 0x898   :  { %v13819_v32 = vpack.c.bf16 %v12899_v61, %v6119_v49 }
 0x89a   :  { %v12902_v0 = vpop.f32.mrb[170].mxu1 }
 0x89b   :  { %v6129_v2 = vpop.f32.mrb[171].mxu1 }
 0x89c   :  { %v13823_v33 = vpack.c.bf16 %v12902_v0, %v6129_v2 }
 0x89e   :  { %v12905_v52 = vpop.f32.mrb[172].mxu1 }
 0x89f   :  { %v6139_v7 = vpop.f32.mrb[173].mxu1 }
 0x8a0   :  { %v13827_v16 = vpack.c.bf16 %v12905_v52, %v6139_v7  ;;  %v10582_v7 = vld [vmem:[%s18057_s4 + $0x148] sm:$0xff] }
 0x8a2   :  { %v12908_v31 = vpop.f32.mrb[174].mxu1 }
 0x8a3   :  { %v6149_v20 = vpop.f32.mrb[175].mxu1 }
 0x8a4   :  { %v13831_v19 = vpack.c.bf16 %v12908_v31, %v6149_v20 }
 0x8a6   :  { %v12911_v15 = vpop.f32.mrb[176].mxu1 }
 0x8a7   :  { %v6159_v34 = vpop.f32.mrb[177].mxu1 }
 0x8a8   :  { %v13801_v23 = vpack.c.bf16 %v12911_v15, %v6159_v34  ;;  %v10583_v15 = vld [vmem:[%s18057_s4 + $0x150] sm:$0xff]  ;;  %v10577_v34 = vld [vmem:[%s18058_s5 + $0x80] sm:$0xff] }
 0x8aa   :  { %v12914_v41 = vpop.f32.mrb[178].mxu1  ;;  %13802 = vmatprep.subr.bf16.mxu0 %v13801_v23 }
 0x8ab   :  { %v6169_v14 = vpop.f32.mrb[179].mxu1  ;;  %13804 = vmatpush3.bf16.msra.mxu0 %v13803_v62 }
 0x8ac   :  { %v13805_v43 = vpack.c.bf16 %v12914_v41, %v6169_v14  ;;  %v10585_v41 = vld [vmem:[%s18057_s4 + $0x160] sm:$0xff]  ;;  %v10586_v14 = vld [vmem:[%s18057_s4 + $0x168] sm:$0xff] }
 0x8ae   :  { %v12917_v46 = vpop.f32.mrb[180].mxu1  ;;  %13806 = vmatprep.subr.bf16.mxu0 %v13805_v43  ;;  %v13841_v43 = vpack.c.bf16 %v10586_v14, %v10585_v41 }
 0x8af   :  { %v6179_v47 = vpop.f32.mrb[181].mxu1  ;;  %13808 = vmatpush3.bf16.msra.mxu0 %v13807_v27 }
 0x8b0   :  { %v13809_v6 = vpack.c.bf16 %v12917_v46, %v6179_v47  ;;  %v10587_v46 = vld [vmem:[%s18057_s4 + $0x170] sm:$0xff]  ;;  %v10588_v47 = vld [vmem:[%s18057_s4 + $0x178] sm:$0xff] }
 0x8b2   :  { %v12920_v48 = vpop.f32.mrb[182].mxu1  ;;  %13810 = vmatprep.subr.bf16.mxu0 %v13809_v6  ;;  %v13845_v6 = vpack.c.bf16 %v10588_v47, %v10587_v46 }
 0x8b3   :  { %v6189_v11 = vpop.f32.mrb[183].mxu1  ;;  %13812 = vmatpush3.bf16.msra.mxu0 %v13811_v5  ;;  %v10581_v5 = vld [vmem:[%s18057_s4 + $0x140] sm:$0xff] }
 0x8b4   :  { %v13813_v53 = vpack.c.bf16 %v12920_v48, %v6189_v11  ;;  %v10622_v48 = vld [vmem:[%s18058_s5 + $0xa8] sm:$0xff] }
 0x8b5   :  { %6623 = vmatprep.mubr.f32.mxu1 %v10622_v48 }
 0x8b6   :  { %v12923_v57 = vpop.f32.mrb[184].mxu1  ;;  %13814 = vmatprep.subr.bf16.mxu0 %v13813_v53 }
 0x8b7   :  { %v6199_v35 = vpop.f32.mrb[185].mxu1  ;;  %13816 = vmatpush3.bf16.msra.mxu0 %v13815_v25 }
 0x8b8   :  { %v13817_v61 = vpack.c.bf16 %v12923_v57, %v6199_v35 }
 0x8ba   :  { %v12926_v49 = vpop.f32.mrb[186].mxu1  ;;  %13818 = vmatprep.subr.bf16.mxu0 %v13817_v61 }
 0x8bb   :  { %v6209_v0 = vpop.f32.mrb[187].mxu1  ;;  %13820 = vmatpush3.bf16.msra.mxu0 %v13819_v32  ;;  %v13833_v32 = vpack.c.bf16 %v10582_v7, %v10581_v5 }
 0x8bc   :  { %v13821_v62 = vpack.c.bf16 %v12926_v49, %v6209_v0 }
 0x8be   :  { %v12929_v2 = vpop.f32.mrb[188].mxu1  ;;  %13822 = vmatprep.subr.bf16.mxu0 %v13821_v62 }
 0x8bf   :  { %v6219_v52 = vpop.f32.mrb[189].mxu1  ;;  %13824 = vmatpush3.bf16.msra.mxu0 %v13823_v33  ;;  %v10584_v33 = vld [vmem:[%s18057_s4 + $0x158] sm:$0xff] }
 0x8c0   :  { %v13825_v27 = vpack.c.bf16 %v12929_v2, %v6219_v52  ;;  %v13837_v23 = vpack.c.bf16 %v10584_v33, %v10583_v15 }
 0x8c2   :  { %v12932_v25 = vpop.f32.mrb[190].mxu1  ;;  %13826 = vmatprep.subr.bf16.mxu0 %v13825_v27 }
 0x8c3   :  { %v6229_v31 = vpop.f32.mrb[191].mxu1  ;;  %13828 = vmatpush3.bf16.msra.mxu0 %v13827_v16  ;;  %v10580_v16 = vld [vmem:[%s18058_s5 + $0x98] sm:$0xff] }
 0x8c4   :  { %v13829_v20 = vpack.c.bf16 %v12932_v25, %v6229_v31 }
 0x8c6   :  { %13830 = vmatprep.subr.bf16.mxu0 %v13829_v20 }
 0x8c7   :  { %13832 = vmatpush3.bf16.msra.mxu0 %v13831_v19  ;;  %v10579_v19 = vld [vmem:[%s18058_s5 + $0x90] sm:$0xff] }
 0x8c8   :  { %13834 = vmatprep.subr.bf16.mxu0 %v13833_v32 }
 0x8ca   :  { %6308 = vmatmul.mubr.f32.vlgmr.msra.gmra.mrb[34].mxu0 %v10577_v34 }
 0x8cb   :  { %13836 = vmatpush3.bf16.msra.mxu0 %v13833_v32  ;;  %6312 = vmatprep.mubr.f32.mxu0 %v10580_v16 }
 0x8cc   :  { %13838 = vmatprep.subr.bf16.mxu0 %v13837_v23 }
 0x8ce   :  { %6313 = vmatmul.mubr.f32.gmra.mrb[36].mxu0 %v10579_v19 }
 0x8cf   :  { %13840 = vmatpush3.bf16.msra.mxu0 %v13837_v23  ;;  %12949 = vmatprep.mubr.msk.f32.mxu0 %vm4657_vm2, %v16710_v58 }
 0x8d0   :  { %13842 = vmatprep.subr.bf16.mxu0 %v13841_v43 }
 0x8d3   :  { %13844 = vmatpush3.bf16.msra.mxu0 %v13841_v43 }
 0x8d4   :  { %13846 = vmatprep.subr.bf16.mxu0 %v13845_v6 }
 0x8d7   :  { %13848 = vmatpush3.bf16.msra.mxu0 %v13845_v6 }
 0x8da   :  { %12950 = vmatmul.mubr.msk.f32.vlgmr.msra.gmra.mrb[38].mxu0 %vm4657_vm2, %v16712_v30 }
 0x8db   :  { %12952 = vmatprep.mubr.msk.f32.mxu0 %vm4657_vm2, %v16724_v63 }
 0x8de   :  { %12953 = vmatmul.mubr.msk.f32.gmra.mrb[40].mxu0 %vm4657_vm2, %v16726_v1 }
 0x8df   :  { %12955 = vmatprep.mubr.msk.f32.mxu0 %vm4657_vm2, %v16738_v9 }
 0x8e2   :  { %12956 = vmatmul.mubr.msk.f32.gmra.mrb[42].mxu0 %vm4657_vm2, %v16740_v10 }
 0x8e3   :  { %12958 = vmatprep.mubr.msk.f32.mxu0 %vm4657_vm2, %v16746_v17 }
 0x8e6   :  { %12959 = vmatmul.mubr.msk.f32.gmra.mrb[44].mxu0 %vm4657_vm2, %v16748_v18 }
 0x8e7   :  { %12961 = vmatprep.mubr.msk.f32.mxu0 %vm4657_vm2, %v18169_v22 }
 0x8ea   :  { %12962 = vmatmul.mubr.msk.f32.gmra.mrb[46].mxu0 %vm4657_vm2, %v18170_v28 }
 0x8eb   :  { %12964 = vmatprep.mubr.msk.f32.mxu0 %vm4657_vm2, %v18171_v38 }
 0x8ee   :  { %12965 = vmatmul.mubr.msk.f32.gmra.mrb[48].mxu0 %vm4657_vm2, %v18172_v54 }
 0x8ef   :  { %12967 = vmatprep.mubr.msk.f32.mxu0 %vm4657_vm2, %v18173_v45 }
 0x8f2   :  { %12968 = vmatmul.mubr.msk.f32.gmra.mrb[50].mxu0 %vm4657_vm2, %v18174_v60 }
 0x8f3   :  { %12970 = vmatprep.mubr.msk.f32.mxu0 %vm4657_vm2, %v18175_v39 }
 0x8f6   :  { %12971 = vmatmul.mubr.msk.f32.gmra.mrb[52].mxu0 %vm4657_vm2, %v18176_v40 }
 0x8f7   :  { %12973 = vmatprep.mubr.msk.f32.mxu0 %vm4657_vm2, %v18177_v36 }
 0x8fa   :  { %12974 = vmatmul.mubr.msk.f32.gmra.mrb[54].mxu0 %vm4657_vm2, %v18178_v42 }
 0x8fb   :  { %12976 = vmatprep.mubr.msk.f32.mxu0 %vm4657_vm2, %v18179_v29 }
 0x8fe   :  { %12977 = vmatmul.mubr.msk.f32.gmra.mrb[56].mxu0 %vm4657_vm2, %v18180_v24 }
 0x8ff   :  { %12979 = vmatprep.mubr.msk.f32.mxu0 %vm4657_vm2, %v18181_v56 }
 0x902   :  { %12980 = vmatmul.mubr.msk.f32.gmra.mrb[58].mxu0 %vm4657_vm2, %v18182_v13 }
 0x903   :  { %12982 = vmatprep.mubr.msk.f32.mxu0 %vm4657_vm2, %v18183_v21 }
 0x906   :  { %12983 = vmatmul.mubr.msk.f32.gmra.mrb[60].mxu0 %vm4657_vm2, %v18184_v8 }
 0x907   :  { %12985 = vmatprep.mubr.msk.f32.mxu0 %vm4657_vm2, %v18185_v3 }
 0x90a   :  { %12986 = vmatmul.mubr.msk.f32.gmra.mrb[62].mxu0 %vm4657_vm2, %v18186_v12 }
 0x90b   :  { %12988 = vmatprep.mubr.msk.f32.mxu0 %vm4657_vm2, %v18187_v4 }
 0x90e   :  { %12989 = vmatmul.mubr.msk.f32.gmra.mrb[64].mxu0 %vm4657_vm2, %v18188_v59 }
 0x90f   :  { %12991 = vmatprep.mubr.msk.f32.mxu0 %vm4657_vm2, %v18189_v55 }
 0x912   :  { %12992 = vmatmul.mubr.msk.f32.gmra.mrb[66].mxu0 %vm4657_vm2, %v18190_v50 }
 0x913   :  { %12994 = vmatprep.mubr.msk.f32.mxu0 %vm4657_vm2, %v18191_v44 }
 0x916   :  { %12995 = vmatmul.mubr.msk.f32.gmra.mrb[68].mxu0 %vm4657_vm2, %v18192_v37 }
 0x99d   :  { %v11789_v11 = vpop.f32.mrb[34].mxu0 }
 0x99e   :  { %v11790_v53 = vpop.f32.mrb[35].mxu0 }
 0x99f   :  { %v11791_v57 = vadd.f32 %v11790_v53, %v11789_v11 }
 0x9a1   :  { %v17490_v35 = vadd.f32 %v11791_v57, %v17384_v51  ;;  %v11792_v61 = vpop.f32.mrb[36].mxu0 }
 0x9a2   :  { %v11793_v49 = vpop.f32.mrb[37].mxu0 }
 0x9a3   :  { %v11794_v0 = vadd.f32 %v11793_v49, %v11792_v61 }
 0x9a5   :  { %v17493_v62 = vadd.f32 %v11794_v0, %v17387_v26 }
 0x9ad   :  { %v12951_v2 = vpop.f32.mrb[38].mxu0 }
 0x9ae   :  { %v6395_v52 = vpop.f32.mrb[39].mxu0 }
 0x9af   :  { %v13851_v27 = vpack.c.bf16 %v12951_v2, %v6395_v52 }
 0x9b1   :  { %v12954_v5 = vpop.f32.mrb[40].mxu0 }
 0x9b2   :  { %v6405_v7 = vpop.f32.mrb[41].mxu0 }
 0x9b3   :  { %v13855_v25 = vpack.c.bf16 %v12954_v5, %v6405_v7 }
 0x9b5   :  { %v12957_v31 = vpop.f32.mrb[42].mxu0 }
 0x9b6   :  { %v6415_v20 = vpop.f32.mrb[43].mxu0 }
 0x9b7   :  { %v13859_v32 = vpack.c.bf16 %v12957_v31, %v6415_v20 }
 0x9b9   :  { %v12960_v15 = vpop.f32.mrb[44].mxu0 }
 0x9ba   :  { %v6425_v33 = vpop.f32.mrb[45].mxu0 }
 0x9bb   :  { %v13863_v34 = vpack.c.bf16 %v12960_v15, %v6425_v33 }
 0x9bd   :  { %v12963_v51 = vpop.f32.mrb[46].mxu0 }
 0x9be   :  { %v6435_v16 = vpop.f32.mrb[47].mxu0 }
 0x9bf   :  { %v13867_v23 = vpack.c.bf16 %v12963_v51, %v6435_v16 }
 0x9c1   :  { %v12966_v41 = vpop.f32.mrb[48].mxu0 }
 0x9c2   :  { %v6445_v14 = vpop.f32.mrb[49].mxu0 }
 0x9c3   :  { %v13871_v19 = vpack.c.bf16 %v12966_v41, %v6445_v14 }
 0x9c5   :  { %v12969_v26 = vpop.f32.mrb[50].mxu0 }
 0x9c6   :  { %v6455_v43 = vpop.f32.mrb[51].mxu0 }
 0x9c7   :  { %v13875_v46 = vpack.c.bf16 %v12969_v26, %v6455_v43  ;;  %v10626_v43 = vld [vmem:[%s18057_s4 + $0x188] sm:$0xff] }
 0x9c9   :  { %v12972_v47 = vpop.f32.mrb[52].mxu0 }
 0x9ca   :  { %v6465_v6 = vpop.f32.mrb[53].mxu0 }
 0x9cb   :  { %v13879_v48 = vpack.c.bf16 %v12972_v47, %v6465_v6 }
 0x9cd   :  { %v12975_v11 = vpop.f32.mrb[54].mxu0 }
 0x9ce   :  { %v6475_v53 = vpop.f32.mrb[55].mxu0 }
 0x9cf   :  { %v13849_v57 = vpack.c.bf16 %v12975_v11, %v6475_v53  ;;  %v10627_v11 = vld [vmem:[%s18057_s4 + $0x190] sm:$0xff]  ;;  %v10621_v53 = vld [vmem:[%s18058_s5 + $0xa0] sm:$0xff] }
 0x9d1   :  { %v12978_v61 = vpop.f32.mrb[56].mxu0  ;;  %13850 = vmatprep.subr.bf16.mxu1 %v13849_v57 }
 0x9d2   :  { %v6485_v49 = vpop.f32.mrb[57].mxu0  ;;  %13852 = vmatpush3.bf16.msra.mxu1 %v13851_v27 }
 0x9d3   :  { %v13853_v0 = vpack.c.bf16 %v12978_v61, %v6485_v49  ;;  %v10629_v61 = vld [vmem:[%s18057_s4 + $0x1a0] sm:$0xff]  ;;  %v10630_v49 = vld [vmem:[%s18057_s4 + $0x1a8] sm:$0xff] }
 0x9d5   :  { %v12981_v2 = vpop.f32.mrb[58].mxu0  ;;  %13854 = vmatprep.subr.bf16.mxu1 %v13853_v0  ;;  %v13889_v0 = vpack.c.bf16 %v10630_v49, %v10629_v61 }
 0x9d6   :  { %v6495_v52 = vpop.f32.mrb[59].mxu0  ;;  %13856 = vmatpush3.bf16.msra.mxu1 %v13855_v25 }
 0x9d7   :  { %v13857_v5 = vpack.c.bf16 %v12981_v2, %v6495_v52  ;;  %v10631_v2 = vld [vmem:[%s18057_s4 + $0x1b0] sm:$0xff]  ;;  %v10632_v52 = vld [vmem:[%s18057_s4 + $0x1b8] sm:$0xff] }
 0x9d9   :  { %v12984_v7 = vpop.f32.mrb[60].mxu0  ;;  %13858 = vmatprep.subr.bf16.mxu1 %v13857_v5  ;;  %v13893_v5 = vpack.c.bf16 %v10632_v52, %v10631_v2 }
 0x9da   :  { %v6505_v31 = vpop.f32.mrb[61].mxu0  ;;  %13860 = vmatpush3.bf16.msra.mxu1 %v13859_v32  ;;  %v10625_v32 = vld [vmem:[%s18057_s4 + $0x180] sm:$0xff] }
 0x9db   :  { %v13861_v20 = vpack.c.bf16 %v12984_v7, %v6505_v31  ;;  %v10666_v7 = vld [vmem:[%s18058_s5 + $0xc8] sm:$0xff] }
 0x9dc   :  { %6939 = vmatprep.mubr.f32.mxu0 %v10666_v7 }
 0x9dd   :  { %v12987_v15 = vpop.f32.mrb[62].mxu0  ;;  %13862 = vmatprep.subr.bf16.mxu1 %v13861_v20 }
 0x9de   :  { %v6515_v33 = vpop.f32.mrb[63].mxu0  ;;  %13864 = vmatpush3.bf16.msra.mxu1 %v13863_v34 }
 0x9df   :  { %v13865_v51 = vpack.c.bf16 %v12987_v15, %v6515_v33 }
 0x9e1   :  { %v12990_v16 = vpop.f32.mrb[64].mxu0  ;;  %13866 = vmatprep.subr.bf16.mxu1 %v13865_v51 }
 0x9e2   :  { %v6525_v41 = vpop.f32.mrb[65].mxu0  ;;  %13868 = vmatpush3.bf16.msra.mxu1 %v13867_v23  ;;  %v13881_v23 = vpack.c.bf16 %v10626_v43, %v10625_v32 }
 0x9e3   :  { %v13869_v27 = vpack.c.bf16 %v12990_v16, %v6525_v41 }
 0x9e5   :  { %v12993_v14 = vpop.f32.mrb[66].mxu0  ;;  %13870 = vmatprep.subr.bf16.mxu1 %v13869_v27 }
 0x9e6   :  { %v6535_v26 = vpop.f32.mrb[67].mxu0  ;;  %13872 = vmatpush3.bf16.msra.mxu1 %v13871_v19  ;;  %v10628_v19 = vld [vmem:[%s18057_s4 + $0x198] sm:$0xff] }
 0x9e7   :  { %v13873_v25 = vpack.c.bf16 %v12993_v14, %v6535_v26  ;;  %v13885_v57 = vpack.c.bf16 %v10628_v19, %v10627_v11 }
 0x9e9   :  { %v12996_v34 = vpop.f32.mrb[68].mxu0  ;;  %13874 = vmatprep.subr.bf16.mxu1 %v13873_v25 }
 0x9ea   :  { %v6545_v47 = vpop.f32.mrb[69].mxu0  ;;  %13876 = vmatpush3.bf16.msra.mxu1 %v13875_v46  ;;  %v10624_v46 = vld [vmem:[%s18058_s5 + $0xb8] sm:$0xff] }
 0x9eb   :  { %v13877_v6 = vpack.c.bf16 %v12996_v34, %v6545_v47 }
 0x9ed   :  { %13878 = vmatprep.subr.bf16.mxu1 %v13877_v6 }
 0x9ee   :  { %13880 = vmatpush3.bf16.msra.mxu1 %v13879_v48  ;;  %v10623_v48 = vld [vmem:[%s18058_s5 + $0xb0] sm:$0xff] }
 0x9ef   :  { %13882 = vmatprep.subr.bf16.mxu1 %v13881_v23 }
 0x9f1   :  { %6624 = vmatmul.mubr.f32.vlgmr.msra.gmra.mrb[192].mxu1 %v10621_v53 }
 0x9f2   :  { %13884 = vmatpush3.bf16.msra.mxu1 %v13881_v23  ;;  %6628 = vmatprep.mubr.f32.mxu1 %v10624_v46 }
 0x9f3   :  { %13886 = vmatprep.subr.bf16.mxu1 %v13885_v57 }
 0x9f5   :  { %6629 = vmatmul.mubr.f32.gmra.mrb[194].mxu1 %v10623_v48 }
 0x9f6   :  { %13888 = vmatpush3.bf16.msra.mxu1 %v13885_v57  ;;  %13013 = vmatprep.mubr.msk.f32.mxu1 %vm4657_vm2, %v16710_v58 }
 0x9f7   :  { %13890 = vmatprep.subr.bf16.mxu1 %v13889_v0 }
 0x9fa   :  { %13892 = vmatpush3.bf16.msra.mxu1 %v13889_v0 }
 0x9fb   :  { %13894 = vmatprep.subr.bf16.mxu1 %v13893_v5 }
 0x9fe   :  { %13896 = vmatpush3.bf16.msra.mxu1 %v13893_v5 }
 0xa01   :  { %13014 = vmatmul.mubr.msk.f32.vlgmr.msra.gmra.mrb[196].mxu1 %vm4657_vm2, %v16712_v30 }
 0xa02   :  { %13016 = vmatprep.mubr.msk.f32.mxu1 %vm4657_vm2, %v16724_v63 }
 0xa05   :  { %13017 = vmatmul.mubr.msk.f32.gmra.mrb[198].mxu1 %vm4657_vm2, %v16726_v1 }
 0xa06   :  { %13019 = vmatprep.mubr.msk.f32.mxu1 %vm4657_vm2, %v16738_v9 }
 0xa09   :  { %13020 = vmatmul.mubr.msk.f32.gmra.mrb[200].mxu1 %vm4657_vm2, %v16740_v10 }
 0xa0a   :  { %13022 = vmatprep.mubr.msk.f32.mxu1 %vm4657_vm2, %v16746_v17 }
 0xa0d   :  { %13023 = vmatmul.mubr.msk.f32.gmra.mrb[202].mxu1 %vm4657_vm2, %v16748_v18 }
 0xa0e   :  { %13025 = vmatprep.mubr.msk.f32.mxu1 %vm4657_vm2, %v18169_v22 }
 0xa11   :  { %13026 = vmatmul.mubr.msk.f32.gmra.mrb[204].mxu1 %vm4657_vm2, %v18170_v28 }
 0xa12   :  { %13028 = vmatprep.mubr.msk.f32.mxu1 %vm4657_vm2, %v18171_v38 }
 0xa15   :  { %13029 = vmatmul.mubr.msk.f32.gmra.mrb[206].mxu1 %vm4657_vm2, %v18172_v54 }
 0xa16   :  { %13031 = vmatprep.mubr.msk.f32.mxu1 %vm4657_vm2, %v18173_v45 }
 0xa19   :  { %13032 = vmatmul.mubr.msk.f32.gmra.mrb[208].mxu1 %vm4657_vm2, %v18174_v60 }
 0xa1a   :  { %13034 = vmatprep.mubr.msk.f32.mxu1 %vm4657_vm2, %v18175_v39 }
 0xa1d   :  { %13035 = vmatmul.mubr.msk.f32.gmra.mrb[210].mxu1 %vm4657_vm2, %v18176_v40 }
 0xa1e   :  { %13037 = vmatprep.mubr.msk.f32.mxu1 %vm4657_vm2, %v18177_v36 }
 0xa21   :  { %13038 = vmatmul.mubr.msk.f32.gmra.mrb[212].mxu1 %vm4657_vm2, %v18178_v42 }
 0xa22   :  { %13040 = vmatprep.mubr.msk.f32.mxu1 %vm4657_vm2, %v18179_v29 }
 0xa25   :  { %13041 = vmatmul.mubr.msk.f32.gmra.mrb[214].mxu1 %vm4657_vm2, %v18180_v24 }
 0xa26   :  { %13043 = vmatprep.mubr.msk.f32.mxu1 %vm4657_vm2, %v18181_v56 }
 0xa29   :  { %13044 = vmatmul.mubr.msk.f32.gmra.mrb[216].mxu1 %vm4657_vm2, %v18182_v13 }
 0xa2a   :  { %13046 = vmatprep.mubr.msk.f32.mxu1 %vm4657_vm2, %v18183_v21 }
 0xa2d   :  { %13047 = vmatmul.mubr.msk.f32.gmra.mrb[218].mxu1 %vm4657_vm2, %v18184_v8 }
 0xa2e   :  { %13049 = vmatprep.mubr.msk.f32.mxu1 %vm4657_vm2, %v18185_v3 }
 0xa31   :  { %13050 = vmatmul.mubr.msk.f32.gmra.mrb[220].mxu1 %vm4657_vm2, %v18186_v12 }
 0xa32   :  { %13052 = vmatprep.mubr.msk.f32.mxu1 %vm4657_vm2, %v18187_v4 }
 0xa35   :  { %13053 = vmatmul.mubr.msk.f32.gmra.mrb[222].mxu1 %vm4657_vm2, %v18188_v59 }
 0xa36   :  { %13055 = vmatprep.mubr.msk.f32.mxu1 %vm4657_vm2, %v18189_v55 }
 0xa39   :  { %13056 = vmatmul.mubr.msk.f32.gmra.mrb[224].mxu1 %vm4657_vm2, %v18190_v50 }
 0xa3a   :  { %13058 = vmatprep.mubr.msk.f32.mxu1 %vm4657_vm2, %v18191_v44 }
 0xa3d   :  { %13059 = vmatmul.mubr.msk.f32.gmra.mrb[226].mxu1 %vm4657_vm2, %v18192_v37 }
 0xac4   :  { %v11867_v31 = vpop.f32.mrb[192].mxu1 }
 0xac5   :  { %v11868_v20 = vpop.f32.mrb[193].mxu1 }
 0xac6   :  { %v11869_v15 = vadd.f32 %v11868_v20, %v11867_v31 }
 0xac8   :  { %v17596_v33 = vadd.f32 %v11869_v15, %v17490_v35  ;;  %v11870_v51 = vpop.f32.mrb[194].mxu1 }
 0xac9   :  { %v11871_v16 = vpop.f32.mrb[195].mxu1 }
 0xaca   :  { %v11872_v41 = vadd.f32 %v11871_v16, %v11870_v51 }
 0xacc   :  { %v17599_v27 = vadd.f32 %v11872_v41, %v17493_v62 }
 0xad4   :  { %v13015_v14 = vpop.f32.mrb[196].mxu1 }
 0xad5   :  { %v6711_v26 = vpop.f32.mrb[197].mxu1 }
 0xad6   :  { %v13899_v25 = vpack.c.bf16 %v13015_v14, %v6711_v26 }
 0xad8   :  { %v13018_v32 = vpop.f32.mrb[198].mxu1 }
 0xad9   :  { %v6721_v43 = vpop.f32.mrb[199].mxu1 }
 0xada   :  { %v13903_v34 = vpack.c.bf16 %v13018_v32, %v6721_v43 }
 0xadc   :  { %v13021_v47 = vpop.f32.mrb[200].mxu1 }
 0xadd   :  { %v6731_v6 = vpop.f32.mrb[201].mxu1 }
 0xade   :  { %v13907_v23 = vpack.c.bf16 %v13021_v47, %v6731_v6 }
 0xae0   :  { %v13024_v11 = vpop.f32.mrb[202].mxu1 }
 0xae1   :  { %v6741_v19 = vpop.f32.mrb[203].mxu1 }
 0xae2   :  { %v13911_v53 = vpack.c.bf16 %v13024_v11, %v6741_v19 }
 0xae4   :  { %v13027_v35 = vpop.f32.mrb[204].mxu1 }
 0xae5   :  { %v6751_v46 = vpop.f32.mrb[205].mxu1 }
 0xae6   :  { %v13915_v57 = vpack.c.bf16 %v13027_v35, %v6751_v46 }
 0xae8   :  { %v13030_v61 = vpop.f32.mrb[206].mxu1 }
 0xae9   :  { %v6761_v49 = vpop.f32.mrb[207].mxu1 }
 0xaea   :  { %v13919_v48 = vpack.c.bf16 %v13030_v61, %v6761_v49 }
 0xaec   :  { %v13033_v62 = vpop.f32.mrb[208].mxu1 }
 0xaed   :  { %v6771_v0 = vpop.f32.mrb[209].mxu1 }
 0xaee   :  { %v13923_v2 = vpack.c.bf16 %v13033_v62, %v6771_v0  ;;  %v10670_v0 = vld [vmem:[%s18057_s4 + $0x1c8] sm:$0xff] }
 0xaf0   :  { %v13036_v52 = vpop.f32.mrb[210].mxu1 }
 0xaf1   :  { %v6781_v5 = vpop.f32.mrb[211].mxu1 }
 0xaf2   :  { %v13927_v7 = vpack.c.bf16 %v13036_v52, %v6781_v5 }
 0xaf4   :  { %v13039_v31 = vpop.f32.mrb[212].mxu1 }
 0xaf5   :  { %v6791_v20 = vpop.f32.mrb[213].mxu1 }
 0xaf6   :  { %v13897_v15 = vpack.c.bf16 %v13039_v31, %v6791_v20  ;;  %v10671_v31 = vld [vmem:[%s18057_s4 + $0x1d0] sm:$0xff]  ;;  %v10665_v20 = vld [vmem:[%s18058_s5 + $0xc0] sm:$0xff] }
 0xaf8   :  { %v13042_v51 = vpop.f32.mrb[214].mxu1  ;;  %13898 = vmatprep.subr.bf16.mxu0 %v13897_v15 }
 0xaf9   :  { %v6801_v16 = vpop.f32.mrb[215].mxu1  ;;  %13900 = vmatpush3.bf16.msra.mxu0 %v13899_v25 }
 0xafa   :  { %v13901_v41 = vpack.c.bf16 %v13042_v51, %v6801_v16  ;;  %v10673_v51 = vld [vmem:[%s18057_s4 + $0x1e0] sm:$0xff]  ;;  %v10674_v16 = vld [vmem:[%s18057_s4 + $0x1e8] sm:$0xff] }
 0xafc   :  { %v13045_v14 = vpop.f32.mrb[216].mxu1  ;;  %13902 = vmatprep.subr.bf16.mxu0 %v13901_v41  ;;  %v13937_v41 = vpack.c.bf16 %v10674_v16, %v10673_v51 }
 0xafd   :  { %v6811_v26 = vpop.f32.mrb[217].mxu1  ;;  %13904 = vmatpush3.bf16.msra.mxu0 %v13903_v34 }
 0xafe   :  { %v13905_v32 = vpack.c.bf16 %v13045_v14, %v6811_v26  ;;  %v10675_v14 = vld [vmem:[%s18057_s4 + $0x1f0] sm:$0xff]  ;;  %v10676_v26 = vld [vmem:[%s18057_s4 + $0x1f8] sm:$0xff] }
 0xb00   :  { %v13048_v43 = vpop.f32.mrb[218].mxu1  ;;  %13906 = vmatprep.subr.bf16.mxu0 %v13905_v32  ;;  %v13941_v32 = vpack.c.bf16 %v10676_v26, %v10675_v14 }
 0xb01   :  { %v6821_v47 = vpop.f32.mrb[219].mxu1  ;;  %13908 = vmatpush3.bf16.msra.mxu0 %v13907_v23  ;;  %v10669_v23 = vld [vmem:[%s18057_s4 + $0x1c0] sm:$0xff] }
 0xb02   :  { %v13909_v6 = vpack.c.bf16 %v13048_v43, %v6821_v47  ;;  %v10710_v43 = vld [vmem:[%s18058_s5 + $0xe8] sm:$0xff] }
 0xb03   :  { %7255 = vmatprep.mubr.f32.mxu1 %v10710_v43 }
 0xb04   :  { %v13051_v11 = vpop.f32.mrb[220].mxu1  ;;  %13910 = vmatprep.subr.bf16.mxu0 %v13909_v6 }
 0xb05   :  { %v6831_v19 = vpop.f32.mrb[221].mxu1  ;;  %13912 = vmatpush3.bf16.msra.mxu0 %v13911_v53 }
 0xb06   :  { %v13913_v35 = vpack.c.bf16 %v13051_v11, %v6831_v19 }
 0xb08   :  { %v13054_v46 = vpop.f32.mrb[222].mxu1  ;;  %13914 = vmatprep.subr.bf16.mxu0 %v13913_v35 }
 0xb09   :  { %v6841_v61 = vpop.f32.mrb[223].mxu1  ;;  %13916 = vmatpush3.bf16.msra.mxu0 %v13915_v57  ;;  %v13929_v57 = vpack.c.bf16 %v10670_v0, %v10669_v23 }
 0xb0a   :  { %v13917_v25 = vpack.c.bf16 %v13054_v46, %v6841_v61 }
 0xb0c   :  { %v13057_v49 = vpop.f32.mrb[224].mxu1  ;;  %13918 = vmatprep.subr.bf16.mxu0 %v13917_v25 }
 0xb0d   :  { %v6851_v62 = vpop.f32.mrb[225].mxu1  ;;  %13920 = vmatpush3.bf16.msra.mxu0 %v13919_v48  ;;  %v10672_v48 = vld [vmem:[%s18057_s4 + $0x1d8] sm:$0xff] }
 0xb0e   :  { %v13921_v34 = vpack.c.bf16 %v13057_v49, %v6851_v62  ;;  %v13933_v15 = vpack.c.bf16 %v10672_v48, %v10671_v31 }
 0xb10   :  { %v13060_v53 = vpop.f32.mrb[226].mxu1  ;;  %13922 = vmatprep.subr.bf16.mxu0 %v13921_v34 }
 0xb11   :  { %v6861_v52 = vpop.f32.mrb[227].mxu1  ;;  %13924 = vmatpush3.bf16.msra.mxu0 %v13923_v2  ;;  %v10668_v2 = vld [vmem:[%s18058_s5 + $0xd8] sm:$0xff] }
 0xb12   :  { %v13925_v5 = vpack.c.bf16 %v13060_v53, %v6861_v52 }
 0xb14   :  { %13926 = vmatprep.subr.bf16.mxu0 %v13925_v5 }
 0xb15   :  { %13928 = vmatpush3.bf16.msra.mxu0 %v13927_v7  ;;  %v10667_v7 = vld [vmem:[%s18058_s5 + $0xd0] sm:$0xff] }
 0xb16   :  { %13930 = vmatprep.subr.bf16.mxu0 %v13929_v57 }
 0xb18   :  { %6940 = vmatmul.mubr.f32.vlgmr.msra.gmra.mrb[70].mxu0 %v10665_v20 }
 0xb19   :  { %13932 = vmatpush3.bf16.msra.mxu0 %v13929_v57  ;;  %6944 = vmatprep.mubr.f32.mxu0 %v10668_v2 }
 0xb1a   :  { %13934 = vmatprep.subr.bf16.mxu0 %v13933_v15 }
 0xb1c   :  { %6945 = vmatmul.mubr.f32.gmra.mrb[72].mxu0 %v10667_v7 }
 0xb1d   :  { %13936 = vmatpush3.bf16.msra.mxu0 %v13933_v15  ;;  %13077 = vmatprep.mubr.msk.f32.mxu0 %vm4657_vm2, %v16710_v58 }
 0xb1e   :  { %13938 = vmatprep.subr.bf16.mxu0 %v13937_v41 }
 0xb21   :  { %13940 = vmatpush3.bf16.msra.mxu0 %v13937_v41 }
 0xb22   :  { %13942 = vmatprep.subr.bf16.mxu0 %v13941_v32 }
 0xb25   :  { %13944 = vmatpush3.bf16.msra.mxu0 %v13941_v32 }
 0xb28   :  { %13078 = vmatmul.mubr.msk.f32.vlgmr.msra.gmra.mrb[74].mxu0 %vm4657_vm2, %v16712_v30 }
 0xb29   :  { %13080 = vmatprep.mubr.msk.f32.mxu0 %vm4657_vm2, %v16724_v63 }
 0xb2c   :  { %13081 = vmatmul.mubr.msk.f32.gmra.mrb[76].mxu0 %vm4657_vm2, %v16726_v1 }
 0xb2d   :  { %13083 = vmatprep.mubr.msk.f32.mxu0 %vm4657_vm2, %v16738_v9 }
 0xb30   :  { %13084 = vmatmul.mubr.msk.f32.gmra.mrb[78].mxu0 %vm4657_vm2, %v16740_v10 }
 0xb31   :  { %13086 = vmatprep.mubr.msk.f32.mxu0 %vm4657_vm2, %v16746_v17 }
 0xb34   :  { %13087 = vmatmul.mubr.msk.f32.gmra.mrb[80].mxu0 %vm4657_vm2, %v16748_v18 }
 0xb35   :  { %13089 = vmatprep.mubr.msk.f32.mxu0 %vm4657_vm2, %v18169_v22 }
 0xb38   :  { %13090 = vmatmul.mubr.msk.f32.gmra.mrb[82].mxu0 %vm4657_vm2, %v18170_v28 }
 0xb39   :  { %13092 = vmatprep.mubr.msk.f32.mxu0 %vm4657_vm2, %v18171_v38 }
 0xb3c   :  { %13093 = vmatmul.mubr.msk.f32.gmra.mrb[84].mxu0 %vm4657_vm2, %v18172_v54 }
 0xb3d   :  { %13095 = vmatprep.mubr.msk.f32.mxu0 %vm4657_vm2, %v18173_v45 }
 0xb40   :  { %13096 = vmatmul.mubr.msk.f32.gmra.mrb[86].mxu0 %vm4657_vm2, %v18174_v60 }
 0xb41   :  { %13098 = vmatprep.mubr.msk.f32.mxu0 %vm4657_vm2, %v18175_v39 }
 0xb44   :  { %13099 = vmatmul.mubr.msk.f32.gmra.mrb[88].mxu0 %vm4657_vm2, %v18176_v40 }
 0xb45   :  { %13101 = vmatprep.mubr.msk.f32.mxu0 %vm4657_vm2, %v18177_v36 }
 0xb48   :  { %13102 = vmatmul.mubr.msk.f32.gmra.mrb[90].mxu0 %vm4657_vm2, %v18178_v42 }
 0xb49   :  { %13104 = vmatprep.mubr.msk.f32.mxu0 %vm4657_vm2, %v18179_v29 }
 0xb4c   :  { %13105 = vmatmul.mubr.msk.f32.gmra.mrb[92].mxu0 %vm4657_vm2, %v18180_v24 }
 0xb4d   :  { %13107 = vmatprep.mubr.msk.f32.mxu0 %vm4657_vm2, %v18181_v56 }
 0xb50   :  { %13108 = vmatmul.mubr.msk.f32.gmra.mrb[94].mxu0 %vm4657_vm2, %v18182_v13 }
 0xb51   :  { %13110 = vmatprep.mubr.msk.f32.mxu0 %vm4657_vm2, %v18183_v21 }
 0xb54   :  { %13111 = vmatmul.mubr.msk.f32.gmra.mrb[96].mxu0 %vm4657_vm2, %v18184_v8 }
 0xb55   :  { %13113 = vmatprep.mubr.msk.f32.mxu0 %vm4657_vm2, %v18185_v3 }
 0xb58   :  { %13114 = vmatmul.mubr.msk.f32.gmra.mrb[98].mxu0 %vm4657_vm2, %v18186_v12 }
 0xb59   :  { %13116 = vmatprep.mubr.msk.f32.mxu0 %vm4657_vm2, %v18187_v4 }
 0xb5c   :  { %13117 = vmatmul.mubr.msk.f32.gmra.mrb[100].mxu0 %vm4657_vm2, %v18188_v59 }
 0xb5d   :  { %13119 = vmatprep.mubr.msk.f32.mxu0 %vm4657_vm2, %v18189_v55 }
 0xb60   :  { %13120 = vmatmul.mubr.msk.f32.gmra.mrb[102].mxu0 %vm4657_vm2, %v18190_v50 }
 0xb61   :  { %13122 = vmatprep.mubr.msk.f32.mxu0 %vm4657_vm2, %v18191_v44 }
 0xb64   :  { %13123 = vmatmul.mubr.msk.f32.gmra.mrb[104].mxu0 %vm4657_vm2, %v18192_v37 }
 0xbeb   :  { %v11945_v47 = vpop.f32.mrb[70].mxu0 }
 0xbec   :  { %v11946_v6 = vpop.f32.mrb[71].mxu0 }
 0xbed   :  { %v11947_v11 = vadd.f32 %v11946_v6, %v11945_v47 }
 0xbef   :  { %v17702_v19 = vadd.f32 %v11947_v11, %v17596_v33  ;;  %v11948_v35 = vpop.f32.mrb[72].mxu0 }
 0xbf0   :  { %v11949_v46 = vpop.f32.mrb[73].mxu0 }
 0xbf1   :  { %v11950_v61 = vadd.f32 %v11949_v46, %v11948_v35 }
 0xbf3   :  { %v17705_v25 = vadd.f32 %v11950_v61, %v17599_v27 }
 0xbfb   :  { %v13079_v49 = vpop.f32.mrb[74].mxu0 }
 0xbfc   :  { %v7027_v62 = vpop.f32.mrb[75].mxu0 }
 0xbfd   :  { %v13947_v34 = vpack.c.bf16 %v13079_v49, %v7027_v62 }
 0xbff   :  { %v13082_v23 = vpop.f32.mrb[76].mxu0 }
 0xc00   :  { %v7037_v0 = vpop.f32.mrb[77].mxu0 }
 0xc01   :  { %v13951_v53 = vpack.c.bf16 %v13082_v23, %v7037_v0 }
 0xc03   :  { %v13085_v52 = vpop.f32.mrb[78].mxu0 }
 0xc04   :  { %v7047_v5 = vpop.f32.mrb[79].mxu0 }
 0xc05   :  { %v13955_v57 = vpack.c.bf16 %v13085_v52, %v7047_v5 }
 0xc07   :  { %v13088_v31 = vpop.f32.mrb[80].mxu0 }
 0xc08   :  { %v7057_v48 = vpop.f32.mrb[81].mxu0 }
 0xc09   :  { %v13959_v20 = vpack.c.bf16 %v13088_v31, %v7057_v48 }
 0xc0b   :  { %v13091_v33 = vpop.f32.mrb[82].mxu0 }
 0xc0c   :  { %v7067_v2 = vpop.f32.mrb[83].mxu0 }
 0xc0d   :  { %v13963_v15 = vpack.c.bf16 %v13091_v33, %v7067_v2 }
 0xc0f   :  { %v13094_v51 = vpop.f32.mrb[84].mxu0 }
 0xc10   :  { %v7077_v16 = vpop.f32.mrb[85].mxu0 }
 0xc11   :  { %v13967_v7 = vpack.c.bf16 %v13094_v51, %v7077_v16 }
 0xc13   :  { %v13097_v27 = vpop.f32.mrb[86].mxu0 }
 0xc14   :  { %v7087_v41 = vpop.f32.mrb[87].mxu0 }
 0xc15   :  { %v13971_v14 = vpack.c.bf16 %v13097_v27, %v7087_v41  ;;  %v10714_v41 = vld [vmem:[%s18057_s4 + $0x208] sm:$0xff] }
 0xc17   :  { %v13100_v26 = vpop.f32.mrb[88].mxu0 }
 0xc18   :  { %v7097_v32 = vpop.f32.mrb[89].mxu0 }
 0xc19   :  { %v13975_v43 = vpack.c.bf16 %v13100_v26, %v7097_v32 }
 0xc1b   :  { %v13103_v47 = vpop.f32.mrb[90].mxu0 }
 0xc1c   :  { %v7107_v6 = vpop.f32.mrb[91].mxu0 }
 0xc1d   :  { %v13945_v11 = vpack.c.bf16 %v13103_v47, %v7107_v6  ;;  %v10715_v47 = vld [vmem:[%s18057_s4 + $0x210] sm:$0xff]  ;;  %v10709_v6 = vld [vmem:[%s18058_s5 + $0xe0] sm:$0xff] }
 0xc1f   :  { %v13106_v35 = vpop.f32.mrb[92].mxu0  ;;  %13946 = vmatprep.subr.bf16.mxu1 %v13945_v11 }
 0xc20   :  { %v7117_v46 = vpop.f32.mrb[93].mxu0  ;;  %13948 = vmatpush3.bf16.msra.mxu1 %v13947_v34 }
 0xc21   :  { %v13949_v61 = vpack.c.bf16 %v13106_v35, %v7117_v46  ;;  %v10717_v35 = vld [vmem:[%s18057_s4 + $0x220] sm:$0xff]  ;;  %v10718_v46 = vld [vmem:[%s18057_s4 + $0x228] sm:$0xff] }
 0xc23   :  { %v13109_v49 = vpop.f32.mrb[94].mxu0  ;;  %13950 = vmatprep.subr.bf16.mxu1 %v13949_v61  ;;  %v13985_v61 = vpack.c.bf16 %v10718_v46, %v10717_v35  ;;  %v10753_v35 = vld [vmem:[%s18058_s5 + $0x100] sm:$0xff]  ;;  %v10756_v46 = vld [vmem:[%s18058_s5 + $0x118] sm:$0xff] }
 0xc24   :  { %v7127_v62 = vpop.f32.mrb[95].mxu0  ;;  %13952 = vmatpush3.bf16.msra.mxu1 %v13951_v53 }
 0xc25   :  { %v13953_v23 = vpack.c.bf16 %v13109_v49, %v7127_v62  ;;  %v10719_v49 = vld [vmem:[%s18057_s4 + $0x230] sm:$0xff]  ;;  %v10720_v62 = vld [vmem:[%s18057_s4 + $0x238] sm:$0xff] }
 0xc27   :  { %v13112_v0 = vpop.f32.mrb[96].mxu0  ;;  %13954 = vmatprep.subr.bf16.mxu1 %v13953_v23  ;;  %v13989_v23 = vpack.c.bf16 %v10720_v62, %v10719_v49  ;;  %v7599_v49 = vld [vmem:[%s18060_s7 + $0x8] sm:$0xff] }
 0xc28   :  { %v7137_v52 = vpop.f32.mrb[97].mxu0  ;;  %13956 = vmatpush3.bf16.msra.mxu1 %v13955_v57  ;;  %v10713_v57 = vld [vmem:[%s18057_s4 + $0x200] sm:$0xff] }
 0xc29   :  { %v13957_v5 = vpack.c.bf16 %v13112_v0, %v7137_v52 }
 0xc2b   :  { %v13115_v31 = vpop.f32.mrb[98].mxu0  ;;  %13958 = vmatprep.subr.bf16.mxu1 %v13957_v5 }
 0xc2c   :  { %v7147_v48 = vpop.f32.mrb[99].mxu0  ;;  %13960 = vmatpush3.bf16.msra.mxu1 %v13959_v20 }
 0xc2d   :  { %v13961_v33 = vpack.c.bf16 %v13115_v31, %v7147_v48 }
 0xc2f   :  { %v13118_v2 = vpop.f32.mrb[100].mxu0  ;;  %13962 = vmatprep.subr.bf16.mxu1 %v13961_v33 }
 0xc30   :  { %v7157_v51 = vpop.f32.mrb[101].mxu0  ;;  %13964 = vmatpush3.bf16.msra.mxu1 %v13963_v15  ;;  %v13977_v15 = vpack.c.bf16 %v10714_v41, %v10713_v57 }
 0xc31   :  { %v13965_v34 = vpack.c.bf16 %v13118_v2, %v7157_v51 }
 0xc33   :  { %v13121_v16 = vpop.f32.mrb[102].mxu0  ;;  %13966 = vmatprep.subr.bf16.mxu1 %v13965_v34 }
 0xc34   :  { %v7167_v27 = vpop.f32.mrb[103].mxu0  ;;  %13968 = vmatpush3.bf16.msra.mxu1 %v13967_v7  ;;  %v10716_v7 = vld [vmem:[%s18057_s4 + $0x218] sm:$0xff] }
 0xc35   :  { %v13969_v53 = vpack.c.bf16 %v13121_v16, %v7167_v27  ;;  %v13981_v11 = vpack.c.bf16 %v10716_v7, %v10715_v47 }
 0xc37   :  { %v13124_v20 = vpop.f32.mrb[104].mxu0  ;;  %13970 = vmatprep.subr.bf16.mxu1 %v13969_v53 }
 0xc38   :  { %v7177_v26 = vpop.f32.mrb[105].mxu0  ;;  %13972 = vmatpush3.bf16.msra.mxu1 %v13971_v14  ;;  %v10712_v14 = vld [vmem:[%s18058_s5 + $0xf8] sm:$0xff] }
 0xc39   :  { %v13973_v32 = vpack.c.bf16 %v13124_v20, %v7177_v26 }
 0xc3b   :  { %13974 = vmatprep.subr.bf16.mxu1 %v13973_v32 }
 0xc3c   :  { %13976 = vmatpush3.bf16.msra.mxu1 %v13975_v43  ;;  %v10711_v43 = vld [vmem:[%s18058_s5 + $0xf0] sm:$0xff] }
 0xc3d   :  { %13978 = vmatprep.subr.bf16.mxu1 %v13977_v15 }
 0xc3f   :  { %7256 = vmatmul.mubr.f32.vlgmr.msra.gmra.mrb[228].mxu1 %v10709_v6 }
 0xc40   :  { %13980 = vmatpush3.bf16.msra.mxu1 %v13977_v15  ;;  %7260 = vmatprep.mubr.f32.mxu1 %v10712_v14 }
 0xc41   :  { %13982 = vmatprep.subr.bf16.mxu1 %v13981_v11 }
 0xc43   :  { %7261 = vmatmul.mubr.f32.gmra.mrb[230].mxu1 %v10711_v43  ;;  %v10755_v43 = vld [vmem:[%s18058_s5 + $0x110] sm:$0xff] }
 0xc44   :  { %13984 = vmatpush3.bf16.msra.mxu1 %v13981_v11  ;;  %13141 = vmatprep.mubr.msk.f32.mxu1 %vm4657_vm2, %v16710_v58  ;;  %v10754_v58 = vld [vmem:[%s18058_s5 + $0x108] sm:$0xff] }
 0xc45   :  { %13986 = vmatprep.subr.bf16.mxu1 %v13985_v61  ;;  %7571 = vmatprep.mubr.f32.mxu0 %v10754_v58 }
 0xc48   :  { %13988 = vmatpush3.bf16.msra.mxu1 %v13985_v61  ;;  %v7598_v61 = vld [vmem:[%s18060_s7] sm:$0xff] }
 0xc49   :  { %13990 = vmatprep.subr.bf16.mxu1 %v13989_v23  ;;  %v14025_v62 = vpack.c.bf16 %v7599_v49, %v7598_v61 }
 0xc4c   :  { %13992 = vmatpush3.bf16.msra.mxu1 %v13989_v23 }
 0xc4f   :  { %13142 = vmatmul.mubr.msk.f32.vlgmr.msra.gmra.mrb[232].mxu1 %vm4657_vm2, %v16712_v30 }
 0xc50   :  { %13144 = vmatprep.mubr.msk.f32.mxu1 %vm4657_vm2, %v16724_v63 }
 0xc53   :  { %13145 = vmatmul.mubr.msk.f32.gmra.mrb[234].mxu1 %vm4657_vm2, %v16726_v1 }
 0xc54   :  { %13147 = vmatprep.mubr.msk.f32.mxu1 %vm4657_vm2, %v16738_v9 }
 0xc57   :  { %13148 = vmatmul.mubr.msk.f32.gmra.mrb[236].mxu1 %vm4657_vm2, %v16740_v10 }
 0xc58   :  { %13150 = vmatprep.mubr.msk.f32.mxu1 %vm4657_vm2, %v16746_v17 }
 0xc5b   :  { %13151 = vmatmul.mubr.msk.f32.gmra.mrb[238].mxu1 %vm4657_vm2, %v16748_v18 }
 0xc5c   :  { %13153 = vmatprep.mubr.msk.f32.mxu1 %vm4657_vm2, %v18169_v22 }
 0xc5f   :  { %13154 = vmatmul.mubr.msk.f32.gmra.mrb[240].mxu1 %vm4657_vm2, %v18170_v28 }
 0xc60   :  { %13156 = vmatprep.mubr.msk.f32.mxu1 %vm4657_vm2, %v18171_v38 }
 0xc63   :  { %13157 = vmatmul.mubr.msk.f32.gmra.mrb[242].mxu1 %vm4657_vm2, %v18172_v54 }
 0xc64   :  { %13159 = vmatprep.mubr.msk.f32.mxu1 %vm4657_vm2, %v18173_v45 }
 0xc67   :  { %13160 = vmatmul.mubr.msk.f32.gmra.mrb[244].mxu1 %vm4657_vm2, %v18174_v60 }
 0xc68   :  { %13162 = vmatprep.mubr.msk.f32.mxu1 %vm4657_vm2, %v18175_v39 }
 0xc6b   :  { %13163 = vmatmul.mubr.msk.f32.gmra.mrb[246].mxu1 %vm4657_vm2, %v18176_v40 }
 0xc6c   :  { %13165 = vmatprep.mubr.msk.f32.mxu1 %vm4657_vm2, %v18177_v36 }
 0xc6f   :  { %13166 = vmatmul.mubr.msk.f32.gmra.mrb[248].mxu1 %vm4657_vm2, %v18178_v42 }
 0xc70   :  { %13168 = vmatprep.mubr.msk.f32.mxu1 %vm4657_vm2, %v18179_v29 }
 0xc73   :  { %13169 = vmatmul.mubr.msk.f32.gmra.mrb[250].mxu1 %vm4657_vm2, %v18180_v24 }
 0xc74   :  { %13171 = vmatprep.mubr.msk.f32.mxu1 %vm4657_vm2, %v18181_v56 }
 0xc77   :  { %13172 = vmatmul.mubr.msk.f32.gmra.mrb[252].mxu1 %vm4657_vm2, %v18182_v13 }
 0xc78   :  { %13174 = vmatprep.mubr.msk.f32.mxu1 %vm4657_vm2, %v18183_v21 }
 0xc7b   :  { %13175 = vmatmul.mubr.msk.f32.gmra.mrb[254].mxu1 %vm4657_vm2, %v18184_v8 }
 0xc7c   :  { %13177 = vmatprep.mubr.msk.f32.mxu1 %vm4657_vm2, %v18185_v3 }
 0xc7f   :  { %13178 = vmatmul.mubr.msk.f32.gmra.mrb[0].mxu1 %vm4657_vm2, %v18186_v12 }
 0xc80   :  { %13180 = vmatprep.mubr.msk.f32.mxu1 %vm4657_vm2, %v18187_v4 }
 0xc83   :  { %13181 = vmatmul.mubr.msk.f32.gmra.mrb[2].mxu1 %vm4657_vm2, %v18188_v59 }
 0xc84   :  { %13183 = vmatprep.mubr.msk.f32.mxu1 %vm4657_vm2, %v18189_v55 }
 0xc87   :  { %13184 = vmatmul.mubr.msk.f32.gmra.mrb[4].mxu1 %vm4657_vm2, %v18190_v50 }
 0xc88   :  { %13186 = vmatprep.mubr.msk.f32.mxu1 %vm4657_vm2, %v18191_v44 }
 0xc8b   :  { %13187 = vmatmul.mubr.msk.f32.gmra.mrb[6].mxu1 %vm4657_vm2, %v18192_v37 }
 0xd12   :  { %v12023_v30 = vpop.f32.mrb[228].mxu1 }
 0xd13   :  { %v12024_v63 = vpop.f32.mrb[229].mxu1 }
 0xd14   :  { %v12025_v1 = vadd.f32 %v12024_v63, %v12023_v30 }
 0xd16   :  { %v17808_v9 = vadd.f32 %v12025_v1, %v17702_v19  ;;  %v12026_v10 = vpop.f32.mrb[230].mxu1 }
 0xd17   :  { %v12027_v17 = vpop.f32.mrb[231].mxu1 }
 0xd18   :  { %v12028_v18 = vadd.f32 %v12027_v17, %v12026_v10  ;;  %v7589_v10 = vpop.permute.xlu0 %7588 }
 0xd1a   :  { %v17811_v22 = vadd.f32 %v12028_v18, %v17705_v25 }
 0xd22   :  { %v13143_v28 = vpop.f32.mrb[232].mxu1 }
 0xd23   :  { %v7343_v38 = vpop.f32.mrb[233].mxu1 }
 0xd24   :  { %v13995_v54 = vpack.c.bf16 %v13143_v28, %v7343_v38 }
 0xd26   :  { %v13146_v45 = vpop.f32.mrb[234].mxu1 }
 0xd27   :  { %v7353_v60 = vpop.f32.mrb[235].mxu1 }
 0xd28   :  { %v13999_v39 = vpack.c.bf16 %v13146_v45, %v7353_v60  ;;  %v7697_v60 = vld [vmem:[%s18064_s11] sm:$0xff] }
 0xd2a   :  { %v13149_v40 = vpop.f32.mrb[236].mxu1 }
 0xd2b   :  { %v7363_v36 = vpop.f32.mrb[237].mxu1 }
 0xd2c   :  { %v14003_v42 = vpack.c.bf16 %v13149_v40, %v7363_v36  ;;  %v7706_v40 = vld [vmem:[%s18062_s9] sm:$0xff] }
 0xd2e   :  { %v13152_v29 = vpop.f32.mrb[238].mxu1 }
 0xd2f   :  { %v7373_v24 = vpop.f32.mrb[239].mxu1 }
 0xd30   :  { %v14007_v56 = vpack.c.bf16 %v13152_v29, %v7373_v24  ;;  %v10757_v29 = vld [vmem:[%s18061_s8] ss:$0 sm:$0xff] }
 0xd32   :  { %v13155_v13 = vpop.f32.mrb[240].mxu1 }
 0xd33   :  { %v7383_v21 = vpop.f32.mrb[241].mxu1 }
 0xd34   :  { %v14011_v8 = vpack.c.bf16 %v13155_v13, %v7383_v21 }
 0xd36   :  { %v13158_v3 = vpop.f32.mrb[242].mxu1 }
 0xd37   :  { %v7393_v12 = vpop.f32.mrb[243].mxu1 }
 0xd38   :  { %v14015_v4 = vpack.c.bf16 %v13158_v3, %v7393_v12  ;;  %v14381_v12 = vmov 0.0  }
 0xd39   :  { %13271 = vmatprep.subr.mxu1 %v14381_v12  ;;  %13273 = vmatprep.mubr.msk.f32.mxu1 %vm14382_vm5, %v14381_v12 }
 0xd3a   :  { %v13161_v59 = vpop.f32.mrb[244].mxu1 }
 0xd3b   :  { %v7403_v55 = vpop.f32.mrb[245].mxu1 }
 0xd3c   :  { %v14019_v50 = vpack.c.bf16 %v13161_v59, %v7403_v55 }
 0xd3e   :  { %v13164_v44 = vpop.f32.mrb[246].mxu1 }
 0xd3f   :  { %v7413_v37 = vpop.f32.mrb[247].mxu1 }
 0xd40   :  { %v14023_v19 = vpack.c.bf16 %v13164_v44, %v7413_v37 }
 0xd42   :  { %v13167_v25 = vpop.f32.mrb[248].mxu1 }
 0xd43   :  { %v7423_v0 = vpop.f32.mrb[249].mxu1 }
 0xd44   :  { %v13993_v52 = vpack.c.bf16 %v13167_v25, %v7423_v0  ;;  %v7956_v0 = vld [vmem:[%s18066_s13] sm:$0xff] }
 0xd46   :  { %v13170_v5 = vpop.f32.mrb[250].mxu1  ;;  %13994 = vmatprep.subr.bf16.mxu0 %v13993_v52  ;;  %v7957_v52 = vld [vmem:[%s18066_s13 + $0x8] sm:$0xff] }
 0xd47   :  { %v7433_v31 = vpop.f32.mrb[251].mxu1  ;;  %13996 = vmatpush3.bf16.msra.mxu0 %v13995_v54  ;;  %v7594_v54 = vpop.permute.xlu1 %7593 }
 0xd48   :  { %v13997_v48 = vpack.c.bf16 %v13170_v5, %v7433_v31  ;;  %v17868_v5 = vpack.c.bf16 %v7957_v52, %v7956_v0  ;;  %v7691_v31 = vlaneseq }
 0xd4a   :  { %v13173_v33 = vpop.f32.mrb[252].mxu1  ;;  %13998 = vmatprep.subr.bf16.mxu0 %v13997_v48  ;;  %v17874_v48 = vshrl.u32 %v7691_v31, 7 }
 0xd4b   :  { %v7443_v2 = vpop.f32.mrb[253].mxu1  ;;  %14000 = vmatpush3.bf16.msra.mxu0 %v13999_v39 }
 0xd4c   :  { %v14001_v51 = vpack.c.bf16 %v13173_v33, %v7443_v2  ;;  %v7950_v33 = vsub.s32 0, %v17874_v48  ;;  %v17880_v2 = vld [vmem:[%s18065_s12] sm:$0xf] }
 0xd4e   :  { %v13176_v34 = vpop.f32.mrb[254].mxu1  ;;  %14002 = vmatprep.subr.bf16.mxu0 %v14001_v51  ;;  %v7951_v51 = vrot.slane %v17880_v2, %v7950_v33 }
 0xd4f   :  { %v7453_v16 = vpop.f32.mrb[255].mxu1  ;;  %14004 = vmatpush3.bf16.msra.mxu0 %v14003_v42  ;;  %v7709_v42 = vsel %vm7708_vm4, %v7706_v40, 0.0 }
 0xd50   :  { %v14005_v27 = vpack.c.bf16 %v13176_v34, %v7453_v16  ;;  %7710 = vadd.xlane.f32.xlu0 %v7709_v42 }
 0xd52   :  { %v13179_v53 = vpop.f32.mrb[0].mxu1  ;;  %14006 = vmatprep.subr.bf16.mxu0 %v14005_v27 }
 0xd53   :  { %v7463_v57 = vpop.f32.mrb[1].mxu1  ;;  %14008 = vmatpush3.bf16.msra.mxu0 %v14007_v56 }
 0xd54   :  { %v14009_v41 = vpack.c.bf16 %v13179_v53, %v7463_v57 }
 0xd56   :  { %v13182_v20 = vpop.f32.mrb[2].mxu1  ;;  %14010 = vmatprep.subr.bf16.mxu0 %v14009_v41 }
 0xd57   :  { %v7473_v26 = vpop.f32.mrb[3].mxu1  ;;  %14012 = vmatpush3.bf16.msra.mxu0 %v14011_v8 }
 0xd58   :  { %v14013_v32 = vpack.c.bf16 %v13182_v20, %v7473_v26 }
 0xd5a   :  { %v13185_v15 = vpop.f32.mrb[4].mxu1  ;;  %14014 = vmatprep.subr.bf16.mxu0 %v14013_v32 }
 0xd5b   :  { %v7483_v47 = vpop.f32.mrb[5].mxu1  ;;  %14016 = vmatpush3.bf16.msra.mxu0 %v14015_v4 }
 0xd5c   :  { %v14017_v7 = vpack.c.bf16 %v13185_v15, %v7483_v47 }
 0xd5e   :  { %v13188_v6 = vpop.f32.mrb[6].mxu1  ;;  %14018 = vmatprep.subr.bf16.mxu0 %v14017_v7 }
 0xd5f   :  { %v7493_v14 = vpop.f32.mrb[7].mxu1  ;;  %14020 = vmatpush3.bf16.msra.mxu0 %v14019_v50 }
 0xd60   :  { %v14021_v11 = vpack.c.bf16 %v13188_v6, %v7493_v14 }
 0xd62   :  { %14022 = vmatprep.subr.bf16.mxu0 %v14021_v11 }
 0xd63   :  { %14024 = vmatpush3.bf16.msra.mxu0 %v14023_v19 }
 0xd64   :  { %14026 = vmatprep.subr.bf16.mxu0 %v14025_v62 }
 0xd66   :  { %7572 = vmatmul.mubr.f32.vlgmr.msra.gmra.mrb[106].mxu0 %v10753_v35 }
 0xd67   :  { %7576 = vmatprep.mubr.f32.mxu0 %v10756_v46  ;;  %14028 = vmatpush3.bf16.msra.mxu0 %v14025_v62  ;;  %v7699_v62 = vld [vmem:[%s18064_s11 + $0x10] sm:$0xff] }
 0xd6a   :  { %7577 = vmatmul.mubr.f32.gmra.mrb[108].mxu0 %v10755_v43 }
 0xddd   :  { %v7711_v4 = vpop.xlane.xlu0 %7710 }
 0xdde   :  { %14334 = vrsqrt.f32 %v7711_v4 }
 0xde8   :  { %v14335_v55 = vpop.eup %14334 }
 0xe39   :  { %v12101_v23 = vpop.f32.mrb[106].mxu0 }
 0xe3a   :  { %v12102_v58 = vpop.f32.mrb[107].mxu0 }
 0xe3b   :  { %v12103_v30 = vadd.f32 %v12102_v58, %v12101_v23  ;;  %v7700_v23 = vld [vmem:[%s18064_s11 + $0x18] sm:$0xff] }
 0xe3d   :  { %v7582_v63 = vadd.f32 %v12103_v30, %v17808_v9  ;;  %v12104_v1 = vpop.f32.mrb[108].mxu0  ;;  %v7698_v9 = vld [vmem:[%s18064_s11 + $0x8] sm:$0xff]  ;;  %v14037_v30 = vpack.c.bf16 %v7700_v23, %v7699_v62 }
 0xe3e   :  { %v12105_v17 = vpop.f32.mrb[109].mxu0  ;;  %v14029_v39 = vpack.c.bf16 %v7698_v9, %v7697_v60 }
 0xe3f   :  { %v7596_v18 = vadd.f32 %v7589_v10, %v7582_v63  ;;  %v12106_v28 = vadd.f32 %v12105_v17, %v12104_v1  ;;  %v17910_v1 = vld [vmem:[%s18067_s14] ss:$0 sm:$0xff] }
 0xe40   :  { %14030 = vmatprep.subr.bf16.mxu0 %v14029_v39 }
 0xe41   :  { %v7583_v38 = vadd.f32 %v12106_v28, %v17811_v22  ;;  %13193 = vmatprep.mubr.msk.f32.mxu0 %vm7607_vm3, %v7596_v18  ;;  %v7707_v22 = vld [vmem:[%s18062_s9 + $0x8] sm:$0xff] }
 0xe42   :  { %v7712_v36 = vsel %vm7708_vm4, %v7707_v22, 0.0 }
 0xe43   :  { %v7597_v45 = vadd.f32 %v7594_v54, %v7583_v38  ;;  %7713 = vadd.xlane.f32.xlu1 %v7712_v36 }
 0xe45   :  { %13194 = vmatmul.mubr.msk.f32.vlgmr.msra.gmra.mrb[110].mxu0 %vm7607_vm3, %v7597_v45 }
 0xe46   :  { %14032 = vmatpush3.bf16.msra.mxu0 %v14029_v39 }
 0xe47   :  { %13203 = vmatprep.subr.mxu0 %v14381_v12 }
 0xed0   :  { %v7714_v59 = vpop.xlane.xlu1 %7713 }
 0xed1   :  { %14336 = vrsqrt.f32 %v7714_v59 }
 0xedb   :  { %v14337_v44 = vpop.eup %14336 }
 0xf18   :  { %v13195_v24 = vpop.f32.mrb[110].mxu0 }
 0xf19   :  { %v7686_v56 = vadd.f32 %v13195_v24, %v10757_v29  ;;  %v7680_v13 = vpop.f32.mrb[111].mxu0 }
 0xf1a   :  { %v7681_v21 = vadd.f32 %v10757_v29, %v7680_v13 }
 0xf1b   :  { %v7690_v3 = vmax.f32 %v7686_v56, 0.0 }
 0xf1c   :  { %v7689_v8 = vmax.f32 %v7681_v21, 0.0 }
 0xf1e   :  { %13200 = vmatprep.mubr.msk.f32.mxu0 %vm7607_vm3, %v7689_v8 }
 0xf1f   :  { %13201 = vmatmul.mubr.msk.f32.vlgmr.msra.gmra.mrb[112].mxu0 %vm7607_vm3, %v7690_v3 }
 0xf20   :  { %13205 = vmatprep.mubr.msk.f32.mxu0 %vm14382_vm5, %v14381_v12 }
 0xff2   :  { %v13202_v50 = vpop.f32.mrb[112].mxu0 }
 0xff3   :  { %v7789_v37 = vpop.f32.mrb[113].mxu0  ;;  %v7799_v25 = vmul.f32 %v14337_v44, %v13202_v50 }
 0xff4   :  { %v7798_v19 = vmul.f32 %v14335_v55, %v7789_v37 }
 0xff6   :  { %13204 = vmatpush3.msra.mxu0 %v7798_v19 }
 0xff7   :  { %13206 = vmatmul.mubr.msk.f32.vlgmr.msra.gmra.mrb[114].mxu0 %vm7708_vm4, %v7706_v40  ;;  %13208 = vmatprep.subr.mxu0 %v14381_v12 }
 0xff8   :  { %13209 = vmatpush3.msra.mxu0 %v7799_v25  ;;  %13210 = vmatprep.mubr.msk.f32.mxu0 %vm14382_vm5, %v14381_v12 }
 0xff9   :  { %14034 = vmatprep.subr.bf16.mxu0 %v17868_v5 }
 0xffb   :  { %13211 = vmatmul.mubr.msk.f32.vlgmr.msra.gmra.mrb[116].mxu0 %vm7708_vm4, %v7707_v22 }
 0xffc   :  { %14036 = vmatpush3.bf16.msra.mxu0 %v17868_v5 }
 0xffd   :  { %13220 = vmatprep.subr.mxu0 %v14381_v12 }
0x10ca   :  { %v7869_v34 = vpop.f32.mrb[114].mxu0 }
0x10cb   :  { %v7946_v16 = vmul.f32 %v14335_v55, %v7869_v34  ;;  %v13207_v27 = vpop.f32.mrb[115].mxu0 }
0x10cd   :  { %v7952_v53 = vadd.f32 %v7951_v51, %v7946_v16 }
0x10ce   :  { %v7942_v57 = vpop.f32.mrb[116].mxu0 }
0x10cf   :  { %v7954_v41 = vmax.f32 %v7952_v53, 0.0  ;;  %v7947_v20 = vmul.f32 %v14337_v44, %v7942_v57  ;;  %v13212_v26 = vpop.f32.mrb[117].mxu0 }
0x10d1   :  { %v7953_v32 = vadd.f32 %v7951_v51, %v7947_v20  ;;  %13217 = vmatprep.mubr.msk.f32.mxu0 %vm7607_vm3, %v7954_v41  ;;  %v8074_v15 = vmul.f32 %v7954_v41, %v7954_v41 }
0x10d3   :  { %v7955_v47 = vmax.f32 %v7953_v32, 0.0  ;;  %v8076_v7 = vsel %vm7607_vm3, %v8074_v15, 0.0 }
0x10d4   :  { %8077 = vadd.xlane.f32.xlu0 %v8076_v7 }
0x10d5   :  { %13218 = vmatmul.mubr.msk.f32.vlgmr.msra.gmra.mrb[118].mxu0 %vm7607_vm3, %v7955_v47  ;;  %v8075_v6 = vmul.f32 %v7955_v47, %v7955_v47 }
0x10d6   :  { %13222 = vmatprep.mubr.msk.f32.mxu0 %vm14382_vm5, %v14381_v12 }
0x10d7   :  { %v8079_v14 = vsel %vm7607_vm3, %v8075_v6, 0.0 }
0x10d8   :  { %8080 = vadd.xlane.f32.xlu0 %v8079_v14 }
0x1161   :  { %v8078_v11 = vpop.xlane.xlu0 %8077 }
0x1162   :  { %v8082_v35 = vmax.f32 %v8078_v11, 1e-24 }
0x1164   :  { %14338 = vrsqrt.f32 %v8082_v35 }
0x1165   :  { %v8081_v46 = vpop.xlane.xlu0 %8080 }
0x1166   :  { %v8083_v43 = vmax.f32 %v8081_v46, 1e-24 }
0x1168   :  { %14340 = vrsqrt.f32 %v8083_v43 }
0x116e   :  { %v14339_v61 = vpop.eup %14338 }
0x116f   :  { %v8086_v49 = vmul.f32 %v14339_v61, %v7954_v41 }
0x1171   :  { %13221 = vmatpush3.xpose.msk.msra.mxu0 %vm7607_vm3, %v8086_v49 }
0x1172   :  { %v14341_v58 = vpop.eup %14340  ;;  %13225 = vmatprep.subr.mxu0 %v14381_v12 }
0x1173   :  { %v8087_v63 = vmul.f32 %v14341_v58, %v7955_v47 }
0x1174   :  { %13223 = vmatmul.mubr.msk.f32.vlgmr.msra.gmra.mrb[120].mxu0 %vm7607_vm3, %v8086_v49 }
0x1175   :  { %13226 = vmatpush3.xpose.msk.msra.mxu0 %vm7607_vm3, %v8087_v63  ;;  %13227 = vmatprep.mubr.msk.f32.mxu0 %vm14382_vm5, %v14381_v12 }
0x1176   :  { %14038 = vmatprep.subr.bf16.mxu0 %v14037_v30 }
0x1178   :  { %13228 = vmatmul.mubr.msk.f32.vlgmr.msra.gmra.mrb[122].mxu0 %vm7607_vm3, %v8087_v63 }
0x1179   :  { %14040 = vmatpush3.bf16.msra.mxu0 %v14037_v30  ;;  %13234 = vmatprep.mubr.msk.f32.mxu0 %vm7607_vm3, %v7954_v41 }
0x117a   :  { %13237 = vmatprep.subr.mxu0 %v14381_v12 }
0x117c   :  { %13235 = vmatmul.mubr.msk.f32.vlgmr.msra.gmra.mrb[124].mxu0 %vm7607_vm3, %v7955_v47 }
0x117d   :  { %13239 = vmatprep.mubr.msk.f32.mxu0 %vm14382_vm5, %v14381_v12 }
0x11a8   :  { %v13219_v10 = vpop.f32.mrb[118].mxu0 }
0x11a9   :  { %v8043_v17 = vadd.f32 %v13219_v10, %v17910_v1  ;;  %v8037_v18 = vpop.f32.mrb[119].mxu0 }
0x11aa   :  { %v8038_v28 = vadd.f32 %v17910_v1, %v8037_v18 }
0x11ab   :  { %v8047_v38 = vmax.f32 %v8043_v17, 0.0 }
0x11ac   :  { %v8046_v54 = vmax.f32 %v8038_v28, 0.0 }
0x11ad   :  { %v8049_v45 = vmul.f32 %v8047_v38, %v8047_v38 }
0x11ae   :  { %v8048_v60 = vmul.f32 %v8046_v54, %v8046_v54 }
0x11af   :  { %v8053_v9 = vsel %vm7708_vm4, %v8049_v45, 0.0 }
0x11b0   :  { %8054 = vadd.xlane.f32.xlu0 %v8053_v9  ;;  %v8050_v39 = vsel %vm7708_vm4, %v8048_v60, 0.0 }
0x11b1   :  { %8051 = vadd.xlane.f32.xlu1 %v8050_v39 }
0x123d   :  { %v8055_v22 = vpop.xlane.xlu0 %8054 }
0x123e   :  { %v8062_v40 = vrot.slane %v8055_v22, 4  ;;  %v8052_v36 = vpop.xlane.xlu1 %8051 }
0x123f   :  { %v8056_v42 = vrot.slane %v8052_v36, 4 }
0x1240   :  { %v8063_v29 = vadd.f32 %v8062_v40, %v8055_v22 }
0x1241   :  { %v8057_v24 = vadd.f32 %v8056_v42, %v8052_v36 }
0x1242   :  { %v8064_v56 = vrot.slane %v8063_v29, 2 }
0x1243   :  { %v8058_v13 = vrot.slane %v8057_v24, 2 }
0x1244   :  { %v8065_v21 = vadd.f32 %v8064_v56, %v8063_v29 }
0x1245   :  { %v8059_v8 = vadd.f32 %v8058_v13, %v8057_v24 }
0x1246   :  { %v8066_v3 = vrot.slane %v8065_v21, 1 }
0x1247   :  { %v8060_v4 = vrot.slane %v8059_v8, 1  ;;  %v8157_v59 = vpop.f32.mrb[120].mxu0 }
0x1248   :  { %v8067_v55 = vadd.f32 %v8066_v3, %v8065_v21  ;;  %v13224_v50 = vpop.f32.mrb[121].mxu0  ;;  %v8574_v21 = vsub.s32 1, %v17874_v48 }
0x1249   :  { %v8061_v44 = vadd.f32 %v8060_v4, %v8059_v8 }
0x124a   :  { %v8069_v37 = vmax.f32 %v8067_v55, 1e-24  ;;  %v8575_v8 = vrot.slane %v17880_v2, %v8574_v21 }
0x124b   :  { %v8068_v19 = vmax.f32 %v8061_v44, 1e-24  ;;  %v8230_v25 = vpop.f32.mrb[122].mxu0 }
0x124c   :  { %14342 = vrsqrt.f32 %v8069_v37  ;;  %v13229_v0 = vpop.f32.mrb[123].mxu0 }
0x124d   :  { %14344 = vrsqrt.f32 %v8068_v19 }
0x124f   :  { %v17916_v52 = vpop.f32.mrb[124].mxu0 }
0x1250   :  { %v17918_v33 = vpop.f32.mrb[125].mxu0 }
0x1256   :  { %v14343_v51 = vpop.eup %14342 }
0x1257   :  { %v14345_v34 = vpop.eup %14344  ;;  %v8073_v16 = vmul.f32 %v14343_v51, %v8047_v38 }
0x1258   :  { %v8072_v27 = vmul.f32 %v14345_v34, %v8046_v54  ;;  %v7694_v54 = vand.u32 127, %v7691_v31 }
0x1259   :  { %v8235_v53 = vsub.f32 %v8073_v16, %v8230_v25  ;;  %v8252_v57 = vsel %vm7708_vm4, %v8073_v16, -inf  ;;  %vm8268_vm8 = vcmp.gt.f32.partialorder %v8073_v16, 0.0 }
0x125a   :  { %v8234_v41 = vsub.f32 %v8072_v27, %v8157_v59  ;;  %v8251_v20 = vsel %vm7708_vm4, %v8072_v27, -inf  ;;  %vm8267_vm10 = vcmp.gt.f32.partialorder %v8072_v27, 0.0  ;;  %vm7695_vm12 = vcmp.eq.s32.totalorder %v17874_v48, %v7694_v54 }
0x125b   :  { %v8237_v26 = vmul.f32 %v8235_v53, %v8235_v53  ;;  %v8253_v32 = vmax.f32 %v8251_v20, %v8252_v57  ;;  %v17931_v45 = vsel %vm7695_vm12, 1.0, %v14381_v12  ;;  %v7701_v20 = vld [vmem:[%s18064_s11 + $0x20] sm:$0xff] }
0x125c   :  { %v8236_v15 = vmul.f32 %v8234_v41, %v8234_v41 }
0x125d   :  { %8254 = vmax.xlane.f32.xlu0 %v8253_v32  ;;  %v8239_v47 = vsel %vm7708_vm4, %v8237_v26, 0.0  ;;  %v7702_v26 = vld [vmem:[%s18064_s11 + $0x28] sm:$0xff] }
0x125e   :  { %v8238_v7 = vsel %vm7708_vm4, %v8236_v15, 0.0  ;;  %v14045_v15 = vpack.c.bf16 %v7702_v26, %v7701_v20 }
0x125f   :  { %v8240_v6 = vadd.f32 %v8239_v47, %v8238_v7 }
0x1261   :  { %8241 = vadd.xlane.f32.xlu1 %v8240_v6 }
0x12ea   :  { %v8255_v14 = vpop.xlane.xlu0 %8254 }
0x12eb   :  { %v8256_v11 = vrot.slane %v8255_v14, 4 }
0x12ed   :  { %v8257_v35 = vmax.f32 %v8255_v14, %v8256_v11 }
0x12ee   :  { %v8242_v46 = vpop.xlane.xlu1 %8241 }
0x12ef   :  { %v8258_v43 = vrot.slane %v8257_v35, 2  ;;  %v8243_v61 = vrot.slane %v8242_v46, 4 }
0x12f1   :  { %v8244_v49 = vadd.f32 %v8243_v61, %v8242_v46  ;;  %v8259_v62 = vmax.f32 %v8257_v35, %v8258_v43 }
0x12f3   :  { %v8245_v23 = vrot.slane %v8244_v49, 2  ;;  %v8260_v30 = vrot.slane %v8259_v62, 1 }
0x12f5   :  { %v8246_v58 = vadd.f32 %v8245_v23, %v8244_v49  ;;  %v8261_v17 = vmax.f32 %v8259_v62, %v8260_v30 }
0x12f7   :  { %v8247_v63 = vrot.slane %v8246_v58, 1 }
0x12f9   :  { %v8248_v10 = vadd.f32 %v8247_v63, %v8246_v58 }
0x12fb   :  { %14313 = vpush %v8248_v10 }
0x12fc   :  { %14315 = vpush %v8261_v17 }
0x132c   :  { %s17924_s14 = spop %14313 }
0x132d   :  { %s14316_s26 = spop %14315  ;;  %s8250_s0 = smul.f32 0.5, %s17924_s14 }
0x132e   :  { %s8263_s28 = smul.f32 0.5, %s14316_s26 }
0x1330   :  { %v8264_v18 = vstv %s8263_s28 }
0x1331   :  { %vm8265_vm6 = vcmp.ge.f32.partialorder %v8072_v27, %v8264_v18  ;;  %vm8266_vm7 = vcmp.ge.f32.partialorder %v8073_v16, %v8264_v18 }
0x1332   :  { %vm8270_vm9 = vmand %vm8266_vm7, %vm8268_vm8 }
0x1333   :  { %v8272_v28 = vsel %vm8270_vm9, 1.0, %v14381_v12  ;;  %vm8269_vm11 = vmand %vm8265_vm6, %vm8267_vm10 }
0x1334   :  { %8305 = vxpose.xlu0.b32.start.end [1/1] (short) (narrow) %v8272_v28, 8  ;;  %v8271_v38 = vsel %vm8269_vm11, 1.0, %v14381_v12 }
0x1335   :  { %8273 = vxpose.xlu1.b32.start.end [1/1] (short) (narrow) %v8271_v38, 8 }
0x13b4   :  { %v8321_v60 = vpop.trf.xlu0 }
0x13b5   :  { %v8338_v9 = vmax.f32 %v8321_v60, %v17931_v45  ;;  %v8289_v39 = vpop.trf.xlu1 }
0x13b6   :  { %v8337_v22 = vmax.f32 %v8289_v39, %v17931_v45 }
0x13b7   :  { %v8342_v40 = vsel %vm7708_vm4, %v8338_v9, 0.0 }
0x13b8   :  { %8343 = vadd.xlane.f32.xlu1 %v8342_v40  ;;  %v8339_v36 = vsel %vm7708_vm4, %v8337_v22, 0.0 }
0x13b9   :  { %8340 = vadd.xlane.f32.xlu0 %v8339_v36 }
0x1445   :  { %v8344_v42 = vpop.xlane.xlu1 %8343 }
0x1446   :  { %v8341_v29 = vpop.xlane.xlu0 %8340  ;;  %14346 = vrsqrt.f32 %v8344_v42 }
0x1447   :  { %14348 = vrsqrt.f32 %v8341_v29 }
0x1450   :  { %v14347_v31 = vpop.eup %14346 }
0x1451   :  { %v14349_v24 = vpop.eup %14348  ;;  %v8423_v13 = vmul.f32 %v14347_v31, %v17916_v52 }
0x1452   :  { %v8422_v56 = vmul.f32 %v14349_v24, %v17918_v33 }
0x1454   :  { %13238 = vmatpush3.msra.mxu0 %v8422_v56 }
0x1455   :  { %13240 = vmatmul.mubr.msk.f32.vlgmr.msra.gmra.mrb[126].mxu0 %vm7708_vm4, %v8337_v22  ;;  %13242 = vmatprep.subr.mxu0 %v14381_v12 }
0x1456   :  { %13243 = vmatpush3.msra.mxu0 %v8423_v13  ;;  %13244 = vmatprep.mubr.msk.f32.mxu0 %vm14382_vm5, %v14381_v12 }
0x1457   :  { %14042 = vmatprep.subr.bf16.mxu0 %v17868_v5 }
0x1459   :  { %13245 = vmatmul.mubr.msk.f32.vlgmr.msra.gmra.mrb[128].mxu0 %vm7708_vm4, %v8338_v9 }
0x145a   :  { %14044 = vmatpush3.bf16.msra.mxu0 %v17868_v5 }
0x145b   :  { %13254 = vmatprep.subr.mxu0 %v14381_v12 }
0x1528   :  { %v8493_v3 = vpop.f32.mrb[126].mxu0 }
0x1529   :  { %v8570_v4 = vmul.f32 %v14349_v24, %v8493_v3  ;;  %v13241_v59 = vpop.f32.mrb[127].mxu0 }
0x152b   :  { %v8576_v55 = vadd.f32 %v8575_v8, %v8570_v4 }
0x152c   :  { %v8566_v50 = vpop.f32.mrb[128].mxu0 }
0x152d   :  { %v8578_v44 = vmax.f32 %v8576_v55, 0.0  ;;  %v8571_v37 = vmul.f32 %v14347_v31, %v8566_v50  ;;  %v13246_v19 = vpop.f32.mrb[129].mxu0 }
0x152f   :  { %v8577_v25 = vadd.f32 %v8575_v8, %v8571_v37  ;;  %13251 = vmatprep.mubr.msk.f32.mxu0 %vm7607_vm3, %v8578_v44  ;;  %v8698_v0 = vmul.f32 %v8578_v44, %v8578_v44 }
0x1531   :  { %v8579_v52 = vmax.f32 %v8577_v25, 0.0  ;;  %v8700_v5 = vsel %vm7607_vm3, %v8698_v0, 0.0 }
0x1532   :  { %8701 = vadd.xlane.f32.xlu1 %v8700_v5 }
0x1533   :  { %13252 = vmatmul.mubr.msk.f32.vlgmr.msra.gmra.mrb[130].mxu0 %vm7607_vm3, %v8579_v52  ;;  %v8699_v33 = vmul.f32 %v8579_v52, %v8579_v52 }
0x1534   :  { %13256 = vmatprep.mubr.msk.f32.mxu0 %vm14382_vm5, %v14381_v12 }
0x1535   :  { %v8703_v51 = vsel %vm7607_vm3, %v8699_v33, 0.0 }
0x1536   :  { %8704 = vadd.xlane.f32.xlu0 %v8703_v51 }
0x15bf   :  { %v8702_v34 = vpop.xlane.xlu1 %8701 }
0x15c0   :  { %v8706_v16 = vmax.f32 %v8702_v34, 1e-24 }
0x15c2   :  { %14350 = vrsqrt.f32 %v8706_v16 }
0x15c3   :  { %v8705_v27 = vpop.xlane.xlu0 %8704 }
0x15c4   :  { %v8707_v53 = vmax.f32 %v8705_v27, 1e-24 }
0x15c6   :  { %14352 = vrsqrt.f32 %v8707_v53 }
0x15cc   :  { %v14351_v57 = vpop.eup %14350 }
0x15cd   :  { %v8710_v41 = vmul.f32 %v14351_v57, %v8578_v44 }
0x15cf   :  { %13255 = vmatpush3.xpose.msk.msra.mxu0 %vm7607_vm3, %v8710_v41 }
0x15d0   :  { %v14353_v32 = vpop.eup %14352  ;;  %13259 = vmatprep.subr.mxu0 %v14381_v12 }
0x15d1   :  { %v8711_v47 = vmul.f32 %v14353_v32, %v8579_v52 }
0x15d2   :  { %13257 = vmatmul.mubr.msk.f32.vlgmr.msra.gmra.mrb[132].mxu0 %vm7607_vm3, %v8710_v41 }
0x15d3   :  { %13260 = vmatpush3.xpose.msk.msra.mxu0 %vm7607_vm3, %v8711_v47  ;;  %13261 = vmatprep.mubr.msk.f32.mxu0 %vm14382_vm5, %v14381_v12 }
0x15d4   :  { %14046 = vmatprep.subr.bf16.mxu0 %v14045_v15 }
0x15d6   :  { %13262 = vmatmul.mubr.msk.f32.vlgmr.msra.gmra.mrb[134].mxu0 %vm7607_vm3, %v8711_v47 }
0x15d7   :  { %14048 = vmatpush3.bf16.msra.mxu0 %v14045_v15  ;;  %13268 = vmatprep.mubr.msk.f32.mxu0 %vm7607_vm3, %v8578_v44 }
0x15d8   :  { %13276 = vmatprep.subr.mxu0 %v14381_v12 }
0x15da   :  { %13269 = vmatmul.mubr.msk.f32.vlgmr.msra.gmra.mrb[136].mxu0 %vm7607_vm3, %v8579_v52 }
0x15db   :  { %13278 = vmatprep.mubr.msk.f32.mxu0 %vm14382_vm5, %v14381_v12 }
0x1606   :  { %v13253_v7 = vpop.f32.mrb[130].mxu0 }
0x1607   :  { %v8667_v6 = vadd.f32 %v13253_v7, %v17910_v1  ;;  %v8661_v14 = vpop.f32.mrb[131].mxu0 }
0x1608   :  { %v8662_v11 = vadd.f32 %v17910_v1, %v8661_v14 }
0x1609   :  { %v8671_v35 = vmax.f32 %v8667_v6, 0.0 }
0x160a   :  { %v8670_v46 = vmax.f32 %v8662_v11, 0.0 }
0x160b   :  { %v8673_v43 = vmul.f32 %v8671_v35, %v8671_v35 }
0x160c   :  { %v8672_v61 = vmul.f32 %v8670_v46, %v8670_v46 }
0x160d   :  { %v8677_v49 = vsel %vm7708_vm4, %v8673_v43, 0.0 }
0x160e   :  { %8678 = vadd.xlane.f32.xlu0 %v8677_v49  ;;  %v8674_v62 = vsel %vm7708_vm4, %v8672_v61, 0.0 }
0x160f   :  { %8675 = vadd.xlane.f32.xlu1 %v8674_v62 }
0x169b   :  { %v8679_v23 = vpop.xlane.xlu0 %8678 }
0x169c   :  { %v8686_v58 = vrot.slane %v8679_v23, 4  ;;  %v8676_v30 = vpop.xlane.xlu1 %8675 }
0x169d   :  { %v8680_v63 = vrot.slane %v8676_v30, 4 }
0x169e   :  { %v8687_v10 = vadd.f32 %v8686_v58, %v8679_v23 }
0x169f   :  { %v8681_v17 = vadd.f32 %v8680_v63, %v8676_v30 }
0x16a0   :  { %v8688_v18 = vrot.slane %v8687_v10, 2 }
0x16a1   :  { %v8682_v28 = vrot.slane %v8681_v17, 2 }
0x16a2   :  { %v8689_v38 = vadd.f32 %v8688_v18, %v8687_v10 }
0x16a3   :  { %v8683_v1 = vadd.f32 %v8682_v28, %v8681_v17  ;;  %v7704_v28 = vld [vmem:[%s18064_s11 + $0x38] sm:$0xff] }
0x16a4   :  { %v8690_v54 = vrot.slane %v8689_v38, 1 }
0x16a5   :  { %v8684_v60 = vrot.slane %v8683_v1, 1  ;;  %v8781_v9 = vpop.f32.mrb[132].mxu0 }
0x16a6   :  { %v8691_v39 = vadd.f32 %v8690_v54, %v8689_v38  ;;  %v13258_v22 = vpop.f32.mrb[133].mxu0  ;;  %v9205_v54 = vld [vmem:[%s18063_s10 + $0x8] sm:$0xff] }
0x16a7   :  { %v8685_v40 = vadd.f32 %v8684_v60, %v8683_v1  ;;  %v9204_v1 = vld [vmem:[%s18063_s10] sm:$0xff] }
0x16a8   :  { %v8693_v36 = vmax.f32 %v8691_v39, 1e-24  ;;  %v9206_v60 = vsel %vm7708_vm4, %v9204_v1, 0.0  ;;  %v9198_v39 = vsub.s32 2, %v17874_v48 }
0x16a9   :  { %v8692_v42 = vmax.f32 %v8685_v40, 1e-24  ;;  %v8854_v29 = vpop.f32.mrb[134].mxu0 }
0x16aa   :  { %14354 = vrsqrt.f32 %v8693_v36  ;;  %v13263_v31 = vpop.f32.mrb[135].mxu0  ;;  %v9199_v22 = vrot.slane %v17880_v2, %v9198_v39 }
0x16ab   :  { %14356 = vrsqrt.f32 %v8692_v42 }
0x16ad   :  { %v17977_v24 = vpop.f32.mrb[136].mxu0 }
0x16ae   :  { %v17979_v56 = vpop.f32.mrb[137].mxu0 }
0x16b4   :  { %v14355_v13 = vpop.eup %14354 }
0x16b5   :  { %v14357_v21 = vpop.eup %14356  ;;  %v8697_v8 = vmul.f32 %v14355_v13, %v8671_v35 }
0x16b6   :  { %v8696_v3 = vmul.f32 %v14357_v21, %v8670_v46 }
0x16b7   :  { %v8859_v4 = vsub.f32 %v8697_v8, %v8854_v29  ;;  %v8876_v59 = vsel %vm7708_vm4, %v8697_v8, -inf  ;;  %vm8892_vm0 = vcmp.gt.f32.partialorder %v8697_v8, 0.0 }
0x16b8   :  { %v8858_v55 = vsub.f32 %v8696_v3, %v8781_v9  ;;  %v8875_v50 = vsel %vm7708_vm4, %v8696_v3, -inf  ;;  %vm8891_vm15 = vcmp.gt.f32.partialorder %v8696_v3, 0.0  ;;  %v9209_v9 = vsel %vm7708_vm4, %v9205_v54, 0.0 }
0x16b9   :  { %v8861_v44 = vmul.f32 %v8859_v4, %v8859_v4  ;;  %v8877_v37 = vmax.f32 %v8875_v50, %v8876_v59 }
0x16ba   :  { %v8860_v19 = vmul.f32 %v8858_v55, %v8858_v55 }
0x16bb   :  { %8878 = vmax.xlane.f32.xlu0 %v8877_v37  ;;  %v8863_v25 = vsel %vm7708_vm4, %v8861_v44, 0.0 }
0x16bc   :  { %v8862_v0 = vsel %vm7708_vm4, %v8860_v19, 0.0 }
0x16bd   :  { %v8864_v52 = vadd.f32 %v8863_v25, %v8862_v0  ;;  %v9452_v25 = vld [vmem:[%s18068_s15 + $0x8] sm:$0xff] }
0x16bf   :  { %8865 = vadd.xlane.f32.xlu1 %v8864_v52  ;;  %v9447_v52 = vsub.s32 3, %v17874_v48 }
0x1748   :  { %v8879_v5 = vpop.xlane.xlu0 %8878 }
0x1749   :  { %v8880_v33 = vrot.slane %v8879_v5, 4 }
0x174b   :  { %v8881_v51 = vmax.f32 %v8879_v5, %v8880_v33  ;;  %v9448_v33 = vrot.slane %v17880_v2, %v9447_v52 }
0x174c   :  { %v8866_v34 = vpop.xlane.xlu1 %8865 }
0x174d   :  { %v8882_v16 = vrot.slane %v8881_v51, 2  ;;  %v8867_v27 = vrot.slane %v8866_v34, 4 }
0x174f   :  { %v8868_v53 = vadd.f32 %v8867_v27, %v8866_v34  ;;  %v8883_v57 = vmax.f32 %v8881_v51, %v8882_v16 }
0x1751   :  { %v8869_v41 = vrot.slane %v8868_v53, 2  ;;  %v8884_v26 = vrot.slane %v8883_v57, 1 }
0x1753   :  { %v8870_v20 = vadd.f32 %v8869_v41, %v8868_v53  ;;  %v8885_v47 = vmax.f32 %v8883_v57, %v8884_v26 }
0x1755   :  { %v8871_v32 = vrot.slane %v8870_v20, 1 }
0x1757   :  { %v8872_v15 = vadd.f32 %v8871_v32, %v8870_v20 }
0x1759   :  { %14317 = vpush %v8872_v15 }
0x175a   :  { %14319 = vpush %v8885_v47 }
0x178a   :  { %s14318_s19 = spop %14317 }
0x178b   :  { %s8874_s1 = smul.f32 0.5, %s14318_s19  ;;  %s14320_s27 = spop %14319 }
0x178c   :  { %s8887_s4 = smul.f32 0.5, %s14320_s27 }
0x178d   :  { %s9544_s3 = sadd.f32 %s8874_s1, %s8250_s0 }
0x178e   :  { %v8888_v7 = vstv %s8887_s4 }
0x178f   :  { %vm8889_vm13 = vcmp.ge.f32.partialorder %v8696_v3, %v8888_v7  ;;  %vm8890_vm14 = vcmp.ge.f32.partialorder %v8697_v8, %v8888_v7  ;;  %9546 = sst [smem:[#allocation2]] %s9544_s3 }
0x1790   :  { %vm8893_vm1 = vmand %vm8889_vm13, %vm8891_vm15 }
0x1791   :  { %vm8894_vm2 = vmand %vm8890_vm14, %vm8892_vm0  ;;  %v8895_v6 = vsel %vm8893_vm1, 1.0, %v14381_v12 }
0x1792   :  { %v8896_v14 = vsel %vm8894_vm2, 1.0, %v14381_v12 }
0x1793   :  { %v14327_v11 = vpack.i.bf16 %v8896_v14, %v8895_v6 }
0x1795   :  { %14328 = vxpose.xlu1.b32.start.end [1/1] (short) (narrow) %v14327_v11, 8 }
0x1815   :  { %v14329_v35 = vpop.trf.xlu1 }
0x1816   :  { %v14333_v46 = vunpack.i.h.bf16 %v14329_v35  ;;  %v14330_v43 = vunpack.i.l.bf16 %v14329_v35 }
0x1818   :  { %v8961_v61 = vmax.f32 %v14330_v43, %v17931_v45  ;;  %v8962_v62 = vmax.f32 %v14333_v46, %v17931_v45  ;;  %v7703_v45 = vld [vmem:[%s18064_s11 + $0x30] sm:$0xff] }
0x1819   :  { %v14049_v38 = vpack.c.bf16 %v7704_v28, %v7703_v45 }
0x181a   :  { %v8963_v49 = vsel %vm7708_vm4, %v8961_v61, 0.0  ;;  %v8966_v23 = vsel %vm7708_vm4, %v8962_v62, 0.0 }
0x181b   :  { %8964 = vadd.xlane.f32.xlu0 %v8963_v49 }
0x181f   :  { %8967 = vadd.xlane.f32.xlu0 %v8966_v23 }
0x1823   :  { %9207 = vadd.xlane.f32.xlu0 %v9206_v60 }
0x1827   :  { %9210 = vadd.xlane.f32.xlu0 %v9209_v9 }
0x18a8   :  { %v8965_v58 = vpop.xlane.xlu0 %8964 }
0x18a9   :  { %14358 = vrsqrt.f32 %v8965_v58 }
0x18ac   :  { %v8968_v30 = vpop.xlane.xlu0 %8967 }
0x18ad   :  { %14360 = vrsqrt.f32 %v8968_v30 }
0x18b0   :  { %v9208_v3 = vpop.xlane.xlu0 %9207 }
0x18b3   :  { %v14359_v63 = vpop.eup %14358 }
0x18b4   :  { %v9046_v10 = vmul.f32 %v14359_v63, %v17979_v56  ;;  %v9211_v4 = vpop.xlane.xlu0 %9210 }
0x18b5   :  { %14362 = vrsqrt.f32 %v9211_v4 }
0x18b6   :  { %13272 = vmatpush3.msra.mxu1 %v9046_v10  ;;  %14364 = vrsqrt.f32 %v9208_v3 }
0x18b7   :  { %v14361_v17 = vpop.eup %14360  ;;  %13274 = vmatmul.mubr.msk.f32.vlgmr.msra.gmra.mrb[8].mxu1 %vm7708_vm4, %v8961_v61  ;;  %14050 = vmatprep.subr.bf16.mxu1 %v14049_v38 }
0x18b8   :  { %v9047_v18 = vmul.f32 %v14361_v17, %v17977_v24  ;;  %14052 = vmatpush3.bf16.msra.mxu1 %v14049_v38 }
0x18b9   :  { %13293 = vmatprep.subr.mxu1 %v14381_v12 }
0x18ba   :  { %13277 = vmatpush3.msra.mxu0 %v9047_v18 }
0x18bb   :  { %13279 = vmatmul.mubr.msk.f32.vlgmr.msra.gmra.mrb[138].mxu0 %vm7708_vm4, %v8962_v62  ;;  %13288 = vmatprep.subr.mxu0 %v14381_v12 }
0x18bc   :  { %13290 = vmatprep.mubr.msk.f32.mxu0 %vm14382_vm5, %v14381_v12 }
0x18bf   :  { %v14363_v59 = vpop.eup %14362 }
0x18c0   :  { %v14365_v50 = vpop.eup %14364 }
0x198a   :  { %v9117_v40 = vpop.f32.mrb[8].mxu1 }
0x198b   :  { %v9194_v36 = vmul.f32 %v14359_v63, %v9117_v40  ;;  %v13275_v42 = vpop.f32.mrb[9].mxu1 }
0x198d   :  { %v9200_v29 = vadd.f32 %v9199_v22, %v9194_v36 }
0x198e   :  { %v9190_v31 = vpop.f32.mrb[138].mxu0 }
0x198f   :  { %v9202_v24 = vmax.f32 %v9200_v29, 0.0  ;;  %v9195_v56 = vmul.f32 %v14361_v17, %v9190_v31  ;;  %v13280_v13 = vpop.f32.mrb[139].mxu0 }
0x1991   :  { %v9201_v21 = vadd.f32 %v9199_v22, %v9195_v56  ;;  %13285 = vmatprep.mubr.msk.f32.mxu1 %vm7607_vm3, %v9202_v24 }
0x1993   :  { %v9203_v8 = vmax.f32 %v9201_v21, 0.0 }
0x1995   :  { %13286 = vmatmul.mubr.msk.f32.vlgmr.msra.gmra.mrb[10].mxu1 %vm7607_vm3, %v9203_v8 }
0x1996   :  { %13295 = vmatprep.mubr.msk.f32.mxu1 %vm14382_vm5, %v14381_v12  ;;  %v9451_v12 = vld [vmem:[%s18068_s15] sm:$0xff] }
0x1997   :  { %v14053_v0 = vpack.c.bf16 %v9452_v25, %v9451_v12 }
0x1a68   :  { %v13287_v55 = vpop.f32.mrb[10].mxu1 }
0x1a69   :  { %v9296_v44 = vmul.f32 %v14363_v59, %v13287_v55  ;;  %v9286_v37 = vpop.f32.mrb[11].mxu1 }
0x1a6a   :  { %v9295_v19 = vmul.f32 %v14365_v50, %v9286_v37 }
0x1a6b   :  { %13294 = vmatpush3.msra.mxu1 %v9296_v44 }
0x1a6c   :  { %13289 = vmatpush3.msra.mxu0 %v9295_v19  ;;  %13296 = vmatmul.mubr.msk.f32.vlgmr.msra.gmra.mrb[12].mxu1 %vm7708_vm4, %v9205_v54 }
0x1a6d   :  { %13291 = vmatmul.mubr.msk.f32.vlgmr.msra.gmra.mrb[140].mxu0 %vm7708_vm4, %v9204_v1  ;;  %14054 = vmatprep.subr.bf16.mxu0 %v14053_v0 }
0x1a6e   :  { %14056 = vmatpush3.bf16.msra.mxu0 %v14053_v0 }
0x1b3f   :  { %v9439_v5 = vpop.f32.mrb[12].mxu1 }
0x1b40   :  { %v9444_v51 = vmul.f32 %v14363_v59, %v9439_v5  ;;  %v9366_v34 = vpop.f32.mrb[140].mxu0  ;;  %v13297_v16 = vpop.f32.mrb[13].mxu1 }
0x1b41   :  { %v9443_v27 = vmul.f32 %v14365_v50, %v9366_v34  ;;  %v13292_v53 = vpop.f32.mrb[141].mxu0 }
0x1b42   :  { %v9450_v41 = vadd.f32 %v9448_v33, %v9444_v51 }
0x1b43   :  { %v9449_v57 = vadd.f32 %v9448_v33, %v9443_v27 }
0x1b45   :  { %13302 = vmatprep.mubr.msk.f32.mxu0 %vm7607_vm3, %v9449_v57 }
0x1b46   :  { %13303 = vmatmul.mubr.msk.f32.vlgmr.msra.gmra.mrb[142].mxu0 %vm7607_vm3, %v9450_v41 }
0x1b47   :  { %14377 = shalt.err (!%p14374_p2)
}
0x1b48   :  { %s14383_s7 = smov [#allocation2]   ;;  %v10790_v48 = vld [vmem:[%s18069_s16] ss:$0 sm:$0xff]  ;;  %vm9541_vm3 = vcmask 15360  }
0x1b49   :  { %9556 = dma.smem_to_hbm %s14383_s7, 16, %s18071_s18, [#allocation3]  }
0x1c19   :  { %v13304_v2 = vpop.f32.mrb[142].mxu0 }
0x1c1a   :  { %v9538_v20 = vadd.f32 %v13304_v2, %v10790_v48  ;;  %v9532_v26 = vpop.f32.mrb[143].mxu0 }
0x1c1b   :  { %v9533_v32 = vadd.f32 %v10790_v48, %v9532_v26 }
0x1c1c   :  { %9543 = vst.msk [vmem:[%s18070_s17 + $0x8] sm:$0xff] %vm9541_vm3, %v9538_v20 }
0x1c1d   :  { %9542 = vst.msk [vmem:[%s18070_s17] sm:$0xff] %vm9541_vm3, %v9533_v32 }
0x1c1e   :  { %14378 = dma.done.wait [#allocation3], 16  }
0x1c1f   :  { %14379 = vsyncadd [#allocation3], 4294967280 }
0x1c20   :  { %9562 = sfence }
0x1c21   :  { %9563 = vsyncpa [#allocation3], 1 }

</bundles_post_ra>
